<compile_context>
chip_gen: v5e
topology: v5e:2x2
jax: 0.10.0
libtpu: 0.0.40
codegen_flags: <defaults>
</compile_context>

<pallas_src>
import math
from functools import partial

import numpy as np
import jax
import jax.numpy as jnp
from jax.experimental import pallas as pl
from jax.experimental.pallas import tpu as pltpu  # noqa: F401  (TPU backend)

# ----------------------- small but consistent config -----------------------
IMG_SIZE   = (8, 8, 6)      # (X, Y, Z)  -> Z needs replicate padding to 8
PATCH_SIZE = (4, 4, 4)
TUBELET    = 2
NUM_FRAMES = 4              # T
IN_CHANS   = 2              # C
ENC_DIM    = 32
ENC_DEPTH  = 2
ENC_HEADS  = 4
DEC_DIM    = 32
DEC_DEPTH  = 2
DEC_HEADS  = 4
MLP_RATIO  = 4.0
LN_EPS     = 1e-5           # torch.nn.LayerNorm default
BATCH      = 2


# ========================= fused Pallas model kernel ========================
def _fused_vit_kernel(tok_ref, pos_ref, blkmat_ref, fc2w_ref, blkvec_ref,
                      miscw_ref, miscv_ref, o_ref, *,
                      enc_depth, dec_depth, num_heads, n_tokens, batch, eps):
    """Single invocation: whole (batch-folded) forward pass in VMEM/vregs."""
    f32 = jnp.float32
    BN, P = tok_ref.shape              # (batch*tokens, patch_dim)
    D = pos_ref.shape[-1]              # embed dim (enc == dec)
    Hm = fc2w_ref.shape[1]             # MLP hidden dim
    out_dim = o_ref.shape[-1]
    N, B, H = n_tokens, batch, num_heads
    dh = D // H
    BHN = B * H * N
    scale = np.float32(dh ** -0.5)
    neg = np.float32(-1e30)

    def layer_norm(x, g, b):
        xm = x - jnp.mean(x, axis=-1, keepdims=True)
        var = jnp.mean(xm * xm, axis=-1, keepdims=True)
        return xm * jax.lax.rsqrt(var + eps) * g + b

    def gelu(x):
        # Exact (erf-form) torch.nn.GELU via Abramowitz-Stegun 7.1.26
        # (|erf err| < 1.5e-7 => f32-noise-level accuracy).  Pure
        # exp/mul/add/select -> guaranteed Mosaic lowering.
        z = x * np.float32(1.0 / math.sqrt(2.0))
        az = jnp.abs(z)
        t = 1.0 / (1.0 + np.float32(0.3275911) * az)
        poly = t * (np.float32(0.254829592)
               + t * (np.float32(-0.284496736)
               + t * (np.float32(1.421413741)
               + t * (np.float32(-1.453152027)
               + t * np.float32(1.061405429)))))
        erf_abs = 1.0 - poly * jnp.exp(-az * az)
        erf_z = jnp.where(z >= 0, erf_abs, -erf_abs)
        return 0.5 * x * (1.0 + erf_z)

    # --- block-diagonal additive mask over (head, batch) groups of N rows ---
    # Built ONCE from elementwise ops only (iota / convert / mul / floor /
    # select); reused by every transformer block.
    inv_n = np.float32(1.0 / N)
    ri = jax.lax.broadcasted_iota(jnp.int32, (BHN, BHN), 0).astype(f32)
    ci = jax.lax.broadcasted_iota(jnp.int32, (BHN, BHN), 1).astype(f32)
    rb = jnp.floor((ri + np.float32(0.5)) * inv_n)
    cb = jnp.floor((ci + np.float32(0.5)) * inv_n)
    mask_bias = jnp.where(rb == cb, np.float32(0.0), neg)

    # --- non-block weights sliced straight out of the packed slabs ---------
    patch_w = miscw_ref[pl.ds(0, P), :]                 # (P, D)
    e2d_w   = miscw_ref[pl.ds(P, D), :]                 # (D, D)
    head_wT = miscw_ref[pl.ds(P + D, out_dim), :]       # (out_dim, D)
    misc_v = miscv_ref[...]                             # (5, max(D, out_dim))
    head_b = misc_v[0:1, 0:out_dim]
    enc_g, enc_b = misc_v[1:2, 0:D], misc_v[2:3, 0:D]
    dec_g, dec_b = misc_v[3:4, 0:D], misc_v[4:5, 0:D]

    def block(x, l):
        m = blkmat_ref[l]                  # (D, 3D + D + Hm): qkv | proj | fc1
        vecs = blkvec_ref[l]               # (7, max(D, Hm))
        qkv_w  = m[:, 0:3 * D]
        proj_w = m[:, 3 * D:4 * D]
        fc1_w  = m[:, 4 * D:4 * D + Hm]
        ln1_g, ln1_b = vecs[0:1, 0:D], vecs[1:2, 0:D]
        proj_b       = vecs[2:3, 0:D]
        ln2_g, ln2_b = vecs[3:4, 0:D], vecs[4:5, 0:D]
        fc2_b        = vecs[5:6, 0:D]
        fc1_b        = vecs[6:7, 0:Hm]

        # ---- attention: single score matmul / softmax / PV matmul for all
        #      heads and batch elements (row-stacked, block-diag masked) ----
        h = layer_norm(x, ln1_g, ln1_b)
        qkv = jnp.dot(h, qkv_w, preferred_element_type=f32)           # (BN, 3D)
        q_r = jnp.concatenate([qkv[:, hd * dh:(hd + 1) * dh]
                               for hd in range(H)], axis=0) * scale   # (BHN, dh)
        k_r = jnp.concatenate([qkv[:, D + hd * dh:D + (hd + 1) * dh]
                               for hd in range(H)], axis=0)
        v_r = jnp.concatenate([qkv[:, 2 * D + hd * dh:2 * D + (hd + 1) * dh]
                               for hd in range(H)], axis=0)
        s = jax.lax.dot_general(q_r, k_r, (((1,), (1,)), ((), ())),
                                preferred_element_type=f32)           # (BHN, BHN)
        s = s + mask_bias
        s = s - jnp.max(s, axis=-1, keepdims=True)
        p = jnp.exp(s)
        p = p / jnp.sum(p, axis=-1, keepdims=True)                    # exact softmax
        o = jnp.dot(p, v_r, preferred_element_type=f32)               # (BHN, dh)
        a = jnp.concatenate([o[hd * BN:(hd + 1) * BN, :]
                             for hd in range(H)], axis=1)             # (BN, D)
        x = x + jnp.dot(a, proj_w, preferred_element_type=f32) + proj_b

        # ---- MLP ----
        hmlp = layer_norm(x, ln2_g, ln2_b)
        hmlp = jnp.dot(hmlp, fc1_w, preferred_element_type=f32) + fc1_b
        hmlp = gelu(hmlp)
        hmlp = jnp.dot(hmlp, fc2w_ref[l], preferred_element_type=f32) + fc2_b
        return x + hmlp

    # patch-embed linear (bias is folded into pos_ref by the wrapper)
    x = jnp.dot(tok_ref[...], patch_w, preferred_element_type=f32) + pos_ref[...]

    # encoder
    for l in range(enc_depth):
        x = block(x, l)
    x = layer_norm(x, enc_g, enc_b)
    x = jnp.dot(x, e2d_w, preferred_element_type=f32)      # encoder_to_decoder (no bias)

    # decoder
    for l in range(dec_depth):
        x = block(x, enc_depth + l)
    x = layer_norm(x, dec_g, dec_b)
    out = jax.lax.dot_general(x, head_wT, (((1,), (1,)), ((), ())),
                              preferred_element_type=f32) + head_b
    o_ref[...] = out.astype(o_ref.dtype)                   # (B*N, 256) lane-dense


# ================================ model glue ================================
def get_sinusoid_encoding_table(n_position, d_hid):
    def get_vec(pos):
        return [pos / np.power(10000, 2 * (i // 2) / d_hid) for i in range(d_hid)]
    table = np.array([get_vec(p) for p in range(n_position)])
    table[:, 0::2] = np.sin(table[:, 0::2])
    table[:, 1::2] = np.cos(table[:, 1::2])
    return jnp.asarray(table, dtype=jnp.float32)[None, :, :]   # (1, N, D)


def _patch_tokens(x):
    """x: (B, C, T, X, Y, Z) -> flattened patch vectors (B*N, P), pads.

    Reproduces the exact PyTorch sequence: permute -> view -> replicate pad ->
    view -> einops rearrange.  Pure layout glue (XLA side).
    """
    B, C, T, X, Y, Z = x.shape
    tt = TUBELET
    px, py, pz = PATCH_SIZE
    grid_sz = tuple(math.ceil(s / p) * p for s, p in zip(IMG_SIZE, PATCH_SIZE))
    pad_x, pad_y, pad_z = grid_sz[0] - X, grid_sz[1] - Y, grid_sz[2] - Z

    x = jnp.transpose(x, (0, 1, 3, 4, 5, 2))          # (B, C, X, Y, Z, T)
    x = x.reshape(B, C * T, X, Y, Z)                  # == torch .view on contiguous
    if pad_x or pad_y or pad_z:
        x = jnp.pad(x, ((0, 0), (0, 0), (0, pad_x), (0, pad_y), (0, pad_z)),
                    mode="edge")                       # F.pad(..., mode='replicate')
    Xp, Yp, Zp = X + pad_x, Y + pad_y, Z + pad_z
    x = x.reshape(B, C, T, Xp, Yp, Zp)
    # rearrange 'b c (t tt) (x px) (y py) (z pz) -> b (t x y z) (tt px py pz c)'
    x = x.reshape(B, C, T // tt, tt, Xp // px, px, Yp // py, py, Zp // pz, pz)
    x = jnp.transpose(x, (0, 2, 4, 6, 8, 3, 5, 7, 9, 1))
    N = (T // tt) * (Xp // px) * (Yp // py) * (Zp // pz)
    P = tt * px * py * pz * C
    return x.reshape(B * N, P), (pad_x, pad_y, pad_z)


def model_forward(x, params):
    """x: (T, B, C, X, Y, Z) -> y_hat: (B, C, X, Y, Z)."""
    assert ENC_DIM == DEC_DIM, "fused kernel stacks enc+dec block weights"
    assert ENC_HEADS == DEC_HEADS, "fused kernel shares one block-diag mask"
    T, B, C, X, Y, Z = x.shape

    # torch.std_mean over (0, -3, -2, -1), unbiased std (tiny, stays in XLA)
    mean = jnp.mean(x, axis=(0, 3, 4, 5), keepdims=True)
    std = jnp.std(x, axis=(0, 3, 4, 5), keepdims=True, ddof=1) + 1e-7
    xn = (x - mean) / std
    xn = jnp.transpose(xn, (1, 2, 0, 3, 4, 5))         # (B, C, T, X, Y, Z)

    tokens, pads = _patch_tokens(xn)                   # (B*N, P)
    BN, P = tokens.shape
    N = BN // B
    D = ENC_DIM
    Hm = int(D * MLP_RATIO)
    out_dim = params["head_w"].shape[1]

    blocks = list(params["enc_blocks"]) + list(params["dec_blocks"])

    def row(v, width):
        v = v.reshape(1, -1)
        return jnp.pad(v, ((0, 0), (0, width - v.shape[1])))

    # ------------------ packed weight slabs (few DMAs, not 22) ------------------
    blk_mats = jnp.stack([jnp.concatenate([b["qkv_w"], b["proj_w"], b["fc1_w"]],
                                          axis=1) for b in blocks])        # (L, D, 4D+Hm)
    blk_fc2 = jnp.stack([b["fc2_w"] for b in blocks])                      # (L, Hm, D)
    vw = max(D, Hm)
    blk_vecs = jnp.stack([jnp.concatenate(
        [row(b["ln1_g"], vw), row(b["ln1_b"], vw), row(b["proj_b"], vw),
         row(b["ln2_g"], vw), row(b["ln2_b"], vw), row(b["fc2_b"], vw),
         row(b["fc1_b"], vw)], axis=0) for b in blocks])                   # (L, 7, vw)
    misc_w = jnp.concatenate([params["patch_w"], params["enc2dec_w"],
                              params["head_w"].T], axis=0)                 # (P+D+out, D)
    mv = max(D, out_dim)
    misc_vecs = jnp.concatenate(
        [row(params["head_b"], mv),
         row(params["enc_norm_g"], mv), row(params["enc_norm_b"], mv),
         row(params["dec_norm_g"], mv), row(params["dec_norm_b"], mv)],
        axis=0)                                                            # (5, mv)

    # pos embed (+ folded patch-embed bias), tiled over the batch rows
    pos_pb = params["pos_embed"].reshape(N, D) + params["patch_b"].reshape(1, D)
    pos_pb = jnp.tile(pos_pb, (B, 1))                                      # (B*N, D)

    # Single invocation: no grid, every input full-block resident in VMEM.
    out = pl.pallas_call(
        partial(_fused_vit_kernel,
                enc_depth=ENC_DEPTH, dec_depth=DEC_DEPTH,
                num_heads=ENC_HEADS, n_tokens=N, batch=B, eps=LN_EPS),
        out_shape=jax.ShapeDtypeStruct((BN, out_dim), jnp.float32),
    )(tokens, pos_pb, blk_mats, blk_fc2, blk_vecs, misc_w, misc_vecs)

    # rearrange 'b (t x y z) (tt px py pz c) -> b c (t tt) (x px) (y py) (z pz)'
    px, py, pz = PATCH_SIZE
    tt = TUBELET
    n_t = T // tt
    n_x = math.ceil(X / px)
    n_y = math.ceil(Y / py)
    n_z = math.ceil(Z / pz)
    out = out.reshape(B, n_t, n_x, n_y, n_z, tt, px, py, pz, C)
    out = jnp.transpose(out, (0, 9, 1, 5, 2, 6, 3, 7, 4, 8))
    out = out.reshape(B, C, n_t * tt, n_x * px, n_y * py, n_z * pz)
    pad_x, pad_y, pad_z = pads
    if pad_x or pad_y or pad_z:
        out = out[:, :, :, :X, :Y, :Z]
    y_hat = out[:, :, -1] * jnp.squeeze(std, 0) + jnp.squeeze(mean, 0)
    return y_hat


# ============================== parameter init ==============================
def init_block(key, dim, mlp_ratio):
    hidden = int(dim * mlp_ratio)
    std = 0.02
    ks = jax.random.split(key, 5)
    return dict(
        ln1_g=jnp.ones((dim,), jnp.float32),
        ln1_b=jnp.zeros((dim,), jnp.float32),
        qkv_w=jax.random.normal(ks[0], (dim, 3 * dim), jnp.float32) * std,
        proj_w=jax.random.normal(ks[1], (dim, dim), jnp.float32) * std,
        proj_b=jax.random.normal(ks[2], (dim,), jnp.float32) * std,
        ln2_g=jnp.ones((dim,), jnp.float32),
        ln2_b=jnp.zeros((dim,), jnp.float32),
        fc1_w=jax.random.normal(ks[3], (dim, hidden), jnp.float32) * std,
        fc1_b=jnp.zeros((hidden,), jnp.float32),
        fc2_w=jax.random.normal(ks[4], (hidden, dim), jnp.float32) * std,
        fc2_b=jnp.zeros((dim,), jnp.float32),
    )


def init_params(key):
    grid = tuple(math.ceil(s / p) * p for s, p in zip(IMG_SIZE, PATCH_SIZE))
    nt = NUM_FRAMES // TUBELET
    nx, ny, nz = (g // p for g, p in zip(grid, PATCH_SIZE))
    num_patches = nt * nx * ny * nz
    patch_in = IN_CHANS * TUBELET * math.prod(PATCH_SIZE)
    out_dim = IN_CHANS * TUBELET * math.prod(PATCH_SIZE)
    std = 0.02
    keys = jax.random.split(key, 4 + ENC_DEPTH + DEC_DEPTH)
    return {
        "patch_w": jax.random.normal(keys[0], (patch_in, ENC_DIM), jnp.float32) * std,
        "patch_b": jnp.zeros((ENC_DIM,), jnp.float32),
        "pos_embed": get_sinusoid_encoding_table(num_patches, ENC_DIM),
        "enc_blocks": [init_block(keys[4 + i], ENC_DIM, MLP_RATIO)
                       for i in range(ENC_DEPTH)],
        "enc_norm_g": jnp.ones((ENC_DIM,), jnp.float32),
        "enc_norm_b": jnp.zeros((ENC_DIM,), jnp.float32),
        "enc2dec_w": jax.random.normal(keys[1], (ENC_DIM, DEC_DIM), jnp.float32) * std,
        "dec_blocks": [init_block(keys[4 + ENC_DEPTH + i], DEC_DIM, MLP_RATIO)
                       for i in range(DEC_DEPTH)],
        "dec_norm_g": jnp.ones((DEC_DIM,), jnp.float32),
        "dec_norm_b": jnp.zeros((DEC_DIM,), jnp.float32),
        "head_w": jax.random.normal(keys[2], (DEC_DIM, out_dim), jnp.float32) * std,
        "head_b": jnp.zeros((out_dim,), jnp.float32),
    }


# ==================================== main ===================================
if __name__ == "__main__":
    key = jax.random.PRNGKey(0)
    kx, kp = jax.random.split(key)
    # x layout: (T, B, C, X, Y, Z), matching the PyTorch module's forward input
    x = jax.random.normal(kx, (NUM_FRAMES, BATCH, IN_CHANS) + IMG_SIZE,
                          dtype=jnp.float32)
    params = init_params(kp)

    fwd = jax.jit(model_forward)
    y = fwd(x, params)
    jax.block_until_ready(y)
    assert y.shape == (BATCH, IN_CHANS) + IMG_SIZE, y.shape
    assert y.dtype == jnp.float32
    assert bool(jnp.all(jnp.isfinite(y)))
    print("KERNEL_OK")
</pallas_src>

<mosaic_0001>
module attributes {stable_mosaic.version = 11 : i64} {
  func.func @_fused_vit_kernel(%arg0: memref<32x256xf32, #tpu.memory_space<vmem>>, %arg1: memref<32x32xf32, #tpu.memory_space<vmem>>, %arg2: memref<4x32x256xf32, #tpu.memory_space<vmem>>, %arg3: memref<4x128x32xf32, #tpu.memory_space<vmem>>, %arg4: memref<4x7x128xf32, #tpu.memory_space<vmem>>, %arg5: memref<544x32xf32, #tpu.memory_space<vmem>>, %arg6: memref<5x256xf32, #tpu.memory_space<vmem>>, %arg7: memref<32x256xf32, #tpu.memory_space<vmem>>) attributes {dimension_semantics = [], scalar_prefetch = 0 : i64, scratch_operands = 0 : i64, tpu.core_type = #tpu.core_type<tc>} {
    %0 = tpu.iota {dimensions = array<i32: 0>} : vector<128x128xi32>
    %1 = arith.sitofp %0 : vector<128x128xi32> to vector<128x128xf32>
    %2 = tpu.iota {dimensions = array<i32: 1>} : vector<128x128xi32>
    %3 = arith.sitofp %2 : vector<128x128xi32> to vector<128x128xf32>
    %cst = arith.constant 5.000000e-01 : f32
    %4 = vector.broadcast %cst : f32 to vector<128x128xf32>
    %5 = arith.addf %1, %4 : vector<128x128xf32>
    %cst_0 = arith.constant 6.250000e-02 : f32
    %6 = vector.broadcast %cst_0 : f32 to vector<128x128xf32>
    %7 = arith.mulf %5, %6 : vector<128x128xf32>
    %8 = math.floor %7 : vector<128x128xf32>
    %cst_1 = arith.constant 5.000000e-01 : f32
    %9 = vector.broadcast %cst_1 : f32 to vector<128x128xf32>
    %10 = arith.addf %3, %9 : vector<128x128xf32>
    %cst_2 = arith.constant 6.250000e-02 : f32
    %11 = vector.broadcast %cst_2 : f32 to vector<128x128xf32>
    %12 = arith.mulf %10, %11 : vector<128x128xf32>
    %13 = math.floor %12 : vector<128x128xf32>
    %14 = arith.cmpf oeq, %8, %13 : vector<128x128xf32>
    %cst_3 = arith.constant 0.000000e+00 : f32
    %cst_4 = arith.constant -1.000000e+30 : f32
    %15 = vector.broadcast %cst_3 : f32 to vector<128x128xf32>
    %16 = vector.broadcast %cst_4 : f32 to vector<128x128xf32>
    %17 = arith.select %14, %15, %16 : vector<128x128xi1>, vector<128x128xf32>
    %c0 = arith.constant 0 : index
    %c0_5 = arith.constant 0 : index
    %18 = vector.load %arg5[%c0, %c0_5] : memref<544x32xf32, #tpu.memory_space<vmem>>, vector<256x32xf32>
    %c256 = arith.constant 256 : index
    %c0_6 = arith.constant 0 : index
    %19 = vector.load %arg5[%c256, %c0_6] : memref<544x32xf32, #tpu.memory_space<vmem>>, vector<32x32xf32>
    %c288 = arith.constant 288 : index
    %c0_7 = arith.constant 0 : index
    %20 = vector.load %arg5[%c288, %c0_7] : memref<544x32xf32, #tpu.memory_space<vmem>>, vector<256x32xf32>
    %c0_8 = arith.constant 0 : index
    %c0_9 = arith.constant 0 : index
    %21 = vector.load %arg6[%c0_8, %c0_9] : memref<5x256xf32, #tpu.memory_space<vmem>>, vector<5x256xf32>
    %22 = vector.extract_strided_slice %21 {offsets = [0, 0], sizes = [1, 256], strides = [1, 1]} : vector<5x256xf32> to vector<1x256xf32>
    %23 = vector.extract_strided_slice %21 {offsets = [1, 0], sizes = [1, 32], strides = [1, 1]} : vector<5x256xf32> to vector<1x32xf32>
    %24 = vector.extract_strided_slice %21 {offsets = [2, 0], sizes = [1, 32], strides = [1, 1]} : vector<5x256xf32> to vector<1x32xf32>
    %25 = vector.extract_strided_slice %21 {offsets = [3, 0], sizes = [1, 32], strides = [1, 1]} : vector<5x256xf32> to vector<1x32xf32>
    %26 = vector.extract_strided_slice %21 {offsets = [4, 0], sizes = [1, 32], strides = [1, 1]} : vector<5x256xf32> to vector<1x32xf32>
    %c0_10 = arith.constant 0 : index
    %c0_11 = arith.constant 0 : index
    %27 = vector.load %arg0[%c0_10, %c0_11] : memref<32x256xf32, #tpu.memory_space<vmem>>, vector<32x256xf32>
    %cst_12 = arith.constant dense<0.000000e+00> : vector<32x32xf32>
    %28 = tpu.matmul %27, %18, %cst_12 {dimension_numbers = #tpu.dot_dimension_numbers<[1], [0], [0], [1], [0, 0, 1, 1], [], []>} : vector<32x256xf32>, vector<256x32xf32>, vector<32x32xf32> -> vector<32x32xf32>
    %c0_13 = arith.constant 0 : index
    %c0_14 = arith.constant 0 : index
    %29 = vector.load %arg1[%c0_13, %c0_14] : memref<32x32xf32, #tpu.memory_space<vmem>>, vector<32x32xf32>
    %30 = arith.addf %28, %29 : vector<32x32xf32>
    %c0_15 = arith.constant 0 : index
    %c0_16 = arith.constant 0 : index
    %c0_17 = arith.constant 0 : index
    %31 = vector.load %arg2[%c0_15, %c0_16, %c0_17] : memref<4x32x256xf32, #tpu.memory_space<vmem>>, vector<1x32x256xf32>
    %32 = vector.shape_cast %31 : vector<1x32x256xf32> to vector<32x256xf32>
    %c0_18 = arith.constant 0 : index
    %c0_19 = arith.constant 0 : index
    %c0_20 = arith.constant 0 : index
    %33 = vector.load %arg4[%c0_18, %c0_19, %c0_20] : memref<4x7x128xf32, #tpu.memory_space<vmem>>, vector<1x7x128xf32>
    %34 = vector.shape_cast %33 : vector<1x7x128xf32> to vector<7x128xf32>
    %35 = vector.extract_strided_slice %32 {offsets = [0, 0], sizes = [32, 96], strides = [1, 1]} : vector<32x256xf32> to vector<32x96xf32>
    %36 = vector.extract_strided_slice %32 {offsets = [0, 96], sizes = [32, 32], strides = [1, 1]} : vector<32x256xf32> to vector<32x32xf32>
    %37 = vector.extract_strided_slice %32 {offsets = [0, 128], sizes = [32, 128], strides = [1, 1]} : vector<32x256xf32> to vector<32x128xf32>
    %38 = vector.extract_strided_slice %34 {offsets = [0, 0], sizes = [1, 32], strides = [1, 1]} : vector<7x128xf32> to vector<1x32xf32>
    %39 = vector.extract_strided_slice %34 {offsets = [1, 0], sizes = [1, 32], strides = [1, 1]} : vector<7x128xf32> to vector<1x32xf32>
    %40 = vector.extract_strided_slice %34 {offsets = [2, 0], sizes = [1, 32], strides = [1, 1]} : vector<7x128xf32> to vector<1x32xf32>
    %41 = vector.extract_strided_slice %34 {offsets = [3, 0], sizes = [1, 32], strides = [1, 1]} : vector<7x128xf32> to vector<1x32xf32>
    %42 = vector.extract_strided_slice %34 {offsets = [4, 0], sizes = [1, 32], strides = [1, 1]} : vector<7x128xf32> to vector<1x32xf32>
    %43 = vector.extract_strided_slice %34 {offsets = [5, 0], sizes = [1, 32], strides = [1, 1]} : vector<7x128xf32> to vector<1x32xf32>
    %44 = vector.extract_strided_slice %34 {offsets = [6, 0], sizes = [1, 128], strides = [1, 1]} : vector<7x128xf32> to vector<1x128xf32>
    %cst_21 = arith.constant dense<0.000000e+00> : vector<32xf32>
    %45 = vector.multi_reduction <add>, %30, %cst_21 [1] : vector<32x32xf32> to vector<32xf32>
    %46 = vector.shape_cast %45 : vector<32xf32> to vector<32x1xf32>
    %cst_22 = arith.constant 3.200000e+01 : f32
    %47 = vector.broadcast %cst_22 : f32 to vector<32x1xf32>
    %48 = arith.divf %46, %47 : vector<32x1xf32>
    %49 = vector.broadcast %48 : vector<32x1xf32> to vector<32x32xf32>
    %50 = arith.subf %30, %49 : vector<32x32xf32>
    %51 = arith.mulf %50, %50 : vector<32x32xf32>
    %cst_23 = arith.constant dense<0.000000e+00> : vector<32xf32>
    %52 = vector.multi_reduction <add>, %51, %cst_23 [1] : vector<32x32xf32> to vector<32xf32>
    %53 = vector.shape_cast %52 : vector<32xf32> to vector<32x1xf32>
    %cst_24 = arith.constant 3.200000e+01 : f32
    %54 = vector.broadcast %cst_24 : f32 to vector<32x1xf32>
    %55 = arith.divf %53, %54 : vector<32x1xf32>
    %cst_25 = arith.constant 9.99999974E-6 : f32
    %56 = vector.broadcast %cst_25 : f32 to vector<32x1xf32>
    %57 = arith.addf %55, %56 : vector<32x1xf32>
    %58 = math.rsqrt %57 : vector<32x1xf32>
    %59 = vector.broadcast %58 : vector<32x1xf32> to vector<32x32xf32>
    %60 = arith.mulf %50, %59 : vector<32x32xf32>
    %61 = vector.broadcast %38 : vector<1x32xf32> to vector<32x32xf32>
    %62 = arith.mulf %60, %61 : vector<32x32xf32>
    %63 = vector.broadcast %39 : vector<1x32xf32> to vector<32x32xf32>
    %64 = arith.addf %62, %63 : vector<32x32xf32>
    %cst_26 = arith.constant dense<0.000000e+00> : vector<32x96xf32>
    %65 = tpu.matmul %64, %35, %cst_26 {dimension_numbers = #tpu.dot_dimension_numbers<[1], [0], [0], [1], [0, 0, 1, 1], [], []>} : vector<32x32xf32>, vector<32x96xf32>, vector<32x96xf32> -> vector<32x96xf32>
    %66 = vector.extract_strided_slice %65 {offsets = [0, 0], sizes = [32, 8], strides = [1, 1]} : vector<32x96xf32> to vector<32x8xf32>
    %67 = vector.extract_strided_slice %65 {offsets = [0, 8], sizes = [32, 8], strides = [1, 1]} : vector<32x96xf32> to vector<32x8xf32>
    %68 = vector.extract_strided_slice %65 {offsets = [0, 16], sizes = [32, 8], strides = [1, 1]} : vector<32x96xf32> to vector<32x8xf32>
    %69 = vector.extract_strided_slice %65 {offsets = [0, 24], sizes = [32, 8], strides = [1, 1]} : vector<32x96xf32> to vector<32x8xf32>
    %70 = tpu.concatenate %66, %67, %68, %69 in 0 : vector<32x8xf32>, vector<32x8xf32>, vector<32x8xf32>, vector<32x8xf32> -> vector<128x8xf32>
    %cst_27 = arith.constant 0.353553385 : f32
    %71 = vector.broadcast %cst_27 : f32 to vector<128x8xf32>
    %72 = arith.mulf %70, %71 : vector<128x8xf32>
    %73 = vector.extract_strided_slice %65 {offsets = [0, 32], sizes = [32, 8], strides = [1, 1]} : vector<32x96xf32> to vector<32x8xf32>
    %74 = vector.extract_strided_slice %65 {offsets = [0, 40], sizes = [32, 8], strides = [1, 1]} : vector<32x96xf32> to vector<32x8xf32>
    %75 = vector.extract_strided_slice %65 {offsets = [0, 48], sizes = [32, 8], strides = [1, 1]} : vector<32x96xf32> to vector<32x8xf32>
    %76 = vector.extract_strided_slice %65 {offsets = [0, 56], sizes = [32, 8], strides = [1, 1]} : vector<32x96xf32> to vector<32x8xf32>
    %77 = tpu.concatenate %73, %74, %75, %76 in 0 : vector<32x8xf32>, vector<32x8xf32>, vector<32x8xf32>, vector<32x8xf32> -> vector<128x8xf32>
    %78 = vector.extract_strided_slice %65 {offsets = [0, 64], sizes = [32, 8], strides = [1, 1]} : vector<32x96xf32> to vector<32x8xf32>
    %79 = vector.extract_strided_slice %65 {offsets = [0, 72], sizes = [32, 8], strides = [1, 1]} : vector<32x96xf32> to vector<32x8xf32>
    %80 = vector.extract_strided_slice %65 {offsets = [0, 80], sizes = [32, 8], strides = [1, 1]} : vector<32x96xf32> to vector<32x8xf32>
    %81 = vector.extract_strided_slice %65 {offsets = [0, 88], sizes = [32, 8], strides = [1, 1]} : vector<32x96xf32> to vector<32x8xf32>
    %82 = tpu.concatenate %78, %79, %80, %81 in 0 : vector<32x8xf32>, vector<32x8xf32>, vector<32x8xf32>, vector<32x8xf32> -> vector<128x8xf32>
    %cst_28 = arith.constant dense<0.000000e+00> : vector<128x128xf32>
    %83 = tpu.matmul %72, %77, %cst_28 {dimension_numbers = #tpu.dot_dimension_numbers<[1], [1], [0], [0], [0, 0, 1, 0], [], []>} : vector<128x8xf32>, vector<128x8xf32>, vector<128x128xf32> -> vector<128x128xf32>
    %84 = arith.addf %83, %17 : vector<128x128xf32>
    %cst_29 = arith.constant dense<0xFF800000> : vector<128xf32>
    %85 = vector.multi_reduction <maximumf>, %84, %cst_29 [1] : vector<128x128xf32> to vector<128xf32>
    %86 = vector.shape_cast %85 : vector<128xf32> to vector<128x1xf32>
    %87 = vector.broadcast %86 : vector<128x1xf32> to vector<128x128xf32>
    %88 = arith.subf %84, %87 : vector<128x128xf32>
    %89 = math.exp %88 : vector<128x128xf32>
    %cst_30 = arith.constant dense<0.000000e+00> : vector<128xf32>
    %90 = vector.multi_reduction <add>, %89, %cst_30 [1] : vector<128x128xf32> to vector<128xf32>
    %91 = vector.shape_cast %90 : vector<128xf32> to vector<128x1xf32>
    %92 = vector.broadcast %91 : vector<128x1xf32> to vector<128x128xf32>
    %93 = arith.divf %89, %92 : vector<128x128xf32>
    %cst_31 = arith.constant dense<0.000000e+00> : vector<128x8xf32>
    %94 = tpu.matmul %93, %82, %cst_31 {dimension_numbers = #tpu.dot_dimension_numbers<[1], [0], [0], [1], [0, 0, 1, 1], [], []>} : vector<128x128xf32>, vector<128x8xf32>, vector<128x8xf32> -> vector<128x8xf32>
    %95 = vector.extract_strided_slice %94 {offsets = [0, 0], sizes = [32, 8], strides = [1, 1]} : vector<128x8xf32> to vector<32x8xf32>
    %96 = vector.extract_strided_slice %94 {offsets = [32, 0], sizes = [32, 8], strides = [1, 1]} : vector<128x8xf32> to vector<32x8xf32>
    %97 = vector.extract_strided_slice %94 {offsets = [64, 0], sizes = [32, 8], strides = [1, 1]} : vector<128x8xf32> to vector<32x8xf32>
    %98 = vector.extract_strided_slice %94 {offsets = [96, 0], sizes = [32, 8], strides = [1, 1]} : vector<128x8xf32> to vector<32x8xf32>
    %99 = tpu.concatenate %95, %96, %97, %98 in 1 : vector<32x8xf32>, vector<32x8xf32>, vector<32x8xf32>, vector<32x8xf32> -> vector<32x32xf32>
    %cst_32 = arith.constant dense<0.000000e+00> : vector<32x32xf32>
    %100 = tpu.matmul %99, %36, %cst_32 {dimension_numbers = #tpu.dot_dimension_numbers<[1], [0], [0], [1], [0, 0, 1, 1], [], []>} : vector<32x32xf32>, vector<32x32xf32>, vector<32x32xf32> -> vector<32x32xf32>
    %101 = arith.addf %30, %100 : vector<32x32xf32>
    %102 = vector.broadcast %40 : vector<1x32xf32> to vector<32x32xf32>
    %103 = arith.addf %101, %102 : vector<32x32xf32>
    %cst_33 = arith.constant dense<0.000000e+00> : vector<32xf32>
    %104 = vector.multi_reduction <add>, %103, %cst_33 [1] : vector<32x32xf32> to vector<32xf32>
    %105 = vector.shape_cast %104 : vector<32xf32> to vector<32x1xf32>
    %cst_34 = arith.constant 3.200000e+01 : f32
    %106 = vector.broadcast %cst_34 : f32 to vector<32x1xf32>
    %107 = arith.divf %105, %106 : vector<32x1xf32>
    %108 = vector.broadcast %107 : vector<32x1xf32> to vector<32x32xf32>
    %109 = arith.subf %103, %108 : vector<32x32xf32>
    %110 = arith.mulf %109, %109 : vector<32x32xf32>
    %cst_35 = arith.constant dense<0.000000e+00> : vector<32xf32>
    %111 = vector.multi_reduction <add>, %110, %cst_35 [1] : vector<32x32xf32> to vector<32xf32>
    %112 = vector.shape_cast %111 : vector<32xf32> to vector<32x1xf32>
    %cst_36 = arith.constant 3.200000e+01 : f32
    %113 = vector.broadcast %cst_36 : f32 to vector<32x1xf32>
    %114 = arith.divf %112, %113 : vector<32x1xf32>
    %cst_37 = arith.constant 9.99999974E-6 : f32
    %115 = vector.broadcast %cst_37 : f32 to vector<32x1xf32>
    %116 = arith.addf %114, %115 : vector<32x1xf32>
    %117 = math.rsqrt %116 : vector<32x1xf32>
    %118 = vector.broadcast %117 : vector<32x1xf32> to vector<32x32xf32>
    %119 = arith.mulf %109, %118 : vector<32x32xf32>
    %120 = vector.broadcast %41 : vector<1x32xf32> to vector<32x32xf32>
    %121 = arith.mulf %119, %120 : vector<32x32xf32>
    %122 = vector.broadcast %42 : vector<1x32xf32> to vector<32x32xf32>
    %123 = arith.addf %121, %122 : vector<32x32xf32>
    %cst_38 = arith.constant dense<0.000000e+00> : vector<32x128xf32>
    %124 = tpu.matmul %123, %37, %cst_38 {dimension_numbers = #tpu.dot_dimension_numbers<[1], [0], [0], [1], [0, 0, 1, 1], [], []>} : vector<32x32xf32>, vector<32x128xf32>, vector<32x128xf32> -> vector<32x128xf32>
    %125 = vector.broadcast %44 : vector<1x128xf32> to vector<32x128xf32>
    %126 = arith.addf %124, %125 : vector<32x128xf32>
    %cst_39 = arith.constant 0.707106769 : f32
    %127 = vector.broadcast %cst_39 : f32 to vector<32x128xf32>
    %128 = arith.mulf %126, %127 : vector<32x128xf32>
    %129 = math.absf %128 : vector<32x128xf32>
    %cst_40 = arith.constant 0.327591091 : f32
    %130 = vector.broadcast %cst_40 : f32 to vector<32x128xf32>
    %131 = arith.mulf %130, %129 : vector<32x128xf32>
    %cst_41 = arith.constant 1.000000e+00 : f32
    %132 = vector.broadcast %cst_41 : f32 to vector<32x128xf32>
    %133 = arith.addf %132, %131 : vector<32x128xf32>
    %cst_42 = arith.constant 1.000000e+00 : f32
    %134 = vector.broadcast %cst_42 : f32 to vector<32x128xf32>
    %135 = arith.divf %134, %133 : vector<32x128xf32>
    %cst_43 = arith.constant 1.06140542 : f32
    %136 = vector.broadcast %cst_43 : f32 to vector<32x128xf32>
    %137 = arith.mulf %135, %136 : vector<32x128xf32>
    %cst_44 = arith.constant -1.45315206 : f32
    %138 = vector.broadcast %cst_44 : f32 to vector<32x128xf32>
    %139 = arith.addf %138, %137 : vector<32x128xf32>
    %140 = arith.mulf %135, %139 : vector<32x128xf32>
    %cst_45 = arith.constant 1.42141378 : f32
    %141 = vector.broadcast %cst_45 : f32 to vector<32x128xf32>
    %142 = arith.addf %141, %140 : vector<32x128xf32>
    %143 = arith.mulf %135, %142 : vector<32x128xf32>
    %cst_46 = arith.constant -0.284496725 : f32
    %144 = vector.broadcast %cst_46 : f32 to vector<32x128xf32>
    %145 = arith.addf %144, %143 : vector<32x128xf32>
    %146 = arith.mulf %135, %145 : vector<32x128xf32>
    %cst_47 = arith.constant 0.254829586 : f32
    %147 = vector.broadcast %cst_47 : f32 to vector<32x128xf32>
    %148 = arith.addf %147, %146 : vector<32x128xf32>
    %149 = arith.mulf %135, %148 : vector<32x128xf32>
    %cst_48 = arith.constant 0.000000e+00 : f32
    %150 = vector.broadcast %cst_48 : f32 to vector<32x128xf32>
    %151 = arith.subf %150, %129 : vector<32x128xf32>
    %152 = arith.mulf %151, %129 : vector<32x128xf32>
    %153 = math.exp %152 : vector<32x128xf32>
    %154 = arith.mulf %149, %153 : vector<32x128xf32>
    %cst_49 = arith.constant 1.000000e+00 : f32
    %155 = vector.broadcast %cst_49 : f32 to vector<32x128xf32>
    %156 = arith.subf %155, %154 : vector<32x128xf32>
    %cst_50 = arith.constant 0.000000e+00 : f32
    %157 = vector.broadcast %cst_50 : f32 to vector<32x128xf32>
    %158 = arith.cmpf oge, %128, %157 : vector<32x128xf32>
    %cst_51 = arith.constant 0.000000e+00 : f32
    %159 = vector.broadcast %cst_51 : f32 to vector<32x128xf32>
    %160 = arith.subf %159, %156 : vector<32x128xf32>
    %161 = arith.select %158, %156, %160 : vector<32x128xi1>, vector<32x128xf32>
    %cst_52 = arith.constant 5.000000e-01 : f32
    %162 = vector.broadcast %cst_52 : f32 to vector<32x128xf32>
    %163 = arith.mulf %162, %126 : vector<32x128xf32>
    %cst_53 = arith.constant 1.000000e+00 : f32
    %164 = vector.broadcast %cst_53 : f32 to vector<32x128xf32>
    %165 = arith.addf %164, %161 : vector<32x128xf32>
    %166 = arith.mulf %163, %165 : vector<32x128xf32>
    %c0_54 = arith.constant 0 : index
    %c0_55 = arith.constant 0 : index
    %c0_56 = arith.constant 0 : index
    %167 = vector.load %arg3[%c0_54, %c0_55, %c0_56] : memref<4x128x32xf32, #tpu.memory_space<vmem>>, vector<1x128x32xf32>
    %168 = vector.shape_cast %167 : vector<1x128x32xf32> to vector<128x32xf32>
    %cst_57 = arith.constant dense<0.000000e+00> : vector<32x32xf32>
    %169 = tpu.matmul %166, %168, %cst_57 {dimension_numbers = #tpu.dot_dimension_numbers<[1], [0], [0], [1], [0, 0, 1, 1], [], []>} : vector<32x128xf32>, vector<128x32xf32>, vector<32x32xf32> -> vector<32x32xf32>
    %170 = vector.broadcast %43 : vector<1x32xf32> to vector<32x32xf32>
    %171 = arith.addf %169, %170 : vector<32x32xf32>
    %172 = arith.addf %103, %171 : vector<32x32xf32>
    %c1 = arith.constant 1 : index
    %c0_58 = arith.constant 0 : index
    %c0_59 = arith.constant 0 : index
    %173 = vector.load %arg2[%c1, %c0_58, %c0_59] : memref<4x32x256xf32, #tpu.memory_space<vmem>>, vector<1x32x256xf32>
    %174 = vector.shape_cast %173 : vector<1x32x256xf32> to vector<32x256xf32>
    %c1_60 = arith.constant 1 : index
    %c0_61 = arith.constant 0 : index
    %c0_62 = arith.constant 0 : index
    %175 = vector.load %arg4[%c1_60, %c0_61, %c0_62] : memref<4x7x128xf32, #tpu.memory_space<vmem>>, vector<1x7x128xf32>
    %176 = vector.shape_cast %175 : vector<1x7x128xf32> to vector<7x128xf32>
    %177 = vector.extract_strided_slice %174 {offsets = [0, 0], sizes = [32, 96], strides = [1, 1]} : vector<32x256xf32> to vector<32x96xf32>
    %178 = vector.extract_strided_slice %174 {offsets = [0, 96], sizes = [32, 32], strides = [1, 1]} : vector<32x256xf32> to vector<32x32xf32>
    %179 = vector.extract_strided_slice %174 {offsets = [0, 128], sizes = [32, 128], strides = [1, 1]} : vector<32x256xf32> to vector<32x128xf32>
    %180 = vector.extract_strided_slice %176 {offsets = [0, 0], sizes = [1, 32], strides = [1, 1]} : vector<7x128xf32> to vector<1x32xf32>
    %181 = vector.extract_strided_slice %176 {offsets = [1, 0], sizes = [1, 32], strides = [1, 1]} : vector<7x128xf32> to vector<1x32xf32>
    %182 = vector.extract_strided_slice %176 {offsets = [2, 0], sizes = [1, 32], strides = [1, 1]} : vector<7x128xf32> to vector<1x32xf32>
    %183 = vector.extract_strided_slice %176 {offsets = [3, 0], sizes = [1, 32], strides = [1, 1]} : vector<7x128xf32> to vector<1x32xf32>
    %184 = vector.extract_strided_slice %176 {offsets = [4, 0], sizes = [1, 32], strides = [1, 1]} : vector<7x128xf32> to vector<1x32xf32>
    %185 = vector.extract_strided_slice %176 {offsets = [5, 0], sizes = [1, 32], strides = [1, 1]} : vector<7x128xf32> to vector<1x32xf32>
    %186 = vector.extract_strided_slice %176 {offsets = [6, 0], sizes = [1, 128], strides = [1, 1]} : vector<7x128xf32> to vector<1x128xf32>
    %cst_63 = arith.constant dense<0.000000e+00> : vector<32xf32>
    %187 = vector.multi_reduction <add>, %172, %cst_63 [1] : vector<32x32xf32> to vector<32xf32>
    %188 = vector.shape_cast %187 : vector<32xf32> to vector<32x1xf32>
    %cst_64 = arith.constant 3.200000e+01 : f32
    %189 = vector.broadcast %cst_64 : f32 to vector<32x1xf32>
    %190 = arith.divf %188, %189 : vector<32x1xf32>
    %191 = vector.broadcast %190 : vector<32x1xf32> to vector<32x32xf32>
    %192 = arith.subf %172, %191 : vector<32x32xf32>
    %193 = arith.mulf %192, %192 : vector<32x32xf32>
    %cst_65 = arith.constant dense<0.000000e+00> : vector<32xf32>
    %194 = vector.multi_reduction <add>, %193, %cst_65 [1] : vector<32x32xf32> to vector<32xf32>
    %195 = vector.shape_cast %194 : vector<32xf32> to vector<32x1xf32>
    %cst_66 = arith.constant 3.200000e+01 : f32
    %196 = vector.broadcast %cst_66 : f32 to vector<32x1xf32>
    %197 = arith.divf %195, %196 : vector<32x1xf32>
    %cst_67 = arith.constant 9.99999974E-6 : f32
    %198 = vector.broadcast %cst_67 : f32 to vector<32x1xf32>
    %199 = arith.addf %197, %198 : vector<32x1xf32>
    %200 = math.rsqrt %199 : vector<32x1xf32>
    %201 = vector.broadcast %200 : vector<32x1xf32> to vector<32x32xf32>
    %202 = arith.mulf %192, %201 : vector<32x32xf32>
    %203 = vector.broadcast %180 : vector<1x32xf32> to vector<32x32xf32>
    %204 = arith.mulf %202, %203 : vector<32x32xf32>
    %205 = vector.broadcast %181 : vector<1x32xf32> to vector<32x32xf32>
    %206 = arith.addf %204, %205 : vector<32x32xf32>
    %cst_68 = arith.constant dense<0.000000e+00> : vector<32x96xf32>
    %207 = tpu.matmul %206, %177, %cst_68 {dimension_numbers = #tpu.dot_dimension_numbers<[1], [0], [0], [1], [0, 0, 1, 1], [], []>} : vector<32x32xf32>, vector<32x96xf32>, vector<32x96xf32> -> vector<32x96xf32>
    %208 = vector.extract_strided_slice %207 {offsets = [0, 0], sizes = [32, 8], strides = [1, 1]} : vector<32x96xf32> to vector<32x8xf32>
    %209 = vector.extract_strided_slice %207 {offsets = [0, 8], sizes = [32, 8], strides = [1, 1]} : vector<32x96xf32> to vector<32x8xf32>
    %210 = vector.extract_strided_slice %207 {offsets = [0, 16], sizes = [32, 8], strides = [1, 1]} : vector<32x96xf32> to vector<32x8xf32>
    %211 = vector.extract_strided_slice %207 {offsets = [0, 24], sizes = [32, 8], strides = [1, 1]} : vector<32x96xf32> to vector<32x8xf32>
    %212 = tpu.concatenate %208, %209, %210, %211 in 0 : vector<32x8xf32>, vector<32x8xf32>, vector<32x8xf32>, vector<32x8xf32> -> vector<128x8xf32>
    %cst_69 = arith.constant 0.353553385 : f32
    %213 = vector.broadcast %cst_69 : f32 to vector<128x8xf32>
    %214 = arith.mulf %212, %213 : vector<128x8xf32>
    %215 = vector.extract_strided_slice %207 {offsets = [0, 32], sizes = [32, 8], strides = [1, 1]} : vector<32x96xf32> to vector<32x8xf32>
    %216 = vector.extract_strided_slice %207 {offsets = [0, 40], sizes = [32, 8], strides = [1, 1]} : vector<32x96xf32> to vector<32x8xf32>
    %217 = vector.extract_strided_slice %207 {offsets = [0, 48], sizes = [32, 8], strides = [1, 1]} : vector<32x96xf32> to vector<32x8xf32>
    %218 = vector.extract_strided_slice %207 {offsets = [0, 56], sizes = [32, 8], strides = [1, 1]} : vector<32x96xf32> to vector<32x8xf32>
    %219 = tpu.concatenate %215, %216, %217, %218 in 0 : vector<32x8xf32>, vector<32x8xf32>, vector<32x8xf32>, vector<32x8xf32> -> vector<128x8xf32>
    %220 = vector.extract_strided_slice %207 {offsets = [0, 64], sizes = [32, 8], strides = [1, 1]} : vector<32x96xf32> to vector<32x8xf32>
    %221 = vector.extract_strided_slice %207 {offsets = [0, 72], sizes = [32, 8], strides = [1, 1]} : vector<32x96xf32> to vector<32x8xf32>
    %222 = vector.extract_strided_slice %207 {offsets = [0, 80], sizes = [32, 8], strides = [1, 1]} : vector<32x96xf32> to vector<32x8xf32>
    %223 = vector.extract_strided_slice %207 {offsets = [0, 88], sizes = [32, 8], strides = [1, 1]} : vector<32x96xf32> to vector<32x8xf32>
    %224 = tpu.concatenate %220, %221, %222, %223 in 0 : vector<32x8xf32>, vector<32x8xf32>, vector<32x8xf32>, vector<32x8xf32> -> vector<128x8xf32>
    %cst_70 = arith.constant dense<0.000000e+00> : vector<128x128xf32>
    %225 = tpu.matmul %214, %219, %cst_70 {dimension_numbers = #tpu.dot_dimension_numbers<[1], [1], [0], [0], [0, 0, 1, 0], [], []>} : vector<128x8xf32>, vector<128x8xf32>, vector<128x128xf32> -> vector<128x128xf32>
    %226 = arith.addf %225, %17 : vector<128x128xf32>
    %cst_71 = arith.constant dense<0xFF800000> : vector<128xf32>
    %227 = vector.multi_reduction <maximumf>, %226, %cst_71 [1] : vector<128x128xf32> to vector<128xf32>
    %228 = vector.shape_cast %227 : vector<128xf32> to vector<128x1xf32>
    %229 = vector.broadcast %228 : vector<128x1xf32> to vector<128x128xf32>
    %230 = arith.subf %226, %229 : vector<128x128xf32>
    %231 = math.exp %230 : vector<128x128xf32>
    %cst_72 = arith.constant dense<0.000000e+00> : vector<128xf32>
    %232 = vector.multi_reduction <add>, %231, %cst_72 [1] : vector<128x128xf32> to vector<128xf32>
    %233 = vector.shape_cast %232 : vector<128xf32> to vector<128x1xf32>
    %234 = vector.broadcast %233 : vector<128x1xf32> to vector<128x128xf32>
    %235 = arith.divf %231, %234 : vector<128x128xf32>
    %cst_73 = arith.constant dense<0.000000e+00> : vector<128x8xf32>
    %236 = tpu.matmul %235, %224, %cst_73 {dimension_numbers = #tpu.dot_dimension_numbers<[1], [0], [0], [1], [0, 0, 1, 1], [], []>} : vector<128x128xf32>, vector<128x8xf32>, vector<128x8xf32> -> vector<128x8xf32>
    %237 = vector.extract_strided_slice %236 {offsets = [0, 0], sizes = [32, 8], strides = [1, 1]} : vector<128x8xf32> to vector<32x8xf32>
    %238 = vector.extract_strided_slice %236 {offsets = [32, 0], sizes = [32, 8], strides = [1, 1]} : vector<128x8xf32> to vector<32x8xf32>
    %239 = vector.extract_strided_slice %236 {offsets = [64, 0], sizes = [32, 8], strides = [1, 1]} : vector<128x8xf32> to vector<32x8xf32>
    %240 = vector.extract_strided_slice %236 {offsets = [96, 0], sizes = [32, 8], strides = [1, 1]} : vector<128x8xf32> to vector<32x8xf32>
    %241 = tpu.concatenate %237, %238, %239, %240 in 1 : vector<32x8xf32>, vector<32x8xf32>, vector<32x8xf32>, vector<32x8xf32> -> vector<32x32xf32>
    %cst_74 = arith.constant dense<0.000000e+00> : vector<32x32xf32>
    %242 = tpu.matmul %241, %178, %cst_74 {dimension_numbers = #tpu.dot_dimension_numbers<[1], [0], [0], [1], [0, 0, 1, 1], [], []>} : vector<32x32xf32>, vector<32x32xf32>, vector<32x32xf32> -> vector<32x32xf32>
    %243 = arith.addf %172, %242 : vector<32x32xf32>
    %244 = vector.broadcast %182 : vector<1x32xf32> to vector<32x32xf32>
    %245 = arith.addf %243, %244 : vector<32x32xf32>
    %cst_75 = arith.constant dense<0.000000e+00> : vector<32xf32>
    %246 = vector.multi_reduction <add>, %245, %cst_75 [1] : vector<32x32xf32> to vector<32xf32>
    %247 = vector.shape_cast %246 : vector<32xf32> to vector<32x1xf32>
    %cst_76 = arith.constant 3.200000e+01 : f32
    %248 = vector.broadcast %cst_76 : f32 to vector<32x1xf32>
    %249 = arith.divf %247, %248 : vector<32x1xf32>
    %250 = vector.broadcast %249 : vector<32x1xf32> to vector<32x32xf32>
    %251 = arith.subf %245, %250 : vector<32x32xf32>
    %252 = arith.mulf %251, %251 : vector<32x32xf32>
    %cst_77 = arith.constant dense<0.000000e+00> : vector<32xf32>
    %253 = vector.multi_reduction <add>, %252, %cst_77 [1] : vector<32x32xf32> to vector<32xf32>
    %254 = vector.shape_cast %253 : vector<32xf32> to vector<32x1xf32>
    %cst_78 = arith.constant 3.200000e+01 : f32
    %255 = vector.broadcast %cst_78 : f32 to vector<32x1xf32>
    %256 = arith.divf %254, %255 : vector<32x1xf32>
    %cst_79 = arith.constant 9.99999974E-6 : f32
    %257 = vector.broadcast %cst_79 : f32 to vector<32x1xf32>
    %258 = arith.addf %256, %257 : vector<32x1xf32>
    %259 = math.rsqrt %258 : vector<32x1xf32>
    %260 = vector.broadcast %259 : vector<32x1xf32> to vector<32x32xf32>
    %261 = arith.mulf %251, %260 : vector<32x32xf32>
    %262 = vector.broadcast %183 : vector<1x32xf32> to vector<32x32xf32>
    %263 = arith.mulf %261, %262 : vector<32x32xf32>
    %264 = vector.broadcast %184 : vector<1x32xf32> to vector<32x32xf32>
    %265 = arith.addf %263, %264 : vector<32x32xf32>
    %cst_80 = arith.constant dense<0.000000e+00> : vector<32x128xf32>
    %266 = tpu.matmul %265, %179, %cst_80 {dimension_numbers = #tpu.dot_dimension_numbers<[1], [0], [0], [1], [0, 0, 1, 1], [], []>} : vector<32x32xf32>, vector<32x128xf32>, vector<32x128xf32> -> vector<32x128xf32>
    %267 = vector.broadcast %186 : vector<1x128xf32> to vector<32x128xf32>
    %268 = arith.addf %266, %267 : vector<32x128xf32>
    %cst_81 = arith.constant 0.707106769 : f32
    %269 = vector.broadcast %cst_81 : f32 to vector<32x128xf32>
    %270 = arith.mulf %268, %269 : vector<32x128xf32>
    %271 = math.absf %270 : vector<32x128xf32>
    %cst_82 = arith.constant 0.327591091 : f32
    %272 = vector.broadcast %cst_82 : f32 to vector<32x128xf32>
    %273 = arith.mulf %272, %271 : vector<32x128xf32>
    %cst_83 = arith.constant 1.000000e+00 : f32
    %274 = vector.broadcast %cst_83 : f32 to vector<32x128xf32>
    %275 = arith.addf %274, %273 : vector<32x128xf32>
    %cst_84 = arith.constant 1.000000e+00 : f32
    %276 = vector.broadcast %cst_84 : f32 to vector<32x128xf32>
    %277 = arith.divf %276, %275 : vector<32x128xf32>
    %cst_85 = arith.constant 1.06140542 : f32
    %278 = vector.broadcast %cst_85 : f32 to vector<32x128xf32>
    %279 = arith.mulf %277, %278 : vector<32x128xf32>
    %cst_86 = arith.constant -1.45315206 : f32
    %280 = vector.broadcast %cst_86 : f32 to vector<32x128xf32>
    %281 = arith.addf %280, %279 : vector<32x128xf32>
    %282 = arith.mulf %277, %281 : vector<32x128xf32>
    %cst_87 = arith.constant 1.42141378 : f32
    %283 = vector.broadcast %cst_87 : f32 to vector<32x128xf32>
    %284 = arith.addf %283, %282 : vector<32x128xf32>
    %285 = arith.mulf %277, %284 : vector<32x128xf32>
    %cst_88 = arith.constant -0.284496725 : f32
    %286 = vector.broadcast %cst_88 : f32 to vector<32x128xf32>
    %287 = arith.addf %286, %285 : vector<32x128xf32>
    %288 = arith.mulf %277, %287 : vector<32x128xf32>
    %cst_89 = arith.constant 0.254829586 : f32
    %289 = vector.broadcast %cst_89 : f32 to vector<32x128xf32>
    %290 = arith.addf %289, %288 : vector<32x128xf32>
    %291 = arith.mulf %277, %290 : vector<32x128xf32>
    %cst_90 = arith.constant 0.000000e+00 : f32
    %292 = vector.broadcast %cst_90 : f32 to vector<32x128xf32>
    %293 = arith.subf %292, %271 : vector<32x128xf32>
    %294 = arith.mulf %293, %271 : vector<32x128xf32>
    %295 = math.exp %294 : vector<32x128xf32>
    %296 = arith.mulf %291, %295 : vector<32x128xf32>
    %cst_91 = arith.constant 1.000000e+00 : f32
    %297 = vector.broadcast %cst_91 : f32 to vector<32x128xf32>
    %298 = arith.subf %297, %296 : vector<32x128xf32>
    %cst_92 = arith.constant 0.000000e+00 : f32
    %299 = vector.broadcast %cst_92 : f32 to vector<32x128xf32>
    %300 = arith.cmpf oge, %270, %299 : vector<32x128xf32>
    %cst_93 = arith.constant 0.000000e+00 : f32
    %301 = vector.broadcast %cst_93 : f32 to vector<32x128xf32>
    %302 = arith.subf %301, %298 : vector<32x128xf32>
    %303 = arith.select %300, %298, %302 : vector<32x128xi1>, vector<32x128xf32>
    %cst_94 = arith.constant 5.000000e-01 : f32
    %304 = vector.broadcast %cst_94 : f32 to vector<32x128xf32>
    %305 = arith.mulf %304, %268 : vector<32x128xf32>
    %cst_95 = arith.constant 1.000000e+00 : f32
    %306 = vector.broadcast %cst_95 : f32 to vector<32x128xf32>
    %307 = arith.addf %306, %303 : vector<32x128xf32>
    %308 = arith.mulf %305, %307 : vector<32x128xf32>
    %c1_96 = arith.constant 1 : index
    %c0_97 = arith.constant 0 : index
    %c0_98 = arith.constant 0 : index
    %309 = vector.load %arg3[%c1_96, %c0_97, %c0_98] : memref<4x128x32xf32, #tpu.memory_space<vmem>>, vector<1x128x32xf32>
    %310 = vector.shape_cast %309 : vector<1x128x32xf32> to vector<128x32xf32>
    %cst_99 = arith.constant dense<0.000000e+00> : vector<32x32xf32>
    %311 = tpu.matmul %308, %310, %cst_99 {dimension_numbers = #tpu.dot_dimension_numbers<[1], [0], [0], [1], [0, 0, 1, 1], [], []>} : vector<32x128xf32>, vector<128x32xf32>, vector<32x32xf32> -> vector<32x32xf32>
    %312 = vector.broadcast %185 : vector<1x32xf32> to vector<32x32xf32>
    %313 = arith.addf %311, %312 : vector<32x32xf32>
    %314 = arith.addf %245, %313 : vector<32x32xf32>
    %cst_100 = arith.constant dense<0.000000e+00> : vector<32xf32>
    %315 = vector.multi_reduction <add>, %314, %cst_100 [1] : vector<32x32xf32> to vector<32xf32>
    %316 = vector.shape_cast %315 : vector<32xf32> to vector<32x1xf32>
    %cst_101 = arith.constant 3.200000e+01 : f32
    %317 = vector.broadcast %cst_101 : f32 to vector<32x1xf32>
    %318 = arith.divf %316, %317 : vector<32x1xf32>
    %319 = vector.broadcast %318 : vector<32x1xf32> to vector<32x32xf32>
    %320 = arith.subf %314, %319 : vector<32x32xf32>
    %321 = arith.mulf %320, %320 : vector<32x32xf32>
    %cst_102 = arith.constant dense<0.000000e+00> : vector<32xf32>
    %322 = vector.multi_reduction <add>, %321, %cst_102 [1] : vector<32x32xf32> to vector<32xf32>
    %323 = vector.shape_cast %322 : vector<32xf32> to vector<32x1xf32>
    %cst_103 = arith.constant 3.200000e+01 : f32
    %324 = vector.broadcast %cst_103 : f32 to vector<32x1xf32>
    %325 = arith.divf %323, %324 : vector<32x1xf32>
    %cst_104 = arith.constant 9.99999974E-6 : f32
    %326 = vector.broadcast %cst_104 : f32 to vector<32x1xf32>
    %327 = arith.addf %325, %326 : vector<32x1xf32>
    %328 = math.rsqrt %327 : vector<32x1xf32>
    %329 = vector.broadcast %328 : vector<32x1xf32> to vector<32x32xf32>
    %330 = arith.mulf %320, %329 : vector<32x32xf32>
    %331 = vector.broadcast %23 : vector<1x32xf32> to vector<32x32xf32>
    %332 = arith.mulf %330, %331 : vector<32x32xf32>
    %333 = vector.broadcast %24 : vector<1x32xf32> to vector<32x32xf32>
    %334 = arith.addf %332, %333 : vector<32x32xf32>
    %cst_105 = arith.constant dense<0.000000e+00> : vector<32x32xf32>
    %335 = tpu.matmul %334, %19, %cst_105 {dimension_numbers = #tpu.dot_dimension_numbers<[1], [0], [0], [1], [0, 0, 1, 1], [], []>} : vector<32x32xf32>, vector<32x32xf32>, vector<32x32xf32> -> vector<32x32xf32>
    %c2 = arith.constant 2 : index
    %c0_106 = arith.constant 0 : index
    %c0_107 = arith.constant 0 : index
    %336 = vector.load %arg2[%c2, %c0_106, %c0_107] : memref<4x32x256xf32, #tpu.memory_space<vmem>>, vector<1x32x256xf32>
    %337 = vector.shape_cast %336 : vector<1x32x256xf32> to vector<32x256xf32>
    %c2_108 = arith.constant 2 : index
    %c0_109 = arith.constant 0 : index
    %c0_110 = arith.constant 0 : index
    %338 = vector.load %arg4[%c2_108, %c0_109, %c0_110] : memref<4x7x128xf32, #tpu.memory_space<vmem>>, vector<1x7x128xf32>
    %339 = vector.shape_cast %338 : vector<1x7x128xf32> to vector<7x128xf32>
    %340 = vector.extract_strided_slice %337 {offsets = [0, 0], sizes = [32, 96], strides = [1, 1]} : vector<32x256xf32> to vector<32x96xf32>
    %341 = vector.extract_strided_slice %337 {offsets = [0, 96], sizes = [32, 32], strides = [1, 1]} : vector<32x256xf32> to vector<32x32xf32>
    %342 = vector.extract_strided_slice %337 {offsets = [0, 128], sizes = [32, 128], strides = [1, 1]} : vector<32x256xf32> to vector<32x128xf32>
    %343 = vector.extract_strided_slice %339 {offsets = [0, 0], sizes = [1, 32], strides = [1, 1]} : vector<7x128xf32> to vector<1x32xf32>
    %344 = vector.extract_strided_slice %339 {offsets = [1, 0], sizes = [1, 32], strides = [1, 1]} : vector<7x128xf32> to vector<1x32xf32>
    %345 = vector.extract_strided_slice %339 {offsets = [2, 0], sizes = [1, 32], strides = [1, 1]} : vector<7x128xf32> to vector<1x32xf32>
    %346 = vector.extract_strided_slice %339 {offsets = [3, 0], sizes = [1, 32], strides = [1, 1]} : vector<7x128xf32> to vector<1x32xf32>
    %347 = vector.extract_strided_slice %339 {offsets = [4, 0], sizes = [1, 32], strides = [1, 1]} : vector<7x128xf32> to vector<1x32xf32>
    %348 = vector.extract_strided_slice %339 {offsets = [5, 0], sizes = [1, 32], strides = [1, 1]} : vector<7x128xf32> to vector<1x32xf32>
    %349 = vector.extract_strided_slice %339 {offsets = [6, 0], sizes = [1, 128], strides = [1, 1]} : vector<7x128xf32> to vector<1x128xf32>
    %cst_111 = arith.constant dense<0.000000e+00> : vector<32xf32>
    %350 = vector.multi_reduction <add>, %335, %cst_111 [1] : vector<32x32xf32> to vector<32xf32>
    %351 = vector.shape_cast %350 : vector<32xf32> to vector<32x1xf32>
    %cst_112 = arith.constant 3.200000e+01 : f32
    %352 = vector.broadcast %cst_112 : f32 to vector<32x1xf32>
    %353 = arith.divf %351, %352 : vector<32x1xf32>
    %354 = vector.broadcast %353 : vector<32x1xf32> to vector<32x32xf32>
    %355 = arith.subf %335, %354 : vector<32x32xf32>
    %356 = arith.mulf %355, %355 : vector<32x32xf32>
    %cst_113 = arith.constant dense<0.000000e+00> : vector<32xf32>
    %357 = vector.multi_reduction <add>, %356, %cst_113 [1] : vector<32x32xf32> to vector<32xf32>
    %358 = vector.shape_cast %357 : vector<32xf32> to vector<32x1xf32>
    %cst_114 = arith.constant 3.200000e+01 : f32
    %359 = vector.broadcast %cst_114 : f32 to vector<32x1xf32>
    %360 = arith.divf %358, %359 : vector<32x1xf32>
    %cst_115 = arith.constant 9.99999974E-6 : f32
    %361 = vector.broadcast %cst_115 : f32 to vector<32x1xf32>
    %362 = arith.addf %360, %361 : vector<32x1xf32>
    %363 = math.rsqrt %362 : vector<32x1xf32>
    %364 = vector.broadcast %363 : vector<32x1xf32> to vector<32x32xf32>
    %365 = arith.mulf %355, %364 : vector<32x32xf32>
    %366 = vector.broadcast %343 : vector<1x32xf32> to vector<32x32xf32>
    %367 = arith.mulf %365, %366 : vector<32x32xf32>
    %368 = vector.broadcast %344 : vector<1x32xf32> to vector<32x32xf32>
    %369 = arith.addf %367, %368 : vector<32x32xf32>
    %cst_116 = arith.constant dense<0.000000e+00> : vector<32x96xf32>
    %370 = tpu.matmul %369, %340, %cst_116 {dimension_numbers = #tpu.dot_dimension_numbers<[1], [0], [0], [1], [0, 0, 1, 1], [], []>} : vector<32x32xf32>, vector<32x96xf32>, vector<32x96xf32> -> vector<32x96xf32>
    %371 = vector.extract_strided_slice %370 {offsets = [0, 0], sizes = [32, 8], strides = [1, 1]} : vector<32x96xf32> to vector<32x8xf32>
    %372 = vector.extract_strided_slice %370 {offsets = [0, 8], sizes = [32, 8], strides = [1, 1]} : vector<32x96xf32> to vector<32x8xf32>
    %373 = vector.extract_strided_slice %370 {offsets = [0, 16], sizes = [32, 8], strides = [1, 1]} : vector<32x96xf32> to vector<32x8xf32>
    %374 = vector.extract_strided_slice %370 {offsets = [0, 24], sizes = [32, 8], strides = [1, 1]} : vector<32x96xf32> to vector<32x8xf32>
    %375 = tpu.concatenate %371, %372, %373, %374 in 0 : vector<32x8xf32>, vector<32x8xf32>, vector<32x8xf32>, vector<32x8xf32> -> vector<128x8xf32>
    %cst_117 = arith.constant 0.353553385 : f32
    %376 = vector.broadcast %cst_117 : f32 to vector<128x8xf32>
    %377 = arith.mulf %375, %376 : vector<128x8xf32>
    %378 = vector.extract_strided_slice %370 {offsets = [0, 32], sizes = [32, 8], strides = [1, 1]} : vector<32x96xf32> to vector<32x8xf32>
    %379 = vector.extract_strided_slice %370 {offsets = [0, 40], sizes = [32, 8], strides = [1, 1]} : vector<32x96xf32> to vector<32x8xf32>
    %380 = vector.extract_strided_slice %370 {offsets = [0, 48], sizes = [32, 8], strides = [1, 1]} : vector<32x96xf32> to vector<32x8xf32>
    %381 = vector.extract_strided_slice %370 {offsets = [0, 56], sizes = [32, 8], strides = [1, 1]} : vector<32x96xf32> to vector<32x8xf32>
    %382 = tpu.concatenate %378, %379, %380, %381 in 0 : vector<32x8xf32>, vector<32x8xf32>, vector<32x8xf32>, vector<32x8xf32> -> vector<128x8xf32>
    %383 = vector.extract_strided_slice %370 {offsets = [0, 64], sizes = [32, 8], strides = [1, 1]} : vector<32x96xf32> to vector<32x8xf32>
    %384 = vector.extract_strided_slice %370 {offsets = [0, 72], sizes = [32, 8], strides = [1, 1]} : vector<32x96xf32> to vector<32x8xf32>
    %385 = vector.extract_strided_slice %370 {offsets = [0, 80], sizes = [32, 8], strides = [1, 1]} : vector<32x96xf32> to vector<32x8xf32>
    %386 = vector.extract_strided_slice %370 {offsets = [0, 88], sizes = [32, 8], strides = [1, 1]} : vector<32x96xf32> to vector<32x8xf32>
    %387 = tpu.concatenate %383, %384, %385, %386 in 0 : vector<32x8xf32>, vector<32x8xf32>, vector<32x8xf32>, vector<32x8xf32> -> vector<128x8xf32>
    %cst_118 = arith.constant dense<0.000000e+00> : vector<128x128xf32>
    %388 = tpu.matmul %377, %382, %cst_118 {dimension_numbers = #tpu.dot_dimension_numbers<[1], [1], [0], [0], [0, 0, 1, 0], [], []>} : vector<128x8xf32>, vector<128x8xf32>, vector<128x128xf32> -> vector<128x128xf32>
    %389 = arith.addf %388, %17 : vector<128x128xf32>
    %cst_119 = arith.constant dense<0xFF800000> : vector<128xf32>
    %390 = vector.multi_reduction <maximumf>, %389, %cst_119 [1] : vector<128x128xf32> to vector<128xf32>
    %391 = vector.shape_cast %390 : vector<128xf32> to vector<128x1xf32>
    %392 = vector.broadcast %391 : vector<128x1xf32> to vector<128x128xf32>
    %393 = arith.subf %389, %392 : vector<128x128xf32>
    %394 = math.exp %393 : vector<128x128xf32>
    %cst_120 = arith.constant dense<0.000000e+00> : vector<128xf32>
    %395 = vector.multi_reduction <add>, %394, %cst_120 [1] : vector<128x128xf32> to vector<128xf32>
    %396 = vector.shape_cast %395 : vector<128xf32> to vector<128x1xf32>
    %397 = vector.broadcast %396 : vector<128x1xf32> to vector<128x128xf32>
    %398 = arith.divf %394, %397 : vector<128x128xf32>
    %cst_121 = arith.constant dense<0.000000e+00> : vector<128x8xf32>
    %399 = tpu.matmul %398, %387, %cst_121 {dimension_numbers = #tpu.dot_dimension_numbers<[1], [0], [0], [1], [0, 0, 1, 1], [], []>} : vector<128x128xf32>, vector<128x8xf32>, vector<128x8xf32> -> vector<128x8xf32>
    %400 = vector.extract_strided_slice %399 {offsets = [0, 0], sizes = [32, 8], strides = [1, 1]} : vector<128x8xf32> to vector<32x8xf32>
    %401 = vector.extract_strided_slice %399 {offsets = [32, 0], sizes = [32, 8], strides = [1, 1]} : vector<128x8xf32> to vector<32x8xf32>
    %402 = vector.extract_strided_slice %399 {offsets = [64, 0], sizes = [32, 8], strides = [1, 1]} : vector<128x8xf32> to vector<32x8xf32>
    %403 = vector.extract_strided_slice %399 {offsets = [96, 0], sizes = [32, 8], strides = [1, 1]} : vector<128x8xf32> to vector<32x8xf32>
    %404 = tpu.concatenate %400, %401, %402, %403 in 1 : vector<32x8xf32>, vector<32x8xf32>, vector<32x8xf32>, vector<32x8xf32> -> vector<32x32xf32>
    %cst_122 = arith.constant dense<0.000000e+00> : vector<32x32xf32>
    %405 = tpu.matmul %404, %341, %cst_122 {dimension_numbers = #tpu.dot_dimension_numbers<[1], [0], [0], [1], [0, 0, 1, 1], [], []>} : vector<32x32xf32>, vector<32x32xf32>, vector<32x32xf32> -> vector<32x32xf32>
    %406 = arith.addf %335, %405 : vector<32x32xf32>
    %407 = vector.broadcast %345 : vector<1x32xf32> to vector<32x32xf32>
    %408 = arith.addf %406, %407 : vector<32x32xf32>
    %cst_123 = arith.constant dense<0.000000e+00> : vector<32xf32>
    %409 = vector.multi_reduction <add>, %408, %cst_123 [1] : vector<32x32xf32> to vector<32xf32>
    %410 = vector.shape_cast %409 : vector<32xf32> to vector<32x1xf32>
    %cst_124 = arith.constant 3.200000e+01 : f32
    %411 = vector.broadcast %cst_124 : f32 to vector<32x1xf32>
    %412 = arith.divf %410, %411 : vector<32x1xf32>
    %413 = vector.broadcast %412 : vector<32x1xf32> to vector<32x32xf32>
    %414 = arith.subf %408, %413 : vector<32x32xf32>
    %415 = arith.mulf %414, %414 : vector<32x32xf32>
    %cst_125 = arith.constant dense<0.000000e+00> : vector<32xf32>
    %416 = vector.multi_reduction <add>, %415, %cst_125 [1] : vector<32x32xf32> to vector<32xf32>
    %417 = vector.shape_cast %416 : vector<32xf32> to vector<32x1xf32>
    %cst_126 = arith.constant 3.200000e+01 : f32
    %418 = vector.broadcast %cst_126 : f32 to vector<32x1xf32>
    %419 = arith.divf %417, %418 : vector<32x1xf32>
    %cst_127 = arith.constant 9.99999974E-6 : f32
    %420 = vector.broadcast %cst_127 : f32 to vector<32x1xf32>
    %421 = arith.addf %419, %420 : vector<32x1xf32>
    %422 = math.rsqrt %421 : vector<32x1xf32>
    %423 = vector.broadcast %422 : vector<32x1xf32> to vector<32x32xf32>
    %424 = arith.mulf %414, %423 : vector<32x32xf32>
    %425 = vector.broadcast %346 : vector<1x32xf32> to vector<32x32xf32>
    %426 = arith.mulf %424, %425 : vector<32x32xf32>
    %427 = vector.broadcast %347 : vector<1x32xf32> to vector<32x32xf32>
    %428 = arith.addf %426, %427 : vector<32x32xf32>
    %cst_128 = arith.constant dense<0.000000e+00> : vector<32x128xf32>
    %429 = tpu.matmul %428, %342, %cst_128 {dimension_numbers = #tpu.dot_dimension_numbers<[1], [0], [0], [1], [0, 0, 1, 1], [], []>} : vector<32x32xf32>, vector<32x128xf32>, vector<32x128xf32> -> vector<32x128xf32>
    %430 = vector.broadcast %349 : vector<1x128xf32> to vector<32x128xf32>
    %431 = arith.addf %429, %430 : vector<32x128xf32>
    %cst_129 = arith.constant 0.707106769 : f32
    %432 = vector.broadcast %cst_129 : f32 to vector<32x128xf32>
    %433 = arith.mulf %431, %432 : vector<32x128xf32>
    %434 = math.absf %433 : vector<32x128xf32>
    %cst_130 = arith.constant 0.327591091 : f32
    %435 = vector.broadcast %cst_130 : f32 to vector<32x128xf32>
    %436 = arith.mulf %435, %434 : vector<32x128xf32>
    %cst_131 = arith.constant 1.000000e+00 : f32
    %437 = vector.broadcast %cst_131 : f32 to vector<32x128xf32>
    %438 = arith.addf %437, %436 : vector<32x128xf32>
    %cst_132 = arith.constant 1.000000e+00 : f32
    %439 = vector.broadcast %cst_132 : f32 to vector<32x128xf32>
    %440 = arith.divf %439, %438 : vector<32x128xf32>
    %cst_133 = arith.constant 1.06140542 : f32
    %441 = vector.broadcast %cst_133 : f32 to vector<32x128xf32>
    %442 = arith.mulf %440, %441 : vector<32x128xf32>
    %cst_134 = arith.constant -1.45315206 : f32
    %443 = vector.broadcast %cst_134 : f32 to vector<32x128xf32>
    %444 = arith.addf %443, %442 : vector<32x128xf32>
    %445 = arith.mulf %440, %444 : vector<32x128xf32>
    %cst_135 = arith.constant 1.42141378 : f32
    %446 = vector.broadcast %cst_135 : f32 to vector<32x128xf32>
    %447 = arith.addf %446, %445 : vector<32x128xf32>
    %448 = arith.mulf %440, %447 : vector<32x128xf32>
    %cst_136 = arith.constant -0.284496725 : f32
    %449 = vector.broadcast %cst_136 : f32 to vector<32x128xf32>
    %450 = arith.addf %449, %448 : vector<32x128xf32>
    %451 = arith.mulf %440, %450 : vector<32x128xf32>
    %cst_137 = arith.constant 0.254829586 : f32
    %452 = vector.broadcast %cst_137 : f32 to vector<32x128xf32>
    %453 = arith.addf %452, %451 : vector<32x128xf32>
    %454 = arith.mulf %440, %453 : vector<32x128xf32>
    %cst_138 = arith.constant 0.000000e+00 : f32
    %455 = vector.broadcast %cst_138 : f32 to vector<32x128xf32>
    %456 = arith.subf %455, %434 : vector<32x128xf32>
    %457 = arith.mulf %456, %434 : vector<32x128xf32>
    %458 = math.exp %457 : vector<32x128xf32>
    %459 = arith.mulf %454, %458 : vector<32x128xf32>
    %cst_139 = arith.constant 1.000000e+00 : f32
    %460 = vector.broadcast %cst_139 : f32 to vector<32x128xf32>
    %461 = arith.subf %460, %459 : vector<32x128xf32>
    %cst_140 = arith.constant 0.000000e+00 : f32
    %462 = vector.broadcast %cst_140 : f32 to vector<32x128xf32>
    %463 = arith.cmpf oge, %433, %462 : vector<32x128xf32>
    %cst_141 = arith.constant 0.000000e+00 : f32
    %464 = vector.broadcast %cst_141 : f32 to vector<32x128xf32>
    %465 = arith.subf %464, %461 : vector<32x128xf32>
    %466 = arith.select %463, %461, %465 : vector<32x128xi1>, vector<32x128xf32>
    %cst_142 = arith.constant 5.000000e-01 : f32
    %467 = vector.broadcast %cst_142 : f32 to vector<32x128xf32>
    %468 = arith.mulf %467, %431 : vector<32x128xf32>
    %cst_143 = arith.constant 1.000000e+00 : f32
    %469 = vector.broadcast %cst_143 : f32 to vector<32x128xf32>
    %470 = arith.addf %469, %466 : vector<32x128xf32>
    %471 = arith.mulf %468, %470 : vector<32x128xf32>
    %c2_144 = arith.constant 2 : index
    %c0_145 = arith.constant 0 : index
    %c0_146 = arith.constant 0 : index
    %472 = vector.load %arg3[%c2_144, %c0_145, %c0_146] : memref<4x128x32xf32, #tpu.memory_space<vmem>>, vector<1x128x32xf32>
    %473 = vector.shape_cast %472 : vector<1x128x32xf32> to vector<128x32xf32>
    %cst_147 = arith.constant dense<0.000000e+00> : vector<32x32xf32>
    %474 = tpu.matmul %471, %473, %cst_147 {dimension_numbers = #tpu.dot_dimension_numbers<[1], [0], [0], [1], [0, 0, 1, 1], [], []>} : vector<32x128xf32>, vector<128x32xf32>, vector<32x32xf32> -> vector<32x32xf32>
    %475 = vector.broadcast %348 : vector<1x32xf32> to vector<32x32xf32>
    %476 = arith.addf %474, %475 : vector<32x32xf32>
    %477 = arith.addf %408, %476 : vector<32x32xf32>
    %c3 = arith.constant 3 : index
    %c0_148 = arith.constant 0 : index
    %c0_149 = arith.constant 0 : index
    %478 = vector.load %arg2[%c3, %c0_148, %c0_149] : memref<4x32x256xf32, #tpu.memory_space<vmem>>, vector<1x32x256xf32>
    %479 = vector.shape_cast %478 : vector<1x32x256xf32> to vector<32x256xf32>
    %c3_150 = arith.constant 3 : index
    %c0_151 = arith.constant 0 : index
    %c0_152 = arith.constant 0 : index
    %480 = vector.load %arg4[%c3_150, %c0_151, %c0_152] : memref<4x7x128xf32, #tpu.memory_space<vmem>>, vector<1x7x128xf32>
    %481 = vector.shape_cast %480 : vector<1x7x128xf32> to vector<7x128xf32>
    %482 = vector.extract_strided_slice %479 {offsets = [0, 0], sizes = [32, 96], strides = [1, 1]} : vector<32x256xf32> to vector<32x96xf32>
    %483 = vector.extract_strided_slice %479 {offsets = [0, 96], sizes = [32, 32], strides = [1, 1]} : vector<32x256xf32> to vector<32x32xf32>
    %484 = vector.extract_strided_slice %479 {offsets = [0, 128], sizes = [32, 128], strides = [1, 1]} : vector<32x256xf32> to vector<32x128xf32>
    %485 = vector.extract_strided_slice %481 {offsets = [0, 0], sizes = [1, 32], strides = [1, 1]} : vector<7x128xf32> to vector<1x32xf32>
    %486 = vector.extract_strided_slice %481 {offsets = [1, 0], sizes = [1, 32], strides = [1, 1]} : vector<7x128xf32> to vector<1x32xf32>
    %487 = vector.extract_strided_slice %481 {offsets = [2, 0], sizes = [1, 32], strides = [1, 1]} : vector<7x128xf32> to vector<1x32xf32>
    %488 = vector.extract_strided_slice %481 {offsets = [3, 0], sizes = [1, 32], strides = [1, 1]} : vector<7x128xf32> to vector<1x32xf32>
    %489 = vector.extract_strided_slice %481 {offsets = [4, 0], sizes = [1, 32], strides = [1, 1]} : vector<7x128xf32> to vector<1x32xf32>
    %490 = vector.extract_strided_slice %481 {offsets = [5, 0], sizes = [1, 32], strides = [1, 1]} : vector<7x128xf32> to vector<1x32xf32>
    %491 = vector.extract_strided_slice %481 {offsets = [6, 0], sizes = [1, 128], strides = [1, 1]} : vector<7x128xf32> to vector<1x128xf32>
    %cst_153 = arith.constant dense<0.000000e+00> : vector<32xf32>
    %492 = vector.multi_reduction <add>, %477, %cst_153 [1] : vector<32x32xf32> to vector<32xf32>
    %493 = vector.shape_cast %492 : vector<32xf32> to vector<32x1xf32>
    %cst_154 = arith.constant 3.200000e+01 : f32
    %494 = vector.broadcast %cst_154 : f32 to vector<32x1xf32>
    %495 = arith.divf %493, %494 : vector<32x1xf32>
    %496 = vector.broadcast %495 : vector<32x1xf32> to vector<32x32xf32>
    %497 = arith.subf %477, %496 : vector<32x32xf32>
    %498 = arith.mulf %497, %497 : vector<32x32xf32>
    %cst_155 = arith.constant dense<0.000000e+00> : vector<32xf32>
    %499 = vector.multi_reduction <add>, %498, %cst_155 [1] : vector<32x32xf32> to vector<32xf32>
    %500 = vector.shape_cast %499 : vector<32xf32> to vector<32x1xf32>
    %cst_156 = arith.constant 3.200000e+01 : f32
    %501 = vector.broadcast %cst_156 : f32 to vector<32x1xf32>
    %502 = arith.divf %500, %501 : vector<32x1xf32>
    %cst_157 = arith.constant 9.99999974E-6 : f32
    %503 = vector.broadcast %cst_157 : f32 to vector<32x1xf32>
    %504 = arith.addf %502, %503 : vector<32x1xf32>
    %505 = math.rsqrt %504 : vector<32x1xf32>
    %506 = vector.broadcast %505 : vector<32x1xf32> to vector<32x32xf32>
    %507 = arith.mulf %497, %506 : vector<32x32xf32>
    %508 = vector.broadcast %485 : vector<1x32xf32> to vector<32x32xf32>
    %509 = arith.mulf %507, %508 : vector<32x32xf32>
    %510 = vector.broadcast %486 : vector<1x32xf32> to vector<32x32xf32>
    %511 = arith.addf %509, %510 : vector<32x32xf32>
    %cst_158 = arith.constant dense<0.000000e+00> : vector<32x96xf32>
    %512 = tpu.matmul %511, %482, %cst_158 {dimension_numbers = #tpu.dot_dimension_numbers<[1], [0], [0], [1], [0, 0, 1, 1], [], []>} : vector<32x32xf32>, vector<32x96xf32>, vector<32x96xf32> -> vector<32x96xf32>
    %513 = vector.extract_strided_slice %512 {offsets = [0, 0], sizes = [32, 8], strides = [1, 1]} : vector<32x96xf32> to vector<32x8xf32>
    %514 = vector.extract_strided_slice %512 {offsets = [0, 8], sizes = [32, 8], strides = [1, 1]} : vector<32x96xf32> to vector<32x8xf32>
    %515 = vector.extract_strided_slice %512 {offsets = [0, 16], sizes = [32, 8], strides = [1, 1]} : vector<32x96xf32> to vector<32x8xf32>
    %516 = vector.extract_strided_slice %512 {offsets = [0, 24], sizes = [32, 8], strides = [1, 1]} : vector<32x96xf32> to vector<32x8xf32>
    %517 = tpu.concatenate %513, %514, %515, %516 in 0 : vector<32x8xf32>, vector<32x8xf32>, vector<32x8xf32>, vector<32x8xf32> -> vector<128x8xf32>
    %cst_159 = arith.constant 0.353553385 : f32
    %518 = vector.broadcast %cst_159 : f32 to vector<128x8xf32>
    %519 = arith.mulf %517, %518 : vector<128x8xf32>
    %520 = vector.extract_strided_slice %512 {offsets = [0, 32], sizes = [32, 8], strides = [1, 1]} : vector<32x96xf32> to vector<32x8xf32>
    %521 = vector.extract_strided_slice %512 {offsets = [0, 40], sizes = [32, 8], strides = [1, 1]} : vector<32x96xf32> to vector<32x8xf32>
    %522 = vector.extract_strided_slice %512 {offsets = [0, 48], sizes = [32, 8], strides = [1, 1]} : vector<32x96xf32> to vector<32x8xf32>
    %523 = vector.extract_strided_slice %512 {offsets = [0, 56], sizes = [32, 8], strides = [1, 1]} : vector<32x96xf32> to vector<32x8xf32>
    %524 = tpu.concatenate %520, %521, %522, %523 in 0 : vector<32x8xf32>, vector<32x8xf32>, vector<32x8xf32>, vector<32x8xf32> -> vector<128x8xf32>
    %525 = vector.extract_strided_slice %512 {offsets = [0, 64], sizes = [32, 8], strides = [1, 1]} : vector<32x96xf32> to vector<32x8xf32>
    %526 = vector.extract_strided_slice %512 {offsets = [0, 72], sizes = [32, 8], strides = [1, 1]} : vector<32x96xf32> to vector<32x8xf32>
    %527 = vector.extract_strided_slice %512 {offsets = [0, 80], sizes = [32, 8], strides = [1, 1]} : vector<32x96xf32> to vector<32x8xf32>
    %528 = vector.extract_strided_slice %512 {offsets = [0, 88], sizes = [32, 8], strides = [1, 1]} : vector<32x96xf32> to vector<32x8xf32>
    %529 = tpu.concatenate %525, %526, %527, %528 in 0 : vector<32x8xf32>, vector<32x8xf32>, vector<32x8xf32>, vector<32x8xf32> -> vector<128x8xf32>
    %cst_160 = arith.constant dense<0.000000e+00> : vector<128x128xf32>
    %530 = tpu.matmul %519, %524, %cst_160 {dimension_numbers = #tpu.dot_dimension_numbers<[1], [1], [0], [0], [0, 0, 1, 0], [], []>} : vector<128x8xf32>, vector<128x8xf32>, vector<128x128xf32> -> vector<128x128xf32>
    %531 = arith.addf %530, %17 : vector<128x128xf32>
    %cst_161 = arith.constant dense<0xFF800000> : vector<128xf32>
    %532 = vector.multi_reduction <maximumf>, %531, %cst_161 [1] : vector<128x128xf32> to vector<128xf32>
    %533 = vector.shape_cast %532 : vector<128xf32> to vector<128x1xf32>
    %534 = vector.broadcast %533 : vector<128x1xf32> to vector<128x128xf32>
    %535 = arith.subf %531, %534 : vector<128x128xf32>
    %536 = math.exp %535 : vector<128x128xf32>
    %cst_162 = arith.constant dense<0.000000e+00> : vector<128xf32>
    %537 = vector.multi_reduction <add>, %536, %cst_162 [1] : vector<128x128xf32> to vector<128xf32>
    %538 = vector.shape_cast %537 : vector<128xf32> to vector<128x1xf32>
    %539 = vector.broadcast %538 : vector<128x1xf32> to vector<128x128xf32>
    %540 = arith.divf %536, %539 : vector<128x128xf32>
    %cst_163 = arith.constant dense<0.000000e+00> : vector<128x8xf32>
    %541 = tpu.matmul %540, %529, %cst_163 {dimension_numbers = #tpu.dot_dimension_numbers<[1], [0], [0], [1], [0, 0, 1, 1], [], []>} : vector<128x128xf32>, vector<128x8xf32>, vector<128x8xf32> -> vector<128x8xf32>
    %542 = vector.extract_strided_slice %541 {offsets = [0, 0], sizes = [32, 8], strides = [1, 1]} : vector<128x8xf32> to vector<32x8xf32>
    %543 = vector.extract_strided_slice %541 {offsets = [32, 0], sizes = [32, 8], strides = [1, 1]} : vector<128x8xf32> to vector<32x8xf32>
    %544 = vector.extract_strided_slice %541 {offsets = [64, 0], sizes = [32, 8], strides = [1, 1]} : vector<128x8xf32> to vector<32x8xf32>
    %545 = vector.extract_strided_slice %541 {offsets = [96, 0], sizes = [32, 8], strides = [1, 1]} : vector<128x8xf32> to vector<32x8xf32>
    %546 = tpu.concatenate %542, %543, %544, %545 in 1 : vector<32x8xf32>, vector<32x8xf32>, vector<32x8xf32>, vector<32x8xf32> -> vector<32x32xf32>
    %cst_164 = arith.constant dense<0.000000e+00> : vector<32x32xf32>
    %547 = tpu.matmul %546, %483, %cst_164 {dimension_numbers = #tpu.dot_dimension_numbers<[1], [0], [0], [1], [0, 0, 1, 1], [], []>} : vector<32x32xf32>, vector<32x32xf32>, vector<32x32xf32> -> vector<32x32xf32>
    %548 = arith.addf %477, %547 : vector<32x32xf32>
    %549 = vector.broadcast %487 : vector<1x32xf32> to vector<32x32xf32>
    %550 = arith.addf %548, %549 : vector<32x32xf32>
    %cst_165 = arith.constant dense<0.000000e+00> : vector<32xf32>
    %551 = vector.multi_reduction <add>, %550, %cst_165 [1] : vector<32x32xf32> to vector<32xf32>
    %552 = vector.shape_cast %551 : vector<32xf32> to vector<32x1xf32>
    %cst_166 = arith.constant 3.200000e+01 : f32
    %553 = vector.broadcast %cst_166 : f32 to vector<32x1xf32>
    %554 = arith.divf %552, %553 : vector<32x1xf32>
    %555 = vector.broadcast %554 : vector<32x1xf32> to vector<32x32xf32>
    %556 = arith.subf %550, %555 : vector<32x32xf32>
    %557 = arith.mulf %556, %556 : vector<32x32xf32>
    %cst_167 = arith.constant dense<0.000000e+00> : vector<32xf32>
    %558 = vector.multi_reduction <add>, %557, %cst_167 [1] : vector<32x32xf32> to vector<32xf32>
    %559 = vector.shape_cast %558 : vector<32xf32> to vector<32x1xf32>
    %cst_168 = arith.constant 3.200000e+01 : f32
    %560 = vector.broadcast %cst_168 : f32 to vector<32x1xf32>
    %561 = arith.divf %559, %560 : vector<32x1xf32>
    %cst_169 = arith.constant 9.99999974E-6 : f32
    %562 = vector.broadcast %cst_169 : f32 to vector<32x1xf32>
    %563 = arith.addf %561, %562 : vector<32x1xf32>
    %564 = math.rsqrt %563 : vector<32x1xf32>
    %565 = vector.broadcast %564 : vector<32x1xf32> to vector<32x32xf32>
    %566 = arith.mulf %556, %565 : vector<32x32xf32>
    %567 = vector.broadcast %488 : vector<1x32xf32> to vector<32x32xf32>
    %568 = arith.mulf %566, %567 : vector<32x32xf32>
    %569 = vector.broadcast %489 : vector<1x32xf32> to vector<32x32xf32>
    %570 = arith.addf %568, %569 : vector<32x32xf32>
    %cst_170 = arith.constant dense<0.000000e+00> : vector<32x128xf32>
    %571 = tpu.matmul %570, %484, %cst_170 {dimension_numbers = #tpu.dot_dimension_numbers<[1], [0], [0], [1], [0, 0, 1, 1], [], []>} : vector<32x32xf32>, vector<32x128xf32>, vector<32x128xf32> -> vector<32x128xf32>
    %572 = vector.broadcast %491 : vector<1x128xf32> to vector<32x128xf32>
    %573 = arith.addf %571, %572 : vector<32x128xf32>
    %cst_171 = arith.constant 0.707106769 : f32
    %574 = vector.broadcast %cst_171 : f32 to vector<32x128xf32>
    %575 = arith.mulf %573, %574 : vector<32x128xf32>
    %576 = math.absf %575 : vector<32x128xf32>
    %cst_172 = arith.constant 0.327591091 : f32
    %577 = vector.broadcast %cst_172 : f32 to vector<32x128xf32>
    %578 = arith.mulf %577, %576 : vector<32x128xf32>
    %cst_173 = arith.constant 1.000000e+00 : f32
    %579 = vector.broadcast %cst_173 : f32 to vector<32x128xf32>
    %580 = arith.addf %579, %578 : vector<32x128xf32>
    %cst_174 = arith.constant 1.000000e+00 : f32
    %581 = vector.broadcast %cst_174 : f32 to vector<32x128xf32>
    %582 = arith.divf %581, %580 : vector<32x128xf32>
    %cst_175 = arith.constant 1.06140542 : f32
    %583 = vector.broadcast %cst_175 : f32 to vector<32x128xf32>
    %584 = arith.mulf %582, %583 : vector<32x128xf32>
    %cst_176 = arith.constant -1.45315206 : f32
    %585 = vector.broadcast %cst_176 : f32 to vector<32x128xf32>
    %586 = arith.addf %585, %584 : vector<32x128xf32>
    %587 = arith.mulf %582, %586 : vector<32x128xf32>
    %cst_177 = arith.constant 1.42141378 : f32
    %588 = vector.broadcast %cst_177 : f32 to vector<32x128xf32>
    %589 = arith.addf %588, %587 : vector<32x128xf32>
    %590 = arith.mulf %582, %589 : vector<32x128xf32>
    %cst_178 = arith.constant -0.284496725 : f32
    %591 = vector.broadcast %cst_178 : f32 to vector<32x128xf32>
    %592 = arith.addf %591, %590 : vector<32x128xf32>
    %593 = arith.mulf %582, %592 : vector<32x128xf32>
    %cst_179 = arith.constant 0.254829586 : f32
    %594 = vector.broadcast %cst_179 : f32 to vector<32x128xf32>
    %595 = arith.addf %594, %593 : vector<32x128xf32>
    %596 = arith.mulf %582, %595 : vector<32x128xf32>
    %cst_180 = arith.constant 0.000000e+00 : f32
    %597 = vector.broadcast %cst_180 : f32 to vector<32x128xf32>
    %598 = arith.subf %597, %576 : vector<32x128xf32>
    %599 = arith.mulf %598, %576 : vector<32x128xf32>
    %600 = math.exp %599 : vector<32x128xf32>
    %601 = arith.mulf %596, %600 : vector<32x128xf32>
    %cst_181 = arith.constant 1.000000e+00 : f32
    %602 = vector.broadcast %cst_181 : f32 to vector<32x128xf32>
    %603 = arith.subf %602, %601 : vector<32x128xf32>
    %cst_182 = arith.constant 0.000000e+00 : f32
    %604 = vector.broadcast %cst_182 : f32 to vector<32x128xf32>
    %605 = arith.cmpf oge, %575, %604 : vector<32x128xf32>
    %cst_183 = arith.constant 0.000000e+00 : f32
    %606 = vector.broadcast %cst_183 : f32 to vector<32x128xf32>
    %607 = arith.subf %606, %603 : vector<32x128xf32>
    %608 = arith.select %605, %603, %607 : vector<32x128xi1>, vector<32x128xf32>
    %cst_184 = arith.constant 5.000000e-01 : f32
    %609 = vector.broadcast %cst_184 : f32 to vector<32x128xf32>
    %610 = arith.mulf %609, %573 : vector<32x128xf32>
    %cst_185 = arith.constant 1.000000e+00 : f32
    %611 = vector.broadcast %cst_185 : f32 to vector<32x128xf32>
    %612 = arith.addf %611, %608 : vector<32x128xf32>
    %613 = arith.mulf %610, %612 : vector<32x128xf32>
    %c3_186 = arith.constant 3 : index
    %c0_187 = arith.constant 0 : index
    %c0_188 = arith.constant 0 : index
    %614 = vector.load %arg3[%c3_186, %c0_187, %c0_188] : memref<4x128x32xf32, #tpu.memory_space<vmem>>, vector<1x128x32xf32>
    %615 = vector.shape_cast %614 : vector<1x128x32xf32> to vector<128x32xf32>
    %cst_189 = arith.constant dense<0.000000e+00> : vector<32x32xf32>
    %616 = tpu.matmul %613, %615, %cst_189 {dimension_numbers = #tpu.dot_dimension_numbers<[1], [0], [0], [1], [0, 0, 1, 1], [], []>} : vector<32x128xf32>, vector<128x32xf32>, vector<32x32xf32> -> vector<32x32xf32>
    %617 = vector.broadcast %490 : vector<1x32xf32> to vector<32x32xf32>
    %618 = arith.addf %616, %617 : vector<32x32xf32>
    %619 = arith.addf %550, %618 : vector<32x32xf32>
    %cst_190 = arith.constant dense<0.000000e+00> : vector<32xf32>
    %620 = vector.multi_reduction <add>, %619, %cst_190 [1] : vector<32x32xf32> to vector<32xf32>
    %621 = vector.shape_cast %620 : vector<32xf32> to vector<32x1xf32>
    %cst_191 = arith.constant 3.200000e+01 : f32
    %622 = vector.broadcast %cst_191 : f32 to vector<32x1xf32>
    %623 = arith.divf %621, %622 : vector<32x1xf32>
    %624 = vector.broadcast %623 : vector<32x1xf32> to vector<32x32xf32>
    %625 = arith.subf %619, %624 : vector<32x32xf32>
    %626 = arith.mulf %625, %625 : vector<32x32xf32>
    %cst_192 = arith.constant dense<0.000000e+00> : vector<32xf32>
    %627 = vector.multi_reduction <add>, %626, %cst_192 [1] : vector<32x32xf32> to vector<32xf32>
    %628 = vector.shape_cast %627 : vector<32xf32> to vector<32x1xf32>
    %cst_193 = arith.constant 3.200000e+01 : f32
    %629 = vector.broadcast %cst_193 : f32 to vector<32x1xf32>
    %630 = arith.divf %628, %629 : vector<32x1xf32>
    %cst_194 = arith.constant 9.99999974E-6 : f32
    %631 = vector.broadcast %cst_194 : f32 to vector<32x1xf32>
    %632 = arith.addf %630, %631 : vector<32x1xf32>
    %633 = math.rsqrt %632 : vector<32x1xf32>
    %634 = vector.broadcast %633 : vector<32x1xf32> to vector<32x32xf32>
    %635 = arith.mulf %625, %634 : vector<32x32xf32>
    %636 = vector.broadcast %25 : vector<1x32xf32> to vector<32x32xf32>
    %637 = arith.mulf %635, %636 : vector<32x32xf32>
    %638 = vector.broadcast %26 : vector<1x32xf32> to vector<32x32xf32>
    %639 = arith.addf %637, %638 : vector<32x32xf32>
    %cst_195 = arith.constant dense<0.000000e+00> : vector<32x256xf32>
    %640 = tpu.matmul %639, %20, %cst_195 {dimension_numbers = #tpu.dot_dimension_numbers<[1], [1], [0], [0], [0, 0, 1, 0], [], []>} : vector<32x32xf32>, vector<256x32xf32>, vector<32x256xf32> -> vector<32x256xf32>
    %641 = vector.broadcast %22 : vector<1x256xf32> to vector<32x256xf32>
    %642 = arith.addf %640, %641 : vector<32x256xf32>
    %c0_196 = arith.constant 0 : index
    %c0_197 = arith.constant 0 : index
    %643 = vector.load %arg7[%c0_196, %c0_197] : memref<32x256xf32, #tpu.memory_space<vmem>>, vector<32x256xf32>
    tpu.vector_store %arg7[%c0_196, %c0_197], %642 {strides = array<i32>} : memref<32x256xf32, #tpu.memory_space<vmem>>, vector<32x256xf32>,
    return
  }
}

</mosaic_0001>

<bundles_post_ra>
// kernel: model_forward.1
= control target key start
LH: loop header
LB: loop body
LE: loop exit
PB: predicated region body
PF: predicated region fallthrough
CT: control target
= control target key end

     0   :  { %vm294_vm0 = vcmask 261120   ;;  %s6940_s28 = smov 104   ;;  %s6941_s29 = smov 112   ;;  %vm529_vm14 = vcmask 64512   ;;  %s10029_s5 = inlined_call_operand.vmem [shape: f32[544,32], index: 5, kind: input, shape index: {}]   ;;  %s10030_s0 = inlined_call_operand.vmem [shape: f32[32,256], index: 0, kind: input, shape index: {}]   ;;  %s10031_s1 = inlined_call_operand.vmem [shape: f32[32,32], index: 1, kind: input, shape index: {}]   ;;  %s10032_s2 = inlined_call_operand.vmem [shape: f32[4,32,256], index: 2, kind: input, shape index: {}]   ;;  %s10033_s4 = inlined_call_operand.vmem [shape: f32[4,7,128], index: 4, kind: input, shape index: {}]   ;;  %s10034_s3 = inlined_call_operand.vmem [shape: f32[4,128,32], index: 3, kind: input, shape index: {}]   ;;  %s10035_s6 = inlined_call_operand.vmem [shape: f32[5,256], index: 6, kind: input, shape index: {}]   ;;  %s10036_s7 = inlined_call_operand.vmem [shape: f32[32,256], index: 7, kind: output, shape index: {}]  }
   0x1   :  { %v160_v0 = vld [vmem:[%s10029_s5 + $0x78] sm:$0xff]  ;;  %v159_v1 = vld [vmem:[%s10029_s5 + $0x70] sm:$0xff]  ;;  %v158_v2 = vld [vmem:[%s10029_s5 + $0x68] sm:$0xff]  ;;  %s6942_s30 = smov 120   ;;  %s6943_s8 = smov 96  }
   0x2   :  { %227 = vmatpush.msra.mxu1 %v160_v0  ;;  %v157_v3 = vld [vmem:[%s10029_s5 + $0x60] sm:$0xff]  ;;  %v156_v4 = vld [vmem:[%s10029_s5 + $0x58] sm:$0xff]  ;;  %v155_v5 = vld [vmem:[%s10029_s5 + $0x50] sm:$0xff]  ;;  %v6939_v0 = vmov 32.0   ;;  %s6944_s9 = smov 64   ;;  %s6946_s10 = smov 32  }
   0x3   :  { %v154_v6 = vld [vmem:[%s10029_s5 + $0x48] sm:$0xff]  ;;  %v153_v7 = vld [vmem:[%s10029_s5 + $0x40] sm:$0xff]  ;;  %v152_v8 = vld [vmem:[%s10029_s5 + $0x38] sm:$0xff]  ;;  %6532 = vrcp.f32 %v6939_v0  ;;  %s6947_s11 = smov 8   ;;  %s6948_s12 = smov 16  }
   0x4   :  { %228 = vmatpush.msra.mxu1 %v159_v1  ;;  %v151_v9 = vld [vmem:[%s10029_s5 + $0x30] sm:$0xff]  ;;  %v150_v10 = vld [vmem:[%s10029_s5 + $0x28] sm:$0xff]  ;;  %v149_v11 = vld [vmem:[%s10029_s5 + $0x20] sm:$0xff]  ;;  %s6949_s13 = smov 24  }
   0x5   :  { %v148_v12 = vld [vmem:[%s10029_s5 + $0x18] sm:$0xff]  ;;  %v147_v13 = vld [vmem:[%s10029_s5 + $0x10] sm:$0xff]  ;;  %v146_v14 = vld [vmem:[%s10029_s5 + $0x8] sm:$0xff] }
   0x6   :  { %229 = vmatpush.msra.mxu1 %v158_v2  ;;  %v145_v15 = vld [vmem:[%s10029_s5] sm:$0xff]  ;;  %v176_v17 = vld [vmem:[%s10029_s5 + $0xf8] sm:$0xff]  ;;  %v175_v18 = vld [vmem:[%s10029_s5 + $0xf0] sm:$0xff] }
   0x7   :  { %v215_v16 = vld [vmem:[%s10030_s0] sm:$0xff]  ;;  %v174_v19 = vld [vmem:[%s10029_s5 + $0xe8] sm:$0xff]  ;;  %v217_v21 = vld [vmem:[%s10030_s0 + $0x10] sm:$0xff] }
   0x8   :  { %230 = vmatpush.msra.mxu1 %v157_v3  ;;  %v173_v20 = vld [vmem:[%s10029_s5 + $0xe0] sm:$0xff]  ;;  %v172_v22 = vld [vmem:[%s10029_s5 + $0xd8] sm:$0xff]  ;;  %v171_v23 = vld [vmem:[%s10029_s5 + $0xd0] sm:$0xff] }
   0x9   :  { %v170_v24 = vld [vmem:[%s10029_s5 + $0xc8] sm:$0xff]  ;;  %v169_v25 = vld [vmem:[%s10029_s5 + $0xc0] sm:$0xff]  ;;  %v168_v27 = vld [vmem:[%s10029_s5 + $0xb8] sm:$0xff]  ;;  %v6533_v1 = vpop.eup %6532 }
   0xa   :  { %231 = vmatpush.msra.mxu1 %v156_v4  ;;  %v219_v26 = vld [vmem:[%s10030_s0 + $0x20] sm:$0xff]  ;;  %v167_v28 = vld [vmem:[%s10029_s5 + $0xb0] sm:$0xff]  ;;  %v166_v29 = vld [vmem:[%s10029_s5 + $0xa8] sm:$0xff]  ;;  %v308_v2 = vmul.f32 32.0, %v6533_v1  ;;  %vm312_vm1 = vweird.f32 %v6533_v1 }
   0xb   :  { %v165_v30 = vld [vmem:[%s10029_s5 + $0xa0] sm:$0xff]  ;;  %v221_v31 = vld [vmem:[%s10030_s0 + $0x30] sm:$0xff]  ;;  %v164_v32 = vld [vmem:[%s10029_s5 + $0x98] sm:$0xff] }
   0xc   :  { %232 = vmatpush.msra.mxu1 %v155_v5  ;;  %v163_v33 = vld [vmem:[%s10029_s5 + $0x90] sm:$0xff]  ;;  %v162_v34 = vld [vmem:[%s10029_s5 + $0x88] sm:$0xff]  ;;  %v161_v35 = vld [vmem:[%s10029_s5 + $0x80] sm:$0xff]  ;;  %v309_v3 = vsub.f32 1.0, %v308_v2 }
   0xd   :  { %v216_v36 = vld [vmem:[%s10030_s0 + $0x8] sm:$0xff]  ;;  %v218_v37 = vld [vmem:[%s10030_s0 + $0x18] sm:$0xff]  ;;  %v223_v44 = vld [vmem:[%s10031_s1] sm:$0xff] }
   0xe   :  { %233 = vmatpush.msra.mxu1 %v154_v6  ;;  %v220_v38 = vld [vmem:[%s10030_s0 + $0x28] sm:$0xff]  ;;  %v222_v39 = vld [vmem:[%s10030_s0 + $0x38] sm:$0xff]  ;;  %v225_v54 = vld [vmem:[%s10031_s1 + $0x10] sm:$0xff]  ;;  %v310_v4 = vmul.f32 %v6533_v1, %v309_v3 }
   0xf   :  { %v224_v49 = vld [vmem:[%s10031_s1 + $0x8] sm:$0xff]  ;;  %v226_v59 = vld [vmem:[%s10031_s1 + $0x18] sm:$0xff] }
  0x10   :  { %234 = vmatpush.msra.mxu1 %v153_v7  ;;  %v311_v5 = vadd.f32 %v6533_v1, %v310_v4 }
  0x12   :  { %235 = vmatpush.msra.mxu1 %v152_v8  ;;  %v7138_v6 = vsel %vm312_vm1, %v6533_v1, %v311_v5 }
  0x14   :  { %236 = vmatpush.msra.mxu1 %v151_v9 }
  0x16   :  { %237 = vmatpush.msra.mxu1 %v150_v10 }
  0x18   :  { %238 = vmatpush.msra.mxu1 %v149_v11 }
  0x1a   :  { %239 = vmatpush.msra.mxu1 %v148_v12 }
  0x1c   :  { %240 = vmatpush.msra.mxu1 %v147_v13 }
  0x1e   :  { %241 = vmatpush.msra.mxu1 %v146_v14 }
  0x20   :  { %242 = vmatpush.msra.mxu1 %v145_v15 }
  0x21   :  { %243 = vmatmul.f32.vlgmr.msra.gmra.mxu1 %v215_v16 }
  0x22   :  { %256 = vmatpush.msrb.mxu1 %v176_v17 }
  0x24   :  { %257 = vmatpush.msrb.mxu1 %v175_v18 }
  0x26   :  { %258 = vmatpush.msrb.mxu1 %v174_v19 }
  0x28   :  { %259 = vmatpush.msrb.mxu1 %v173_v20 }
  0x29   :  { %246 = vmatmul.f32.gmra.mxu1 %v217_v21 }
  0x2a   :  { %260 = vmatpush.msrb.mxu1 %v172_v22 }
  0x2c   :  { %261 = vmatpush.msrb.mxu1 %v171_v23 }
  0x2e   :  { %262 = vmatpush.msrb.mxu1 %v170_v24 }
  0x30   :  { %263 = vmatpush.msrb.mxu1 %v169_v25 }
  0x31   :  { %249 = vmatmul.f32.gmra.mxu1 %v219_v26 }
  0x32   :  { %264 = vmatpush.msrb.mxu1 %v168_v27  ;;  %v7167_v27 = vld [vmem:[%s10032_s2 + $0x30] sm:$0xff] }
  0x33   :  { %424 = vmatpush.msra.mxu2 %v7167_v27 }
  0x34   :  { %265 = vmatpush.msrb.mxu1 %v167_v28  ;;  %v7173_v28 = vld [vmem:[%s10032_s2 + $0x20] sm:$0xff] }
  0x35   :  { %425 = vmatpush.msra.mxu2 %v7173_v28 }
  0x36   :  { %266 = vmatpush.msrb.mxu1 %v166_v29  ;;  %v7179_v29 = vld [vmem:[%s10032_s2 + $0x10] sm:$0xff] }
  0x37   :  { %426 = vmatpush.msra.mxu2 %v7179_v29 }
  0x38   :  { %267 = vmatpush.msrb.mxu1 %v165_v30  ;;  %v7185_v30 = vld [vmem:[%s10032_s2] sm:$0xff] }
  0x39   :  { %252 = vmatmul.f32.gmra.mxu1 %v221_v31  ;;  %427 = vmatpush.msra.mxu2 %v7185_v30 }
  0x3a   :  { %268 = vmatpush.msrb.mxu1 %v164_v32 }
  0x3c   :  { %269 = vmatpush.msrb.mxu1 %v163_v33 }
  0x3e   :  { %270 = vmatpush.msrb.mxu1 %v162_v34 }
  0x40   :  { %271 = vmatpush.msrb.mxu1 %v161_v35 }
  0x41   :  { %272 = vmatmul.f32.vlgmr.msrb.gmra.mxu1 %v216_v36 }
  0x49   :  { %275 = vmatmul.f32.gmra.mxu1 %v218_v37 }
  0x51   :  { %278 = vmatmul.f32.gmra.mxu1 %v220_v38 }
  0x59   :  { %281 = vmatmul.f32.gmra.mxu1 %v222_v39 }
  0x9e   :  { %v244_v40 = vpop.f32.mrf.mxu1 }
  0x9f   :  { %v245_v45 = vadd.f32 %v244_v40, %v223_v44 }
  0xa6   :  { %v247_v41 = vpop.f32.mrf.mxu1 }
  0xa7   :  { %v248_v50 = vadd.f32 %v247_v41, %v224_v49 }
  0xae   :  { %v250_v42 = vpop.f32.mrf.mxu1 }
  0xaf   :  { %v251_v55 = vadd.f32 %v250_v42, %v225_v54 }
  0xb6   :  { %v253_v43 = vpop.f32.mrf.mxu1 }
  0xb7   :  { %v254_v60 = vadd.f32 %v253_v43, %v226_v59 }
  0xbe   :  { %v273_v46 = vpop.f32.mrf.mxu1 }
  0xbf   :  { %v7113_v47 = vadd.f32 %v273_v46, %v245_v45  ;;  %v293_v46 = vld [vmem:[%s10033_s4] sm:$0x7f] }
  0xc1   :  { %v295_v48 = vsel %vm294_vm0, %v7113_v47, 0.0 }
  0xc2   :  { %296 = vadd.xlane.f32.xlu0 %v295_v48 }
  0xc6   :  { %v276_v51 = vpop.f32.mrf.mxu1 }
  0xc7   :  { %v7120_v52 = vadd.f32 %v276_v51, %v248_v50 }
  0xc9   :  { %v298_v53 = vsel %vm294_vm0, %v7120_v52, 0.0 }
  0xca   :  { %299 = vadd.xlane.f32.xlu0 %v298_v53  ;;  %v390_v53 = vperm.slane %v293_v46, 0 }
  0xce   :  { %v279_v56 = vpop.f32.mrf.mxu1 }
  0xcf   :  { %v7127_v57 = vadd.f32 %v279_v56, %v251_v55 }
  0xd1   :  { %v301_v58 = vsel %vm294_vm0, %v7127_v57, 0.0 }
  0xd2   :  { %302 = vadd.xlane.f32.xlu1 %v301_v58  ;;  %v395_v58 = vperm.slane %v293_v46, 1 }
  0xd6   :  { %v282_v61 = vpop.f32.mrf.mxu1 }
  0xd7   :  { %v7134_v62 = vadd.f32 %v282_v61, %v254_v60 }
  0xd9   :  { %v304_v63 = vsel %vm294_vm0, %v7134_v62, 0.0 }
  0xda   :  { %305 = vadd.xlane.f32.xlu1 %v304_v63 }
 0x135   :  { %v297_v7 = vpop.xlane.xlu0 %296 }
 0x136   :  { %v314_v8 = vmul.f32 %v7138_v6, %v297_v7 }
 0x138   :  { %v318_v9 = vsub.f32 %v7113_v47, %v314_v8 }
 0x13a   :  { %v322_v10 = vmul.f32 %v318_v9, %v318_v9 }
 0x13c   :  { %v326_v11 = vsel %vm294_vm0, %v322_v10, 0.0 }
 0x13d   :  { %327 = vadd.xlane.f32.xlu2 %v326_v11  ;;  %v300_v12 = vpop.xlane.xlu0 %299 }
 0x13e   :  { %v315_v13 = vmul.f32 %v7138_v6, %v300_v12 }
 0x140   :  { %v7145_v14 = vsub.f32 %v7120_v52, %v315_v13 }
 0x142   :  { %v323_v15 = vmul.f32 %v7145_v14, %v7145_v14 }
 0x144   :  { %v329_v16 = vsel %vm294_vm0, %v323_v15, 0.0 }
 0x145   :  { %v303_v17 = vpop.xlane.xlu1 %302  ;;  %330 = vadd.xlane.f32.xlu2 %v329_v16 }
 0x146   :  { %v316_v18 = vmul.f32 %v7138_v6, %v303_v17 }
 0x148   :  { %v7152_v19 = vsub.f32 %v7127_v57, %v316_v18 }
 0x14a   :  { %v324_v20 = vmul.f32 %v7152_v19, %v7152_v19 }
 0x14c   :  { %v332_v21 = vsel %vm294_vm0, %v324_v20, 0.0 }
 0x14d   :  { %v306_v22 = vpop.xlane.xlu1 %305  ;;  %333 = vadd.xlane.f32.xlu0 %v332_v21 }
 0x14e   :  { %v317_v23 = vmul.f32 %v7138_v6, %v306_v22 }
 0x150   :  { %v7159_v24 = vsub.f32 %v7134_v62, %v317_v23 }
 0x152   :  { %v325_v25 = vmul.f32 %v7159_v24, %v7159_v24 }
 0x154   :  { %v335_v26 = vsel %vm294_vm0, %v325_v25, 0.0 }
 0x155   :  { %336 = vadd.xlane.f32.xlu1 %v335_v26 }
 0x1b0   :  { %v328_v31 = vpop.xlane.xlu2 %327 }
 0x1b1   :  { %v338_v32 = vmul.f32 %v328_v31, %v7138_v6 }
 0x1b3   :  { %v342_v33 = vadd.f32 1e-05, %v338_v32 }
 0x1b5   :  { %6534 = vrsqrt.f32 %v342_v33  ;;  %vm352_vm3 = vweird.f32 %v342_v33 }
 0x1b8   :  { %v331_v35 = vpop.xlane.xlu2 %330 }
 0x1b9   :  { %v339_v36 = vmul.f32 %v331_v35, %v7138_v6 }
 0x1bb   :  { %v6535_v37 = vpop.eup %6534  ;;  %v343_v38 = vadd.f32 1e-05, %v339_v36 }
 0x1bc   :  { %v347_v39 = vmul.f32 %v6535_v37, %v342_v33  ;;  %vm353_vm2 = vweird.f32 %v6535_v37 }
 0x1bd   :  { %6536 = vrsqrt.f32 %v343_v38  ;;  %vm354_vm4 = vmor %vm352_vm3, %vm353_vm2  ;;  %vm362_vm6 = vweird.f32 %v343_v38 }
 0x1be   :  { %v348_v41 = vmul.f32 %v6535_v37, %v347_v39 }
 0x1c0   :  { %v349_v42 = vmul.f32 0.5, %v348_v41  ;;  %v334_v43 = vpop.xlane.xlu0 %333 }
 0x1c1   :  { %v340_v44 = vmul.f32 %v334_v43, %v7138_v6 }
 0x1c2   :  { %v350_v45 = vsub.f32 1.5, %v349_v42 }
 0x1c3   :  { %v6537_v48 = vpop.eup %6536  ;;  %v344_v49 = vadd.f32 1e-05, %v340_v44 }
 0x1c4   :  { %v351_v50 = vmul.f32 %v6535_v37, %v350_v45  ;;  %v357_v51 = vmul.f32 %v6537_v48, %v343_v38  ;;  %vm363_vm5 = vweird.f32 %v6537_v48 }
 0x1c5   :  { %6538 = vrsqrt.f32 %v344_v49  ;;  %vm364_vm7 = vmor %vm362_vm6, %vm363_vm5  ;;  %vm372_vm9 = vweird.f32 %v344_v49 }
 0x1c6   :  { %v358_v54 = vmul.f32 %v6537_v48, %v357_v51  ;;  %v355_v55 = vsel %vm354_vm4, %v6535_v37, %v351_v50 }
 0x1c7   :  { %v386_v56 = vmul.f32 %v355_v55, %v318_v9 }
 0x1c8   :  { %v359_v59 = vmul.f32 0.5, %v358_v54  ;;  %v337_v60 = vpop.xlane.xlu1 %336 }
 0x1c9   :  { %v341_v61 = vmul.f32 %v337_v60, %v7138_v6  ;;  %v391_v63 = vmul.f32 %v390_v53, %v386_v56 }
 0x1ca   :  { %v360_v0 = vsub.f32 1.5, %v359_v59 }
 0x1cb   :  { %v6539_v1 = vpop.eup %6538  ;;  %v345_v2 = vadd.f32 1e-05, %v341_v61  ;;  %v396_v3 = vadd.f32 %v395_v58, %v391_v63 }
 0x1cc   :  { %v361_v4 = vmul.f32 %v6537_v48, %v360_v0  ;;  %v367_v5 = vmul.f32 %v6539_v1, %v344_v49  ;;  %vm373_vm8 = vweird.f32 %v6539_v1 }
 0x1cd   :  { %6540 = vrsqrt.f32 %v345_v2  ;;  %6010 = vmatmul.msk.f32.vlgmr.msra.gmra.mxu2 %vm294_vm0, %v396_v3  ;;  %vm374_vm10 = vmor %vm372_vm9, %vm373_vm8  ;;  %vm382_vm12 = vweird.f32 %v345_v2 }
 0x1ce   :  { %v368_v7 = vmul.f32 %v6539_v1, %v367_v5  ;;  %v365_v8 = vsel %vm364_vm7, %v6537_v48, %v361_v4 }
 0x1cf   :  { %v387_v9 = vmul.f32 %v365_v8, %v7145_v14 }
 0x1d0   :  { %v369_v10 = vmul.f32 0.5, %v368_v7 }
 0x1d1   :  { %v392_v11 = vmul.f32 %v390_v53, %v387_v9 }
 0x1d2   :  { %v370_v12 = vsub.f32 1.5, %v369_v10 }
 0x1d3   :  { %v6541_v13 = vpop.eup %6540  ;;  %v397_v15 = vadd.f32 %v395_v58, %v392_v11 }
 0x1d4   :  { %v371_v16 = vmul.f32 %v6539_v1, %v370_v12  ;;  %v377_v17 = vmul.f32 %v6541_v13, %v345_v2  ;;  %vm383_vm11 = vweird.f32 %v6541_v13 }
 0x1d5   :  { %6011 = vmatmul.msk.f32.gmra.mxu2 %vm294_vm0, %v397_v15  ;;  %vm384_vm13 = vmor %vm382_vm12, %vm383_vm11 }
 0x1d6   :  { %v378_v18 = vmul.f32 %v6541_v13, %v377_v17  ;;  %v375_v20 = vsel %vm374_vm10, %v6539_v1, %v371_v16 }
 0x1d7   :  { %v388_v21 = vmul.f32 %v375_v20, %v7152_v19 }
 0x1d8   :  { %v379_v22 = vmul.f32 0.5, %v378_v18 }
 0x1d9   :  { %v393_v23 = vmul.f32 %v390_v53, %v388_v21 }
 0x1da   :  { %v380_v25 = vsub.f32 1.5, %v379_v22 }
 0x1db   :  { %v398_v14 = vadd.f32 %v395_v58, %v393_v23 }
 0x1dc   :  { %v381_v26 = vmul.f32 %v6541_v13, %v380_v25 }
 0x1dd   :  { %6012 = vmatmul.msk.f32.gmra.mxu2 %vm294_vm0, %v398_v14 }
 0x1de   :  { %v385_v31 = vsel %vm384_vm13, %v6541_v13, %v381_v26 }
 0x1df   :  { %v389_v32 = vmul.f32 %v385_v31, %v7159_v24 }
 0x1e1   :  { %v394_v33 = vmul.f32 %v390_v53, %v389_v32 }
 0x1e3   :  { %v399_v35 = vadd.f32 %v395_v58, %v394_v33 }
 0x1e5   :  { %6013 = vmatmul.msk.f32.gmra.mxu2 %vm294_vm0, %v399_v35 }
 0x250   :  { %v7206_v36 = vpop.f32.mrf.mxu2 }
 0x251   :  { %v481_v20 = vmul.f32 0.35355338, %v7206_v36 }
 0x258   :  { %v7208_v19 = vpop.f32.mrf.mxu2 }
 0x259   :  { %471 = vrot.lane.b32.xlu1 %v7208_v19, %s6940_s28  ;;  %v482_v25 = vmul.f32 0.35355338, %v7208_v19 }
 0x260   :  { %v7212_v37 = vpop.f32.mrf.mxu2 }
 0x261   :  { %459 = vrot.lane.b32.xlu1 %v7208_v19, %s6941_s29  ;;  %473 = vrot.lane.b32.xlu0 %v7212_v37, %s6940_s28  ;;  %v483_v14 = vmul.f32 0.35355338, %v7212_v37 }
 0x268   :  { %v7218_v24 = vpop.f32.mrf.mxu2 }
 0x269   :  { %449 = vrot.lane.b32.xlu1 %v7212_v37, %s6942_s30  ;;  %463 = vrot.lane.b32.xlu0 %v7218_v24, %s6941_s29  ;;  %v484_v26 = vmul.f32 0.35355338, %v7218_v24 }
 0x26a   :  { %475 = vrot.lane.b32.xlu2 %v7218_v24, %s6940_s28 }
 0x271   :  { %457 = vrot.lane.b32.xlu0 %v7206_v36, %s6941_s29 }
 0x272   :  { %469 = vrot.lane.b32.xlu2 %v7206_v36, %s6940_s28 }
 0x27a   :  { %461 = vrot.lane.b32.xlu2 %v7212_v37, %s6941_s29 }
 0x282   :  { %451 = vrot.lane.b32.xlu2 %v7218_v24, %s6942_s30 }
 0x28a   :  { %447 = vrot.lane.b32.xlu2 %v7208_v19, %s6942_s30 }
 0x2c4   :  { %v7236_v38 = vpop.permute.xlu2 %475 }
 0x2c5   :  { %527 = vrot.lane.b32.xlu0 %v7236_v38, %s6943_s8 }
 0x2cb   :  { %v7240_v39 = vpop.permute.xlu1 %471 }
 0x2cc   :  { %v7242_v41 = vpop.permute.xlu2 %469  ;;  %523 = vrot.lane.b32.xlu2 %v7240_v39, %s6943_s8 }
 0x2cd   :  { %445 = vrot.lane.b32.xlu0 %v7206_v36, %s6942_s30  ;;  %v6332_v63 = vpack.i.bf16 %v7242_v41, %v7240_v39 }
 0x2d3   :  { %v7248_v42 = vpop.permute.xlu0 %473  ;;  %v7266_v46 = vpop.permute.xlu1 %459 }
 0x2d4   :  { %v7250_v43 = vpop.permute.xlu2 %461  ;;  %525 = vrot.lane.b32.xlu1 %v7248_v42, %s6943_s8  ;;  %v6337_v51 = vpack.i.bf16 %v7248_v42, %v7236_v38 }
 0x2d5   :  { %517 = vrot.lane.b32.xlu2 %v7250_v43, %s6943_s8 }
 0x2db   :  { %v7256_v44 = vpop.permute.xlu0 %463  ;;  %v7274_v49 = vpop.permute.xlu1 %449 }
 0x2dc   :  { %v7258_v45 = vpop.permute.xlu2 %451  ;;  %519 = vrot.lane.b32.xlu0 %v7256_v44, %s6943_s8  ;;  %521 = vrot.lane.b32.xlu1 %v7242_v41, %s6943_s8  ;;  %v6342_v53 = vpack.i.bf16 %v7250_v43, %v7256_v44  ;;  %v487_v33 = vmul.f32 0.35355338, %v7274_v49 }
 0x2dd   :  { %511 = vrot.lane.b32.xlu2 %v7258_v45, %s6943_s8  ;;  %v6352_v54 = vpack.i.bf16 %v7274_v49, %v7258_v45  ;;  %v488_v35 = vmul.f32 0.35355338, %v7258_v45  ;;  %v493_v45 = vmul.f32 0.35355338, %v7242_v41 }
 0x2e3   :  { %v7268_v48 = vpop.permute.xlu0 %457 }
 0x2e4   :  { %513 = vrot.lane.b32.xlu0 %v7268_v48, %s6943_s8  ;;  %515 = vrot.lane.b32.xlu1 %v7266_v46, %s6943_s8  ;;  %v7276_v50 = vpop.permute.xlu2 %447 }
 0x2e5   :  { %v486_v32 = vmul.f32 0.35355338, %v7276_v50 }
 0x2ec   :  { %509 = vrot.lane.b32.xlu1 %v7274_v49, %s6943_s8  ;;  %507 = vrot.lane.b32.xlu0 %v7276_v50, %s6943_s8  ;;  %v492_v49 = vmul.f32 0.35355338, %v7256_v44 }
 0x2f4   :  { %503 = vrot.lane.b32.xlu1 %v7218_v24, %s6943_s8  ;;  %501 = vrot.lane.b32.xlu0 %v7212_v37, %s6943_s8 }
 0x2fc   :  { %497 = vrot.lane.b32.xlu1 %v7206_v36, %s6943_s8  ;;  %6338 = vrot.lane.b32.xlu0 %v6337_v51, %s6944_s9  ;;  %v489_v51 = vmul.f32 0.35355338, %v7268_v48 }
 0x304   :  { %6343 = vrot.lane.b32.xlu1 %v6342_v53, %s6944_s9  ;;  %v490_v53 = vmul.f32 0.35355338, %v7266_v46 }
 0x30c   :  { %6353 = vrot.lane.b32.xlu1 %v6352_v54, %s6944_s9  ;;  %v491_v54 = vmul.f32 0.35355338, %v7250_v43  ;;  %v495_v43 = vmul.f32 0.35355338, %v7248_v42 }
 0x326   :  { %v524_v59 = vpop.permute.xlu2 %523 }
 0x32f   :  { %v518_v0 = vpop.permute.xlu2 %517 }
 0x337   :  { %v528_v55 = vpop.permute.xlu0 %527  ;;  %v512_v4 = vpop.permute.xlu2 %511 }
 0x338   :  { %6014 = vmatpush.xpose.msk.msra.mxu3 %vm529_vm14, %v528_v55  ;;  %v494_v55 = vmul.f32 0.35355338, %v7240_v39 }
 0x33f   :  { %v7298_v56 = vpop.permute.xlu0 %445 }
 0x340   :  { %505 = vrot.lane.b32.xlu2 %v7298_v56, %s6943_s8  ;;  %v485_v31 = vmul.f32 0.35355338, %v7298_v56 }
 0x346   :  { %v526_v58 = vpop.permute.xlu1 %525 }
 0x347   :  { %6015 = vmatpush.xpose.msk.msra.mxu3 %vm529_vm14, %v526_v58  ;;  %v26_v58 = vlaneseq }
 0x348   :  { %499 = vrot.lane.b32.xlu2 %v7208_v19, %s6943_s8 }
 0x34b   :  { %6016 = vmatpush.xpose.msk.msra.mxu3 %vm529_vm14, %v524_v59  ;;  %v7350_v59 = vshrl.u32 %v26_v58, 7 }
 0x34d   :  { %v28_v41 = vadd.s32 8, %v7350_v59 }
 0x34e   :  { %v520_v60 = vpop.permute.xlu0 %519  ;;  %v522_v61 = vpop.permute.xlu1 %521 }
 0x34f   :  { %6017 = vmatpush.xpose.msk.msra.mxu3 %vm529_vm14, %v522_v61  ;;  %v43_v61 = vcvt.s32.f32 %v7350_v59 }
 0x350   :  { %6333 = vrot.lane.b32.xlu2 %v6332_v63, %s6944_s9 }
 0x351   :  { %v62_v44 = vadd.f32 0.5, %v43_v61 }
 0x353   :  { %6018 = vmatpush.xpose.msk.msra.mxu3 %vm529_vm14, %v520_v60  ;;  %v60_v60 = vand.u32 127, %v26_v58  ;;  %v78_v39 = vmul.f32 0.0625, %v62_v44 }
 0x355   :  { %v61_v63 = vcvt.s32.f32 %v60_v60 }
 0x356   :  { %v514_v1 = vpop.permute.xlu0 %513  ;;  %v516_v2 = vpop.permute.xlu1 %515 }
 0x357   :  { %6019 = vmatpush.xpose.msk.msra.mxu3 %vm529_vm14, %v518_v0  ;;  %v110_v0 = vadd.f32 0.5, %v61_v63 }
 0x35b   :  { %6020 = vmatpush.xpose.msk.msra.mxu3 %vm529_vm14, %v516_v2  ;;  %v111_v2 = vmul.f32 0.0625, %v110_v0  ;;  %v31_v0 = vadd.s32 32, %v7350_v59 }
 0x35e   :  { %v508_v3 = vpop.permute.xlu0 %507  ;;  %v510_v5 = vpop.permute.xlu1 %509 }
 0x35f   :  { %6021 = vmatpush.xpose.msk.msra.mxu3 %vm529_vm14, %v514_v1  ;;  %v496_v1 = vmul.f32 0.35355338, %v7236_v38 }
 0x363   :  { %6022 = vmatpush.xpose.msk.msra.mxu3 %vm529_vm14, %v512_v4  ;;  %v94_v4 = vfloor.f32 %v78_v39  ;;  %v47_v39 = vcvt.s32.f32 %v31_v0 }
 0x366   :  { %v502_v7 = vpop.permute.xlu0 %501  ;;  %v504_v11 = vpop.permute.xlu1 %503 }
 0x367   :  { %6023 = vmatpush.xpose.msk.msra.mxu3 %vm529_vm14, %v510_v5  ;;  %v7358_v5 = vfloor.f32 %v111_v2 }
 0x369   :  { %vm113_vm15 = vcmp.eq.f32.partialorder %v94_v4, %v7358_v5  ;;  %v34_v4 = vadd.s32 56, %v7350_v59 }
 0x36b   :  { %6024 = vmatpush.xpose.msk.msra.mxu3 %vm529_vm14, %v508_v3  ;;  %v44_v3 = vcvt.s32.f32 %v28_v41 }
 0x36d   :  { %v63_v42 = vadd.f32 0.5, %v44_v3  ;;  %v66_v3 = vadd.f32 0.5, %v47_v39 }
 0x36e   :  { %v6339_v8 = vpop.permute.xlu0 %6338  ;;  %v498_v13 = vpop.permute.xlu1 %497 }
 0x36f   :  { %v6340_v9 = vunpack.i.l.bf16 %v6339_v8  ;;  %v6341_v10 = vunpack.i.h.bf16 %v6339_v8  ;;  %v79_v8 = vmul.f32 0.0625, %v63_v42 }
 0x371   :  { %1075 = vmatpush.msrb.mxu2 %v6340_v9  ;;  %v95_v38 = vfloor.f32 %v79_v8  ;;  %v50_v8 = vcvt.s32.f32 %v34_v4 }
 0x373   :  { %1076 = vmatpush.msrb.mxu2 %v6341_v10  ;;  %v6945_v10 = vmov -1e+30   ;;  %vm114_vm1 = vcmp.eq.f32.partialorder %v95_v38, %v7358_v5 }
 0x376   :  { %v6344_v18 = vpop.permute.xlu1 %6343 }
 0x377   :  { %v6345_v22 = vunpack.i.l.bf16 %v6344_v18  ;;  %v6346_v23 = vunpack.i.h.bf16 %v6344_v18 }
 0x39a   :  { %v506_v12 = vpop.permute.xlu2 %505 }
 0x39b   :  { %6025 = vmatpush.xpose.msk.msra.mxu3 %vm529_vm14, %v506_v12 }
 0x39f   :  { %6026 = vmatpush.xpose.msk.msra.mxu3 %vm529_vm14, %v504_v11  ;;  %v7363_v11 = vsel %vm113_vm15, 0.0, %v6945_v10 }
 0x3a2   :  { %v500_v15 = vpop.permute.xlu2 %499 }
 0x3a3   :  { %6027 = vmatpush.xpose.msk.msra.mxu3 %vm529_vm14, %v502_v7  ;;  %v29_v7 = vadd.s32 16, %v7350_v59 }
 0x3a5   :  { %v45_v9 = vcvt.s32.f32 %v29_v7  ;;  %v82_v7 = vmul.f32 0.0625, %v66_v3 }
 0x3a7   :  { %6028 = vmatpush.xpose.msk.msra.mxu3 %vm529_vm14, %v500_v15  ;;  %v64_v12 = vadd.f32 0.5, %v45_v9  ;;  %v98_v38 = vfloor.f32 %v82_v7 }
 0x3a9   :  { %vm117_vm6 = vcmp.eq.f32.partialorder %v98_v38, %v7358_v5 }
 0x3aa   :  { %v6334_v16 = vpop.permute.xlu2 %6333 }
 0x3ab   :  { %6029 = vmatpush.xpose.msk.msra.mxu3 %vm529_vm14, %v498_v13  ;;  %v6335_v17 = vunpack.i.l.bf16 %v6334_v16  ;;  %v6336_v21 = vunpack.i.h.bf16 %v6334_v16  ;;  %v80_v16 = vmul.f32 0.0625, %v64_v12  ;;  %v69_v12 = vadd.f32 0.5, %v50_v8 }
 0x3ad   :  { %1077 = vmatpush.msrb.mxu2 %v6335_v17  ;;  %v7371_v17 = vsel %vm114_vm1, 0.0, %v6945_v10  ;;  %v96_v18 = vfloor.f32 %v80_v16 }
 0x3ae   :  { %6030 = vmatmul.msk.f32.vlgmr.msra.gmra.mxu3 %vm529_vm14, %v481_v20 }
 0x3af   :  { %1078 = vmatpush.msrb.mxu2 %v6336_v21  ;;  %vm115_vm2 = vcmp.eq.f32.partialorder %v96_v18, %v7358_v5  ;;  %v85_v18 = vmul.f32 0.0625, %v69_v12 }
 0x3b1   :  { %1079 = vmatpush.msrb.mxu2 %v6345_v22  ;;  %v7379_v22 = vsel %vm115_vm2, 0.0, %v6945_v10 }
 0x3b3   :  { %1080 = vmatpush.msrb.mxu2 %v6346_v23  ;;  %v32_v23 = vadd.s32 40, %v7350_v59 }
 0x3b6   :  { %6031 = vmatmul.msk.f32.gmra.mxu3 %vm529_vm14, %v482_v25 }
 0x3be   :  { %6032 = vmatmul.msk.f32.gmra.mxu3 %vm529_vm14, %v483_v14 }
 0x3c6   :  { %6033 = vmatmul.msk.f32.gmra.mxu3 %vm529_vm14, %v484_v26  ;;  %v48_v26 = vcvt.s32.f32 %v32_v23  ;;  %v7423_v23 = vsel %vm117_vm6, 0.0, %v6945_v10 }
 0x3ce   :  { %6034 = vmatmul.msk.f32.gmra.mxu3 %vm529_vm14, %v485_v31  ;;  %v6357_v31 = vpack.i.bf16 %v7298_v56, %v7276_v50  ;;  %v30_v50 = vadd.s32 24, %v7350_v59 }
 0x3d0   :  { %v46_v63 = vcvt.s32.f32 %v30_v50 }
 0x3d6   :  { %6035 = vmatmul.msk.f32.gmra.mxu3 %vm529_vm14, %v486_v32  ;;  %v67_v32 = vadd.f32 0.5, %v48_v26 }
 0x3de   :  { %6036 = vmatmul.msk.f32.gmra.mxu3 %vm529_vm14, %v487_v33  ;;  %v33_v33 = vadd.s32 48, %v7350_v59 }
 0x3e6   :  { %6037 = vmatmul.msk.f32.gmra.mxu3 %vm529_vm14, %v488_v35 }
 0x3ee   :  { %6038 = vmatmul.msk.f32.gmra.mxu3 %vm529_vm14, %v489_v51  ;;  %v83_v51 = vmul.f32 0.0625, %v67_v32 }
 0x3f6   :  { %6039 = vmatmul.msk.f32.gmra.mxu3 %vm529_vm14, %v490_v53  ;;  %v49_v53 = vcvt.s32.f32 %v33_v33 }
 0x3fe   :  { %6040 = vmatmul.msk.f32.gmra.mxu3 %vm529_vm14, %v491_v54  ;;  %v99_v54 = vfloor.f32 %v83_v51 }
 0x400   :  { %vm118_vm3 = vcmp.eq.f32.partialorder %v99_v54, %v7358_v5 }
 0x401   :  { %v7396_v56 = vsel %vm118_vm3, 0.0, %v6945_v10 }
 0x406   :  { %6041 = vmatmul.msk.f32.gmra.mxu3 %vm529_vm14, %v492_v49  ;;  %v68_v49 = vadd.f32 0.5, %v49_v53 }
 0x408   :  { %v84_v58 = vmul.f32 0.0625, %v68_v49 }
 0x40a   :  { %v100_v60 = vfloor.f32 %v84_v58 }
 0x40c   :  { %vm119_vm4 = vcmp.eq.f32.partialorder %v100_v60, %v7358_v5 }
 0x40e   :  { %6042 = vmatmul.msk.f32.gmra.mxu3 %vm529_vm14, %v493_v45 }
 0x416   :  { %6043 = vmatmul.msk.f32.gmra.mxu3 %vm529_vm14, %v494_v55  ;;  %v6347_v55 = vpack.i.bf16 %v7268_v48, %v7266_v46  ;;  %v65_v46 = vadd.f32 0.5, %v46_v63  ;;  %v7404_v48 = vsel %vm119_vm4, 0.0, %v6945_v10 }
 0x41e   :  { %6044 = vmatmul.msk.f32.gmra.mxu3 %vm529_vm14, %v495_v43 }
 0x426   :  { %6045 = vmatmul.msk.f32.gmra.mxu3 %vm529_vm14, %v496_v1  ;;  %v81_v1 = vmul.f32 0.0625, %v65_v46 }
 0x428   :  { %v97_v2 = vfloor.f32 %v81_v1 }
 0x42a   :  { %vm116_vm5 = vcmp.eq.f32.partialorder %v97_v2, %v7358_v5  ;;  %v6354_v2 = vpop.permute.xlu1 %6353 }
 0x42b   :  { %v7414_v42 = vsel %vm116_vm5, 0.0, %v6945_v10 }
 0x431   :  { %v627_v13 = vpop.f32.mrf.mxu3 }
 0x432   :  { %v7366_v15 = vadd.f32 %v627_v13, %v7363_v11  ;;  %v35_v13 = vadd.s32 64, %v7350_v59 }
 0x434   :  { %675 = vmax.xlane.f32.xlu0 %v7366_v15 }
 0x439   :  { %v630_v20 = vpop.f32.mrf.mxu3 }
 0x43a   :  { %v7374_v21 = vadd.f32 %v630_v20, %v7371_v17  ;;  %v51_v20 = vcvt.s32.f32 %v35_v13 }
 0x43c   :  { %677 = vmax.xlane.f32.xlu2 %v7374_v21  ;;  %v70_v26 = vadd.f32 0.5, %v51_v20 }
 0x441   :  { %v633_v25 = vpop.f32.mrf.mxu3 }
 0x442   :  { %v7383_v14 = vadd.f32 %v633_v25, %v7379_v22  ;;  %v101_v25 = vfloor.f32 %v85_v18 }
 0x444   :  { %679 = vmax.xlane.f32.xlu1 %v7383_v14  ;;  %vm120_vm7 = vcmp.eq.f32.partialorder %v101_v25, %v7358_v5 }
 0x445   :  { %v7432_v53 = vsel %vm120_vm7, 0.0, %v6945_v10 }
 0x448   :  { %6358 = vrot.lane.b32.xlu0 %v6357_v31, %s6944_s9  ;;  %v37_v31 = vadd.s32 80, %v7350_v59 }
 0x449   :  { %v636_v35 = vpop.f32.mrf.mxu3 }
 0x44a   :  { %v7417_v9 = vadd.f32 %v636_v35, %v7414_v42  ;;  %v86_v35 = vmul.f32 0.0625, %v70_v26  ;;  %v53_v51 = vcvt.s32.f32 %v37_v31  ;;  %v6356_v26 = vunpack.i.h.bf16 %v6354_v2 }
 0x44c   :  { %v102_v54 = vfloor.f32 %v86_v35  ;;  %v72_v49 = vadd.f32 0.5, %v53_v51  ;;  %v6362_v35 = vpack.i.bf16 %v7212_v37, %v7218_v24  ;;  %v6367_v51 = vpack.i.bf16 %v7206_v36, %v7208_v19 }
 0x44e   :  { %vm121_vm8 = vcmp.eq.f32.partialorder %v102_v54, %v7358_v5  ;;  %v36_v54 = vadd.s32 72, %v7350_v59 }
 0x44f   :  { %v7442_v50 = vsel %vm121_vm8, 0.0, %v6945_v10 }
 0x451   :  { %v639_v45 = vpop.f32.mrf.mxu3 }
 0x452   :  { %v7427_v32 = vadd.f32 %v639_v45, %v7423_v23  ;;  %v88_v45 = vmul.f32 0.0625, %v72_v49  ;;  %v52_v49 = vcvt.s32.f32 %v36_v54 }
 0x454   :  { %6348 = vrot.lane.b32.xlu2 %v6347_v55, %s6944_s9  ;;  %v104_v60 = vfloor.f32 %v88_v45 }
 0x456   :  { %vm123_vm9 = vcmp.eq.f32.partialorder %v104_v60, %v7358_v5  ;;  %v71_v60 = vadd.f32 0.5, %v52_v49 }
 0x457   :  { %v7450_v46 = vsel %vm123_vm9, 0.0, %v6945_v10 }
 0x459   :  { %v642_v43 = vpop.f32.mrf.mxu3 }
 0x45a   :  { %v7399_v61 = vadd.f32 %v642_v43, %v7396_v56 }
 0x45c   :  { %685 = vmax.xlane.f32.xlu1 %v7399_v61 }
 0x461   :  { %v645_v44 = vpop.f32.mrf.mxu3 }
 0x462   :  { %v7408_v41 = vadd.f32 %v645_v44, %v7404_v48 }
 0x464   :  { %687 = vmax.xlane.f32.xlu1 %v7408_v41 }
 0x469   :  { %v648_v16 = vpop.f32.mrf.mxu3 }
 0x46a   :  { %v7435_v55 = vadd.f32 %v648_v16, %v7432_v53 }
 0x471   :  { %v651_v33 = vpop.f32.mrf.mxu3 }
 0x472   :  { %681 = vmax.xlane.f32.xlu0 %v7417_v9  ;;  %v7445_v43 = vadd.f32 %v651_v33, %v7442_v50 }
 0x479   :  { %v7439_v58 = vpop.f32.mrf.mxu3 }
 0x47d   :  { %683 = vmax.xlane.f32.xlu2 %v7427_v32 }
 0x481   :  { %v657_v63 = vpop.f32.mrf.mxu3 }
 0x482   :  { %v7453_v44 = vadd.f32 %v657_v63, %v7450_v46  ;;  %v87_v63 = vmul.f32 0.0625, %v71_v60 }
 0x485   :  { %689 = vmax.xlane.f32.xlu2 %v7435_v55 }
 0x48d   :  { %691 = vmax.xlane.f32.xlu2 %v7445_v43 }
 0x495   :  { %695 = vmax.xlane.f32.xlu2 %v7453_v44 }
 0x4a7   :  { %v676_v0 = vpop.xlane.xlu0 %675 }
 0x4a8   :  { %v707_v1 = vsub.f32 %v7366_v15, %v676_v0  ;;  %v38_v0 = vadd.s32 88, %v7350_v59 }
 0x4aa   :  { %v723_v39 = vmul.f32 1.442695, %v707_v1  ;;  %v54_v37 = vcvt.s32.f32 %v38_v0 }
 0x4ac   :  { %6542 = vpow2.f32 %v723_v39  ;;  %v103_v39 = vfloor.f32 %v87_v63  ;;  %v73_v19 = vadd.f32 0.5, %v54_v37 }
 0x4ae   :  { %vm122_vm10 = vcmp.eq.f32.partialorder %v103_v39, %v7358_v5  ;;  %v41_v39 = vadd.s32 112, %v7350_v59 }
 0x4af   :  { %v678_v3 = vpop.xlane.xlu2 %677 }
 0x4b0   :  { %v708_v4 = vsub.f32 %v7374_v21, %v678_v3  ;;  %v6355_v21 = vunpack.i.l.bf16 %v6354_v2 }
 0x4b2   :  { %v7458_v7 = vpop.eup %6542  ;;  %v725_v8 = vmul.f32 1.442695, %v708_v4  ;;  %v7480_v4 = vsel %vm122_vm10, 0.0, %v6945_v10 }
 0x4b3   :  { %755 = vadd.xlane.f32.xlu0 %v7458_v7 }
 0x4b4   :  { %6544 = vpow2.f32 %v725_v8 }
 0x4b7   :  { %v680_v38 = vpop.xlane.xlu1 %679  ;;  %v6349_v12 = vpop.permute.xlu2 %6348 }
 0x4b8   :  { %v709_v13 = vsub.f32 %v7383_v14, %v680_v38  ;;  %v6350_v16 = vunpack.i.l.bf16 %v6349_v12  ;;  %v6351_v20 = vunpack.i.h.bf16 %v6349_v12  ;;  %v89_v38 = vmul.f32 0.0625, %v73_v19 }
 0x4b9   :  { %v7484_v12 = vadd.f32 %v7439_v58, %v7480_v4  ;;  %v660_v58 = vpop.f32.mrf.mxu3 }
 0x4ba   :  { %v7462_v18 = vpop.eup %6544  ;;  %v727_v15 = vmul.f32 1.442695, %v709_v13  ;;  %1081 = vmatpush.msrb.mxu2 %v6350_v16  ;;  %v6359_v25 = vpop.permute.xlu0 %6358  ;;  %v39_v16 = vadd.s32 96, %v7350_v59 }
 0x4bb   :  { %757 = vadd.xlane.f32.xlu1 %v7462_v18  ;;  %v6360_v31 = vunpack.i.l.bf16 %v6359_v25  ;;  %v6361_v14 = vunpack.i.h.bf16 %v6359_v25 }
 0x4bc   :  { %6546 = vpow2.f32 %v727_v15  ;;  %1082 = vmatpush.msrb.mxu2 %v6351_v20  ;;  %v55_v25 = vcvt.s32.f32 %v39_v16 }
 0x4be   :  { %1083 = vmatpush.msrb.mxu2 %v6355_v21 }
 0x4c0   :  { %1084 = vmatpush.msrb.mxu2 %v6356_v26 }
 0x4c2   :  { %v7465_v33 = vpop.eup %6546  ;;  %1085 = vmatpush.msrb.mxu2 %v6360_v31 }
 0x4c3   :  { %759 = vadd.xlane.f32.xlu2 %v7465_v33 }
 0x4c4   :  { %1086 = vmatpush.msrb.mxu2 %v6361_v14 }
 0x4c7   :  { %6363 = vrot.lane.b32.xlu0 %v6362_v35, %s6944_s9  ;;  %v74_v35 = vadd.f32 0.5, %v55_v25 }
 0x4c9   :  { %v90_v60 = vmul.f32 0.0625, %v74_v35 }
 0x4cb   :  { %v106_v0 = vfloor.f32 %v90_v60 }
 0x4cd   :  { %vm125_vm12 = vcmp.eq.f32.partialorder %v106_v0, %v7358_v5 }
 0x4cf   :  { %v686_v45 = vpop.xlane.xlu1 %685 }
 0x4d0   :  { %v712_v21 = vsub.f32 %v7399_v61, %v686_v45 }
 0x4d2   :  { %v733_v31 = vmul.f32 1.442695, %v712_v21 }
 0x4d4   :  { %6368 = vrot.lane.b32.xlu1 %v6367_v51, %s6944_s9 }
 0x4d7   :  { %v688_v24 = vpop.xlane.xlu1 %687 }
 0x4d8   :  { %v713_v36 = vsub.f32 %v7408_v41, %v688_v24  ;;  %v105_v41 = vfloor.f32 %v89_v38  ;;  %v7519_v38 = vsel %vm125_vm12, 0.0, %v6945_v10 }
 0x4da   :  { %v735_v8 = vmul.f32 1.442695, %v713_v36  ;;  %vm124_vm11 = vcmp.eq.f32.partialorder %v105_v41, %v7358_v5 }
 0x4db   :  { %v7500_v54 = vsel %vm124_vm11, 0.0, %v6945_v10 }
 0x4dc   :  { %v7506_v45 = vadd.f32 %v660_v58, %v7500_v54 }
 0x4e5   :  { %v682_v1 = vpop.xlane.xlu0 %681 }
 0x4e6   :  { %v710_v2 = vsub.f32 %v7417_v9, %v682_v1 }
 0x4e8   :  { %v729_v3 = vmul.f32 1.442695, %v710_v2  ;;  %v663_v2 = vpop.f32.mrf.mxu3 }
 0x4ea   :  { %6548 = vpow2.f32 %v729_v3 }
 0x4eb   :  { %6550 = vpow2.f32 %v735_v8  ;;  %v57_v8 = vcvt.s32.f32 %v41_v39 }
 0x4f0   :  { %v7486_v13 = vpop.eup %6548  ;;  %v684_v9 = vpop.xlane.xlu2 %683 }
 0x4f1   :  { %v711_v15 = vsub.f32 %v7427_v32, %v684_v9  ;;  %693 = vmax.xlane.f32.xlu0 %v7484_v12  ;;  %761 = vadd.xlane.f32.xlu2 %v7486_v13  ;;  %v7494_v26 = vpop.eup %6550  ;;  %v40_v32 = vadd.s32 104, %v7350_v59  ;;  %v666_v25 = vpop.f32.mrf.mxu3 }
 0x4f3   :  { %v731_v20 = vmul.f32 1.442695, %v711_v15  ;;  %v56_v63 = vcvt.s32.f32 %v40_v32  ;;  %v42_v15 = vadd.s32 120, %v7350_v59 }
 0x4f5   :  { %6552 = vpow2.f32 %v731_v20  ;;  %v75_v1 = vadd.f32 0.5, %v56_v63  ;;  %v7524_v20 = vadd.f32 %v663_v2, %v7519_v38 }
 0x4f6   :  { %6554 = vpow2.f32 %v733_v31 }
 0x4f7   :  { %v91_v19 = vmul.f32 0.0625, %v75_v1 }
 0x4f8   :  { %v690_v14 = vpop.xlane.xlu2 %689 }
 0x4f9   :  { %v714_v51 = vsub.f32 %v7435_v55, %v690_v14  ;;  %767 = vadd.xlane.f32.xlu0 %v7494_v26  ;;  %v107_v16 = vfloor.f32 %v91_v19  ;;  %v58_v14 = vcvt.s32.f32 %v42_v15  ;;  %v669_v60 = vpop.f32.mrf.mxu3 }
 0x4fb   :  { %v7502_v61 = vpop.eup %6552  ;;  %v737_v49 = vmul.f32 1.442695, %v714_v51  ;;  %vm126_vm13 = vcmp.eq.f32.partialorder %v107_v16, %v7358_v5  ;;  %v77_v35 = vadd.f32 0.5, %v58_v14 }
 0x4fc   :  { %763 = vadd.xlane.f32.xlu2 %v7502_v61  ;;  %v7511_v24 = vpop.eup %6554  ;;  %v7532_v59 = vsel %vm126_vm13, 0.0, %v6945_v10 }
 0x4fd   :  { %6556 = vpow2.f32 %v737_v49  ;;  %v7535_v32 = vadd.f32 %v666_v25, %v7532_v59  ;;  %v93_v49 = vmul.f32 0.0625, %v77_v35 }
 0x4fe   :  { %697 = vmax.xlane.f32.xlu1 %v7506_v45 }
 0x500   :  { %v692_v55 = vpop.xlane.xlu2 %691 }
 0x501   :  { %v715_v37 = vsub.f32 %v7445_v43, %v692_v55  ;;  %v76_v43 = vadd.f32 0.5, %v57_v8  ;;  %v109_v55 = vfloor.f32 %v93_v49  ;;  %v672_v1 = vpop.f32.mrf.mxu3 }
 0x503   :  { %v7513_v3 = vpop.eup %6556  ;;  %v739_v36 = vmul.f32 1.442695, %v715_v37  ;;  %v92_v31 = vmul.f32 0.0625, %v76_v43  ;;  %vm128_vm1 = vcmp.eq.f32.partialorder %v109_v55, %v7358_v5 }
 0x504   :  { %769 = vadd.xlane.f32.xlu0 %v7513_v3  ;;  %765 = vadd.xlane.f32.xlu2 %v7511_v24  ;;  %v7551_v39 = vsel %vm128_vm1, 0.0, %v6945_v10 }
 0x505   :  { %6558 = vpow2.f32 %v739_v36  ;;  %v7554_v2 = vadd.f32 %v672_v1, %v7551_v39 }
 0x508   :  { %v696_v9 = vpop.xlane.xlu2 %695 }
 0x509   :  { %v717_v41 = vsub.f32 %v7453_v44, %v696_v9  ;;  %v108_v44 = vfloor.f32 %v92_v31 }
 0x50b   :  { %v7526_v21 = vpop.eup %6558  ;;  %v743_v58 = vmul.f32 1.442695, %v717_v41  ;;  %vm127_vm15 = vcmp.eq.f32.partialorder %v108_v44, %v7358_v5 }
 0x50c   :  { %771 = vadd.xlane.f32.xlu0 %v7526_v21  ;;  %699 = vmax.xlane.f32.xlu2 %v7524_v20  ;;  %v7543_v63 = vsel %vm127_vm15, 0.0, %v6945_v10 }
 0x50d   :  { %6560 = vpow2.f32 %v743_v58  ;;  %10039 = vst [vmem:[#allocation2_spill] sm:$0xff] %v7543_v63  ;;  %v7546_v0 = vadd.f32 %v669_v60, %v7543_v63 }
 0x513   :  { %v7537_v51 = vpop.eup %6560 }
 0x514   :  { %775 = vadd.xlane.f32.xlu0 %v7537_v51  ;;  %701 = vmax.xlane.f32.xlu2 %v7535_v32 }
 0x51c   :  { %703 = vmax.xlane.f32.xlu2 %v7546_v0 }
 0x524   :  { %705 = vmax.xlane.f32.xlu2 %v7554_v2 }
 0x526   :  { %v756_v37 = vpop.xlane.xlu0 %755 }
 0x527   :  { %6562 = vrcp.f32 %v756_v37  ;;  %v798_v44 = vand.u32 2147483648, %v756_v37  ;;  %vm792_vm3 = vweird.f32 %v756_v37  ;;  %v796_v35 = vand.u32 2147483647, %v756_v37 }
 0x529   :  { %v799_v1 = vor.u32 1.1754944e-38, %v798_v44  ;;  %vm797_vm5 = vcmp.eq.f32.partialorder %v796_v35, 8.507059e+37 }
 0x52d   :  { %v6563_v19 = vpop.eup %6562 }
 0x52e   :  { %v758_v36 = vpop.xlane.xlu1 %757  ;;  %v788_v8 = vmul.f32 %v6563_v19, %v756_v37  ;;  %vm793_vm2 = vweird.f32 %v6563_v19 }
 0x52f   :  { %6564 = vrcp.f32 %v758_v36  ;;  %vm794_vm4 = vmor %vm792_vm3, %vm793_vm2  ;;  %vm807_vm7 = vweird.f32 %v758_v36 }
 0x530   :  { %v789_v9 = vsub.f32 1.0, %v788_v8 }
 0x532   :  { %v790_v25 = vmul.f32 %v6563_v19, %v789_v9 }
 0x534   :  { %v791_v31 = vadd.f32 %v6563_v19, %v790_v25  ;;  %v811_v25 = vand.u32 2147483647, %v758_v36 }
 0x535   :  { %v6565_v43 = vpop.eup %6564 }
 0x536   :  { %v760_v16 = vpop.xlane.xlu2 %759  ;;  %v803_v41 = vmul.f32 %v6565_v43, %v758_v36  ;;  %v795_v60 = vsel %vm794_vm4, %v6563_v19, %v791_v31  ;;  %vm808_vm6 = vweird.f32 %v6565_v43  ;;  %vm812_vm9 = vcmp.eq.f32.partialorder %v811_v25, 8.507059e+37 }
 0x537   :  { %6566 = vrcp.f32 %v760_v16  ;;  %v800_v34 = vsel %vm797_vm5, %v799_v1, %v795_v60  ;;  %vm809_vm8 = vmor %vm807_vm7, %vm808_vm6  ;;  %v828_v35 = vand.u32 2147483648, %v760_v16  ;;  %vm822_vm11 = vweird.f32 %v760_v16 }
 0x538   :  { %v804_v58 = vsub.f32 1.0, %v803_v41  ;;  %v813_v41 = vand.u32 2147483648, %v758_v36 }
 0x539   :  { %v6364_v15 = vpop.permute.xlu0 %6363 }
 0x53a   :  { %v6365_v5 = vunpack.i.l.bf16 %v6364_v15  ;;  %v6366_v10 = vunpack.i.h.bf16 %v6364_v15  ;;  %v805_v55 = vmul.f32 %v6565_v43, %v804_v58  ;;  %v814_v58 = vor.u32 1.1754944e-38, %v813_v41 }
 0x53c   :  { %1087 = vmatpush.msrb.mxu2 %v6365_v5  ;;  %v806_v15 = vadd.f32 %v6565_v43, %v805_v55 }
 0x53d   :  { %v6567_v14 = vpop.eup %6566 }
 0x53e   :  { %1088 = vmatpush.msrb.mxu2 %v6366_v10  ;;  %v818_v49 = vmul.f32 %v6567_v14, %v760_v16  ;;  %v801_v10 = vmul.f32 %v7458_v7, %v800_v34  ;;  %v810_v37 = vsel %vm809_vm8, %v6565_v43, %v806_v15  ;;  %vm823_vm10 = vweird.f32 %v6567_v14 }
 0x53f   :  { %v815_v31 = vsel %vm812_vm9, %v814_v58, %v810_v37  ;;  %vm824_vm12 = vmor %vm822_vm11, %vm823_vm10  ;;  %v829_v7 = vor.u32 1.1754944e-38, %v828_v35 }
 0x540   :  { %v819_v5 = vsub.f32 1.0, %v818_v49  ;;  %v816_v49 = vmul.f32 %v7462_v18, %v815_v31 }
 0x542   :  { %v820_v19 = vmul.f32 %v6567_v14, %v819_v5 }
 0x544   :  { %v821_v44 = vadd.f32 %v6567_v14, %v820_v19 }
 0x546   :  { %v6369_v8 = vpop.permute.xlu1 %6368  ;;  %v825_v34 = vsel %vm824_vm12, %v6567_v14, %v821_v44 }
 0x547   :  { %v6370_v40 = vunpack.i.l.bf16 %v6369_v8  ;;  %v6371_v9 = vunpack.i.h.bf16 %v6369_v8 }
 0x549   :  { %1089 = vmatpush.msrb.mxu2 %v6370_v40  ;;  %v826_v40 = vand.u32 2147483647, %v760_v16 }
 0x54b   :  { %1090 = vmatpush.msrb.mxu2 %v6371_v9  ;;  %vm827_vm13 = vcmp.eq.f32.partialorder %v826_v40, 8.507059e+37 }
 0x54c   :  { %1091 = vmatmul.f32.vlgmr.msrb.gmra.mxu2 %v801_v10  ;;  %v830_v36 = vsel %vm827_vm13, %v829_v7, %v825_v34 }
 0x54d   :  { %v831_v60 = vmul.f32 %v7465_v33, %v830_v36 }
 0x554   :  { %1094 = vmatmul.f32.gmra.mxu2 %v816_v49 }
 0x55c   :  { %1097 = vmatmul.f32.gmra.mxu2 %v831_v60 }
 0x564   :  { %v762_v43 = vpop.xlane.xlu2 %761  ;;  %v694_v55 = vpop.xlane.xlu0 %693 }
 0x565   :  { %6568 = vrcp.f32 %v762_v43  ;;  %v716_v1 = vsub.f32 %v7484_v12, %v694_v55  ;;  %v843_v41 = vand.u32 2147483648, %v762_v43  ;;  %v841_v10 = vand.u32 2147483647, %v762_v43 }
 0x566   :  { %vm837_vm1 = vweird.f32 %v762_v43 }
 0x567   :  { %v741_v8 = vmul.f32 1.442695, %v716_v1  ;;  %v844_v19 = vor.u32 1.1754944e-38, %v843_v41  ;;  %vm842_vm3 = vcmp.eq.f32.partialorder %v841_v10, 8.507059e+37 }
 0x569   :  { %6570 = vpow2.f32 %v741_v8 }
 0x56b   :  { %v6569_v5 = vpop.eup %6568 }
 0x56c   :  { %v833_v18 = vmul.f32 %v6569_v5, %v762_v43  ;;  %v7563_v9 = vpop.xlane.xlu0 %767  ;;  %vm838_vm15 = vweird.f32 %v6569_v5 }
 0x56d   :  { %vm839_vm2 = vmor %vm837_vm1, %vm838_vm15  ;;  %vm882_vm13 = vweird.f32 %v7563_v9 }
 0x56e   :  { %v834_v15 = vsub.f32 1.0, %v833_v18 }
 0x56f   :  { %v7561_v16 = vpop.eup %6570  ;;  %v764_v14 = vpop.xlane.xlu2 %763 }
 0x570   :  { %6572 = vrcp.f32 %v764_v14  ;;  %773 = vadd.xlane.f32.xlu1 %v7561_v16  ;;  %v835_v33 = vmul.f32 %v6569_v5, %v834_v15  ;;  %v858_v60 = vand.u32 2147483648, %v764_v14  ;;  %v856_v1 = vand.u32 2147483647, %v764_v14 }
 0x571   :  { %v698_v25 = vpop.xlane.xlu1 %697  ;;  %6574 = vrcp.f32 %v7563_v9  ;;  %vm852_vm5 = vweird.f32 %v764_v14 }
 0x572   :  { %v718_v12 = vsub.f32 %v7506_v45, %v698_v25  ;;  %v836_v37 = vadd.f32 %v6569_v5, %v835_v33  ;;  %v859_v18 = vor.u32 1.1754944e-38, %v858_v60  ;;  %vm857_vm7 = vcmp.eq.f32.partialorder %v856_v1, 8.507059e+37 }
 0x574   :  { %v745_v58 = vmul.f32 1.442695, %v718_v12  ;;  %v840_v31 = vsel %vm839_vm2, %v6569_v5, %v836_v37 }
 0x575   :  { %v845_v44 = vsel %vm842_vm3, %v844_v19, %v840_v31 }
 0x576   :  { %v6573_v35 = vpop.eup %6572  ;;  %6576 = vpow2.f32 %v745_v58  ;;  %v846_v49 = vmul.f32 %v7486_v13, %v845_v44 }
 0x577   :  { %v848_v40 = vmul.f32 %v6573_v35, %v764_v14  ;;  %v766_v34 = vpop.xlane.xlu2 %765  ;;  %v7569_v7 = vpop.xlane.xlu0 %769  ;;  %vm853_vm4 = vweird.f32 %v6573_v35 }
 0x578   :  { %v7571_v36 = vpop.eup %6574  ;;  %6578 = vrcp.f32 %v766_v34  ;;  %1100 = vmatmul.f32.gmra.mxu2 %v846_v49  ;;  %vm854_vm6 = vmor %vm852_vm5, %vm853_vm4  ;;  %v871_v14 = vand.u32 2147483647, %v766_v34  ;;  %v873_v49 = vand.u32 2147483648, %v766_v34  ;;  %vm867_vm9 = vweird.f32 %v766_v34 }
 0x579   :  { %v849_v45 = vsub.f32 1.0, %v848_v40  ;;  %6580 = vrcp.f32 %v7569_v7  ;;  %v878_v43 = vmul.f32 %v7571_v36, %v7563_v9  ;;  %vm883_vm11 = vweird.f32 %v7571_v36 }
 0x57a   :  { %vm872_vm12 = vcmp.eq.f32.partialorder %v871_v14, 8.507059e+37  ;;  %vm884_vm15 = vmor %vm882_vm13, %vm883_vm11  ;;  %vm897_vm3 = vweird.f32 %v7569_v7 }
 0x57b   :  { %v850_v55 = vmul.f32 %v6573_v35, %v849_v45  ;;  %v879_v15 = vsub.f32 1.0, %v878_v43 }
 0x57c   :  { %v7576_v8 = vpop.eup %6576 }
 0x57d   :  { %777 = vadd.xlane.f32.xlu2 %v7576_v8  ;;  %v851_v13 = vadd.f32 %v6573_v35, %v850_v55 }
 0x57e   :  { %v6579_v5 = vpop.eup %6578 }
 0x57f   :  { %v863_v41 = vmul.f32 %v6579_v5, %v766_v34  ;;  %v700_v33 = vpop.xlane.xlu2 %699  ;;  %v7579_v10 = vpop.xlane.xlu0 %771  ;;  %v855_v25 = vsel %vm854_vm6, %v6573_v35, %v851_v13  ;;  %vm868_vm8 = vweird.f32 %v6579_v5  ;;  %v880_v35 = vmul.f32 %v7571_v36, %v879_v15 }
 0x580   :  { %v7581_v12 = vpop.eup %6580  ;;  %v719_v37 = vsub.f32 %v7524_v20, %v700_v33  ;;  %v860_v19 = vsel %vm857_vm7, %v859_v18, %v855_v25  ;;  %6582 = vrcp.f32 %v7579_v10  ;;  %vm869_vm10 = vmor %vm867_vm9, %vm868_vm8  ;;  %v874_v20 = vor.u32 1.1754944e-38, %v873_v49 }
 0x581   :  { %v864_v58 = vsub.f32 1.0, %v863_v41  ;;  %v861_v31 = vmul.f32 %v7502_v61, %v860_v19  ;;  %v893_v40 = vmul.f32 %v7581_v12, %v7569_v7  ;;  %v881_v1 = vadd.f32 %v7571_v36, %v880_v35 }
 0x582   :  { %v747_v44 = vmul.f32 1.442695, %v719_v37  ;;  %v888_v33 = vand.u32 2147483648, %v7563_v9  ;;  %v886_v34 = vand.u32 2147483647, %v7563_v9  ;;  %vm898_vm2 = vweird.f32 %v7581_v12 }
 0x583   :  { %1103 = vmatmul.f32.gmra.mxu2 %v861_v31  ;;  %v865_v45 = vmul.f32 %v6579_v5, %v864_v58  ;;  %v894_v61 = vsub.f32 1.0, %v893_v40  ;;  %v903_v49 = vand.u32 2147483648, %v7569_v7  ;;  %vm899_vm4 = vmor %vm897_vm3, %vm898_vm2  ;;  %vm912_vm7 = vweird.f32 %v7579_v10 }
 0x584   :  { %6584 = vpow2.f32 %v747_v44  ;;  %vm887_vm1 = vcmp.eq.f32.partialorder %v886_v34, 8.507059e+37 }
 0x585   :  { %v866_v60 = vadd.f32 %v6579_v5, %v865_v45  ;;  %v895_v19 = vmul.f32 %v7581_v12, %v894_v61 }
 0x586   :  { %v6583_v13 = vpop.eup %6582 }
 0x587   :  { %v702_v43 = vpop.xlane.xlu2 %701  ;;  %v870_v55 = vsel %vm869_vm10, %v6579_v5, %v866_v60  ;;  %v908_v5 = vmul.f32 %v6583_v13, %v7579_v10  ;;  %v896_v44 = vadd.f32 %v7581_v12, %v895_v19  ;;  %vm913_vm6 = vweird.f32 %v6583_v13 }
 0x588   :  { %v720_v18 = vsub.f32 %v7535_v32, %v702_v43  ;;  %v875_v41 = vsel %vm872_vm12, %v874_v20, %v870_v55  ;;  %v885_v32 = vsel %vm884_vm15, %v7571_v36, %v881_v1  ;;  %v901_v36 = vand.u32 2147483647, %v7569_v7  ;;  %vm914_vm8 = vmor %vm912_vm7, %vm913_vm6 }
 0x589   :  { %v876_v15 = vmul.f32 %v7511_v24, %v875_v41  ;;  %v889_v24 = vor.u32 1.1754944e-38, %v888_v33  ;;  %v909_v9 = vsub.f32 1.0, %v908_v5  ;;  %v900_v60 = vsel %vm899_vm4, %v7581_v12, %v896_v44 }
 0x58a   :  { %v7596_v25 = vpop.eup %6584  ;;  %v749_v37 = vmul.f32 1.442695, %v720_v18  ;;  %vm902_vm5 = vcmp.eq.f32.partialorder %v901_v36, 8.507059e+37  ;;  %v918_v7 = vand.u32 2147483648, %v7579_v10  ;;  %v916_v18 = vand.u32 2147483647, %v7579_v10 }
 0x58b   :  { %779 = vadd.xlane.f32.xlu1 %v7596_v25  ;;  %1106 = vmatmul.f32.gmra.mxu2 %v876_v15  ;;  %v890_v58 = vsel %vm887_vm1, %v889_v24, %v885_v32  ;;  %v910_v20 = vmul.f32 %v6583_v13, %v909_v9  ;;  %v10041_v10 = vpack.i.bf16 %v7185_v30, %v7179_v29 }
 0x58c   :  { %6586 = vpow2.f32 %v749_v37  ;;  %v891_v40 = vmul.f32 %v7494_v26, %v890_v58  ;;  %v919_v15 = vor.u32 1.1754944e-38, %v918_v7  ;;  %vm917_vm9 = vcmp.eq.f32.partialorder %v916_v18, 8.507059e+37 }
 0x58d   :  { %v911_v26 = vadd.f32 %v6583_v13, %v910_v20 }
 0x58f   :  { %v704_v31 = vpop.xlane.xlu2 %703  ;;  %v915_v33 = vsel %vm914_vm8, %v6583_v13, %v911_v26  ;;  %v776_v13 = vpop.xlane.xlu0 %775 }
 0x590   :  { %v721_v14 = vsub.f32 %v7546_v0, %v704_v31  ;;  %v904_v0 = vor.u32 1.1754944e-38, %v903_v49  ;;  %v948_v20 = vand.u32 2147483648, %v776_v13  ;;  %vm942_vm1 = vweird.f32 %v776_v13 }
 0x592   :  { %v7611_v45 = vpop.eup %6586  ;;  %v751_v35 = vmul.f32 1.442695, %v721_v14  ;;  %v905_v61 = vsel %vm902_vm5, %v904_v0, %v900_v60 }
 0x593   :  { %781 = vadd.xlane.f32.xlu0 %v7611_v45  ;;  %1109 = vmatmul.f32.gmra.mxu2 %v891_v40  ;;  %v906_v1 = vmul.f32 %v7513_v3, %v905_v61  ;;  %v10040_v3 = vpack.i.bf16 %v7173_v28, %v7167_v27  ;;  %v946_v61 = vand.u32 2147483647, %v776_v13 }
 0x594   :  { %6588 = vpow2.f32 %v751_v35 }
 0x595   :  { %vm947_vm3 = vcmp.eq.f32.partialorder %v946_v61, 8.507059e+37 }
 0x597   :  { %v706_v43 = vpop.xlane.xlu2 %705 }
 0x598   :  { %v722_v55 = vsub.f32 %v7554_v2, %v706_v43  ;;  %v920_v2 = vsel %vm917_vm9, %v919_v15, %v915_v33 }
 0x599   :  { %v921_v34 = vmul.f32 %v7526_v21, %v920_v2 }
 0x59a   :  { %v7620_v41 = vpop.eup %6588  ;;  %v753_v12 = vmul.f32 1.442695, %v722_v55 }
 0x59b   :  { %783 = vadd.xlane.f32.xlu2 %v7620_v41  ;;  %1112 = vmatmul.f32.gmra.mxu2 %v906_v1  ;;  %v949_v1 = vor.u32 1.1754944e-38, %v948_v20 }
 0x59c   :  { %6590 = vpow2.f32 %v753_v12 }
 0x59d   :  { %6592 = vrcp.f32 %v776_v13 }
 0x5a2   :  { %v7624_v37 = vpop.eup %6590 }
 0x5a3   :  { %785 = vadd.xlane.f32.xlu1 %v7624_v37  ;;  %1115 = vmatmul.f32.gmra.mxu2 %v921_v34  ;;  %v6593_v32 = vpop.eup %6592 }
 0x5a4   :  { %v938_v19 = vmul.f32 %v6593_v32, %v776_v13  ;;  %vm943_vm15 = vweird.f32 %v6593_v32 }
 0x5a5   :  { %vm944_vm2 = vmor %vm942_vm1, %vm943_vm15 }
 0x5a6   :  { %v939_v58 = vsub.f32 1.0, %v938_v19 }
 0x5a7   :  { %6373 = vrot.lane.b32.xlu0 %v10040_v3, %s6946_s10 }
 0x5a8   :  { %v940_v29 = vmul.f32 %v6593_v32, %v939_v58 }
 0x5aa   :  { %v941_v35 = vadd.f32 %v6593_v32, %v940_v29 }
 0x5ac   :  { %v945_v55 = vsel %vm944_vm2, %v6593_v32, %v941_v35 }
 0x5ad   :  { %v950_v12 = vsel %vm947_vm3, %v949_v1, %v945_v55 }
 0x5ae   :  { %v951_v2 = vmul.f32 %v7537_v51, %v950_v12 }
 0x5bc   :  { %6378 = vrot.lane.b32.xlu1 %v10041_v10, %s6946_s10 }
 0x5cf   :  { %v7635_v5 = vpop.f32.mrf.mxu2 }
 0x5d7   :  { %v7637_v31 = vpop.f32.mrf.mxu2 }
 0x5df   :  { %v7640_v43 = vpop.f32.mrf.mxu2 }
 0x5e3   :  { %v774_v21 = vpop.xlane.xlu1 %773 }
 0x5e4   :  { %6594 = vrcp.f32 %v774_v21  ;;  %v933_v28 = vand.u32 2147483648, %v774_v21  ;;  %v931_v14 = vand.u32 2147483647, %v774_v21  ;;  %vm927_vm11 = vweird.f32 %v774_v21 }
 0x5e6   :  { %v934_v40 = vor.u32 1.1754944e-38, %v933_v28  ;;  %vm932_vm13 = vcmp.eq.f32.partialorder %v931_v14, 8.507059e+37 }
 0x5ea   :  { %v6595_v24 = vpop.eup %6594 }
 0x5eb   :  { %v923_v9 = vmul.f32 %v6595_v24, %v774_v21  ;;  %vm928_vm10 = vweird.f32 %v6595_v24 }
 0x5ec   :  { %vm929_vm12 = vmor %vm927_vm11, %vm928_vm10 }
 0x5ed   :  { %v924_v27 = vsub.f32 1.0, %v923_v9 }
 0x5ef   :  { %v925_v44 = vmul.f32 %v6595_v24, %v924_v27 }
 0x5f0   :  { %v778_v30 = vpop.xlane.xlu2 %777 }
 0x5f1   :  { %6596 = vrcp.f32 %v778_v30  ;;  %v926_v49 = vadd.f32 %v6595_v24, %v925_v44  ;;  %v963_v15 = vand.u32 2147483648, %v778_v30  ;;  %v961_v34 = vand.u32 2147483647, %v778_v30 }
 0x5f2   :  { %vm957_vm5 = vweird.f32 %v778_v30 }
 0x5f3   :  { %v930_v36 = vsel %vm929_vm12, %v6595_v24, %v926_v49  ;;  %v964_v21 = vor.u32 1.1754944e-38, %v963_v15  ;;  %vm962_vm7 = vcmp.eq.f32.partialorder %v961_v34, 8.507059e+37 }
 0x5f4   :  { %v935_v60 = vsel %vm932_vm13, %v934_v40, %v930_v36 }
 0x5f5   :  { %v936_v0 = vmul.f32 %v7561_v16, %v935_v60 }
 0x5f7   :  { %v6597_v26 = vpop.eup %6596  ;;  %1118 = vmatmul.f32.gmra.mxu2 %v936_v0 }
 0x5f8   :  { %v953_v7 = vmul.f32 %v6597_v26, %v778_v30  ;;  %vm958_vm4 = vweird.f32 %v6597_v26 }
 0x5f9   :  { %vm959_vm6 = vmor %vm957_vm5, %vm958_vm4 }
 0x5fa   :  { %v954_v18 = vsub.f32 1.0, %v953_v7 }
 0x5fb   :  { %v7643_v16 = vpop.f32.mrf.mxu2 }
 0x5fc   :  { %v955_v33 = vmul.f32 %v6597_v26, %v954_v18 }
 0x5fe   :  { %v780_v3 = vpop.xlane.xlu1 %779  ;;  %v956_v10 = vadd.f32 %v6597_v26, %v955_v33 }
 0x5ff   :  { %6598 = vrcp.f32 %v780_v3  ;;  %1121 = vmatmul.f32.gmra.mxu2 %v951_v2  ;;  %v978_v28 = vand.u32 2147483648, %v780_v3  ;;  %v976_v14 = vand.u32 2147483647, %v780_v3  ;;  %vm972_vm9 = vweird.f32 %v780_v3 }
 0x600   :  { %v960_v13 = vsel %vm959_vm6, %v6597_v26, %v956_v10 }
 0x601   :  { %v965_v32 = vsel %vm962_vm7, %v964_v21, %v960_v13  ;;  %v979_v49 = vor.u32 1.1754944e-38, %v978_v28  ;;  %vm977_vm11 = vcmp.eq.f32.partialorder %v976_v14, 8.507059e+37 }
 0x602   :  { %v966_v24 = vmul.f32 %v7576_v8, %v965_v32 }
 0x605   :  { %v6599_v19 = vpop.eup %6598 }
 0x606   :  { %v968_v58 = vmul.f32 %v6599_v19, %v780_v3  ;;  %v782_v9 = vpop.xlane.xlu0 %781  ;;  %v1104_v27 = vpop.f32.mrf.mxu2  ;;  %vm973_vm8 = vweird.f32 %v6599_v19 }
 0x607   :  { %6600 = vrcp.f32 %v782_v9  ;;  %1124 = vmatmul.f32.gmra.mxu2 %v966_v24  ;;  %1144 = vrot.lane.b32.xlu2 %v1104_v27, %s6947_s11  ;;  %vm974_vm10 = vmor %vm972_vm9, %vm973_vm8  ;;  %v993_v61 = vand.u32 2147483648, %v782_v9  ;;  %v991_v55 = vand.u32 2147483647, %v782_v9  ;;  %vm987_vm13 = vweird.f32 %v782_v9 }
 0x608   :  { %v969_v51 = vsub.f32 1.0, %v968_v58 }
 0x609   :  { %v994_v18 = vor.u32 1.1754944e-38, %v993_v61  ;;  %vm992_vm1 = vcmp.eq.f32.partialorder %v991_v55, 8.507059e+37 }
 0x60a   :  { %v970_v44 = vmul.f32 %v6599_v19, %v969_v51 }
 0x60c   :  { %v971_v29 = vadd.f32 %v6599_v19, %v970_v44 }
 0x60d   :  { %v6601_v30 = vpop.eup %6600 }
 0x60e   :  { %v983_v40 = vmul.f32 %v6601_v30, %v782_v9  ;;  %v784_v8 = vpop.xlane.xlu2 %783  ;;  %v1107_v36 = vpop.f32.mrf.mxu2  ;;  %v975_v35 = vsel %vm974_vm10, %v6599_v19, %v971_v29  ;;  %vm988_vm12 = vweird.f32 %v6601_v30  ;;  %vm1192_vm10 = vcmask 130048  }
 0x60f   :  { %6602 = vrcp.f32 %v784_v8  ;;  %v980_v60 = vsel %vm977_vm11, %v979_v49, %v975_v35  ;;  %vm989_vm15 = vmor %vm987_vm13, %vm988_vm12  ;;  %v1008_v10 = vand.u32 2147483648, %v784_v8  ;;  %v1006_v21 = vand.u32 2147483647, %v784_v8 }
 0x610   :  { %v984_v20 = vsub.f32 1.0, %v983_v40  ;;  %v981_v0 = vmul.f32 %v7596_v25, %v980_v60  ;;  %vm1002_vm3 = vweird.f32 %v784_v8  ;;  %vm1197_vm11 = vcmask 195584  }
 0x611   :  { %v1009_v24 = vor.u32 1.1754944e-38, %v1008_v10  ;;  %vm1007_vm5 = vcmp.eq.f32.partialorder %v1006_v21, 8.507059e+37 }
 0x612   :  { %1127 = vmatmul.f32.gmra.mxu2 %v981_v0  ;;  %v985_v26 = vmul.f32 %v6601_v30, %v984_v20 }
 0x614   :  { %v986_v7 = vadd.f32 %v6601_v30, %v985_v26 }
 0x615   :  { %v6603_v1 = vpop.eup %6602 }
 0x616   :  { %v998_v12 = vmul.f32 %v6603_v1, %v784_v8  ;;  %v786_v33 = vpop.xlane.xlu1 %785  ;;  %v1110_v15 = vpop.f32.mrf.mxu2  ;;  %v990_v2 = vsel %vm989_vm15, %v6601_v30, %v986_v7  ;;  %vm1003_vm2 = vweird.f32 %v6603_v1 }
 0x617   :  { %6604 = vrcp.f32 %v786_v33  ;;  %v995_v34 = vsel %vm992_vm1, %v994_v18, %v990_v2  ;;  %vm1004_vm4 = vmor %vm1002_vm3, %vm1003_vm2  ;;  %v1023_v14 = vand.u32 2147483648, %v786_v33  ;;  %v1021_v29 = vand.u32 2147483647, %v786_v33 }
 0x618   :  { %v999_v3 = vsub.f32 1.0, %v998_v12  ;;  %v996_v25 = vmul.f32 %v7611_v45, %v995_v34  ;;  %vm1017_vm7 = vweird.f32 %v786_v33 }
 0x619   :  { %v1024_v49 = vor.u32 1.1754944e-38, %v1023_v14  ;;  %vm1022_vm9 = vcmp.eq.f32.partialorder %v1021_v29, 8.507059e+37  ;;  %v6374_v61 = vpop.permute.xlu0 %6373 }
 0x61a   :  { %1130 = vmatmul.f32.gmra.mxu2 %v996_v25  ;;  %v1000_v13 = vmul.f32 %v6603_v1, %v999_v3  ;;  %v6375_v26 = vunpack.i.l.bf16 %v6374_v61  ;;  %v6376_v55 = vunpack.i.h.bf16 %v6374_v61 }
 0x61c   :  { %v1001_v32 = vadd.f32 %v6603_v1, %v1000_v13  ;;  %1242 = vmatpush.msra.mxu0 %v6375_v26 }
 0x61d   :  { %v6605_v19 = vpop.eup %6604 }
 0x61e   :  { %v1013_v58 = vmul.f32 %v6605_v19, %v786_v33  ;;  %v1113_v9 = vpop.f32.mrf.mxu2  ;;  %v1005_v27 = vsel %vm1004_vm4, %v6603_v1, %v1001_v32  ;;  %vm1018_vm6 = vweird.f32 %v6605_v19  ;;  %1243 = vmatpush.msra.mxu0 %v6376_v55 }
 0x61f   :  { %v1010_v51 = vsel %vm1007_vm5, %v1009_v24, %v1005_v27  ;;  %vm1019_vm8 = vmor %vm1017_vm7, %vm1018_vm6 }
 0x620   :  { %v1014_v28 = vsub.f32 1.0, %v1013_v58  ;;  %v1011_v44 = vmul.f32 %v7620_v41, %v1010_v51 }
 0x622   :  { %1133 = vmatmul.f32.gmra.mxu2 %v1011_v44  ;;  %v1015_v45 = vmul.f32 %v6605_v19, %v1014_v28 }
 0x624   :  { %v1016_v30 = vadd.f32 %v6605_v19, %v1015_v45 }
 0x626   :  { %v1116_v40 = vpop.f32.mrf.mxu2  ;;  %v1020_v8 = vsel %vm1019_vm8, %v6605_v19, %v1016_v30 }
 0x627   :  { %1160 = vrot.lane.b32.xlu0 %v1116_v40, %s6948_s12  ;;  %v1025_v35 = vsel %vm1022_vm9, %v1024_v49, %v1020_v8 }
 0x628   :  { %v1026_v60 = vmul.f32 %v7624_v37, %v1025_v35 }
 0x62a   :  { %1136 = vmatmul.f32.gmra.mxu2 %v1026_v60 }
 0x62e   :  { %v6379_v37 = vpop.permute.xlu1 %6378 }
 0x62f   :  { %1146 = vrot.lane.b32.xlu0 %v1107_v36, %s6947_s11  ;;  %v6380_v7 = vunpack.i.l.bf16 %v6379_v37  ;;  %v6381_v33 = vunpack.i.h.bf16 %v6379_v37 }
 0x631   :  { %1244 = vmatpush.msra.mxu0 %v6380_v7 }
 0x633   :  { %1245 = vmatpush.msra.mxu0 %v6381_v33 }
 0x637   :  { %1148 = vrot.lane.b32.xlu0 %v1110_v15, %s6947_s11 }
 0x63f   :  { %1150 = vrot.lane.b32.xlu0 %v1113_v9, %s6947_s11 }
 0x661   :  { %v1145_v2 = vpop.permute.xlu2 %1144 }
 0x662   :  { %v1188_v34 = vsel %vm529_vm14, %v7635_v5, %v1145_v2 }
 0x67a   :  { %v1119_v41 = vpop.f32.mrf.mxu2 }
 0x67b   :  { %1162 = vrot.lane.b32.xlu1 %v1119_v41, %s6948_s12 }
 0x682   :  { %v1122_v20 = vpop.f32.mrf.mxu2 }
 0x683   :  { %1164 = vrot.lane.b32.xlu1 %v1122_v20, %s6948_s12 }
 0x68a   :  { %v1125_v0 = vpop.f32.mrf.mxu2 }
 0x68b   :  { %1166 = vrot.lane.b32.xlu1 %v1125_v0, %s6948_s12 }
 0x695   :  { %v1128_v36 = vpop.f32.mrf.mxu2 }
 0x696   :  { %1176 = vrot.lane.b32.xlu2 %v1128_v36, %s6949_s13 }
 0x699   :  { %v1161_v15 = vpop.permute.xlu0 %1160 }
 0x69a   :  { %v1193_v3 = vsel %vm1192_vm10, %v1188_v34, %v1161_v15 }
 0x69d   :  { %v1131_v1 = vpop.f32.mrf.mxu2 }
 0x69e   :  { %1178 = vrot.lane.b32.xlu2 %v1131_v1, %s6949_s13 }
 0x6a1   :  { %v1147_v25 = vpop.permute.xlu0 %1146 }
 0x6a2   :  { %v1189_v32 = vsel %vm529_vm14, %v7637_v31, %v1147_v25 }
 0x6a5   :  { %v1134_v18 = vpop.f32.mrf.mxu2 }
 0x6a6   :  { %1180 = vrot.lane.b32.xlu2 %v1134_v18, %s6949_s13 }
 0x6a9   :  { %v1149_v9 = vpop.permute.xlu0 %1148 }
 0x6aa   :  { %v1190_v27 = vsel %vm529_vm14, %v7640_v43, %v1149_v9  ;;  %v7685_v43 = vld [vmem:[%s10033_s4] sm:$0x7f] }
 0x6ab   :  { %v1263_v40 = vperm.slane %v7685_v43, 2 }
 0x6ad   :  { %v1137_v12 = vpop.f32.mrf.mxu2 }
 0x6ae   :  { %1182 = vrot.lane.b32.xlu2 %v1137_v12, %s6949_s13 }
 0x6b1   :  { %v1151_v31 = vpop.permute.xlu0 %1150 }
 0x6b2   :  { %v1191_v45 = vsel %vm529_vm14, %v7643_v16, %v1151_v31  ;;  %v286_v31 = vld [vmem:[%s10032_s2 + $0x8] sm:$0xff] }
 0x6ed   :  { %v1163_v13 = vpop.permute.xlu1 %1162 }
 0x6ee   :  { %v1194_v19 = vsel %vm1192_vm10, %v1189_v32, %v1163_v13 }
 0x6f0   :  { %v1177_v10 = vpop.permute.xlu2 %1176 }
 0x6f1   :  { %v1198_v21 = vsel %vm1197_vm11, %v1193_v3, %v1177_v10 }
 0x6f2   :  { %6046 = vmatmul.msk.f32.vlgmr.msra.gmra.mxu0 %vm294_vm0, %v1198_v21 }
 0x6f5   :  { %v1165_v5 = vpop.permute.xlu1 %1164 }
 0x6f6   :  { %v1195_v51 = vsel %vm1192_vm10, %v1190_v27, %v1165_v5 }
 0x6f8   :  { %v1179_v24 = vpop.permute.xlu2 %1178 }
 0x6f9   :  { %v1199_v58 = vsel %vm1197_vm11, %v1194_v19, %v1179_v24 }
 0x6fa   :  { %6047 = vmatmul.msk.f32.gmra.mxu0 %vm294_vm0, %v1199_v58 }
 0x6fd   :  { %v1167_v14 = vpop.permute.xlu1 %1166 }
 0x6fe   :  { %v1196_v29 = vsel %vm1192_vm10, %v1191_v45, %v1167_v14 }
 0x700   :  { %v1181_v28 = vpop.permute.xlu2 %1180 }
 0x701   :  { %v1200_v44 = vsel %vm1197_vm11, %v1195_v51, %v1181_v28  ;;  %v292_v51 = vld [vmem:[%s10032_s2 + $0x38] sm:$0xff]  ;;  %v290_v28 = vld [vmem:[%s10032_s2 + $0x28] sm:$0xff] }
 0x702   :  { %6048 = vmatmul.msk.f32.gmra.mxu0 %vm294_vm0, %v1200_v44  ;;  %1391 = vmatpush.msra.mxu1 %v292_v51  ;;  %v288_v44 = vld [vmem:[%s10032_s2 + $0x18] sm:$0xff] }
 0x704   :  { %1392 = vmatpush.msra.mxu1 %v290_v28 }
 0x706   :  { %1393 = vmatpush.msra.mxu1 %v288_v44 }
 0x708   :  { %v1183_v30 = vpop.permute.xlu2 %1182  ;;  %1394 = vmatpush.msra.mxu1 %v286_v31 }
 0x709   :  { %v1201_v49 = vsel %vm1197_vm11, %v1196_v29, %v1183_v30 }
 0x70a   :  { %6049 = vmatmul.msk.f32.gmra.mxu0 %vm294_vm0, %v1201_v49 }
 0x76f   :  { %v1247_v8 = vpop.f32.mrf.mxu0 }
 0x770   :  { %v1259_v35 = vadd.f32 %v1247_v8, %v7113_v47 }
 0x772   :  { %v7689_v60 = vadd.f32 %v1263_v40, %v1259_v35 }
 0x774   :  { %v1268_v16 = vsel %vm294_vm0, %v7689_v60, 0.0 }
 0x775   :  { %1269 = vadd.xlane.f32.xlu0 %v1268_v16 }
 0x777   :  { %v1250_v41 = vpop.f32.mrf.mxu0 }
 0x778   :  { %v1260_v20 = vadd.f32 %v1250_v41, %v7120_v52 }
 0x77a   :  { %v7694_v0 = vadd.f32 %v1263_v40, %v1260_v20 }
 0x77c   :  { %v1271_v61 = vsel %vm294_vm0, %v7694_v0, 0.0 }
 0x77d   :  { %1272 = vadd.xlane.f32.xlu1 %v1271_v61 }
 0x77f   :  { %v1253_v26 = vpop.f32.mrf.mxu0 }
 0x780   :  { %v1261_v55 = vadd.f32 %v1253_v26, %v7127_v57 }
 0x782   :  { %v7699_v37 = vadd.f32 %v1263_v40, %v1261_v55 }
 0x784   :  { %v1274_v47 = vsel %vm294_vm0, %v7699_v37, 0.0 }
 0x785   :  { %1275 = vadd.xlane.f32.xlu2 %v1274_v47 }
 0x787   :  { %v1256_v7 = vpop.f32.mrf.mxu0 }
 0x788   :  { %v1262_v36 = vadd.f32 %v1256_v7, %v7134_v62 }
 0x78a   :  { %v7704_v1 = vadd.f32 %v1263_v40, %v1262_v36 }
 0x78c   :  { %v1277_v52 = vsel %vm294_vm0, %v7704_v1, 0.0 }
 0x78d   :  { %1278 = vadd.xlane.f32.xlu0 %v1277_v52  ;;  %v1356_v52 = vperm.slane %v7685_v43, 3 }
 0x7e8   :  { %v1270_v18 = vpop.xlane.xlu0 %1269 }
 0x7e9   :  { %v1280_v12 = vmul.f32 %v1270_v18, %v7138_v6 }
 0x7eb   :  { %v1284_v57 = vsub.f32 %v7689_v60, %v1280_v12 }
 0x7ed   :  { %v1288_v33 = vmul.f32 %v1284_v57, %v1284_v57 }
 0x7ef   :  { %v1292_v15 = vsel %vm294_vm0, %v1288_v33, 0.0 }
 0x7f0   :  { %v1273_v2 = vpop.xlane.xlu1 %1272  ;;  %1293 = vadd.xlane.f32.xlu2 %v1292_v15  ;;  %v1361_v15 = vperm.slane %v7685_v43, 4 }
 0x7f1   :  { %v1281_v34 = vmul.f32 %v1273_v2, %v7138_v6 }
 0x7f3   :  { %v7713_v62 = vsub.f32 %v7694_v0, %v1281_v34 }
 0x7f5   :  { %v1289_v3 = vmul.f32 %v7713_v62, %v7713_v62 }
 0x7f7   :  { %v1295_v25 = vsel %vm294_vm0, %v1289_v3, 0.0 }
 0x7f8   :  { %1296 = vadd.xlane.f32.xlu1 %v1295_v25  ;;  %v1276_v10 = vpop.xlane.xlu2 %1275 }
 0x7f9   :  { %v1282_v13 = vmul.f32 %v1276_v10, %v7138_v6 }
 0x7fb   :  { %v7720_v21 = vsub.f32 %v7699_v37, %v1282_v13 }
 0x7fd   :  { %v1290_v32 = vmul.f32 %v7720_v21, %v7720_v21 }
 0x7ff   :  { %v1298_v19 = vsel %vm294_vm0, %v1290_v32, 0.0 }
 0x800   :  { %v1279_v24 = vpop.xlane.xlu0 %1278  ;;  %1299 = vadd.xlane.f32.xlu0 %v1298_v19 }
 0x801   :  { %v1283_v58 = vmul.f32 %v1279_v24, %v7138_v6 }
 0x803   :  { %v7727_v9 = vsub.f32 %v7704_v1, %v1283_v58 }
 0x805   :  { %v1291_v5 = vmul.f32 %v7727_v9, %v7727_v9 }
 0x807   :  { %v1301_v27 = vsel %vm294_vm0, %v1291_v5, 0.0 }
 0x808   :  { %1302 = vadd.xlane.f32.xlu2 %v1301_v27 }
 0x863   :  { %v1294_v14 = vpop.xlane.xlu2 %1293 }
 0x864   :  { %v1304_v45 = vmul.f32 %v1294_v14, %v7138_v6 }
 0x866   :  { %v1308_v29 = vadd.f32 1e-05, %v1304_v45 }
 0x868   :  { %6606 = vrsqrt.f32 %v1308_v29  ;;  %vm1318_vm13 = vweird.f32 %v1308_v29 }
 0x86b   :  { %v1297_v30 = vpop.xlane.xlu1 %1296 }
 0x86c   :  { %v1305_v49 = vmul.f32 %v1297_v30, %v7138_v6 }
 0x86e   :  { %v6607_v40 = vpop.eup %6606  ;;  %v1309_v8 = vadd.f32 1e-05, %v1305_v49 }
 0x86f   :  { %v1313_v35 = vmul.f32 %v6607_v40, %v1308_v29  ;;  %vm1319_vm12 = vweird.f32 %v6607_v40 }
 0x870   :  { %6608 = vrsqrt.f32 %v1309_v8  ;;  %vm1320_vm15 = vmor %vm1318_vm13, %vm1319_vm12  ;;  %vm1328_vm2 = vweird.f32 %v1309_v8 }
 0x871   :  { %v1314_v16 = vmul.f32 %v6607_v40, %v1313_v35 }
 0x873   :  { %v1315_v41 = vmul.f32 0.5, %v1314_v16  ;;  %v1300_v20 = vpop.xlane.xlu0 %1299 }
 0x874   :  { %v1306_v61 = vmul.f32 %v1300_v20, %v7138_v6 }
 0x875   :  { %v1316_v26 = vsub.f32 1.5, %v1315_v41 }
 0x876   :  { %v6609_v55 = vpop.eup %6608  ;;  %v1310_v47 = vadd.f32 1e-05, %v1306_v61 }
 0x877   :  { %v1317_v7 = vmul.f32 %v6607_v40, %v1316_v26  ;;  %v1323_v36 = vmul.f32 %v6609_v55, %v1309_v8  ;;  %vm1329_vm1 = vweird.f32 %v6609_v55 }
 0x878   :  { %6610 = vrsqrt.f32 %v1310_v47  ;;  %vm1330_vm3 = vmor %vm1328_vm2, %vm1329_vm1  ;;  %vm1338_vm5 = vweird.f32 %v1310_v47 }
 0x879   :  { %v1321_v18 = vsel %vm1320_vm15, %v6607_v40, %v1317_v7  ;;  %v1324_v12 = vmul.f32 %v6609_v55, %v1323_v36  ;;  %v1582_v7 = vld [vmem:[%s10034_s3 + $0x70] sm:$0xff] }
 0x87a   :  { %v1352_v33 = vmul.f32 %v1321_v18, %v1284_v57  ;;  %v1580_v18 = vld [vmem:[%s10034_s3 + $0x60] sm:$0xff] }
 0x87b   :  { %v1325_v2 = vmul.f32 0.5, %v1324_v12  ;;  %v1303_v34 = vpop.xlane.xlu2 %1302 }
 0x87c   :  { %v1357_v3 = vmul.f32 %v1356_v52, %v1352_v33  ;;  %v1307_v25 = vmul.f32 %v1303_v34, %v7138_v6  ;;  %v1579_v33 = vld [vmem:[%s10034_s3 + $0x58] sm:$0xff] }
 0x87d   :  { %v1326_v10 = vsub.f32 1.5, %v1325_v2  ;;  %v1578_v2 = vld [vmem:[%s10034_s3 + $0x50] sm:$0xff] }
 0x87e   :  { %v6611_v13 = vpop.eup %6610  ;;  %v1311_v32 = vadd.f32 1e-05, %v1307_v25  ;;  %v1362_v19 = vadd.f32 %v1361_v15, %v1357_v3  ;;  %v1577_v3 = vld [vmem:[%s10034_s3 + $0x48] sm:$0xff] }
 0x87f   :  { %v1327_v24 = vmul.f32 %v6609_v55, %v1326_v10  ;;  %v1333_v58 = vmul.f32 %v6611_v13, %v1310_v47  ;;  %vm1339_vm4 = vweird.f32 %v6611_v13  ;;  %v1366_v47 = vperm.slane %v7685_v43, 6 }
 0x880   :  { %6612 = vrsqrt.f32 %v1311_v32  ;;  %6050 = vmatmul.msk.f32.vlgmr.msra.gmra.mxu1 %vm294_vm0, %v1362_v19  ;;  %vm1340_vm6 = vmor %vm1338_vm5, %vm1339_vm4  ;;  %vm1348_vm8 = vweird.f32 %v1311_v32  ;;  %v1575_v19 = vld [vmem:[%s10034_s3 + $0x38] sm:$0xff] }
 0x881   :  { %v1334_v57 = vmul.f32 %v6611_v13, %v1333_v58  ;;  %v1331_v5 = vsel %vm1330_vm3, %v6609_v55, %v1327_v24  ;;  %v1574_v58 = vld [vmem:[%s10034_s3 + $0x30] sm:$0xff] }
 0x882   :  { %v1353_v27 = vmul.f32 %v1331_v5, %v7713_v62 }
 0x883   :  { %v1335_v51 = vmul.f32 0.5, %v1334_v57  ;;  %v1573_v57 = vld [vmem:[%s10034_s3 + $0x28] sm:$0xff] }
 0x884   :  { %v1358_v28 = vmul.f32 %v1356_v52, %v1353_v27  ;;  %v1572_v27 = vld [vmem:[%s10034_s3 + $0x20] sm:$0xff] }
 0x885   :  { %v1336_v44 = vsub.f32 1.5, %v1335_v51 }
 0x886   :  { %v6613_v31 = vpop.eup %6612  ;;  %v1363_v14 = vadd.f32 %v1361_v15, %v1358_v28 }
 0x887   :  { %v1337_v45 = vmul.f32 %v6611_v13, %v1336_v44  ;;  %v1343_v29 = vmul.f32 %v6613_v31, %v1311_v32  ;;  %vm1349_vm7 = vweird.f32 %v6613_v31  ;;  %v1576_v32 = vld [vmem:[%s10034_s3 + $0x40] sm:$0xff] }
 0x888   :  { %6051 = vmatmul.msk.f32.gmra.mxu1 %vm294_vm0, %v1363_v14  ;;  %vm1350_vm9 = vmor %vm1348_vm8, %vm1349_vm7  ;;  %v1571_v14 = vld [vmem:[%s10034_s3 + $0x18] sm:$0xff] }
 0x889   :  { %v1344_v30 = vmul.f32 %v6613_v31, %v1343_v29  ;;  %v1341_v49 = vsel %vm1340_vm6, %v6611_v13, %v1337_v45 }
 0x88a   :  { %v1354_v40 = vmul.f32 %v1341_v49, %v7720_v21  ;;  %v1583_v21 = vld [vmem:[%s10034_s3 + $0x78] sm:$0xff]  ;;  %v1570_v49 = vld [vmem:[%s10034_s3 + $0x10] sm:$0xff] }
 0x88b   :  { %v1345_v8 = vmul.f32 0.5, %v1344_v30  ;;  %1585 = vmatpush.msrb.mxu0 %v1583_v21 }
 0x88c   :  { %v1359_v35 = vmul.f32 %v1356_v52, %v1354_v40 }
 0x88d   :  { %v1346_v16 = vsub.f32 1.5, %v1345_v8  ;;  %1586 = vmatpush.msrb.mxu0 %v1582_v7 }
 0x88e   :  { %v1364_v62 = vadd.f32 %v1361_v15, %v1359_v35  ;;  %v1569_v35 = vld [vmem:[%s10034_s3 + $0x8] sm:$0xff] }
 0x88f   :  { %v1347_v41 = vmul.f32 %v6613_v31, %v1346_v16 }
 0x890   :  { %6052 = vmatmul.msk.f32.gmra.mxu1 %vm294_vm0, %v1364_v62 }
 0x891   :  { %v1351_v20 = vsel %vm1350_vm9, %v6613_v31, %v1347_v41 }
 0x892   :  { %v1355_v61 = vmul.f32 %v1351_v20, %v7727_v9  ;;  %v1581_v9 = vld [vmem:[%s10034_s3 + $0x68] sm:$0xff]  ;;  %v1568_v20 = vld [vmem:[%s10034_s3] sm:$0xff] }
 0x893   :  { %1587 = vmatpush.msrb.mxu0 %v1581_v9 }
 0x894   :  { %v1360_v26 = vmul.f32 %v1356_v52, %v1355_v61 }
 0x895   :  { %1588 = vmatpush.msrb.mxu0 %v1580_v18 }
 0x896   :  { %v1365_v55 = vadd.f32 %v1361_v15, %v1360_v26 }
 0x897   :  { %1589 = vmatpush.msrb.mxu0 %v1579_v33 }
 0x898   :  { %6053 = vmatmul.msk.f32.gmra.mxu1 %vm294_vm0, %v1365_v55 }
 0x899   :  { %1590 = vmatpush.msrb.mxu0 %v1578_v2 }
 0x89b   :  { %1591 = vmatpush.msrb.mxu0 %v1577_v3 }
 0x89d   :  { %1592 = vmatpush.msrb.mxu0 %v1576_v32 }
 0x89f   :  { %1593 = vmatpush.msrb.mxu0 %v1575_v19 }
 0x8a1   :  { %1594 = vmatpush.msrb.mxu0 %v1574_v58 }
 0x8a3   :  { %1595 = vmatpush.msrb.mxu0 %v1573_v57 }
 0x8a5   :  { %1596 = vmatpush.msrb.mxu0 %v1572_v27 }
 0x8a7   :  { %1597 = vmatpush.msrb.mxu0 %v1571_v14 }
 0x8a9   :  { %1598 = vmatpush.msrb.mxu0 %v1570_v49 }
 0x8ab   :  { %1599 = vmatpush.msrb.mxu0 %v1569_v35 }
 0x8ad   :  { %1600 = vmatpush.msrb.mxu0 %v1568_v20 }
 0x8fd   :  { %v1396_v36 = vpop.f32.mrf.mxu1 }
 0x8fe   :  { %v7767_v52 = vadd.f32 %v1396_v36, %v1366_v47 }
 0x900   :  { %v7773_v12 = vmul.f32 0.70710677, %v7767_v52 }
 0x902   :  { %v7779_v15 = vand.u32 2147483647, %v7773_v12 }
 0x904   :  { %v1416_v34 = vmul.f32 0.3275911, %v7779_v15  ;;  %v1520_v3 = vsub.f32 0.0, %v7779_v15 }
 0x905   :  { %v1399_v25 = vpop.f32.mrf.mxu1 }
 0x906   :  { %v1420_v10 = vadd.f32 1.0, %v1416_v34  ;;  %v7788_v13 = vadd.f32 %v1399_v25, %v1366_v47 }
 0x908   :  { %6614 = vrcp.f32 %v1420_v10  ;;  %v7797_v24 = vmul.f32 0.70710677, %v7788_v13  ;;  %v1435_v62 = vand.u32 2147483648, %v1420_v10  ;;  %v1433_v61 = vand.u32 2147483647, %v1420_v10 }
 0x909   :  { %vm1429_vm13 = vweird.f32 %v1420_v10 }
 0x90a   :  { %v7806_v5 = vand.u32 2147483647, %v7797_v24  ;;  %v1436_v36 = vor.u32 1.1754944e-38, %v1435_v62  ;;  %vm1434_vm1 = vcmp.eq.f32.partialorder %v1433_v61, 8.507059e+37 }
 0x90c   :  { %v1417_v51 = vmul.f32 0.3275911, %v7806_v5  ;;  %v1521_v35 = vsub.f32 0.0, %v7806_v5 }
 0x90d   :  { %v1402_v28 = vpop.f32.mrf.mxu1 }
 0x90e   :  { %v6615_v44 = vpop.eup %6614  ;;  %v7812_v31 = vadd.f32 %v1402_v28, %v1366_v47  ;;  %v1421_v29 = vadd.f32 1.0, %v1417_v51  ;;  %v1524_v28 = vmul.f32 %v1520_v3, %v7779_v15 }
 0x90f   :  { %v1425_v45 = vmul.f32 %v6615_v44, %v1420_v10  ;;  %vm1430_vm12 = vweird.f32 %v6615_v44 }
 0x910   :  { %v7818_v30 = vmul.f32 0.70710677, %v7812_v31  ;;  %6616 = vrcp.f32 %v1421_v29  ;;  %vm1431_vm15 = vmor %vm1429_vm13, %vm1430_vm12  ;;  %v1450_v32 = vand.u32 2147483648, %v1421_v29  ;;  %v1448_v57 = vand.u32 2147483647, %v1421_v29 }
 0x911   :  { %v1426_v40 = vsub.f32 1.0, %v1425_v45  ;;  %vm1444_vm3 = vweird.f32 %v1421_v29  ;;  %v1528_v61 = vmul.f32 1.442695, %v1524_v28 }
 0x912   :  { %v7824_v8 = vand.u32 2147483647, %v7818_v30  ;;  %vm1449_vm5 = vcmp.eq.f32.partialorder %v1448_v57, 8.507059e+37 }
 0x913   :  { %v1427_v16 = vmul.f32 %v6615_v44, %v1426_v40  ;;  %v1451_v40 = vor.u32 1.1754944e-38, %v1450_v32 }
 0x914   :  { %v1418_v41 = vmul.f32 0.3275911, %v7824_v8  ;;  %v1522_v28 = vsub.f32 0.0, %v7824_v8 }
 0x915   :  { %v1405_v26 = vpop.f32.mrf.mxu1  ;;  %v1428_v55 = vadd.f32 %v6615_v44, %v1427_v16 }
 0x916   :  { %v1422_v21 = vadd.f32 1.0, %v1418_v41  ;;  %v7833_v7 = vadd.f32 %v1405_v26, %v1366_v47  ;;  %v6617_v9 = vpop.eup %6616 }
 0x917   :  { %v1432_v18 = vsel %vm1431_vm15, %v6615_v44, %v1428_v55  ;;  %v1440_v33 = vmul.f32 %v6617_v9, %v1421_v29  ;;  %vm1445_vm2 = vweird.f32 %v6617_v9 }
 0x918   :  { %6618 = vrcp.f32 %v1422_v21  ;;  %v7836_v2 = vmul.f32 0.70710677, %v7833_v7  ;;  %v1437_v34 = vsel %vm1434_vm1, %v1436_v36, %v1432_v18  ;;  %vm1446_vm4 = vmor %vm1444_vm3, %vm1445_vm2  ;;  %v1465_v15 = vand.u32 2147483648, %v1422_v21 }
 0x919   :  { %v1441_v25 = vsub.f32 1.0, %v1440_v33  ;;  %v1484_v47 = vmul.f32 1.0614054, %v1437_v34  ;;  %v1463_v29 = vand.u32 2147483647, %v1422_v21  ;;  %v1525_v18 = vmul.f32 %v1521_v35, %v7806_v5 }
 0x91a   :  { %v7840_v10 = vand.u32 2147483647, %v7836_v2  ;;  %vm1459_vm7 = vweird.f32 %v1422_v21  ;;  %v1466_v32 = vor.u32 1.1754944e-38, %v1465_v15  ;;  %vm1544_vm2 = vcmp.ge.f32.partialorder %v7773_v12, 0.0 }
 0x91b   :  { %v1442_v58 = vmul.f32 %v6617_v9, %v1441_v25  ;;  %v1488_v27 = vadd.f32 -1.4531521, %v1484_v47  ;;  %vm1464_vm9 = vcmp.eq.f32.partialorder %v1463_v29, 8.507059e+37  ;;  %vm1545_vm3 = vcmp.ge.f32.partialorder %v7797_v24, 0.0 }
 0x91c   :  { %v1419_v19 = vmul.f32 0.3275911, %v7840_v10 }
 0x91d   :  { %v1443_v14 = vadd.f32 %v6617_v9, %v1442_v58  ;;  %v1492_v49 = vmul.f32 %v1488_v27, %v1437_v34  ;;  %v1530_v27 = vmul.f32 1.442695, %v1525_v18 }
 0x91e   :  { %v6619_v51 = vpop.eup %6618  ;;  %v7844_v44 = vadd.f32 1.0, %v1419_v19 }
 0x91f   :  { %v1455_v45 = vmul.f32 %v6619_v51, %v1422_v21  ;;  %v1447_v16 = vsel %vm1446_vm4, %v6617_v9, %v1443_v14  ;;  %v1496_v41 = vadd.f32 1.4214138, %v1492_v49  ;;  %vm1460_vm6 = vweird.f32 %v6619_v51 }
 0x920   :  { %6620 = vrcp.f32 %v7844_v44  ;;  %v1452_v20 = vsel %vm1449_vm5, %v1451_v40, %v1447_v16  ;;  %vm1461_vm8 = vmor %vm1459_vm7, %vm1460_vm6  ;;  %v1478_v21 = vand.u32 2147483647, %v7844_v44  ;;  %v1480_v16 = vand.u32 2147483648, %v7844_v44 }
 0x921   :  { %v1456_v62 = vsub.f32 1.0, %v1455_v45  ;;  %v1485_v26 = vmul.f32 1.0614054, %v1452_v20  ;;  %v1500_v55 = vmul.f32 %v1496_v41, %v1437_v34  ;;  %6622 = vpow2.f32 %v1528_v61 }
 0x922   :  { %6624 = vpow2.f32 %v1530_v27  ;;  %vm1474_vm13 = vweird.f32 %v7844_v44  ;;  %vm1479_vm1 = vcmp.eq.f32.partialorder %v1478_v21, 8.507059e+37  ;;  %vm1546_vm4 = vcmp.ge.f32.partialorder %v7818_v30, 0.0 }
 0x923   :  { %v1457_v36 = vmul.f32 %v6619_v51, %v1456_v62  ;;  %v1489_v33 = vadd.f32 -1.4531521, %v1485_v26  ;;  %v1504_v3 = vadd.f32 -0.28449672, %v1500_v55  ;;  %vm1547_vm5 = vcmp.ge.f32.partialorder %v7836_v2, 0.0 }
 0x924   :  { %v1584_v30 = vperm.slane %v7685_v43, 5 }
 0x925   :  { %v1458_v25 = vadd.f32 %v6619_v51, %v1457_v36  ;;  %v1493_v9 = vmul.f32 %v1489_v33, %v1452_v20  ;;  %v1508_v58 = vmul.f32 %v1504_v3, %v1437_v34  ;;  %v1481_v33 = vor.u32 1.1754944e-38, %v1480_v16 }
 0x926   :  { %v6621_v47 = vpop.eup %6620 }
 0x927   :  { %v1470_v19 = vmul.f32 %v6621_v47, %v7844_v44  ;;  %v1462_v57 = vsel %vm1461_vm8, %v6619_v51, %v1458_v25  ;;  %v1497_v14 = vadd.f32 1.4214138, %v1493_v9  ;;  %v1512_v49 = vadd.f32 0.2548296, %v1508_v58  ;;  %v6623_v26 = vpop.eup %6622 }
 0x928   :  { %v1467_v45 = vsel %vm1464_vm9, %v1466_v32, %v1462_v57  ;;  %vm1475_vm12 = vweird.f32 %v6621_v47  ;;  %v1526_v51 = vmul.f32 %v1522_v28, %v7824_v8  ;;  %v1523_v32 = vsub.f32 0.0, %v7840_v10  ;;  %v6625_v28 = vpop.eup %6624 }
 0x929   :  { %v1471_v5 = vsub.f32 1.0, %v1470_v19  ;;  %v1486_v40 = vmul.f32 1.0614054, %v1467_v45  ;;  %v1501_v35 = vmul.f32 %v1497_v14, %v1452_v20  ;;  %v1516_v62 = vmul.f32 %v1512_v49, %v1437_v34  ;;  %vm1476_vm15 = vmor %vm1474_vm13, %vm1475_vm12 }
 0x92a   :  { %v1532_v34 = vmul.f32 1.442695, %v1526_v51  ;;  %v1556_v44 = vmul.f32 0.5, %v7767_v52 }
 0x92b   :  { %v1490_v41 = vadd.f32 -1.4531521, %v1486_v40  ;;  %v1472_v61 = vmul.f32 %v6621_v47, %v1471_v5  ;;  %v1505_v15 = vadd.f32 -0.28449672, %v1501_v35  ;;  %v1536_v55 = vmul.f32 %v6623_v26, %v1516_v62 }
 0x92c   :  { %6626 = vpow2.f32 %v1532_v34 }
 0x92d   :  { %v1494_v36 = vmul.f32 %v1490_v41, %v1467_v45  ;;  %v1473_v29 = vadd.f32 %v6621_v47, %v1472_v61  ;;  %v1509_v18 = vmul.f32 %v1505_v15, %v1452_v20  ;;  %v1540_v3 = vsub.f32 1.0, %v1536_v55 }
 0x92f   :  { %v1498_v25 = vadd.f32 1.4214138, %v1494_v36  ;;  %v1477_v9 = vsel %vm1476_vm15, %v6621_v47, %v1473_v29  ;;  %v1513_v19 = vadd.f32 0.2548296, %v1509_v18  ;;  %v1548_v57 = vsub.f32 0.0, %v1540_v3 }
 0x930   :  { %v1482_v58 = vsel %vm1479_vm1, %v1481_v33, %v1477_v9  ;;  %v1527_v47 = vmul.f32 %v1523_v32, %v7840_v10  ;;  %v1557_v29 = vmul.f32 0.5, %v7788_v13 }
 0x931   :  { %v1502_v8 = vmul.f32 %v1498_v25, %v1467_v45  ;;  %v1487_v27 = vmul.f32 1.0614054, %v1482_v58  ;;  %v1517_v14 = vmul.f32 %v1513_v19, %v1452_v20  ;;  %v1552_v5 = vsel %vm1544_vm2, %v1540_v3, %v1548_v57 }
 0x932   :  { %v1560_v35 = vadd.f32 1.0, %v1552_v5  ;;  %v1534_v15 = vmul.f32 1.442695, %v1527_v47  ;;  %v6627_v55 = vpop.eup %6626  ;;  %v1558_v57 = vmul.f32 0.5, %v7812_v31  ;;  %v1559_v5 = vmul.f32 0.5, %v7833_v7 }
 0x933   :  { %v1506_v49 = vadd.f32 -0.28449672, %v1502_v8  ;;  %v1491_v40 = vadd.f32 -1.4531521, %v1487_v27  ;;  %v1537_v21 = vmul.f32 %v6625_v28, %v1517_v14 }
 0x934   :  { %v1564_v41 = vmul.f32 %v1560_v35, %v1556_v44  ;;  %6628 = vpow2.f32 %v1534_v15 }
 0x935   :  { %v1510_v16 = vmul.f32 %v1506_v49, %v1467_v45  ;;  %v1495_v62 = vmul.f32 %v1491_v40, %v1482_v58  ;;  %v1541_v61 = vsub.f32 1.0, %v1537_v21 }
 0x936   :  { %1601 = vmatmul.f32.vlgmr.msrb.gmra.mxu0 %v1564_v41 }
 0x937   :  { %v1514_v26 = vadd.f32 0.2548296, %v1510_v16  ;;  %v1499_v51 = vadd.f32 1.4214138, %v1495_v62  ;;  %v1549_v12 = vsub.f32 0.0, %v1541_v61 }
 0x939   :  { %v1518_v52 = vmul.f32 %v1514_v26, %v1467_v45  ;;  %v1503_v20 = vmul.f32 %v1499_v51, %v1482_v58  ;;  %v1553_v36 = vsel %vm1545_vm3, %v1541_v61, %v1549_v12 }
 0x93a   :  { %v1561_v10 = vadd.f32 1.0, %v1553_v36  ;;  %v6629_v45 = vpop.eup %6628 }
 0x93b   :  { %v1538_v18 = vmul.f32 %v6627_v55, %v1518_v52  ;;  %v1507_v33 = vadd.f32 -0.28449672, %v1503_v20 }
 0x93c   :  { %v1565_v3 = vmul.f32 %v1561_v10, %v1557_v29 }
 0x93d   :  { %v1542_v25 = vsub.f32 1.0, %v1538_v18  ;;  %v1511_v9 = vmul.f32 %v1507_v33, %v1482_v58 }
 0x93e   :  { %1604 = vmatmul.f32.gmra.mxu0 %v1565_v3 }
 0x93f   :  { %v1550_v34 = vsub.f32 0.0, %v1542_v25  ;;  %v1515_v32 = vadd.f32 0.2548296, %v1511_v9 }
 0x941   :  { %v1554_v19 = vsel %vm1546_vm4, %v1542_v25, %v1550_v34  ;;  %v1519_v24 = vmul.f32 %v1515_v32, %v1482_v58 }
 0x942   :  { %v1562_v8 = vadd.f32 1.0, %v1554_v19 }
 0x943   :  { %v1539_v27 = vmul.f32 %v6629_v45, %v1519_v24 }
 0x944   :  { %v1566_v13 = vmul.f32 %v1562_v8, %v1558_v57  ;;  %v7913_v57 = vld [vmem:[%s10032_s2 + $0x70] sm:$0xff]  ;;  %v7919_v8 = vld [vmem:[%s10032_s2 + $0x60] sm:$0xff] }
 0x945   :  { %v1543_v28 = vsub.f32 1.0, %v1539_v27  ;;  %1751 = vmatpush.msrb.mxu1 %v7913_v57  ;;  %v7925_v27 = vld [vmem:[%s10032_s2 + $0x50] sm:$0xff] }
 0x946   :  { %1607 = vmatmul.f32.gmra.mxu0 %v1566_v13  ;;  %v7931_v13 = vld [vmem:[%s10032_s2 + $0x40] sm:$0xff] }
 0x947   :  { %v1551_v14 = vsub.f32 0.0, %v1543_v28  ;;  %1752 = vmatpush.msrb.mxu1 %v7919_v8 }
 0x949   :  { %v1555_v44 = vsel %vm1547_vm5, %v1543_v28, %v1551_v14  ;;  %1753 = vmatpush.msrb.mxu1 %v7925_v27 }
 0x94a   :  { %v1563_v49 = vadd.f32 1.0, %v1555_v44 }
 0x94b   :  { %1754 = vmatpush.msrb.mxu1 %v7931_v13 }
 0x94c   :  { %v1567_v40 = vmul.f32 %v1563_v49, %v1559_v5 }
 0x94e   :  { %1610 = vmatmul.f32.gmra.mxu0 %v1567_v40 }
 0x9b3   :  { %v1602_v58 = vpop.f32.mrf.mxu0 }
 0x9b4   :  { %v1603_v47 = vadd.f32 %v1602_v58, %v1584_v30 }
 0x9b6   :  { %v7867_v31 = vadd.f32 %v1603_v47, %v7689_v60 }
 0x9b8   :  { %v1629_v35 = vsel %vm294_vm0, %v7867_v31, 0.0 }
 0x9b9   :  { %1630 = vadd.xlane.f32.xlu1 %v1629_v35 }
 0x9bb   :  { %v1605_v21 = vpop.f32.mrf.mxu0 }
 0x9bc   :  { %v1606_v2 = vadd.f32 %v1605_v21, %v1584_v30 }
 0x9be   :  { %v7872_v16 = vadd.f32 %v1606_v2, %v7694_v0 }
 0x9c0   :  { %v1632_v7 = vsel %vm294_vm0, %v7872_v16, 0.0 }
 0x9c1   :  { %1633 = vadd.xlane.f32.xlu0 %v1632_v7 }
 0x9c3   :  { %v1608_v62 = vpop.f32.mrf.mxu0 }
 0x9c4   :  { %v1609_v43 = vadd.f32 %v1608_v62, %v1584_v30 }
 0x9c6   :  { %v7877_v41 = vadd.f32 %v1609_v43, %v7699_v37  ;;  %v6062_v43 = vld [vmem:[%s10033_s4 + $0x8] sm:$0x7f] }
 0x9c8   :  { %v1635_v60 = vsel %vm294_vm0, %v7877_v41, 0.0 }
 0x9c9   :  { %1636 = vadd.xlane.f32.xlu2 %v1635_v60 }
 0x9cb   :  { %v1611_v61 = vpop.f32.mrf.mxu0 }
 0x9cc   :  { %v1612_v26 = vadd.f32 %v1611_v61, %v1584_v30 }
 0x9ce   :  { %v7882_v51 = vadd.f32 %v1612_v26, %v7704_v1 }
 0x9d0   :  { %v1638_v0 = vsel %vm294_vm0, %v7882_v51, 0.0 }
 0x9d1   :  { %1639 = vadd.xlane.f32.xlu1 %v1638_v0 }
 0xa2c   :  { %v1631_v15 = vpop.xlane.xlu1 %1630 }
 0xa2d   :  { %v1641_v12 = vmul.f32 %v1631_v15, %v7138_v6 }
 0xa2f   :  { %v1645_v52 = vsub.f32 %v7867_v31, %v1641_v12  ;;  %v1717_v12 = vperm.slane %v6062_v43, 0 }
 0xa31   :  { %v1649_v37 = vmul.f32 %v1645_v52, %v1645_v52 }
 0xa33   :  { %v1653_v20 = vsel %vm294_vm0, %v1649_v37, 0.0 }
 0xa34   :  { %v1634_v55 = vpop.xlane.xlu0 %1633  ;;  %1654 = vadd.xlane.f32.xlu0 %v1653_v20 }
 0xa35   :  { %v1642_v36 = vmul.f32 %v1634_v55, %v7138_v6 }
 0xa37   :  { %v7891_v29 = vsub.f32 %v7872_v16, %v1642_v36  ;;  %v1722_v36 = vperm.slane %v6062_v43, 1 }
 0xa39   :  { %v1650_v1 = vmul.f32 %v7891_v29, %v7891_v29 }
 0xa3b   :  { %v1656_v10 = vsel %vm294_vm0, %v1650_v1, 0.0 }
 0xa3c   :  { %1657 = vadd.xlane.f32.xlu2 %v1656_v10  ;;  %v1637_v18 = vpop.xlane.xlu2 %1636 }
 0xa3d   :  { %v1643_v33 = vmul.f32 %v1637_v18, %v7138_v6 }
 0xa3f   :  { %v7898_v3 = vsub.f32 %v7877_v41, %v1643_v33 }
 0xa41   :  { %v1651_v25 = vmul.f32 %v7898_v3, %v7898_v3 }
 0xa43   :  { %v1659_v9 = vsel %vm294_vm0, %v1651_v25, 0.0 }
 0xa44   :  { %v1640_v34 = vpop.xlane.xlu1 %1639  ;;  %1660 = vadd.xlane.f32.xlu1 %v1659_v9 }
 0xa45   :  { %v1644_v32 = vmul.f32 %v1640_v34, %v7138_v6 }
 0xa47   :  { %v7905_v19 = vsub.f32 %v7882_v51, %v1644_v32 }
 0xa49   :  { %v1652_v24 = vmul.f32 %v7905_v19, %v7905_v19 }
 0xa4b   :  { %v1662_v45 = vsel %vm294_vm0, %v1652_v24, 0.0 }
 0xa4c   :  { %1663 = vadd.xlane.f32.xlu0 %v1662_v45 }
 0xaa7   :  { %v1655_v28 = vpop.xlane.xlu0 %1654 }
 0xaa8   :  { %v1665_v14 = vmul.f32 %v1655_v28, %v7138_v6 }
 0xaaa   :  { %v1669_v44 = vadd.f32 1e-05, %v1665_v14 }
 0xaac   :  { %6630 = vrsqrt.f32 %v1669_v44  ;;  %vm1679_vm7 = vweird.f32 %v1669_v44 }
 0xaaf   :  { %v1658_v49 = vpop.xlane.xlu2 %1657 }
 0xab0   :  { %v1666_v40 = vmul.f32 %v1658_v49, %v7138_v6 }
 0xab2   :  { %v6631_v30 = vpop.eup %6630  ;;  %v1670_v58 = vadd.f32 1e-05, %v1666_v40 }
 0xab3   :  { %v1674_v47 = vmul.f32 %v6631_v30, %v1669_v44  ;;  %vm1680_vm6 = vweird.f32 %v6631_v30 }
 0xab4   :  { %6632 = vrsqrt.f32 %v1670_v58  ;;  %vm1681_vm8 = vmor %vm1679_vm7, %vm1680_vm6  ;;  %vm1689_vm12 = vweird.f32 %v1670_v58 }
 0xab5   :  { %v1675_v21 = vmul.f32 %v6631_v30, %v1674_v47 }
 0xab7   :  { %v1676_v2 = vmul.f32 0.5, %v1675_v21  ;;  %v1661_v7 = vpop.xlane.xlu1 %1660 }
 0xab8   :  { %v1667_v62 = vmul.f32 %v1661_v7, %v7138_v6 }
 0xab9   :  { %v1677_v60 = vsub.f32 1.5, %v1676_v2 }
 0xaba   :  { %v6633_v61 = vpop.eup %6632  ;;  %v1671_v26 = vadd.f32 1e-05, %v1667_v62 }
 0xabb   :  { %v1678_v0 = vmul.f32 %v6631_v30, %v1677_v60  ;;  %v1684_v15 = vmul.f32 %v6633_v61, %v1670_v58  ;;  %vm1690_vm9 = vweird.f32 %v6633_v61 }
 0xabc   :  { %6634 = vrsqrt.f32 %v1671_v26  ;;  %vm1691_vm13 = vmor %vm1689_vm12, %vm1690_vm9  ;;  %vm1699_vm1 = vweird.f32 %v1671_v26 }
 0xabd   :  { %v1682_v37 = vsel %vm1681_vm8, %v6631_v30, %v1678_v0  ;;  %v1685_v20 = vmul.f32 %v6633_v61, %v1684_v15 }
 0xabe   :  { %v1713_v55 = vmul.f32 %v1682_v37, %v1645_v52 }
 0xabf   :  { %v1686_v1 = vmul.f32 0.5, %v1685_v20  ;;  %v1664_v10 = vpop.xlane.xlu0 %1663 }
 0xac0   :  { %v1718_v18 = vmul.f32 %v1717_v12, %v1713_v55  ;;  %v1668_v33 = vmul.f32 %v1664_v10, %v7138_v6 }
 0xac1   :  { %v1687_v25 = vsub.f32 1.5, %v1686_v1 }
 0xac2   :  { %v6635_v9 = vpop.eup %6634  ;;  %v1672_v34 = vadd.f32 1e-05, %v1668_v33  ;;  %v1723_v32 = vadd.f32 %v1722_v36, %v1718_v18 }
 0xac3   :  { %v1688_v24 = vmul.f32 %v6633_v61, %v1687_v25  ;;  %v1694_v45 = vmul.f32 %v6635_v9, %v1671_v26  ;;  %vm1700_vm15 = vweird.f32 %v6635_v9 }
 0xac4   :  { %6636 = vrsqrt.f32 %v1672_v34  ;;  %6063 = vmatmul.msk.f32.vlgmr.msrb.gmra.mxu1 %vm294_vm0, %v1723_v32  ;;  %vm1701_vm2 = vmor %vm1699_vm1, %vm1700_vm15  ;;  %vm1709_vm4 = vweird.f32 %v1672_v34 }
 0xac5   :  { %v1695_v28 = vmul.f32 %v6635_v9, %v1694_v45  ;;  %v1692_v52 = vsel %vm1691_vm13, %v6633_v61, %v1688_v24 }
 0xac6   :  { %v1714_v14 = vmul.f32 %v1692_v52, %v7891_v29 }
 0xac7   :  { %v1696_v44 = vmul.f32 0.5, %v1695_v28 }
 0xac8   :  { %v1719_v49 = vmul.f32 %v1717_v12, %v1714_v14 }
 0xac9   :  { %v1697_v40 = vsub.f32 1.5, %v1696_v44 }
 0xaca   :  { %v6637_v30 = vpop.eup %6636  ;;  %v1724_v47 = vadd.f32 %v1722_v36, %v1719_v49 }
 0xacb   :  { %v1698_v21 = vmul.f32 %v6635_v9, %v1697_v40  ;;  %v1704_v2 = vmul.f32 %v6637_v30, %v1672_v34  ;;  %vm1710_vm3 = vweird.f32 %v6637_v30 }
 0xacc   :  { %6064 = vmatmul.msk.f32.gmra.mxu1 %vm294_vm0, %v1724_v47  ;;  %vm1711_vm5 = vmor %vm1709_vm4, %vm1710_vm3 }
 0xacd   :  { %v1705_v58 = vmul.f32 %v6637_v30, %v1704_v2  ;;  %v1702_v7 = vsel %vm1701_vm2, %v6635_v9, %v1698_v21 }
 0xace   :  { %v1715_v62 = vmul.f32 %v1702_v7, %v7898_v3 }
 0xacf   :  { %v1706_v43 = vmul.f32 0.5, %v1705_v58 }
 0xad0   :  { %v1720_v60 = vmul.f32 %v1717_v12, %v1715_v62 }
 0xad1   :  { %v1707_v61 = vsub.f32 1.5, %v1706_v43 }
 0xad2   :  { %v1725_v29 = vadd.f32 %v1722_v36, %v1720_v60 }
 0xad3   :  { %v1708_v0 = vmul.f32 %v6637_v30, %v1707_v61 }
 0xad4   :  { %6065 = vmatmul.msk.f32.gmra.mxu1 %vm294_vm0, %v1725_v29 }
 0xad5   :  { %v1712_v15 = vsel %vm1711_vm5, %v6637_v30, %v1708_v0 }
 0xad6   :  { %v1716_v26 = vmul.f32 %v1712_v15, %v7905_v19 }
 0xad8   :  { %v1721_v37 = vmul.f32 %v1717_v12, %v1716_v26 }
 0xada   :  { %v1726_v20 = vadd.f32 %v1722_v36, %v1721_v37 }
 0xadc   :  { %6066 = vmatmul.msk.f32.gmra.mxu1 %vm294_vm0, %v1726_v20 }
 0xb41   :  { %v7952_v55 = vpop.f32.mrf.mxu1 }
 0xb49   :  { %v7954_v3 = vpop.f32.mrf.mxu1 }
 0xb4a   :  { %1798 = vrot.lane.b32.xlu0 %v7954_v3, %s6940_s28 }
 0xb51   :  { %v7958_v1 = vpop.f32.mrf.mxu1 }
 0xb52   :  { %1800 = vrot.lane.b32.xlu1 %v7958_v1, %s6940_s28 }
 0xb59   :  { %v7962_v10 = vpop.f32.mrf.mxu1 }
 0xb5a   :  { %1788 = vrot.lane.b32.xlu1 %v7958_v1, %s6941_s29  ;;  %1790 = vrot.lane.b32.xlu0 %v7962_v10, %s6941_s29 }
 0xb5b   :  { %1802 = vrot.lane.b32.xlu2 %v7962_v10, %s6940_s28 }
 0xb62   :  { %1778 = vrot.lane.b32.xlu1 %v7962_v10, %s6942_s30  ;;  %1784 = vrot.lane.b32.xlu0 %v7952_v55, %s6941_s29 }
 0xb63   :  { %1796 = vrot.lane.b32.xlu2 %v7952_v55, %s6940_s28 }
 0xb6a   :  { %1774 = vrot.lane.b32.xlu1 %v7954_v3, %s6942_s30 }
 0xb6b   :  { %1786 = vrot.lane.b32.xlu2 %v7954_v3, %s6941_s29 }
 0xb73   :  { %1776 = vrot.lane.b32.xlu2 %v7958_v1, %s6942_s30 }
 0xbb5   :  { %v7982_v19 = vpop.permute.xlu2 %1802 }
 0xbb6   :  { %1854 = vrot.lane.b32.xlu0 %v7982_v19, %s6943_s8 }
 0xbbc   :  { %v7986_v12 = vpop.permute.xlu0 %1798 }
 0xbbd   :  { %1850 = vrot.lane.b32.xlu1 %v7986_v12, %s6943_s8  ;;  %v7996_v18 = vpop.permute.xlu2 %1796 }
 0xbbe   :  { %1772 = vrot.lane.b32.xlu0 %v7952_v55, %s6942_s30  ;;  %v6382_v2 = vpack.i.bf16 %v7996_v18, %v7986_v12 }
 0xbc4   :  { %v7992_v36 = vpop.permute.xlu1 %1800 }
 0xbc5   :  { %1852 = vrot.lane.b32.xlu2 %v7992_v36, %s6943_s8  ;;  %v8008_v9 = vpop.permute.xlu2 %1786  ;;  %v6387_v28 = vpack.i.bf16 %v7992_v36, %v7982_v19 }
 0xbcc   :  { %v7998_v33 = vpop.permute.xlu1 %1788  ;;  %v8000_v25 = vpop.permute.xlu0 %1790 }
 0xbcd   :  { %1844 = vrot.lane.b32.xlu1 %v7998_v33, %s6943_s8  ;;  %1846 = vrot.lane.b32.xlu0 %v8000_v25, %s6943_s8  ;;  %v8022_v45 = vpop.permute.xlu2 %1776  ;;  %v6392_v52 = vpack.i.bf16 %v7998_v33, %v8000_v25 }
 0xbce   :  { %1848 = vrot.lane.b32.xlu2 %v7996_v18, %s6943_s8 }
 0xbd4   :  { %v8010_v34 = vpop.permute.xlu1 %1778  ;;  %v8012_v32 = vpop.permute.xlu0 %1784 }
 0xbd5   :  { %1838 = vrot.lane.b32.xlu1 %v8010_v34, %s6943_s8  ;;  %1840 = vrot.lane.b32.xlu0 %v8012_v32, %s6943_s8  ;;  %v6402_v14 = vpack.i.bf16 %v8022_v45, %v8010_v34 }
 0xbd6   :  { %1842 = vrot.lane.b32.xlu2 %v8008_v9, %s6943_s8 }
 0xbdc   :  { %v8020_v24 = vpop.permute.xlu1 %1774 }
 0xbdd   :  { %1834 = vrot.lane.b32.xlu0 %v8020_v24, %s6943_s8 }
 0xbde   :  { %1836 = vrot.lane.b32.xlu2 %v8022_v45, %s6943_s8 }
 0xbe5   :  { %1828 = vrot.lane.b32.xlu0 %v7958_v1, %s6943_s8 }
 0xbe6   :  { %1830 = vrot.lane.b32.xlu2 %v7962_v10, %s6943_s8 }
 0xbed   :  { %6388 = vrot.lane.b32.xlu0 %v6387_v28, %s6944_s9 }
 0xbee   :  { %1824 = vrot.lane.b32.xlu2 %v7952_v55, %s6943_s8 }
 0xbf6   :  { %6393 = vrot.lane.b32.xlu2 %v6392_v52, %s6944_s9 }
 0xbfe   :  { %6403 = vrot.lane.b32.xlu2 %v6402_v14, %s6944_s9 }
 0xc1f   :  { %v1853_v49 = vpop.permute.xlu2 %1852 }
 0xc28   :  { %v1855_v44 = vpop.permute.xlu0 %1854  ;;  %v1849_v47 = vpop.permute.xlu2 %1848 }
 0xc29   :  { %6067 = vmatpush.xpose.msk.msra.mxu0 %vm529_vm14, %v1855_v44 }
 0xc2d   :  { %6068 = vmatpush.xpose.msk.msra.mxu0 %vm529_vm14, %v1853_v49 }
 0xc2f   :  { %v1851_v40 = vpop.permute.xlu1 %1850 }
 0xc30   :  { %v8045_v30 = vpop.permute.xlu0 %1772  ;;  %v1843_v7 = vpop.permute.xlu2 %1842 }
 0xc31   :  { %1832 = vrot.lane.b32.xlu1 %v8045_v30, %s6943_s8  ;;  %6069 = vmatpush.xpose.msk.msra.mxu0 %vm529_vm14, %v1851_v40  ;;  %v1808_v40 = vmul.f32 0.35355338, %v7952_v55 }
 0xc35   :  { %6070 = vmatpush.xpose.msk.msra.mxu0 %vm529_vm14, %v1849_v47 }
 0xc38   :  { %v1837_v61 = vpop.permute.xlu2 %1836 }
 0xc39   :  { %1826 = vrot.lane.b32.xlu1 %v7954_v3, %s6943_s8 }
 0xc3f   :  { %v1847_v21 = vpop.permute.xlu0 %1846  ;;  %v1845_v58 = vpop.permute.xlu1 %1844 }
 0xc40   :  { %6071 = vmatpush.xpose.msk.msra.mxu0 %vm529_vm14, %v1847_v21  ;;  %v1831_v37 = vpop.permute.xlu2 %1830 }
 0xc41   :  { %6383 = vrot.lane.b32.xlu1 %v6382_v2, %s6944_s9 }
 0xc44   :  { %6072 = vmatpush.xpose.msk.msra.mxu0 %vm529_vm14, %v1845_v58  ;;  %v1809_v58 = vmul.f32 0.35355338, %v7954_v3 }
 0xc47   :  { %v1841_v62 = vpop.permute.xlu0 %1840  ;;  %v1839_v43 = vpop.permute.xlu1 %1838 }
 0xc48   :  { %6073 = vmatpush.xpose.msk.msra.mxu0 %vm529_vm14, %v1843_v7  ;;  %v1825_v28 = vpop.permute.xlu2 %1824  ;;  %v1810_v7 = vmul.f32 0.35355338, %v7958_v1 }
 0xc4c   :  { %6074 = vmatpush.xpose.msk.msra.mxu0 %vm529_vm14, %v1841_v62  ;;  %v1811_v62 = vmul.f32 0.35355338, %v7962_v10 }
 0xc4f   :  { %v1835_v60 = vpop.permute.xlu0 %1834 }
 0xc50   :  { %6075 = vmatpush.xpose.msk.msra.mxu0 %vm529_vm14, %v1839_v43  ;;  %v6394_v49 = vpop.permute.xlu2 %6393  ;;  %v1812_v43 = vmul.f32 0.35355338, %v8045_v30 }
 0xc51   :  { %v6395_v21 = vunpack.i.l.bf16 %v6394_v49  ;;  %v6396_v2 = vunpack.i.h.bf16 %v6394_v49  ;;  %v6397_v49 = vpack.i.bf16 %v8012_v32, %v8008_v9 }
 0xc54   :  { %6076 = vmatpush.xpose.msk.msra.mxu0 %vm529_vm14, %v1837_v61  ;;  %v1814_v61 = vmul.f32 0.35355338, %v8022_v45  ;;  %v1819_v45 = vmul.f32 0.35355338, %v8000_v25 }
 0xc57   :  { %v1829_v29 = vpop.permute.xlu0 %1828 }
 0xc58   :  { %6077 = vmatpush.xpose.msk.msra.mxu0 %vm529_vm14, %v1835_v60  ;;  %v1813_v60 = vmul.f32 0.35355338, %v8020_v24 }
 0xc5f   :  { %v6389_v0 = vpop.permute.xlu0 %6388 }
 0xc60   :  { %v6390_v15 = vunpack.i.l.bf16 %v6389_v0  ;;  %v6391_v26 = vunpack.i.h.bf16 %v6389_v0  ;;  %v1816_v0 = vmul.f32 0.35355338, %v8012_v32 }
 0xc62   :  { %2401 = vmatpush.msra.mxu1 %v6390_v15  ;;  %v1817_v15 = vmul.f32 0.35355338, %v8008_v9 }
 0xc64   :  { %2402 = vmatpush.msra.mxu1 %v6391_v26  ;;  %v1818_v26 = vmul.f32 0.35355338, %v7998_v33  ;;  %v1823_v33 = vmul.f32 0.35355338, %v7982_v19 }
 0xca3   :  { %v1833_v20 = vpop.permute.xlu1 %1832 }
 0xca4   :  { %6078 = vmatpush.xpose.msk.msra.mxu0 %vm529_vm14, %v1833_v20  ;;  %v1822_v20 = vmul.f32 0.35355338, %v7992_v36  ;;  %v6407_v36 = vpack.i.bf16 %v8045_v30, %v8020_v24 }
 0xca8   :  { %6079 = vmatpush.xpose.msk.msra.mxu0 %vm529_vm14, %v1831_v37  ;;  %v1821_v37 = vmul.f32 0.35355338, %v7986_v12 }
 0xcab   :  { %v1827_v52 = vpop.permute.xlu1 %1826 }
 0xcac   :  { %6080 = vmatpush.xpose.msk.msra.mxu0 %vm529_vm14, %v1829_v29  ;;  %v1815_v29 = vmul.f32 0.35355338, %v8010_v34  ;;  %v1820_v34 = vmul.f32 0.35355338, %v7996_v18 }
 0xcb0   :  { %6081 = vmatpush.xpose.msk.msra.mxu0 %vm529_vm14, %v1827_v52 }
 0xcb3   :  { %v6384_v14 = vpop.permute.xlu1 %6383 }
 0xcb4   :  { %v6385_v44 = vunpack.i.l.bf16 %v6384_v14  ;;  %6082 = vmatpush.xpose.msk.msra.mxu0 %vm529_vm14, %v1825_v28  ;;  %v6386_v47 = vunpack.i.h.bf16 %v6384_v14 }
 0xcb6   :  { %2403 = vmatpush.msra.mxu1 %v6385_v44 }
 0xcb7   :  { %6083 = vmatmul.msk.f32.vlgmr.msra.gmra.mxu0 %vm529_vm14, %v1808_v40 }
 0xcb8   :  { %2404 = vmatpush.msra.mxu1 %v6386_v47 }
 0xcba   :  { %2405 = vmatpush.msra.mxu1 %v6395_v21 }
 0xcbc   :  { %2406 = vmatpush.msra.mxu1 %v6396_v2 }
 0xcbf   :  { %6084 = vmatmul.msk.f32.gmra.mxu0 %vm529_vm14, %v1809_v58 }
 0xcc7   :  { %6085 = vmatmul.msk.f32.gmra.mxu0 %vm529_vm14, %v1810_v7 }
 0xccf   :  { %6086 = vmatmul.msk.f32.gmra.mxu0 %vm529_vm14, %v1811_v62 }
 0xcd7   :  { %6087 = vmatmul.msk.f32.gmra.mxu0 %vm529_vm14, %v1812_v43 }
 0xcdf   :  { %6088 = vmatmul.msk.f32.gmra.mxu0 %vm529_vm14, %v1813_v60 }
 0xce7   :  { %6089 = vmatmul.msk.f32.gmra.mxu0 %vm529_vm14, %v1814_v61 }
 0xcef   :  { %6090 = vmatmul.msk.f32.gmra.mxu0 %vm529_vm14, %v1815_v29 }
 0xcf7   :  { %6091 = vmatmul.msk.f32.gmra.mxu0 %vm529_vm14, %v1816_v0 }
 0xcff   :  { %6092 = vmatmul.msk.f32.gmra.mxu0 %vm529_vm14, %v1817_v15  ;;  %v6404_v15 = vpop.permute.xlu2 %6403 }
 0xd07   :  { %6093 = vmatmul.msk.f32.gmra.mxu0 %vm529_vm14, %v1818_v26 }
 0xd0f   :  { %6094 = vmatmul.msk.f32.gmra.mxu0 %vm529_vm14, %v1819_v45 }
 0xd17   :  { %6095 = vmatmul.msk.f32.gmra.mxu0 %vm529_vm14, %v1820_v34 }
 0xd1f   :  { %6096 = vmatmul.msk.f32.gmra.mxu0 %vm529_vm14, %v1821_v37 }
 0xd27   :  { %6097 = vmatmul.msk.f32.gmra.mxu0 %vm529_vm14, %v1822_v20 }
 0xd2f   :  { %6098 = vmatmul.msk.f32.gmra.mxu0 %vm529_vm14, %v1823_v33 }
 0xd34   :  { %v1953_v28 = vpop.f32.mrf.mxu0 }
 0xd35   :  { %v1954_v25 = vadd.f32 %v1953_v28, %v7363_v11 }
 0xd37   :  { %2001 = vmax.xlane.f32.xlu0 %v1954_v25 }
 0xd3c   :  { %v1956_v52 = vpop.f32.mrf.mxu0 }
 0xd3d   :  { %v1957_v18 = vadd.f32 %v1956_v52, %v7371_v17 }
 0xd3f   :  { %2003 = vmax.xlane.f32.xlu1 %v1957_v18 }
 0xd44   :  { %v1959_v14 = vpop.f32.mrf.mxu0 }
 0xd45   :  { %v1960_v12 = vadd.f32 %v1959_v14, %v7379_v22 }
 0xd47   :  { %2005 = vmax.xlane.f32.xlu2 %v1960_v12 }
 0xd4b   :  { %6408 = vrot.lane.b32.xlu0 %v6407_v36, %s6944_s9 }
 0xd4c   :  { %v1962_v19 = vpop.f32.mrf.mxu0 }
 0xd4d   :  { %v1963_v24 = vadd.f32 %v1962_v19, %v7414_v42 }
 0xd54   :  { %v1965_v44 = vpop.f32.mrf.mxu0 }
 0xd55   :  { %v8116_v58 = vadd.f32 %v1965_v44, %v7423_v23 }
 0xd58   :  { %6398 = vrot.lane.b32.xlu1 %v6397_v49, %s6944_s9  ;;  %v6406_v49 = vunpack.i.h.bf16 %v6404_v15 }
 0xd5c   :  { %v1968_v40 = vpop.f32.mrf.mxu0 }
 0xd5d   :  { %v8110_v47 = vadd.f32 %v1968_v40, %v7396_v56 }
 0xd5f   :  { %2011 = vmax.xlane.f32.xlu2 %v8110_v47 }
 0xd64   :  { %v1971_v21 = vpop.f32.mrf.mxu0 }
 0xd65   :  { %v1972_v2 = vadd.f32 %v1971_v21, %v7404_v48  ;;  %v6417_v21 = vpack.i.bf16 %v7952_v55, %v7954_v3 }
 0xd67   :  { %2013 = vmax.xlane.f32.xlu2 %v1972_v2 }
 0xd6c   :  { %v1974_v30 = vpop.f32.mrf.mxu0 }
 0xd6d   :  { %v8120_v32 = vadd.f32 %v1974_v30, %v7432_v53 }
 0xd74   :  { %v1977_v9 = vpop.f32.mrf.mxu0 }
 0xd75   :  { %2007 = vmax.xlane.f32.xlu0 %v1963_v24  ;;  %v8124_v62 = vadd.f32 %v1977_v9, %v7442_v50 }
 0xd7c   :  { %v1980_v7 = vpop.f32.mrf.mxu0 }
 0xd82   :  { %2009 = vmax.xlane.f32.xlu1 %v8116_v58 }
 0xd84   :  { %v1983_v43 = vpop.f32.mrf.mxu0 }
 0xd85   :  { %v8128_v60 = vadd.f32 %v1983_v43, %v7450_v46 }
 0xd8a   :  { %2015 = vmax.xlane.f32.xlu1 %v8120_v32 }
 0xd92   :  { %2017 = vmax.xlane.f32.xlu1 %v8124_v62 }
 0xd9a   :  { %2021 = vmax.xlane.f32.xlu1 %v8128_v60 }
 0xdaa   :  { %v2002_v61 = vpop.xlane.xlu0 %2001 }
 0xdab   :  { %v2033_v29 = vsub.f32 %v1954_v25, %v2002_v61 }
 0xdad   :  { %v2049_v0 = vmul.f32 1.442695, %v2033_v29 }
 0xdaf   :  { %6638 = vpow2.f32 %v2049_v0 }
 0xdb2   :  { %v2004_v26 = vpop.xlane.xlu1 %2003 }
 0xdb3   :  { %v2034_v45 = vsub.f32 %v1957_v18, %v2004_v26  ;;  %v6412_v18 = vpack.i.bf16 %v7958_v1, %v7962_v10 }
 0xdb5   :  { %v8131_v34 = vpop.eup %6638  ;;  %v2051_v37 = vmul.f32 1.442695, %v2034_v45 }
 0xdb6   :  { %2081 = vadd.xlane.f32.xlu0 %v8131_v34 }
 0xdb7   :  { %6640 = vpow2.f32 %v2051_v37  ;;  %v1986_v37 = vpop.f32.mrf.mxu0 }
 0xdba   :  { %v2006_v20 = vpop.xlane.xlu2 %2005 }
 0xdbb   :  { %v2035_v33 = vsub.f32 %v1960_v12, %v2006_v20  ;;  %v6405_v12 = vunpack.i.l.bf16 %v6404_v15  ;;  %v8147_v15 = vadd.f32 %v1980_v7, %v7480_v4  ;;  %v8159_v7 = vadd.f32 %v1986_v37, %v7500_v54 }
 0xdbd   :  { %v8134_v28 = vpop.eup %6640  ;;  %v2053_v52 = vmul.f32 1.442695, %v2035_v33  ;;  %v6409_v44 = vpop.permute.xlu0 %6408 }
 0xdbe   :  { %2083 = vadd.xlane.f32.xlu2 %v8134_v28  ;;  %v6410_v40 = vunpack.i.l.bf16 %v6409_v44  ;;  %v6411_v30 = vunpack.i.h.bf16 %v6409_v44 }
 0xdbf   :  { %6642 = vpow2.f32 %v2053_v52 }
 0xdc5   :  { %v8137_v25 = vpop.eup %6642 }
 0xdc6   :  { %2085 = vadd.xlane.f32.xlu1 %v8137_v25 }
 0xdca   :  { %v6399_v14 = vpop.permute.xlu1 %6398  ;;  %6413 = vrot.lane.b32.xlu0 %v6412_v18, %s6944_s9 }
 0xdcb   :  { %v6400_v36 = vunpack.i.l.bf16 %v6399_v14  ;;  %v6401_v19 = vunpack.i.h.bf16 %v6399_v14  ;;  %v1989_v14 = vpop.f32.mrf.mxu0 }
 0xdcd   :  { %2407 = vmatpush.msra.mxu1 %v6400_v36 }
 0xdcf   :  { %2408 = vmatpush.msra.mxu1 %v6401_v19 }
 0xdd1   :  { %2409 = vmatpush.msra.mxu1 %v6405_v12 }
 0xdd2   :  { %v2012_v1 = vpop.xlane.xlu2 %2011 }
 0xdd3   :  { %2410 = vmatpush.msra.mxu1 %v6406_v49 }
 0xdd5   :  { %2411 = vmatpush.msra.mxu1 %v6410_v40  ;;  %v8175_v40 = vadd.f32 %v1989_v14, %v7519_v38 }
 0xdd6   :  { %6418 = vrot.lane.b32.xlu2 %v6417_v21, %s6944_s9 }
 0xdd7   :  { %2412 = vmatpush.msra.mxu1 %v6411_v30  ;;  %v1992_v30 = vpop.f32.mrf.mxu0 }
 0xdda   :  { %v2014_v43 = vpop.xlane.xlu2 %2013 }
 0xddb   :  { %v2039_v29 = vsub.f32 %v1972_v2, %v2014_v43 }
 0xddd   :  { %v2061_v0 = vmul.f32 1.442695, %v2039_v29 }
 0xde8   :  { %v2008_v10 = vpop.xlane.xlu0 %2007 }
 0xde9   :  { %v2036_v9 = vsub.f32 %v1963_v24, %v2008_v10  ;;  %v2038_v24 = vsub.f32 %v8110_v47, %v2012_v1  ;;  %v8182_v1 = vadd.f32 %v1992_v30, %v7532_v59 }
 0xdeb   :  { %v2055_v61 = vmul.f32 1.442695, %v2036_v9  ;;  %v2059_v20 = vmul.f32 1.442695, %v2038_v24 }
 0xded   :  { %6644 = vpow2.f32 %v2055_v61 }
 0xdee   :  { %6646 = vpow2.f32 %v2061_v0 }
 0xdf3   :  { %v8149_v26 = vpop.eup %6644 }
 0xdf4   :  { %2019 = vmax.xlane.f32.xlu0 %v8147_v15  ;;  %2087 = vadd.xlane.f32.xlu1 %v8149_v26  ;;  %v8155_v2 = vpop.eup %6646 }
 0xdf5   :  { %v2010_v55 = vpop.xlane.xlu1 %2009 }
 0xdf6   :  { %v2037_v3 = vsub.f32 %v8116_v58, %v2010_v55 }
 0xdf8   :  { %v2057_v45 = vmul.f32 1.442695, %v2037_v3 }
 0xdfa   :  { %6648 = vpow2.f32 %v2057_v45 }
 0xdfb   :  { %6650 = vpow2.f32 %v2059_v20 }
 0xdfc   :  { %2093 = vadd.xlane.f32.xlu0 %v8155_v2 }
 0xdfd   :  { %v2016_v33 = vpop.xlane.xlu1 %2015 }
 0xdfe   :  { %v2040_v52 = vsub.f32 %v8120_v32, %v2016_v33 }
 0xdff   :  { %2023 = vmax.xlane.f32.xlu2 %v8159_v7 }
 0xe00   :  { %v8163_v18 = vpop.eup %6648  ;;  %v2063_v58 = vmul.f32 1.442695, %v2040_v52 }
 0xe01   :  { %2089 = vadd.xlane.f32.xlu1 %v8163_v18  ;;  %v8167_v19 = vpop.eup %6650 }
 0xe02   :  { %6652 = vpow2.f32 %v2063_v58 }
 0xe05   :  { %v2018_v47 = vpop.xlane.xlu1 %2017 }
 0xe06   :  { %v2041_v36 = vsub.f32 %v8124_v62, %v2018_v47 }
 0xe08   :  { %v8169_v12 = vpop.eup %6652  ;;  %v2065_v44 = vmul.f32 1.442695, %v2041_v36 }
 0xe09   :  { %2095 = vadd.xlane.f32.xlu0 %v8169_v12  ;;  %2091 = vadd.xlane.f32.xlu1 %v8167_v19 }
 0xe0a   :  { %6654 = vpow2.f32 %v2065_v44 }
 0xe0d   :  { %v2022_v32 = vpop.xlane.xlu1 %2021 }
 0xe0e   :  { %v2043_v49 = vsub.f32 %v8128_v60, %v2022_v32  ;;  %v1995_v60 = vpop.f32.mrf.mxu0 }
 0xe0f   :  { %v8189_v9 = vadd.f32 %v1995_v60, %v7543_v63 }
 0xe10   :  { %v8177_v21 = vpop.eup %6654  ;;  %v2069_v62 = vmul.f32 1.442695, %v2043_v49 }
 0xe11   :  { %2097 = vadd.xlane.f32.xlu0 %v8177_v21  ;;  %2025 = vmax.xlane.f32.xlu1 %v8175_v40 }
 0xe12   :  { %6656 = vpow2.f32 %v2069_v62 }
 0xe16   :  { %v1998_v43 = vpop.f32.mrf.mxu0 }
 0xe17   :  { %v8193_v61 = vadd.f32 %v1998_v43, %v7551_v39 }
 0xe18   :  { %v8184_v10 = vpop.eup %6656 }
 0xe19   :  { %2101 = vadd.xlane.f32.xlu0 %v8184_v10  ;;  %2027 = vmax.xlane.f32.xlu1 %v8182_v1 }
 0xe21   :  { %2029 = vmax.xlane.f32.xlu1 %v8189_v9 }
 0xe29   :  { %2031 = vmax.xlane.f32.xlu1 %v8193_v61  ;;  %v2082_v29 = vpop.xlane.xlu0 %2081 }
 0xe2a   :  { %6658 = vrcp.f32 %v2082_v29  ;;  %v2124_v58 = vand.u32 2147483648, %v2082_v29  ;;  %vm2118_vm7 = vweird.f32 %v2082_v29  ;;  %v2122_v36 = vand.u32 2147483647, %v2082_v29 }
 0xe2c   :  { %v2125_v62 = vor.u32 1.1754944e-38, %v2124_v58  ;;  %vm2123_vm9 = vcmp.eq.f32.partialorder %v2122_v36, 8.507059e+37 }
 0xe30   :  { %v6659_v0 = vpop.eup %6658 }
 0xe31   :  { %v2114_v55 = vmul.f32 %v6659_v0, %v2082_v29  ;;  %v2084_v3 = vpop.xlane.xlu2 %2083  ;;  %vm2119_vm6 = vweird.f32 %v6659_v0 }
 0xe32   :  { %6660 = vrcp.f32 %v2084_v3  ;;  %vm2120_vm8 = vmor %vm2118_vm7, %vm2119_vm6  ;;  %v2139_v29 = vand.u32 2147483648, %v2084_v3  ;;  %vm2133_vm13 = vweird.f32 %v2084_v3 }
 0xe33   :  { %v2115_v45 = vsub.f32 1.0, %v2114_v55 }
 0xe35   :  { %v2116_v24 = vmul.f32 %v6659_v0, %v2115_v45 }
 0xe37   :  { %v2117_v52 = vadd.f32 %v6659_v0, %v2116_v24 }
 0xe38   :  { %v6661_v37 = vpop.eup %6660 }
 0xe39   :  { %v2129_v20 = vmul.f32 %v6661_v37, %v2084_v3  ;;  %v2086_v33 = vpop.xlane.xlu1 %2085  ;;  %v6419_v32 = vpop.permute.xlu2 %6418  ;;  %v2121_v49 = vsel %vm2120_vm8, %v6659_v0, %v2117_v52  ;;  %vm2134_vm12 = vweird.f32 %v6661_v37  ;;  %v2137_v0 = vand.u32 2147483647, %v2084_v3 }
 0xe3a   :  { %6662 = vrcp.f32 %v2086_v33  ;;  %v6420_v55 = vunpack.i.l.bf16 %v6419_v32  ;;  %v2126_v35 = vsel %vm2123_vm9, %v2125_v62, %v2121_v49  ;;  %vm2135_vm15 = vmor %vm2133_vm13, %vm2134_vm12  ;;  %vm2148_vm3 = vweird.f32 %v2086_v33 }
 0xe3b   :  { %v2130_v47 = vsub.f32 1.0, %v2129_v20  ;;  %v6421_v20 = vunpack.i.h.bf16 %v6419_v32  ;;  %v2127_v63 = vmul.f32 %v8131_v34, %v2126_v35  ;;  %vm2138_vm1 = vcmp.eq.f32.partialorder %v2137_v0, 8.507059e+37 }
 0xe3c   :  { %v6414_v14 = vpop.permute.xlu0 %6413  ;;  %v2152_v49 = vand.u32 2147483647, %v2086_v33 }
 0xe3d   :  { %v6415_v44 = vunpack.i.l.bf16 %v6414_v14  ;;  %v2131_v30 = vmul.f32 %v6661_v37, %v2130_v47  ;;  %v6416_v60 = vunpack.i.h.bf16 %v6414_v14  ;;  %v2140_v47 = vor.u32 1.1754944e-38, %v2139_v29 }
 0xe3e   :  { %vm2153_vm5 = vcmp.eq.f32.partialorder %v2152_v49, 8.507059e+37 }
 0xe3f   :  { %2413 = vmatpush.msra.mxu1 %v6415_v44  ;;  %v2132_v24 = vadd.f32 %v6661_v37, %v2131_v30  ;;  %v2154_v44 = vand.u32 2147483648, %v2086_v33 }
 0xe40   :  { %v6663_v43 = vpop.eup %6662 }
 0xe41   :  { %v2144_v45 = vmul.f32 %v6663_v43, %v2086_v33  ;;  %2414 = vmatpush.msra.mxu1 %v6416_v60  ;;  %v2136_v52 = vsel %vm2135_vm15, %v6661_v37, %v2132_v24  ;;  %vm2149_vm2 = vweird.f32 %v6663_v43  ;;  %v2155_v34 = vor.u32 1.1754944e-38, %v2154_v44 }
 0xe42   :  { %v2141_v14 = vsel %vm2138_vm1, %v2140_v47, %v2136_v52  ;;  %vm2150_vm4 = vmor %vm2148_vm3, %vm2149_vm2 }
 0xe43   :  { %v2145_v5 = vsub.f32 1.0, %v2144_v45  ;;  %2415 = vmatpush.msra.mxu1 %v6420_v55  ;;  %v2142_v32 = vmul.f32 %v8134_v28, %v2141_v14 }
 0xe45   :  { %2416 = vmatpush.msra.mxu1 %v6421_v20  ;;  %v2146_v58 = vmul.f32 %v6663_v43, %v2145_v5 }
 0xe46   :  { %2417 = vmatmul.f32.vlgmr.msra.gmra.mxu1 %v2127_v63 }
 0xe47   :  { %v2147_v36 = vadd.f32 %v6663_v43, %v2146_v58 }
 0xe49   :  { %v2151_v35 = vsel %vm2150_vm4, %v6663_v43, %v2147_v36 }
 0xe4a   :  { %v2156_v3 = vsel %vm2153_vm5, %v2155_v34, %v2151_v35 }
 0xe4b   :  { %v2157_v63 = vmul.f32 %v8137_v25, %v2156_v3 }
 0xe4e   :  { %2420 = vmatmul.f32.gmra.mxu1 %v2142_v32 }
 0xe56   :  { %2423 = vmatmul.f32.gmra.mxu1 %v2157_v63 }
 0xe67   :  { %v2088_v5 = vpop.xlane.xlu1 %2087  ;;  %v2020_v37 = vpop.xlane.xlu0 %2019 }
 0xe68   :  { %6664 = vrcp.f32 %v2088_v5  ;;  %v2042_v30 = vsub.f32 %v8147_v15, %v2020_v37  ;;  %v2169_v43 = vand.u32 2147483648, %v2088_v5  ;;  %v2167_v29 = vand.u32 2147483647, %v2088_v5 }
 0xe69   :  { %vm2163_vm7 = vweird.f32 %v2088_v5 }
 0xe6a   :  { %v2067_v62 = vmul.f32 1.442695, %v2042_v30  ;;  %v2170_v58 = vor.u32 1.1754944e-38, %v2169_v43  ;;  %vm2168_vm9 = vcmp.eq.f32.partialorder %v2167_v29, 8.507059e+37 }
 0xe6c   :  { %6666 = vpow2.f32 %v2067_v62 }
 0xe6e   :  { %v6665_v60 = vpop.eup %6664 }
 0xe6f   :  { %v2159_v28 = vmul.f32 %v6665_v60, %v2088_v5  ;;  %v8202_v24 = vpop.xlane.xlu0 %2093  ;;  %vm2164_vm6 = vweird.f32 %v6665_v60 }
 0xe70   :  { %vm2165_vm8 = vmor %vm2163_vm7, %vm2164_vm6  ;;  %vm2208_vm7 = vweird.f32 %v8202_v24 }
 0xe71   :  { %v2160_v55 = vsub.f32 1.0, %v2159_v28 }
 0xe72   :  { %v8200_v33 = vpop.eup %6666  ;;  %v2024_v45 = vpop.xlane.xlu2 %2023 }
 0xe73   :  { %v2044_v20 = vsub.f32 %v8159_v7, %v2024_v45  ;;  %2099 = vadd.xlane.f32.xlu2 %v8200_v33  ;;  %v2161_v25 = vmul.f32 %v6665_v60, %v2160_v55 }
 0xe74   :  { %v2090_v0 = vpop.xlane.xlu1 %2089 }
 0xe75   :  { %v2071_v15 = vmul.f32 1.442695, %v2044_v20  ;;  %6668 = vrcp.f32 %v2090_v0  ;;  %v2162_v52 = vadd.f32 %v6665_v60, %v2161_v25  ;;  %v2182_v37 = vand.u32 2147483647, %v2090_v0 }
 0xe76   :  { %6670 = vrcp.f32 %v8202_v24  ;;  %vm2178_vm13 = vweird.f32 %v2090_v0 }
 0xe77   :  { %6672 = vpow2.f32 %v2071_v15  ;;  %v2166_v47 = vsel %vm2165_vm8, %v6665_v60, %v2162_v52  ;;  %vm2183_vm1 = vcmp.eq.f32.partialorder %v2182_v37, 8.507059e+37 }
 0xe78   :  { %v2171_v14 = vsel %vm2168_vm9, %v2170_v58, %v2166_v47 }
 0xe79   :  { %v2172_v7 = vmul.f32 %v8149_v26, %v2171_v14  ;;  %v2184_v26 = vand.u32 2147483648, %v2090_v0 }
 0xe7b   :  { %v6669_v36 = vpop.eup %6668  ;;  %2426 = vmatmul.f32.gmra.mxu1 %v2172_v7  ;;  %v2185_v28 = vor.u32 1.1754944e-38, %v2184_v26 }
 0xe7c   :  { %v8208_v44 = vpop.eup %6670  ;;  %v2174_v32 = vmul.f32 %v6669_v36, %v2090_v0  ;;  %v2092_v49 = vpop.xlane.xlu1 %2091  ;;  %vm2179_vm12 = vweird.f32 %v6669_v36 }
 0xe7d   :  { %v8210_v35 = vpop.xlane.xlu0 %2095  ;;  %v8212_v34 = vpop.eup %6672  ;;  %6674 = vrcp.f32 %v2092_v49  ;;  %v2204_v63 = vmul.f32 %v8208_v44, %v8202_v24  ;;  %vm2180_vm15 = vmor %vm2178_vm13, %vm2179_vm12  ;;  %v2199_v0 = vand.u32 2147483648, %v2092_v49  ;;  %vm2193_vm3 = vweird.f32 %v2092_v49 }
 0xe7e   :  { %v2175_v3 = vsub.f32 1.0, %v2174_v32  ;;  %2103 = vadd.xlane.f32.xlu1 %v8212_v34  ;;  %6676 = vrcp.f32 %v8210_v35  ;;  %v2197_v32 = vand.u32 2147483647, %v2092_v49  ;;  %vm2209_vm5 = vweird.f32 %v8208_v44 }
 0xe7f   :  { %v2205_v60 = vsub.f32 1.0, %v2204_v63  ;;  %vm2210_vm8 = vmor %vm2208_vm7, %vm2209_vm5  ;;  %vm2223_vm13 = vweird.f32 %v8210_v35 }
 0xe80   :  { %v2176_v5 = vmul.f32 %v6669_v36, %v2175_v3  ;;  %vm2198_vm6 = vcmp.eq.f32.partialorder %v2197_v32, 8.507059e+37 }
 0xe81   :  { %v2206_v14 = vmul.f32 %v8208_v44, %v2205_v60 }
 0xe82   :  { %v2177_v30 = vadd.f32 %v6669_v36, %v2176_v5 }
 0xe83   :  { %v6675_v62 = vpop.eup %6674  ;;  %v2207_v5 = vadd.f32 %v8208_v44, %v2206_v14 }
 0xe84   :  { %v2189_v55 = vmul.f32 %v6675_v62, %v2092_v49  ;;  %v2026_v45 = vpop.xlane.xlu1 %2025  ;;  %v2181_v20 = vsel %vm2180_vm15, %v6669_v36, %v2177_v30  ;;  %v8220_v25 = vpop.eup %6676  ;;  %vm2194_vm2 = vweird.f32 %v6675_v62  ;;  %v2212_v49 = vand.u32 2147483647, %v8202_v24 }
 0xe85   :  { %v8218_v43 = vpop.xlane.xlu0 %2097  ;;  %v2045_v29 = vsub.f32 %v8175_v40, %v2026_v45  ;;  %v2186_v15 = vsel %vm2183_vm1, %v2185_v28, %v2181_v20  ;;  %v2219_v7 = vmul.f32 %v8220_v25, %v8210_v35  ;;  %vm2195_vm4 = vmor %vm2193_vm3, %vm2194_vm2  ;;  %v2200_v40 = vor.u32 1.1754944e-38, %v2199_v0 }
 0xe86   :  { %v2190_v52 = vsub.f32 1.0, %v2189_v55  ;;  %v2187_v58 = vmul.f32 %v8163_v18, %v2186_v15  ;;  %6678 = vrcp.f32 %v8218_v43  ;;  %v2214_v28 = vand.u32 2147483648, %v8202_v24 }
 0xe87   :  { %v2073_v47 = vmul.f32 1.442695, %v2045_v29  ;;  %v2220_v18 = vsub.f32 1.0, %v2219_v7  ;;  %vm2213_vm9 = vcmp.eq.f32.partialorder %v2212_v49, 8.507059e+37  ;;  %vm2224_vm12 = vweird.f32 %v8220_v25 }
 0xe88   :  { %2429 = vmatmul.f32.gmra.mxu1 %v2187_v58  ;;  %v2191_v36 = vmul.f32 %v6675_v62, %v2190_v52  ;;  %v2229_v0 = vand.u32 2147483648, %v8210_v35  ;;  %vm2225_vm15 = vmor %vm2223_vm13, %vm2224_vm12  ;;  %vm2238_vm3 = vweird.f32 %v8218_v43 }
 0xe89   :  { %6680 = vpow2.f32 %v2073_v47  ;;  %v2221_v29 = vmul.f32 %v8220_v25, %v2220_v18 }
 0xe8a   :  { %v2192_v3 = vadd.f32 %v6675_v62, %v2191_v36 }
 0xe8b   :  { %v2222_v58 = vadd.f32 %v8220_v25, %v2221_v29 }
 0xe8c   :  { %v2028_v63 = vpop.xlane.xlu1 %2027  ;;  %v2196_v26 = vsel %vm2195_vm4, %v6675_v62, %v2192_v3  ;;  %v6679_v37 = vpop.eup %6678 }
 0xe8d   :  { %v2046_v30 = vsub.f32 %v8182_v1, %v2028_v63  ;;  %v2201_v60 = vsel %vm2198_vm6, %v2200_v40, %v2196_v26  ;;  %v2234_v62 = vmul.f32 %v6679_v37, %v8218_v43  ;;  %v2211_v1 = vsel %vm2210_vm8, %v8208_v44, %v2207_v5 }
 0xe8e   :  { %v2202_v55 = vmul.f32 %v8167_v19, %v2201_v60  ;;  %v2215_v19 = vor.u32 1.1754944e-38, %v2214_v28  ;;  %v2227_v44 = vand.u32 2147483647, %v8210_v35  ;;  %v2226_v32 = vsel %vm2225_vm15, %v8220_v25, %v2222_v58 }
 0xe8f   :  { %v8235_v45 = vpop.eup %6680  ;;  %v2075_v20 = vmul.f32 1.442695, %v2046_v30  ;;  %v2235_v24 = vsub.f32 1.0, %v2234_v62  ;;  %vm2239_vm2 = vweird.f32 %v6679_v37  ;;  %v2244_v35 = vand.u32 2147483648, %v8218_v43 }
 0xe90   :  { %2105 = vadd.xlane.f32.xlu2 %v8235_v45  ;;  %2432 = vmatmul.f32.gmra.mxu1 %v2202_v55  ;;  %v2216_v15 = vsel %vm2213_vm9, %v2215_v19, %v2211_v1  ;;  %vm2228_vm1 = vcmp.eq.f32.partialorder %v2227_v44, 8.507059e+37  ;;  %v2242_v5 = vand.u32 2147483647, %v8218_v43  ;;  %vm2240_vm4 = vmor %vm2238_vm3, %vm2239_vm2  ;;  %v10043_v43 = vpack.i.bf16 %v7931_v13, %v7925_v27 }
 0xe91   :  { %6682 = vpow2.f32 %v2075_v20  ;;  %v2217_v14 = vmul.f32 %v8155_v2, %v2216_v15  ;;  %v2236_v3 = vmul.f32 %v6679_v37, %v2235_v24  ;;  %v2245_v28 = vor.u32 1.1754944e-38, %v2244_v35 }
 0xe92   :  { %vm2243_vm5 = vcmp.eq.f32.partialorder %v2242_v5, 8.507059e+37 }
 0xe93   :  { %v2237_v2 = vadd.f32 %v6679_v37, %v2236_v3 }
 0xe94   :  { %v2030_v52 = vpop.xlane.xlu1 %2029 }
 0xe95   :  { %v2047_v47 = vsub.f32 %v8189_v9, %v2030_v52  ;;  %v2230_v9 = vor.u32 1.1754944e-38, %v2229_v0  ;;  %v2241_v60 = vsel %vm2240_vm4, %v6679_v37, %v2237_v2  ;;  %v2102_v37 = vpop.xlane.xlu0 %2101 }
 0xe96   :  { %v2274_v3 = vand.u32 2147483648, %v2102_v37  ;;  %vm2268_vm13 = vweird.f32 %v2102_v37 }
 0xe97   :  { %v8250_v7 = vpop.eup %6682  ;;  %v2077_v36 = vmul.f32 1.442695, %v2047_v47  ;;  %v2231_v40 = vsel %vm2228_vm1, %v2230_v9, %v2226_v32 }
 0xe98   :  { %2107 = vadd.xlane.f32.xlu0 %v8250_v7  ;;  %2435 = vmatmul.f32.gmra.mxu1 %v2217_v14  ;;  %v2232_v26 = vmul.f32 %v8169_v12, %v2231_v40  ;;  %v10042_v12 = vpack.i.bf16 %v7919_v8, %v7913_v57 }
 0xe99   :  { %6684 = vpow2.f32 %v2077_v36 }
 0xe9c   :  { %v2032_v18 = vpop.xlane.xlu1 %2031 }
 0xe9d   :  { %v2048_v63 = vsub.f32 %v8193_v61, %v2032_v18  ;;  %v2246_v61 = vsel %vm2243_vm5, %v2245_v28, %v2241_v60  ;;  %v2272_v18 = vand.u32 2147483647, %v2102_v37 }
 0xe9e   :  { %v2247_v55 = vmul.f32 %v8177_v21, %v2246_v61 }
 0xe9f   :  { %v8259_v30 = vpop.eup %6684  ;;  %v2079_v25 = vmul.f32 1.442695, %v2048_v63  ;;  %vm2273_vm1 = vcmp.eq.f32.partialorder %v2272_v18, 8.507059e+37 }
 0xea0   :  { %2109 = vadd.xlane.f32.xlu1 %v8259_v30  ;;  %2438 = vmatmul.f32.gmra.mxu1 %v2232_v26  ;;  %v2275_v26 = vor.u32 1.1754944e-38, %v2274_v3 }
 0xea1   :  { %6686 = vpow2.f32 %v2079_v25 }
 0xea2   :  { %6688 = vrcp.f32 %v2102_v37 }
 0xea7   :  { %v8263_v49 = vpop.eup %6686 }
 0xea8   :  { %2111 = vadd.xlane.f32.xlu2 %v8263_v49  ;;  %2441 = vmatmul.f32.gmra.mxu1 %v2247_v55  ;;  %v6689_v21 = vpop.eup %6688 }
 0xea9   :  { %v2264_v1 = vmul.f32 %v6689_v21, %v2102_v37  ;;  %vm2269_vm12 = vweird.f32 %v6689_v21 }
 0xeaa   :  { %vm2270_vm15 = vmor %vm2268_vm13, %vm2269_vm12 }
 0xeab   :  { %v2265_v15 = vsub.f32 1.0, %v2264_v1 }
 0xeac   :  { %6423 = vrot.lane.b32.xlu0 %v10042_v12, %s6946_s10 }
 0xead   :  { %v2266_v58 = vmul.f32 %v6689_v21, %v2265_v15 }
 0xeaf   :  { %v2267_v36 = vadd.f32 %v6689_v21, %v2266_v58 }
 0xeb1   :  { %v2271_v63 = vsel %vm2270_vm15, %v6689_v21, %v2267_v36 }
 0xeb2   :  { %v2276_v25 = vsel %vm2273_vm1, %v2275_v26, %v2271_v63 }
 0xeb3   :  { %v2277_v55 = vmul.f32 %v8184_v10, %v2276_v25 }
 0xec0   :  { %6428 = vrot.lane.b32.xlu2 %v10043_v43, %s6946_s10 }
 0xec3   :  { %v8274_v20 = vpop.f32.mrf.mxu1 }
 0xecb   :  { %v8276_v29 = vpop.f32.mrf.mxu1 }
 0xed3   :  { %v8278_v0 = vpop.f32.mrf.mxu1 }
 0xee6   :  { %v2100_v62 = vpop.xlane.xlu2 %2099 }
 0xee7   :  { %6690 = vrcp.f32 %v2100_v62  ;;  %v2259_v52 = vand.u32 2147483648, %v2100_v62  ;;  %v2257_v13 = vand.u32 2147483647, %v2100_v62  ;;  %vm2253_vm7 = vweird.f32 %v2100_v62 }
 0xee9   :  { %v2260_v14 = vor.u32 1.1754944e-38, %v2259_v52  ;;  %vm2258_vm9 = vcmp.eq.f32.partialorder %v2257_v13, 8.507059e+37 }
 0xeed   :  { %v6691_v19 = vpop.eup %6690 }
 0xeee   :  { %v2249_v24 = vmul.f32 %v6691_v19, %v2100_v62  ;;  %vm2254_vm6 = vweird.f32 %v6691_v19 }
 0xeef   :  { %vm2255_vm8 = vmor %vm2253_vm7, %vm2254_vm6 }
 0xef0   :  { %v2250_v57 = vsub.f32 1.0, %v2249_v24 }
 0xef1   :  { %v2104_v8 = vpop.xlane.xlu1 %2103 }
 0xef2   :  { %6692 = vrcp.f32 %v2104_v8  ;;  %v2251_v27 = vmul.f32 %v6691_v19, %v2250_v57  ;;  %v2289_v61 = vand.u32 2147483648, %v2104_v8  ;;  %vm2283_vm3 = vweird.f32 %v2104_v8 }
 0xef4   :  { %v2252_v47 = vadd.f32 %v6691_v19, %v2251_v27  ;;  %v2290_v37 = vor.u32 1.1754944e-38, %v2289_v61 }
 0xef6   :  { %v2256_v44 = vsel %vm2255_vm8, %v6691_v19, %v2252_v47 }
 0xef7   :  { %v2261_v32 = vsel %vm2258_vm9, %v2260_v14, %v2256_v44 }
 0xef8   :  { %v6693_v9 = vpop.eup %6692  ;;  %v2262_v40 = vmul.f32 %v8200_v33, %v2261_v32  ;;  %v8281_v5 = vpop.f32.mrf.mxu1  ;;  %v2287_v33 = vand.u32 2147483647, %v2104_v8 }
 0xef9   :  { %v2279_v2 = vmul.f32 %v6693_v9, %v2104_v8  ;;  %vm2284_vm2 = vweird.f32 %v6693_v9 }
 0xefa   :  { %2444 = vmatmul.f32.gmra.mxu1 %v2262_v40  ;;  %vm2285_vm4 = vmor %vm2283_vm3, %vm2284_vm2  ;;  %vm2288_vm5 = vcmp.eq.f32.partialorder %v2287_v33, 8.507059e+37 }
 0xefb   :  { %v2280_v35 = vsub.f32 1.0, %v2279_v2 }
 0xefd   :  { %v2281_v60 = vmul.f32 %v6693_v9, %v2280_v35 }
 0xeff   :  { %v2282_v28 = vadd.f32 %v6693_v9, %v2281_v60 }
 0xf01   :  { %v2286_v12 = vsel %vm2285_vm4, %v6693_v9, %v2282_v28 }
 0xf02   :  { %2447 = vmatmul.f32.gmra.mxu1 %v2277_v55  ;;  %v2291_v62 = vsel %vm2288_vm5, %v2290_v37, %v2286_v12 }
 0xf03   :  { %v2106_v43 = vpop.xlane.xlu2 %2105  ;;  %v2292_v1 = vmul.f32 %v8212_v34, %v2291_v62 }
 0xf04   :  { %6694 = vrcp.f32 %v2106_v43  ;;  %v2304_v8 = vand.u32 2147483648, %v2106_v43  ;;  %v2302_v58 = vand.u32 2147483647, %v2106_v43  ;;  %vm2298_vm7 = vweird.f32 %v2106_v43 }
 0xf05   :  { %v2430_v21 = vpop.f32.mrf.mxu1 }
 0xf06   :  { %2470 = vrot.lane.b32.xlu1 %v2430_v21, %s6947_s11  ;;  %v2305_v47 = vor.u32 1.1754944e-38, %v2304_v8  ;;  %vm2303_vm9 = vcmp.eq.f32.partialorder %v2302_v58, 8.507059e+37 }
 0xf0a   :  { %v6695_v19 = vpop.eup %6694  ;;  %2450 = vmatmul.f32.gmra.mxu1 %v2292_v1 }
 0xf0b   :  { %v2294_v15 = vmul.f32 %v6695_v19, %v2106_v43  ;;  %v2108_v24 = vpop.xlane.xlu0 %2107  ;;  %vm2299_vm6 = vweird.f32 %v6695_v19 }
 0xf0c   :  { %6696 = vrcp.f32 %v2108_v24  ;;  %vm2300_vm8 = vmor %vm2298_vm7, %vm2299_vm6  ;;  %v2319_v40 = vand.u32 2147483648, %v2108_v24  ;;  %v2317_v2 = vand.u32 2147483647, %v2108_v24  ;;  %vm2313_vm13 = vweird.f32 %v2108_v24 }
 0xf0d   :  { %v2295_v10 = vsub.f32 1.0, %v2294_v15  ;;  %v8286_v57 = vpop.f32.mrf.mxu1 }
 0xf0e   :  { %v2320_v26 = vor.u32 1.1754944e-38, %v2319_v40  ;;  %vm2318_vm1 = vcmp.eq.f32.partialorder %v2317_v2, 8.507059e+37 }
 0xf0f   :  { %v2296_v52 = vmul.f32 %v6695_v19, %v2295_v10 }
 0xf11   :  { %v2297_v27 = vadd.f32 %v6695_v19, %v2296_v52 }
 0xf12   :  { %v6697_v13 = vpop.eup %6696 }
 0xf13   :  { %v2309_v14 = vmul.f32 %v6697_v13, %v2108_v24  ;;  %v2110_v44 = vpop.xlane.xlu1 %2109  ;;  %v2301_v34 = vsel %vm2300_vm8, %v6695_v19, %v2297_v27  ;;  %vm2314_vm12 = vweird.f32 %v6697_v13 }
 0xf14   :  { %6698 = vrcp.f32 %v2110_v44  ;;  %v2306_v36 = vsel %vm2303_vm9, %v2305_v47, %v2301_v34  ;;  %vm2315_vm15 = vmor %vm2313_vm13, %vm2314_vm12  ;;  %v2334_v12 = vand.u32 2147483648, %v2110_v44  ;;  %v2332_v37 = vand.u32 2147483647, %v2110_v44 }
 0xf15   :  { %v2310_v32 = vsub.f32 1.0, %v2309_v14  ;;  %v2436_v3 = vpop.f32.mrf.mxu1  ;;  %v2307_v9 = vmul.f32 %v8235_v45, %v2306_v36  ;;  %vm2328_vm3 = vweird.f32 %v2110_v44 }
 0xf16   :  { %v2335_v1 = vor.u32 1.1754944e-38, %v2334_v12  ;;  %vm2333_vm5 = vcmp.eq.f32.partialorder %v2332_v37, 8.507059e+37 }
 0xf17   :  { %2453 = vmatmul.f32.gmra.mxu1 %v2307_v9  ;;  %v2311_v18 = vmul.f32 %v6697_v13, %v2310_v32 }
 0xf19   :  { %v2312_v63 = vadd.f32 %v6697_v13, %v2311_v18 }
 0xf1a   :  { %v6699_v35 = vpop.eup %6698 }
 0xf1b   :  { %v2324_v25 = vmul.f32 %v6699_v35, %v2110_v44  ;;  %v2112_v60 = vpop.xlane.xlu2 %2111  ;;  %v2316_v28 = vsel %vm2315_vm15, %v6697_v13, %v2312_v63  ;;  %vm2329_vm2 = vweird.f32 %v6699_v35 }
 0xf1c   :  { %6700 = vrcp.f32 %v2112_v60  ;;  %v2321_v61 = vsel %vm2318_vm1, %v2320_v26, %v2316_v28  ;;  %vm2330_vm4 = vmor %vm2328_vm3, %vm2329_vm2  ;;  %v2347_v27 = vand.u32 2147483647, %v2112_v60  ;;  %vm2343_vm7 = vweird.f32 %v2112_v60 }
 0xf1d   :  { %v2325_v55 = vsub.f32 1.0, %v2324_v25  ;;  %v2439_v33 = vpop.f32.mrf.mxu1  ;;  %v2322_v45 = vmul.f32 %v8250_v7, %v2321_v61  ;;  %v2349_v7 = vand.u32 2147483648, %v2112_v60 }
 0xf1e   :  { %vm2348_vm9 = vcmp.eq.f32.partialorder %v2347_v27, 8.507059e+37 }
 0xf1f   :  { %2456 = vmatmul.f32.gmra.mxu1 %v2322_v45  ;;  %v2326_v43 = vmul.f32 %v6699_v35, %v2325_v55  ;;  %v2350_v47 = vor.u32 1.1754944e-38, %v2349_v7 }
 0xf21   :  { %v2327_v21 = vadd.f32 %v6699_v35, %v2326_v43 }
 0xf22   :  { %v6701_v62 = vpop.eup %6700 }
 0xf23   :  { %v2339_v19 = vmul.f32 %v6701_v62, %v2112_v60  ;;  %v2331_v15 = vsel %vm2330_vm4, %v6699_v35, %v2327_v21  ;;  %vm2344_vm6 = vweird.f32 %v6701_v62 }
 0xf24   :  { %v2336_v24 = vsel %vm2333_vm5, %v2335_v1, %v2331_v15  ;;  %vm2345_vm8 = vmor %vm2343_vm7, %vm2344_vm6 }
 0xf25   :  { %v2340_v10 = vsub.f32 1.0, %v2339_v19  ;;  %v2442_v8 = vpop.f32.mrf.mxu1  ;;  %v2337_v52 = vmul.f32 %v8259_v30, %v2336_v24  ;;  %v6424_v30 = vpop.permute.xlu0 %6423 }
 0xf26   :  { %2486 = vrot.lane.b32.xlu0 %v2442_v8, %s6948_s12  ;;  %v6426_v36 = vunpack.i.h.bf16 %v6424_v30  ;;  %v6425_v32 = vunpack.i.l.bf16 %v6424_v30 }
 0xf27   :  { %2459 = vmatmul.f32.gmra.mxu1 %v2337_v52  ;;  %v2341_v58 = vmul.f32 %v6701_v62, %v2340_v10 }
 0xf28   :  { %2566 = vmatpush.msra.mxu2 %v6425_v32 }
 0xf29   :  { %v2342_v13 = vadd.f32 %v6701_v62, %v2341_v58 }
 0xf2a   :  { %2567 = vmatpush.msra.mxu2 %v6426_v36 }
 0xf2b   :  { %v2346_v14 = vsel %vm2345_vm8, %v6701_v62, %v2342_v13 }
 0xf2c   :  { %v2351_v44 = vsel %vm2348_vm9, %v2350_v47, %v2346_v14 }
 0xf2d   :  { %v2352_v34 = vmul.f32 %v8263_v49, %v2351_v44 }
 0xf2e   :  { %2472 = vrot.lane.b32.xlu0 %v8286_v57, %s6947_s11  ;;  %v6429_v57 = vpop.permute.xlu2 %6428 }
 0xf2f   :  { %2462 = vmatmul.f32.gmra.mxu1 %v2352_v34  ;;  %v6431_v18 = vunpack.i.h.bf16 %v6429_v57  ;;  %v6430_v2 = vunpack.i.l.bf16 %v6429_v57 }
 0xf31   :  { %2568 = vmatpush.msra.mxu2 %v6430_v2 }
 0xf33   :  { %2569 = vmatpush.msra.mxu2 %v6431_v18 }
 0xf36   :  { %2474 = vrot.lane.b32.xlu0 %v2436_v3, %s6947_s11 }
 0xf3e   :  { %2476 = vrot.lane.b32.xlu0 %v2439_v33, %s6947_s11 }
 0xf77   :  { %v2445_v9 = vpop.f32.mrf.mxu1 }
 0xf78   :  { %2488 = vrot.lane.b32.xlu2 %v2445_v9, %s6948_s12  ;;  %v2471_v60 = vpop.permute.xlu1 %2470 }
 0xf79   :  { %v2514_v28 = vsel %vm529_vm14, %v8274_v20, %v2471_v60 }
 0xf7f   :  { %v2448_v40 = vpop.f32.mrf.mxu1 }
 0xf80   :  { %2490 = vrot.lane.b32.xlu2 %v2448_v40, %s6948_s12 }
 0xf87   :  { %v2451_v49 = vpop.f32.mrf.mxu1 }
 0xf88   :  { %2492 = vrot.lane.b32.xlu2 %v2451_v49, %s6948_s12 }
 0xf94   :  { %v2454_v3 = vpop.f32.mrf.mxu1 }
 0xf95   :  { %2502 = vrot.lane.b32.xlu1 %v2454_v3, %s6949_s13 }
 0xf98   :  { %v2487_v25 = vpop.permute.xlu0 %2486 }
 0xf99   :  { %v2518_v61 = vsel %vm1192_vm10, %v2514_v28, %v2487_v25 }
 0xf9c   :  { %v2457_v63 = vpop.f32.mrf.mxu1 }
 0xf9d   :  { %2504 = vrot.lane.b32.xlu1 %v2457_v63, %s6949_s13  ;;  %v6059_v63 = vld [vmem:[%s10032_s2 + $0x68] sm:$0xff] }
 0xfa0   :  { %v2473_v55 = vpop.permute.xlu0 %2472 }
 0xfa1   :  { %v2515_v43 = vsel %vm529_vm14, %v8276_v29, %v2473_v55 }
 0xfa4   :  { %v2460_v35 = vpop.f32.mrf.mxu1 }
 0xfa5   :  { %2506 = vrot.lane.b32.xlu1 %v2460_v35, %s6949_s13 }
 0xfa8   :  { %v2475_v1 = vpop.permute.xlu0 %2474 }
 0xfa9   :  { %v2516_v19 = vsel %vm529_vm14, %v8278_v0, %v2475_v1  ;;  %v8327_v0 = vld [vmem:[%s10033_s4 + $0x8] sm:$0x7f] }
 0xfaa   :  { %v2587_v13 = vperm.slane %v8327_v0, 2 }
 0xfac   :  { %v2463_v26 = vpop.f32.mrf.mxu1 }
 0xfad   :  { %2508 = vrot.lane.b32.xlu1 %v2463_v26, %s6949_s13 }
 0xfb0   :  { %v2477_v29 = vpop.permute.xlu0 %2476 }
 0xfb1   :  { %v2517_v52 = vsel %vm529_vm14, %v8281_v5, %v2477_v29 }
 0xfd2   :  { %v2489_v45 = vpop.permute.xlu2 %2488 }
 0xfd3   :  { %v2519_v37 = vsel %vm1192_vm10, %v2515_v43, %v2489_v45 }
 0xfda   :  { %v2491_v20 = vpop.permute.xlu2 %2490 }
 0xfdb   :  { %v2520_v15 = vsel %vm1192_vm10, %v2516_v19, %v2491_v20 }
 0xfe2   :  { %v2493_v8 = vpop.permute.xlu2 %2492 }
 0xfe3   :  { %v2521_v7 = vsel %vm1192_vm10, %v2517_v52, %v2493_v8 }
0x1007   :  { %v2503_v33 = vpop.permute.xlu1 %2502 }
0x1008   :  { %v2522_v12 = vsel %vm1197_vm11, %v2518_v61, %v2503_v33 }
0x1009   :  { %6099 = vmatmul.msk.f32.vlgmr.msra.gmra.mxu2 %vm294_vm0, %v2522_v12 }
0x100f   :  { %v2505_v21 = vpop.permute.xlu1 %2504 }
0x1010   :  { %v2523_v62 = vsel %vm1197_vm11, %v2519_v37, %v2505_v21 }
0x1011   :  { %6100 = vmatmul.msk.f32.gmra.mxu2 %vm294_vm0, %v2523_v62 }
0x1017   :  { %v2507_v24 = vpop.permute.xlu1 %2506 }
0x1018   :  { %v2524_v10 = vsel %vm1197_vm11, %v2520_v15, %v2507_v24 }
0x1019   :  { %6101 = vmatmul.msk.f32.gmra.mxu2 %vm294_vm0, %v2524_v10  ;;  %v6055_v10 = vld [vmem:[%s10032_s2 + $0x48] sm:$0xff] }
0x101f   :  { %v2509_v58 = vpop.permute.xlu1 %2508 }
0x1020   :  { %v2525_v27 = vsel %vm1197_vm11, %v2521_v7, %v2509_v58 }
0x1021   :  { %6102 = vmatmul.msk.f32.gmra.mxu2 %vm294_vm0, %v2525_v27 }
0x108c   :  { %v2571_v47 = vpop.f32.mrf.mxu2 }
0x108d   :  { %v2583_v14 = vadd.f32 %v2571_v47, %v7867_v31 }
0x108f   :  { %v8331_v44 = vadd.f32 %v2587_v13, %v2583_v14 }
0x1091   :  { %v2592_v5 = vsel %vm294_vm0, %v8331_v44, 0.0 }
0x1092   :  { %2593 = vadd.xlane.f32.xlu0 %v2592_v5 }
0x1094   :  { %v2574_v34 = vpop.f32.mrf.mxu2 }
0x1095   :  { %v2584_v30 = vadd.f32 %v2574_v34, %v7872_v16 }
0x1097   :  { %v8336_v36 = vadd.f32 %v2587_v13, %v2584_v30 }
0x1099   :  { %v2595_v32 = vsel %vm294_vm0, %v8336_v36, 0.0 }
0x109a   :  { %2596 = vadd.xlane.f32.xlu2 %v2595_v32 }
0x109c   :  { %v2577_v9 = vpop.f32.mrf.mxu2 }
0x109d   :  { %v2585_v40 = vadd.f32 %v2577_v9, %v7877_v41  ;;  %v6061_v41 = vld [vmem:[%s10032_s2 + $0x78] sm:$0xff] }
0x109e   :  { %2715 = vmatpush.msrb.mxu3 %v6061_v41 }
0x109f   :  { %v8341_v49 = vadd.f32 %v2587_v13, %v2585_v40 }
0x10a0   :  { %2716 = vmatpush.msrb.mxu3 %v6059_v63 }
0x10a1   :  { %v2598_v31 = vsel %vm294_vm0, %v8341_v49, 0.0 }
0x10a2   :  { %2599 = vadd.xlane.f32.xlu1 %v2598_v31 }
0x10a4   :  { %v2580_v57 = vpop.f32.mrf.mxu2 }
0x10a5   :  { %v2586_v18 = vadd.f32 %v2580_v57, %v7882_v51  ;;  %v6057_v51 = vld [vmem:[%s10032_s2 + $0x58] sm:$0xff] }
0x10a6   :  { %2717 = vmatpush.msrb.mxu3 %v6057_v51  ;;  %v2685_v51 = vperm.slane %v8327_v0, 4 }
0x10a7   :  { %v8346_v2 = vadd.f32 %v2587_v13, %v2586_v18  ;;  %v8390_v18 = vperm.slane %v8327_v0, 3 }
0x10a8   :  { %2718 = vmatpush.msrb.mxu3 %v6055_v10 }
0x10a9   :  { %v2601_v16 = vsel %vm294_vm0, %v8346_v2, 0.0 }
0x10aa   :  { %2602 = vadd.xlane.f32.xlu2 %v2601_v16  ;;  %v6122_v16 = vld [vmem:[%s10034_s3 + $0xf8] sm:$0xff] }
0x10ab   :  { %2910 = vmatpush.msrb.mxu0 %v6122_v16  ;;  %6305 = vmatpush.msrb.mxu2 %v6122_v16 }
0x1105   :  { %v2594_v3 = vpop.xlane.xlu0 %2593 }
0x1106   :  { %v2604_v35 = vmul.f32 %v2594_v3, %v7138_v6  ;;  %v6121_v3 = vld [vmem:[%s10034_s3 + $0xf0] sm:$0xff] }
0x1107   :  { %2911 = vmatpush.msrb.mxu0 %v6121_v3  ;;  %6306 = vmatpush.msrb.mxu2 %v6121_v3 }
0x1108   :  { %v2608_v26 = vsub.f32 %v8331_v44, %v2604_v35 }
0x110a   :  { %v2612_v25 = vmul.f32 %v2608_v26, %v2608_v26 }
0x110c   :  { %v2616_v60 = vsel %vm294_vm0, %v2612_v25, 0.0  ;;  %v6120_v25 = vld [vmem:[%s10034_s3 + $0xe8] sm:$0xff] }
0x110d   :  { %2617 = vadd.xlane.f32.xlu0 %v2616_v60  ;;  %v2597_v28 = vpop.xlane.xlu2 %2596  ;;  %2912 = vmatpush.msrb.mxu0 %v6120_v25 }
0x110e   :  { %v2605_v61 = vmul.f32 %v2597_v28, %v7138_v6  ;;  %6307 = vmatpush.msrb.mxu2 %v6120_v25 }
0x1110   :  { %v8364_v55 = vsub.f32 %v8336_v36, %v2605_v61 }
0x1112   :  { %v2613_v33 = vmul.f32 %v8364_v55, %v8364_v55 }
0x1114   :  { %v2619_v45 = vsel %vm294_vm0, %v2613_v33, 0.0 }
0x1115   :  { %2620 = vadd.xlane.f32.xlu1 %v2619_v45  ;;  %v2600_v12 = vpop.xlane.xlu1 %2599  ;;  %v6119_v45 = vld [vmem:[%s10034_s3 + $0xe0] sm:$0xff] }
0x1116   :  { %v2606_v43 = vmul.f32 %v2600_v12, %v7138_v6  ;;  %2913 = vmatpush.msrb.mxu0 %v6119_v45  ;;  %6308 = vmatpush.msrb.mxu2 %v6119_v45 }
0x1118   :  { %v8371_v37 = vsub.f32 %v8341_v49, %v2606_v43 }
0x111a   :  { %v2614_v21 = vmul.f32 %v8371_v37, %v8371_v37 }
0x111c   :  { %v2622_v62 = vsel %vm294_vm0, %v2614_v21, 0.0 }
0x111d   :  { %v2603_v1 = vpop.xlane.xlu2 %2602  ;;  %2623 = vadd.xlane.f32.xlu2 %v2622_v62  ;;  %v6118_v62 = vld [vmem:[%s10034_s3 + $0xd8] sm:$0xff] }
0x111e   :  { %v2607_v20 = vmul.f32 %v2603_v1, %v7138_v6  ;;  %2914 = vmatpush.msrb.mxu0 %v6118_v62  ;;  %6309 = vmatpush.msrb.mxu2 %v6118_v62  ;;  %v6112_v62 = vld [vmem:[%s10034_s3 + $0xa8] sm:$0xff] }
0x1120   :  { %v8378_v19 = vsub.f32 %v8346_v2, %v2607_v20 }
0x1122   :  { %v2615_v15 = vmul.f32 %v8378_v19, %v8378_v19 }
0x1124   :  { %v2625_v24 = vsel %vm294_vm0, %v2615_v15, 0.0  ;;  %v6117_v15 = vld [vmem:[%s10034_s3 + $0xd0] sm:$0xff] }
0x1125   :  { %2626 = vadd.xlane.f32.xlu0 %v2625_v24  ;;  %2915 = vmatpush.msrb.mxu0 %v6117_v15 }
0x1126   :  { %6310 = vmatpush.msrb.mxu2 %v6117_v15 }
0x1180   :  { %v2618_v29 = vpop.xlane.xlu0 %2617 }
0x1181   :  { %v2628_v8 = vmul.f32 %v2618_v29, %v7138_v6 }
0x1183   :  { %v2632_v52 = vadd.f32 1e-05, %v2628_v8 }
0x1185   :  { %6702 = vrsqrt.f32 %v2632_v52  ;;  %vm2642_vm13 = vweird.f32 %v2632_v52 }
0x1188   :  { %v2621_v7 = vpop.xlane.xlu1 %2620 }
0x1189   :  { %v2629_v58 = vmul.f32 %v2621_v7, %v7138_v6 }
0x118b   :  { %v6703_v27 = vpop.eup %6702  ;;  %v2633_v13 = vadd.f32 1e-05, %v2629_v58 }
0x118c   :  { %v2637_v47 = vmul.f32 %v6703_v27, %v2632_v52  ;;  %vm2643_vm12 = vweird.f32 %v6703_v27 }
0x118d   :  { %6704 = vrsqrt.f32 %v2633_v13  ;;  %vm2644_vm15 = vmor %vm2642_vm13, %vm2643_vm12  ;;  %vm2652_vm2 = vweird.f32 %v2633_v13 }
0x118e   :  { %v2638_v14 = vmul.f32 %v6703_v27, %v2637_v47 }
0x1190   :  { %v2639_v5 = vmul.f32 0.5, %v2638_v14  ;;  %v2624_v34 = vpop.xlane.xlu2 %2623 }
0x1191   :  { %v2630_v30 = vmul.f32 %v2624_v34, %v7138_v6 }
0x1192   :  { %v2640_v32 = vsub.f32 1.5, %v2639_v5 }
0x1193   :  { %v6705_v9 = vpop.eup %6704  ;;  %v2634_v40 = vadd.f32 1e-05, %v2630_v30 }
0x1194   :  { %v2641_v31 = vmul.f32 %v6703_v27, %v2640_v32  ;;  %v2647_v57 = vmul.f32 %v6705_v9, %v2633_v13  ;;  %vm2653_vm1 = vweird.f32 %v6705_v9 }
0x1195   :  { %6706 = vrsqrt.f32 %v2634_v40  ;;  %vm2654_vm3 = vmor %vm2652_vm2, %vm2653_vm1  ;;  %vm2662_vm5 = vweird.f32 %v2634_v40 }
0x1196   :  { %v2645_v41 = vsel %vm2644_vm15, %v6703_v27, %v2641_v31  ;;  %v2648_v63 = vmul.f32 %v6705_v9, %v2647_v57 }
0x1197   :  { %v2676_v35 = vmul.f32 %v2645_v41, %v2608_v26 }
0x1198   :  { %v2649_v60 = vmul.f32 0.5, %v2648_v63  ;;  %v2627_v28 = vpop.xlane.xlu0 %2626 }
0x1199   :  { %v2631_v61 = vmul.f32 %v2627_v28, %v7138_v6  ;;  %v2681_v33 = vmul.f32 %v8390_v18, %v2676_v35 }
0x119a   :  { %v2650_v12 = vsub.f32 1.5, %v2649_v60 }
0x119b   :  { %v6707_v26 = vpop.eup %6706  ;;  %v2635_v43 = vadd.f32 1e-05, %v2631_v61  ;;  %v2686_v21 = vadd.f32 %v2685_v51, %v2681_v33  ;;  %v6115_v61 = vld [vmem:[%s10034_s3 + $0xc0] sm:$0xff]  ;;  %v6114_v33 = vld [vmem:[%s10034_s3 + $0xb8] sm:$0xff] }
0x119c   :  { %v2651_v1 = vmul.f32 %v6705_v9, %v2650_v12  ;;  %v2657_v20 = vmul.f32 %v6707_v26, %v2634_v40  ;;  %vm2663_vm4 = vweird.f32 %v6707_v26 }
0x119d   :  { %6708 = vrsqrt.f32 %v2635_v43  ;;  %6103 = vmatmul.msk.f32.vlgmr.msrb.gmra.mxu3 %vm294_vm0, %v2686_v21  ;;  %vm2664_vm6 = vmor %vm2662_vm5, %vm2663_vm4  ;;  %vm2672_vm8 = vweird.f32 %v2635_v43 }
0x119e   :  { %v2658_v24 = vmul.f32 %v6707_v26, %v2657_v20  ;;  %v2655_v10 = vsel %vm2654_vm3, %v6705_v9, %v2651_v1 }
0x119f   :  { %v2677_v29 = vmul.f32 %v2655_v10, %v8364_v55  ;;  %v6111_v10 = vld [vmem:[%s10034_s3 + $0xa0] sm:$0xff] }
0x11a0   :  { %v2659_v8 = vmul.f32 0.5, %v2658_v24 }
0x11a1   :  { %v2682_v52 = vmul.f32 %v8390_v18, %v2677_v29 }
0x11a2   :  { %v2660_v7 = vsub.f32 1.5, %v2659_v8 }
0x11a3   :  { %v6709_v58 = vpop.eup %6708  ;;  %v2687_v27 = vadd.f32 %v2685_v51, %v2682_v52  ;;  %v6110_v52 = vld [vmem:[%s10034_s3 + $0x98] sm:$0xff] }
0x11a4   :  { %v2661_v13 = vmul.f32 %v6707_v26, %v2660_v7  ;;  %v2667_v47 = vmul.f32 %v6709_v58, %v2635_v43  ;;  %vm2673_vm7 = vweird.f32 %v6709_v58 }
0x11a5   :  { %6104 = vmatmul.msk.f32.gmra.mxu3 %vm294_vm0, %v2687_v27  ;;  %vm2674_vm9 = vmor %vm2672_vm8, %vm2673_vm7 }
0x11a6   :  { %v2668_v14 = vmul.f32 %v6709_v58, %v2667_v47  ;;  %v2665_v5 = vsel %vm2664_vm6, %v6707_v26, %v2661_v13  ;;  %v6113_v26 = vld [vmem:[%s10034_s3 + $0xb0] sm:$0xff] }
0x11a7   :  { %v2678_v34 = vmul.f32 %v2665_v5, %v8371_v37  ;;  %v2690_v37 = vperm.slane %v8327_v0, 6  ;;  %v6109_v47 = vld [vmem:[%s10034_s3 + $0x90] sm:$0xff] }
0x11a8   :  { %v2669_v55 = vmul.f32 0.5, %v2668_v14 }
0x11a9   :  { %v2683_v30 = vmul.f32 %v8390_v18, %v2678_v34 }
0x11aa   :  { %v2670_v32 = vsub.f32 1.5, %v2669_v55  ;;  %v6108_v55 = vld [vmem:[%s10034_s3 + $0x88] sm:$0xff] }
0x11ab   :  { %v2688_v9 = vadd.f32 %v2685_v51, %v2683_v30 }
0x11ac   :  { %v2671_v31 = vmul.f32 %v6709_v58, %v2670_v32 }
0x11ad   :  { %6105 = vmatmul.msk.f32.gmra.mxu3 %vm294_vm0, %v2688_v9 }
0x11ae   :  { %v2675_v40 = vsel %vm2674_vm9, %v6709_v58, %v2671_v31 }
0x11af   :  { %v2679_v57 = vmul.f32 %v2675_v40, %v8378_v19  ;;  %v6116_v19 = vld [vmem:[%s10034_s3 + $0xc8] sm:$0xff] }
0x11b0   :  { %2916 = vmatpush.msrb.mxu0 %v6116_v19  ;;  %6311 = vmatpush.msrb.mxu2 %v6116_v19 }
0x11b1   :  { %v2684_v16 = vmul.f32 %v8390_v18, %v2679_v57 }
0x11b2   :  { %2917 = vmatpush.msrb.mxu0 %v6115_v61  ;;  %6312 = vmatpush.msrb.mxu2 %v6115_v61 }
0x11b3   :  { %v2689_v3 = vadd.f32 %v2685_v51, %v2684_v16  ;;  %v6107_v16 = vld [vmem:[%s10034_s3 + $0x80] sm:$0xff] }
0x11b4   :  { %2918 = vmatpush.msrb.mxu0 %v6114_v33  ;;  %6313 = vmatpush.msrb.mxu2 %v6114_v33 }
0x11b5   :  { %6106 = vmatmul.msk.f32.gmra.mxu3 %vm294_vm0, %v2689_v3 }
0x11b6   :  { %2919 = vmatpush.msrb.mxu0 %v6113_v26  ;;  %6314 = vmatpush.msrb.mxu2 %v6113_v26 }
0x11b8   :  { %2920 = vmatpush.msrb.mxu0 %v6112_v62  ;;  %6315 = vmatpush.msrb.mxu2 %v6112_v62 }
0x11ba   :  { %2921 = vmatpush.msrb.mxu0 %v6111_v10  ;;  %6316 = vmatpush.msrb.mxu2 %v6111_v10 }
0x11bc   :  { %2922 = vmatpush.msrb.mxu0 %v6110_v52  ;;  %6317 = vmatpush.msrb.mxu2 %v6110_v52 }
0x11be   :  { %2923 = vmatpush.msrb.mxu0 %v6109_v47  ;;  %6318 = vmatpush.msrb.mxu2 %v6109_v47 }
0x11c0   :  { %2924 = vmatpush.msrb.mxu0 %v6108_v55  ;;  %6319 = vmatpush.msrb.mxu2 %v6108_v55 }
0x11c2   :  { %2925 = vmatpush.msrb.mxu0 %v6107_v16  ;;  %6320 = vmatpush.msrb.mxu2 %v6107_v16 }
0x1220   :  { %v2720_v41 = vpop.f32.mrf.mxu3 }
0x1221   :  { %v8424_v63 = vadd.f32 %v2720_v41, %v2690_v37 }
0x1223   :  { %v8427_v35 = vmul.f32 0.70710677, %v8424_v63 }
0x1225   :  { %v8430_v25 = vand.u32 2147483647, %v8427_v35 }
0x1227   :  { %v2740_v60 = vmul.f32 0.3275911, %v8430_v25  ;;  %v2844_v57 = vsub.f32 0.0, %v8430_v25 }
0x1228   :  { %v2723_v18 = vpop.f32.mrf.mxu3 }
0x1229   :  { %v2744_v51 = vadd.f32 1.0, %v2740_v60  ;;  %v8436_v28 = vadd.f32 %v2723_v18, %v2690_v37 }
0x122b   :  { %6710 = vrcp.f32 %v2744_v51  ;;  %v8445_v45 = vmul.f32 0.70710677, %v8436_v28  ;;  %v2759_v7 = vand.u32 2147483648, %v2744_v51  ;;  %v2757_v13 = vand.u32 2147483647, %v2744_v51 }
0x122c   :  { %vm2753_vm13 = vweird.f32 %v2744_v51 }
0x122d   :  { %v8448_v12 = vand.u32 2147483647, %v8445_v45  ;;  %v2760_v30 = vor.u32 1.1754944e-38, %v2759_v7  ;;  %vm2758_vm1 = vcmp.eq.f32.partialorder %v2757_v13, 8.507059e+37 }
0x122f   :  { %v2741_v43 = vmul.f32 0.3275911, %v8448_v12 }
0x1230   :  { %v2726_v21 = vpop.f32.mrf.mxu3 }
0x1231   :  { %v6711_v1 = vpop.eup %6710  ;;  %v8457_v20 = vadd.f32 %v2726_v21, %v2690_v37  ;;  %v2745_v24 = vadd.f32 1.0, %v2741_v43 }
0x1232   :  { %v2749_v15 = vmul.f32 %v6711_v1, %v2744_v51  ;;  %vm2754_vm12 = vweird.f32 %v6711_v1  ;;  %v2848_v51 = vmul.f32 %v2844_v57, %v8430_v25 }
0x1233   :  { %v8463_v29 = vmul.f32 0.70710677, %v8457_v20  ;;  %6712 = vrcp.f32 %v2745_v24  ;;  %vm2755_vm15 = vmor %vm2753_vm13, %vm2754_vm12  ;;  %v2774_v61 = vand.u32 2147483648, %v2745_v24  ;;  %v2772_v43 = vand.u32 2147483647, %v2745_v24 }
0x1234   :  { %v2750_v8 = vsub.f32 1.0, %v2749_v15  ;;  %vm2768_vm3 = vweird.f32 %v2745_v24  ;;  %v2852_v7 = vmul.f32 1.442695, %v2848_v51 }
0x1235   :  { %v8469_v58 = vand.u32 2147483647, %v8463_v29  ;;  %vm2773_vm5 = vcmp.eq.f32.partialorder %v2772_v43, 8.507059e+37 }
0x1236   :  { %v2751_v27 = vmul.f32 %v6711_v1, %v2750_v8  ;;  %v2775_v8 = vor.u32 1.1754944e-38, %v2774_v61 }
0x1237   :  { %v2742_v14 = vmul.f32 0.3275911, %v8469_v58 }
0x1238   :  { %v2752_v5 = vadd.f32 %v6711_v1, %v2751_v27  ;;  %v2729_v34 = vpop.f32.mrf.mxu3 }
0x1239   :  { %v2746_v32 = vadd.f32 1.0, %v2742_v14  ;;  %v8478_v9 = vadd.f32 %v2729_v34, %v2690_v37  ;;  %v6713_v31 = vpop.eup %6712 }
0x123a   :  { %v2756_v40 = vsel %vm2755_vm15, %v6711_v1, %v2752_v5  ;;  %v2764_v41 = vmul.f32 %v6713_v31, %v2745_v24  ;;  %vm2769_vm2 = vweird.f32 %v6713_v31  ;;  %v2845_v5 = vsub.f32 0.0, %v8448_v12 }
0x123b   :  { %v2761_v3 = vsel %vm2758_vm1, %v2760_v30, %v2756_v40  ;;  %6714 = vrcp.f32 %v2746_v32  ;;  %v8485_v37 = vmul.f32 0.70710677, %v8478_v9  ;;  %vm2770_vm4 = vmor %vm2768_vm3, %vm2769_vm2  ;;  %v2789_v34 = vand.u32 2147483648, %v2746_v32 }
0x123c   :  { %v2808_v60 = vmul.f32 1.0614054, %v2761_v3  ;;  %v2765_v19 = vsub.f32 1.0, %v2764_v41  ;;  %v2787_v55 = vand.u32 2147483647, %v2746_v32  ;;  %vm2783_vm7 = vweird.f32 %v2746_v32 }
0x123d   :  { %v8489_v26 = vand.u32 2147483647, %v8485_v37  ;;  %vm2868_vm15 = vcmp.ge.f32.partialorder %v8427_v35, 0.0  ;;  %vm2869_vm3 = vcmp.ge.f32.partialorder %v8445_v45, 0.0 }
0x123e   :  { %v2812_v18 = vadd.f32 -1.4531521, %v2808_v60  ;;  %v2766_v33 = vmul.f32 %v6713_v31, %v2765_v19  ;;  %v2790_v60 = vor.u32 1.1754944e-38, %v2789_v34  ;;  %vm2788_vm9 = vcmp.eq.f32.partialorder %v2787_v55, 8.507059e+37 }
0x123f   :  { %v2743_v1 = vmul.f32 0.3275911, %v8489_v26 }
0x1240   :  { %v2816_v21 = vmul.f32 %v2812_v18, %v2761_v3  ;;  %v2767_v15 = vadd.f32 %v6713_v31, %v2766_v33  ;;  %v2846_v33 = vsub.f32 0.0, %v8469_v58 }
0x1241   :  { %v6715_v62 = vpop.eup %6714  ;;  %v2747_v27 = vadd.f32 1.0, %v2743_v1 }
0x1242   :  { %v2820_v10 = vadd.f32 1.4214138, %v2816_v21  ;;  %v2779_v52 = vmul.f32 %v6715_v62, %v2746_v32  ;;  %v2771_v25 = vsel %vm2770_vm4, %v6713_v31, %v2767_v15  ;;  %vm2784_vm6 = vweird.f32 %v6715_v62 }
0x1243   :  { %v2776_v14 = vsel %vm2773_vm5, %v2775_v8, %v2771_v25  ;;  %6716 = vrcp.f32 %v2747_v27  ;;  %v2849_v31 = vmul.f32 %v2845_v5, %v8448_v12  ;;  %vm2785_vm8 = vmor %vm2783_vm7, %vm2784_vm6  ;;  %v2850_v12 = vmul.f32 %v2846_v33, %v8469_v58 }
0x1244   :  { %v2824_v13 = vmul.f32 %v2820_v10, %v2761_v3  ;;  %v2780_v47 = vsub.f32 1.0, %v2779_v52  ;;  %v2809_v40 = vmul.f32 1.0614054, %v2776_v14  ;;  %6718 = vpow2.f32 %v2852_v7 }
0x1245   :  { %v2854_v8 = vmul.f32 1.442695, %v2849_v31  ;;  %vm2798_vm13 = vweird.f32 %v2747_v27  ;;  %vm2870_vm4 = vcmp.ge.f32.partialorder %v8463_v29, 0.0  ;;  %vm2871_vm5 = vcmp.ge.f32.partialorder %v8485_v37, 0.0 }
0x1246   :  { %v2828_v24 = vadd.f32 -0.28449672, %v2824_v13  ;;  %v2781_v30 = vmul.f32 %v6715_v62, %v2780_v47  ;;  %v2813_v16 = vadd.f32 -1.4531521, %v2809_v40  ;;  %v2802_v13 = vand.u32 2147483647, %v2747_v27 }
0x1247   :  { %v2804_v47 = vand.u32 2147483648, %v2747_v27  ;;  %6720 = vpow2.f32 %v2854_v8  ;;  %v2909_v29 = vperm.slane %v8327_v0, 5 }
0x1248   :  { %v2832_v57 = vmul.f32 %v2828_v24, %v2761_v3  ;;  %v2782_v41 = vadd.f32 %v6715_v62, %v2781_v30  ;;  %v2817_v18 = vmul.f32 %v2813_v16, %v2776_v14  ;;  %v2880_v24 = vmul.f32 0.5, %v8424_v63 }
0x1249   :  { %v6717_v61 = vpop.eup %6716  ;;  %v2856_v16 = vmul.f32 1.442695, %v2850_v12  ;;  %v2805_v58 = vor.u32 1.1754944e-38, %v2804_v47  ;;  %vm2803_vm2 = vcmp.eq.f32.partialorder %v2802_v13, 8.507059e+37  ;;  %v2847_v63 = vsub.f32 0.0, %v8489_v26 }
0x124a   :  { %v2836_v19 = vadd.f32 0.2548296, %v2832_v57  ;;  %v2786_v51 = vsel %vm2785_vm8, %v6715_v62, %v2782_v41  ;;  %v2794_v1 = vmul.f32 %v6717_v61, %v2747_v27  ;;  %v2821_v15 = vadd.f32 1.4214138, %v2817_v18  ;;  %v6719_v10 = vpop.eup %6718 }
0x124b   :  { %v2791_v43 = vsel %vm2788_vm9, %v2790_v60, %v2786_v51  ;;  %vm2799_vm12 = vweird.f32 %v6717_v61  ;;  %6722 = vpow2.f32 %v2856_v16 }
0x124c   :  { %v2840_v21 = vmul.f32 %v2836_v19, %v2761_v3  ;;  %v2810_v32 = vmul.f32 1.0614054, %v2791_v43  ;;  %v2795_v7 = vsub.f32 1.0, %v2794_v1  ;;  %v2825_v25 = vmul.f32 %v2821_v15, %v2776_v14  ;;  %vm2800_vm1 = vmor %vm2798_vm13, %vm2799_vm12 }
0x124d   :  { %v6721_v15 = vpop.eup %6720 }
0x124e   :  { %v2860_v52 = vmul.f32 %v6719_v10, %v2840_v21  ;;  %v2814_v5 = vadd.f32 -1.4531521, %v2810_v32  ;;  %v2796_v34 = vmul.f32 %v6717_v61, %v2795_v7  ;;  %v2829_v55 = vadd.f32 -0.28449672, %v2825_v25 }
0x124f   :  { %v2851_v32 = vmul.f32 %v2847_v63, %v8489_v26 }
0x1250   :  { %v2864_v62 = vsub.f32 1.0, %v2860_v52  ;;  %v2818_v3 = vmul.f32 %v2814_v5, %v2791_v43  ;;  %v2797_v40 = vadd.f32 %v6717_v61, %v2796_v34  ;;  %v2833_v57 = vmul.f32 %v2829_v55, %v2776_v14 }
0x1251   :  { %v2858_v47 = vmul.f32 1.442695, %v2851_v32  ;;  %v2881_v55 = vmul.f32 0.5, %v8436_v28 }
0x1252   :  { %v2872_v30 = vsub.f32 0.0, %v2864_v62  ;;  %v2822_v41 = vadd.f32 1.4214138, %v2818_v3  ;;  %v2801_v60 = vsel %vm2800_vm1, %v6717_v61, %v2797_v40  ;;  %v2837_v19 = vadd.f32 0.2548296, %v2833_v57 }
0x1253   :  { %v2806_v51 = vsel %vm2803_vm2, %v2805_v58, %v2801_v60  ;;  %6724 = vpow2.f32 %v2858_v47 }
0x1254   :  { %v2876_v31 = vsel %vm2868_vm15, %v2864_v62, %v2872_v30  ;;  %v2826_v33 = vmul.f32 %v2822_v41, %v2791_v43  ;;  %v2811_v21 = vmul.f32 1.0614054, %v2806_v51  ;;  %v2841_v1 = vmul.f32 %v2837_v19, %v2776_v14  ;;  %v6723_v14 = vpop.eup %6722 }
0x1255   :  { %v2884_v18 = vadd.f32 1.0, %v2876_v31 }
0x1256   :  { %v2830_v10 = vadd.f32 -0.28449672, %v2826_v33  ;;  %v2815_v35 = vadd.f32 -1.4531521, %v2811_v21  ;;  %v2861_v8 = vmul.f32 %v6721_v15, %v2841_v1  ;;  %v2883_v21 = vmul.f32 0.5, %v8478_v9 }
0x1257   :  { %v2888_v27 = vmul.f32 %v2884_v18, %v2880_v24 }
0x1258   :  { %v2834_v52 = vmul.f32 %v2830_v10, %v2791_v43  ;;  %v2819_v61 = vmul.f32 %v2815_v35, %v2806_v51  ;;  %v2865_v7 = vsub.f32 1.0, %v2861_v8 }
0x1259   :  { %2926 = vmatmul.f32.vlgmr.msrb.gmra.mxu0 %v2888_v27  ;;  %v6725_v60 = vpop.eup %6724 }
0x125a   :  { %v2838_v25 = vadd.f32 0.2548296, %v2834_v52  ;;  %v2823_v12 = vadd.f32 1.4214138, %v2819_v61  ;;  %v2873_v13 = vsub.f32 0.0, %v2865_v7 }
0x125c   :  { %v2842_v5 = vmul.f32 %v2838_v25, %v2791_v43  ;;  %v2827_v62 = vmul.f32 %v2823_v12, %v2806_v51  ;;  %v2877_v34 = vsel %vm2869_vm3, %v2865_v7, %v2873_v13  ;;  %v2882_v43 = vmul.f32 0.5, %v8457_v20 }
0x125d   :  { %v2885_v24 = vadd.f32 1.0, %v2877_v34 }
0x125e   :  { %v2862_v3 = vmul.f32 %v6723_v14, %v2842_v5  ;;  %v2831_v30 = vadd.f32 -0.28449672, %v2827_v62 }
0x125f   :  { %v2889_v26 = vmul.f32 %v2885_v24, %v2881_v55 }
0x1260   :  { %v2866_v40 = vsub.f32 1.0, %v2862_v3  ;;  %v2835_v57 = vmul.f32 %v2831_v30, %v2806_v51 }
0x1261   :  { %2929 = vmatmul.f32.gmra.mxu0 %v2889_v26 }
0x1262   :  { %v2874_v16 = vsub.f32 0.0, %v2866_v40  ;;  %v2839_v58 = vadd.f32 0.2548296, %v2835_v57 }
0x1264   :  { %v2878_v45 = vsel %vm2870_vm4, %v2866_v40, %v2874_v16  ;;  %v2843_v41 = vmul.f32 %v2839_v58, %v2806_v51 }
0x1265   :  { %v2886_v31 = vadd.f32 1.0, %v2878_v45 }
0x1266   :  { %v2863_v19 = vmul.f32 %v6725_v60, %v2843_v41  ;;  %v180_v41 = vld [vmem:[%s10029_s5 + $0x118] sm:$0xff]  ;;  %v178_v60 = vld [vmem:[%s10029_s5 + $0x108] sm:$0xff] }
0x1267   :  { %v2890_v28 = vmul.f32 %v2886_v31, %v2882_v43  ;;  %3065 = vmatpush.msra.mxu3 %v180_v41  ;;  %v179_v31 = vld [vmem:[%s10029_s5 + $0x110] sm:$0xff] }
0x1268   :  { %v2867_v18 = vsub.f32 1.0, %v2863_v19  ;;  %v177_v19 = vld [vmem:[%s10029_s5 + $0x100] sm:$0xff] }
0x1269   :  { %2932 = vmatmul.f32.gmra.mxu0 %v2890_v28  ;;  %3066 = vmatpush.msra.mxu3 %v179_v31 }
0x126a   :  { %v2875_v63 = vsub.f32 0.0, %v2867_v18 }
0x126b   :  { %3067 = vmatpush.msra.mxu3 %v178_v60 }
0x126c   :  { %v2879_v33 = vsel %vm2871_vm5, %v2867_v18, %v2875_v63 }
0x126d   :  { %v2887_v1 = vadd.f32 1.0, %v2879_v33  ;;  %3068 = vmatpush.msra.mxu3 %v177_v19 }
0x126f   :  { %v2891_v15 = vmul.f32 %v2887_v1, %v2883_v21 }
0x1271   :  { %2935 = vmatmul.f32.vlgmr.msrb.gmra.mxu2 %v2891_v15 }
0x12d6   :  { %v2927_v27 = vpop.f32.mrf.mxu0 }
0x12d7   :  { %v2928_v20 = vadd.f32 %v2927_v27, %v2909_v29 }
0x12d9   :  { %v2939_v51 = vadd.f32 %v2928_v20, %v8331_v44 }
0x12db   :  { %v2943_v10 = vsel %vm294_vm0, %v2939_v51, 0.0 }
0x12dc   :  { %2944 = vadd.xlane.f32.xlu1 %v2943_v10 }
0x12de   :  { %v2930_v35 = vpop.f32.mrf.mxu0 }
0x12df   :  { %v2931_v8 = vadd.f32 %v2930_v35, %v2909_v29 }
0x12e1   :  { %v2940_v32 = vadd.f32 %v2931_v8, %v8336_v36 }
0x12e3   :  { %v2946_v37 = vsel %vm294_vm0, %v2940_v32, 0.0 }
0x12e4   :  { %2947 = vadd.xlane.f32.xlu2 %v2946_v37 }
0x12e6   :  { %v2933_v9 = vpop.f32.mrf.mxu0 }
0x12e7   :  { %v2934_v52 = vadd.f32 %v2933_v9, %v2909_v29 }
0x12e9   :  { %v2941_v61 = vadd.f32 %v2934_v52, %v8341_v49 }
0x12eb   :  { %v2949_v0 = vsel %vm294_vm0, %v2941_v61, 0.0 }
0x12ec   :  { %2950 = vadd.xlane.f32.xlu0 %v2949_v0 }
0x12f4   :  { %v2936_v7 = vpop.f32.mrf.mxu2 }
0x12f5   :  { %v2937_v25 = vadd.f32 %v2936_v7, %v2909_v29 }
0x12f7   :  { %v2942_v44 = vadd.f32 %v2937_v25, %v8346_v2 }
0x12f9   :  { %v2952_v12 = vsel %vm294_vm0, %v2942_v44, 0.0 }
0x12fa   :  { %2953 = vadd.xlane.f32.xlu1 %v2952_v12 }
0x134f   :  { %v2945_v13 = vpop.xlane.xlu1 %2944 }
0x1350   :  { %v2955_v36 = vmul.f32 %v2945_v13, %v7138_v6 }
0x1352   :  { %v2959_v47 = vsub.f32 %v2939_v51, %v2955_v36  ;;  %v213_v51 = vld [vmem:[%s10035_s6] sm:$0x1f] }
0x1353   :  { %v3031_v9 = vperm.slane %v213_v51, 1  ;;  %v3036_v25 = vperm.slane %v213_v51, 2 }
0x1354   :  { %v2963_v5 = vmul.f32 %v2959_v47, %v2959_v47 }
0x1356   :  { %v2967_v14 = vsel %vm294_vm0, %v2963_v5, 0.0 }
0x1357   :  { %2968 = vadd.xlane.f32.xlu2 %v2967_v14  ;;  %v2948_v62 = vpop.xlane.xlu2 %2947 }
0x1358   :  { %v2956_v49 = vmul.f32 %v2948_v62, %v7138_v6 }
0x135a   :  { %v8518_v34 = vsub.f32 %v2940_v32, %v2956_v49 }
0x135c   :  { %v2964_v55 = vmul.f32 %v8518_v34, %v8518_v34 }
0x135e   :  { %v2970_v2 = vsel %vm294_vm0, %v2964_v55, 0.0 }
0x135f   :  { %v2951_v24 = vpop.xlane.xlu0 %2950  ;;  %2971 = vadd.xlane.f32.xlu0 %v2970_v2 }
0x1360   :  { %v2957_v3 = vmul.f32 %v2951_v24, %v7138_v6 }
0x1362   :  { %v8524_v30 = vsub.f32 %v2941_v61, %v2957_v3 }
0x1364   :  { %v2965_v26 = vmul.f32 %v8524_v30, %v8524_v30 }
0x1366   :  { %v2973_v40 = vsel %vm294_vm0, %v2965_v26, 0.0 }
0x1367   :  { %2974 = vadd.xlane.f32.xlu1 %v2973_v40 }
0x136d   :  { %v2954_v57 = vpop.xlane.xlu1 %2953 }
0x136e   :  { %v2958_v16 = vmul.f32 %v2954_v57, %v7138_v6 }
0x1370   :  { %v8530_v58 = vsub.f32 %v2942_v44, %v2958_v16 }
0x1372   :  { %v2966_v45 = vmul.f32 %v8530_v58, %v8530_v58 }
0x1374   :  { %v2976_v43 = vsel %vm294_vm0, %v2966_v45, 0.0 }
0x1375   :  { %2977 = vadd.xlane.f32.xlu2 %v2976_v43 }
0x13ca   :  { %v2969_v28 = vpop.xlane.xlu2 %2968 }
0x13cb   :  { %v2979_v18 = vmul.f32 %v2969_v28, %v7138_v6 }
0x13cd   :  { %v2983_v63 = vadd.f32 1e-05, %v2979_v18 }
0x13cf   :  { %6726 = vrsqrt.f32 %v2983_v63  ;;  %vm2993_vm7 = vweird.f32 %v2983_v63 }
0x13d2   :  { %v2972_v33 = vpop.xlane.xlu0 %2971 }
0x13d3   :  { %v2980_v1 = vmul.f32 %v2972_v33, %v7138_v6 }
0x13d5   :  { %v6727_v21 = vpop.eup %6726  ;;  %v2984_v29 = vadd.f32 1e-05, %v2980_v1 }
0x13d6   :  { %v2988_v15 = vmul.f32 %v6727_v21, %v2983_v63  ;;  %vm2994_vm6 = vweird.f32 %v6727_v21 }
0x13d7   :  { %6728 = vrsqrt.f32 %v2984_v29  ;;  %vm2995_vm8 = vmor %vm2993_vm7, %vm2994_vm6  ;;  %vm3003_vm12 = vweird.f32 %v2984_v29 }
0x13d8   :  { %v2989_v27 = vmul.f32 %v6727_v21, %v2988_v15 }
0x13da   :  { %v2990_v20 = vmul.f32 0.5, %v2989_v27  ;;  %v2975_v35 = vpop.xlane.xlu1 %2974 }
0x13db   :  { %v2981_v8 = vmul.f32 %v2975_v35, %v7138_v6 }
0x13dc   :  { %v2991_v10 = vsub.f32 1.5, %v2990_v20 }
0x13dd   :  { %v6729_v37 = vpop.eup %6728  ;;  %v2985_v52 = vadd.f32 1e-05, %v2981_v8 }
0x13de   :  { %v2992_v32 = vmul.f32 %v6727_v21, %v2991_v10  ;;  %v2998_v0 = vmul.f32 %v6729_v37, %v2984_v29  ;;  %vm3004_vm9 = vweird.f32 %v6729_v37 }
0x13df   :  { %6730 = vrsqrt.f32 %v2985_v52  ;;  %vm3005_vm13 = vmor %vm3003_vm12, %vm3004_vm9  ;;  %vm3013_vm1 = vweird.f32 %v2985_v52 }
0x13e0   :  { %v2996_v61 = vsel %vm2995_vm8, %v6727_v21, %v2992_v32  ;;  %v2999_v44 = vmul.f32 %v6729_v37, %v2998_v0 }
0x13e1   :  { %v3027_v7 = vmul.f32 %v2996_v61, %v2959_v47 }
0x13e2   :  { %v3000_v13 = vmul.f32 0.5, %v2999_v44 }
0x13e3   :  { %v3032_v12 = vmul.f32 %v3031_v9, %v3027_v7 }
0x13e4   :  { %v3001_v5 = vsub.f32 1.5, %v3000_v13 }
0x13e5   :  { %v3037_v36 = vadd.f32 %v3036_v25, %v3032_v12  ;;  %v6731_v14 = vpop.eup %6730 }
0x13e6   :  { %v3002_v62 = vmul.f32 %v6729_v37, %v3001_v5  ;;  %v3008_v49 = vmul.f32 %v6731_v14, %v2985_v52  ;;  %vm3014_vm15 = vweird.f32 %v6731_v14 }
0x13e7   :  { %6123 = vmatmul.msk.f32.vlgmr.msra.gmra.mxu3 %vm294_vm0, %v3037_v36  ;;  %vm3015_vm2 = vmor %vm3013_vm1, %vm3014_vm15 }
0x13e8   :  { %v3009_v55 = vmul.f32 %v6731_v14, %v3008_v49  ;;  %v2978_v2 = vpop.xlane.xlu2 %2977  ;;  %v3006_v24 = vsel %vm3005_vm13, %v6729_v37, %v3002_v62 }
0x13e9   :  { %v2982_v47 = vmul.f32 %v2978_v2, %v7138_v6  ;;  %v3028_v3 = vmul.f32 %v3006_v24, %v8518_v34 }
0x13ea   :  { %v3010_v26 = vmul.f32 0.5, %v3009_v55 }
0x13eb   :  { %v2986_v40 = vadd.f32 1e-05, %v2982_v47  ;;  %v3033_v57 = vmul.f32 %v3031_v9, %v3028_v3 }
0x13ec   :  { %v3011_v16 = vsub.f32 1.5, %v3010_v26  ;;  %v8604_v26 = vld [vmem:[%s10032_s2 + $0xb0] sm:$0xff] }
0x13ed   :  { %6732 = vrsqrt.f32 %v2986_v40  ;;  %v3038_v45 = vadd.f32 %v3036_v25, %v3033_v57  ;;  %vm3023_vm4 = vweird.f32 %v2986_v40  ;;  %3215 = vmatpush.msra.mxu2 %v8604_v26  ;;  %v8616_v57 = vld [vmem:[%s10032_s2 + $0x90] sm:$0xff] }
0x13ee   :  { %v3012_v43 = vmul.f32 %v6731_v14, %v3011_v16  ;;  %v8622_v16 = vld [vmem:[%s10032_s2 + $0x80] sm:$0xff] }
0x13ef   :  { %6124 = vmatmul.msk.f32.gmra.mxu3 %vm294_vm0, %v3038_v45 }
0x13f0   :  { %v3016_v41 = vsel %vm3015_vm2, %v6731_v14, %v3012_v43 }
0x13f1   :  { %v3029_v31 = vmul.f32 %v3016_v41, %v8524_v30 }
0x13f3   :  { %v6733_v60 = vpop.eup %6732  ;;  %v3034_v19 = vmul.f32 %v3031_v9, %v3029_v31 }
0x13f4   :  { %v3018_v28 = vmul.f32 %v6733_v60, %v2986_v40  ;;  %vm3024_vm3 = vweird.f32 %v6733_v60  ;;  %v8610_v40 = vld [vmem:[%s10032_s2 + $0xa0] sm:$0xff] }
0x13f5   :  { %v3039_v18 = vadd.f32 %v3036_v25, %v3034_v19  ;;  %vm3025_vm5 = vmor %vm3023_vm4, %vm3024_vm3  ;;  %3216 = vmatpush.msra.mxu2 %v8610_v40  ;;  %v6472_v31 = vpack.i.bf16 %v8610_v40, %v8604_v26 }
0x13f6   :  { %v3019_v34 = vmul.f32 %v6733_v60, %v3018_v28 }
0x13f7   :  { %6125 = vmatmul.msk.f32.gmra.mxu3 %vm294_vm0, %v3039_v18  ;;  %3217 = vmatpush.msra.mxu2 %v8616_v57 }
0x13f8   :  { %v3020_v63 = vmul.f32 0.5, %v3019_v34 }
0x13f9   :  { %3218 = vmatpush.msra.mxu2 %v8622_v16 }
0x13fa   :  { %v3021_v33 = vsub.f32 1.5, %v3020_v63 }
0x13fc   :  { %v3022_v21 = vmul.f32 %v6733_v60, %v3021_v33 }
0x13fe   :  { %v3026_v1 = vsel %vm3025_vm5, %v6733_v60, %v3022_v21  ;;  %v6477_v60 = vpack.i.bf16 %v8622_v16, %v8616_v57 }
0x13ff   :  { %v3030_v15 = vmul.f32 %v3026_v1, %v8530_v58  ;;  %v6135_v1 = vld [vmem:[%s10033_s4 + $0x10] sm:$0x7f] }
0x1401   :  { %v3035_v29 = vmul.f32 %v3031_v9, %v3030_v15 }
0x1403   :  { %v3040_v27 = vadd.f32 %v3036_v25, %v3035_v29 }
0x1405   :  { %6126 = vmatmul.msk.f32.gmra.mxu3 %vm294_vm0, %v3040_v27 }
0x146a   :  { %v8561_v30 = vpop.f32.mrf.mxu3 }
0x146b   :  { %v3093_v20 = vsel %vm294_vm0, %v8561_v30, 0.0 }
0x146c   :  { %3094 = vadd.xlane.f32.xlu0 %v3093_v20 }
0x1472   :  { %v8565_v51 = vpop.f32.mrf.mxu3 }
0x1473   :  { %v3096_v10 = vsel %vm294_vm0, %v8565_v51, 0.0 }
0x1474   :  { %3097 = vadd.xlane.f32.xlu1 %v3096_v10 }
0x147a   :  { %v8569_v35 = vpop.f32.mrf.mxu3 }
0x147b   :  { %v3099_v58 = vsel %vm294_vm0, %v8569_v35, 0.0 }
0x147c   :  { %3100 = vadd.xlane.f32.xlu2 %v3099_v58  ;;  %v3181_v58 = vperm.slane %v6135_v1, 0 }
0x1488   :  { %v8573_v8 = vpop.f32.mrf.mxu3 }
0x1489   :  { %v3102_v32 = vsel %vm294_vm0, %v8573_v8, 0.0 }
0x148a   :  { %3103 = vadd.xlane.f32.xlu0 %v3102_v32 }
0x14df   :  { %v3095_v37 = vpop.xlane.xlu0 %3094 }
0x14e0   :  { %v3105_v9 = vmul.f32 %v3095_v37, %v7138_v6 }
0x14e2   :  { %v3109_v52 = vsub.f32 %v8561_v30, %v3105_v9 }
0x14e4   :  { %v3113_v61 = vmul.f32 %v3109_v52, %v3109_v52 }
0x14e6   :  { %v3117_v0 = vsel %vm294_vm0, %v3113_v61, 0.0  ;;  %v3186_v61 = vperm.slane %v6135_v1, 1 }
0x14e7   :  { %3118 = vadd.xlane.f32.xlu1 %v3117_v0  ;;  %v3098_v7 = vpop.xlane.xlu1 %3097 }
0x14e8   :  { %v3106_v25 = vmul.f32 %v3098_v7, %v7138_v6 }
0x14ea   :  { %v8582_v44 = vsub.f32 %v8565_v51, %v3106_v25 }
0x14ec   :  { %v3114_v12 = vmul.f32 %v8582_v44, %v8582_v44 }
0x14ee   :  { %v3120_v13 = vsel %vm294_vm0, %v3114_v12, 0.0 }
0x14ef   :  { %v3101_v36 = vpop.xlane.xlu2 %3100  ;;  %3121 = vadd.xlane.f32.xlu2 %v3120_v13 }
0x14f0   :  { %v3107_v5 = vmul.f32 %v3101_v36, %v7138_v6 }
0x14f2   :  { %v8589_v14 = vsub.f32 %v8569_v35, %v3107_v5 }
0x14f4   :  { %v3115_v62 = vmul.f32 %v8589_v14, %v8589_v14 }
0x14f6   :  { %v3123_v49 = vsel %vm294_vm0, %v3115_v62, 0.0 }
0x14f7   :  { %3124 = vadd.xlane.f32.xlu0 %v3123_v49 }
0x14fd   :  { %v3104_v55 = vpop.xlane.xlu0 %3103 }
0x14fe   :  { %v3108_v2 = vmul.f32 %v3104_v55, %v7138_v6 }
0x1500   :  { %v8596_v24 = vsub.f32 %v8573_v8, %v3108_v2 }
0x1502   :  { %v3116_v47 = vmul.f32 %v8596_v24, %v8596_v24 }
0x1504   :  { %v3126_v3 = vsel %vm294_vm0, %v3116_v47, 0.0 }
0x1505   :  { %3127 = vadd.xlane.f32.xlu1 %v3126_v3 }
0x155a   :  { %v3119_v45 = vpop.xlane.xlu1 %3118 }
0x155b   :  { %v3129_v43 = vmul.f32 %v3119_v45, %v7138_v6 }
0x155d   :  { %v3133_v41 = vadd.f32 1e-05, %v3129_v43 }
0x155f   :  { %6734 = vrsqrt.f32 %v3133_v41  ;;  %vm3143_vm7 = vweird.f32 %v3133_v41 }
0x1562   :  { %v3122_v19 = vpop.xlane.xlu2 %3121 }
0x1563   :  { %v3130_v18 = vmul.f32 %v3122_v19, %v7138_v6 }
0x1565   :  { %v6735_v28 = vpop.eup %6734  ;;  %v3134_v63 = vadd.f32 1e-05, %v3130_v18 }
0x1566   :  { %v3138_v34 = vmul.f32 %v6735_v28, %v3133_v41  ;;  %vm3144_vm6 = vweird.f32 %v6735_v28 }
0x1567   :  { %6736 = vrsqrt.f32 %v3134_v63  ;;  %vm3145_vm8 = vmor %vm3143_vm7, %vm3144_vm6  ;;  %vm3153_vm12 = vweird.f32 %v3134_v63 }
0x1568   :  { %v3139_v33 = vmul.f32 %v6735_v28, %v3138_v34 }
0x156a   :  { %v3140_v21 = vmul.f32 0.5, %v3139_v33  ;;  %v3125_v29 = vpop.xlane.xlu0 %3124 }
0x156b   :  { %v3131_v27 = vmul.f32 %v3125_v29, %v7138_v6 }
0x156c   :  { %v3141_v15 = vsub.f32 1.5, %v3140_v21 }
0x156d   :  { %v6737_v10 = vpop.eup %6736  ;;  %v3135_v32 = vadd.f32 1e-05, %v3131_v27 }
0x156e   :  { %v3142_v20 = vmul.f32 %v6735_v28, %v3141_v15  ;;  %v3148_v9 = vmul.f32 %v6737_v10, %v3134_v63  ;;  %vm3154_vm9 = vweird.f32 %v6737_v10 }
0x156f   :  { %6738 = vrsqrt.f32 %v3135_v32  ;;  %vm3155_vm13 = vmor %vm3153_vm12, %vm3154_vm9  ;;  %vm3163_vm1 = vweird.f32 %v3135_v32 }
0x1570   :  { %v3146_v37 = vsel %vm3145_vm8, %v6735_v28, %v3142_v20  ;;  %v3149_v7 = vmul.f32 %v6737_v10, %v3148_v9 }
0x1571   :  { %v3177_v0 = vmul.f32 %v3146_v37, %v3109_v52 }
0x1572   :  { %v3150_v12 = vmul.f32 0.5, %v3149_v7 }
0x1573   :  { %v3182_v25 = vmul.f32 %v3181_v58, %v3177_v0 }
0x1574   :  { %v3151_v36 = vsub.f32 1.5, %v3150_v12 }
0x1575   :  { %v3187_v13 = vadd.f32 %v3186_v61, %v3182_v25  ;;  %v6739_v5 = vpop.eup %6738 }
0x1576   :  { %v3152_v62 = vmul.f32 %v6737_v10, %v3151_v36  ;;  %v3158_v49 = vmul.f32 %v6739_v5, %v3135_v32  ;;  %vm3164_vm15 = vweird.f32 %v6739_v5 }
0x1577   :  { %6136 = vmatmul.msk.f32.vlgmr.msra.gmra.mxu2 %vm294_vm0, %v3187_v13  ;;  %vm3165_vm2 = vmor %vm3163_vm1, %vm3164_vm15 }
0x1578   :  { %v3156_v55 = vsel %vm3155_vm13, %v6737_v10, %v3152_v62  ;;  %v3159_v2 = vmul.f32 %v6739_v5, %v3158_v49  ;;  %v3128_v47 = vpop.xlane.xlu1 %3127 }
0x1579   :  { %v3178_v3 = vmul.f32 %v3156_v55, %v8582_v44  ;;  %v3132_v52 = vmul.f32 %v3128_v47, %v7138_v6 }
0x157a   :  { %v3160_v45 = vmul.f32 0.5, %v3159_v2 }
0x157b   :  { %v3136_v43 = vadd.f32 1e-05, %v3132_v52  ;;  %v3183_v41 = vmul.f32 %v3181_v58, %v3178_v3 }
0x157c   :  { %v3161_v19 = vsub.f32 1.5, %v3160_v45 }
0x157d   :  { %6740 = vrsqrt.f32 %v3136_v43  ;;  %v3188_v28 = vadd.f32 %v3186_v61, %v3183_v41  ;;  %vm3173_vm4 = vweird.f32 %v3136_v43 }
0x157e   :  { %v3162_v18 = vmul.f32 %v6739_v5, %v3161_v19 }
0x157f   :  { %6137 = vmatmul.msk.f32.gmra.mxu2 %vm294_vm0, %v3188_v28 }
0x1580   :  { %v3166_v34 = vsel %vm3165_vm2, %v6739_v5, %v3162_v18 }
0x1581   :  { %v3179_v63 = vmul.f32 %v3166_v34, %v8589_v14 }
0x1583   :  { %v6741_v33 = vpop.eup %6740  ;;  %v3184_v21 = vmul.f32 %v3181_v58, %v3179_v63 }
0x1584   :  { %v3168_v44 = vmul.f32 %v6741_v33, %v3136_v43  ;;  %vm3174_vm3 = vweird.f32 %v6741_v33 }
0x1585   :  { %v3189_v1 = vadd.f32 %v3186_v61, %v3184_v21  ;;  %vm3175_vm5 = vmor %vm3173_vm4, %vm3174_vm3 }
0x1586   :  { %v3169_v15 = vmul.f32 %v6741_v33, %v3168_v44 }
0x1587   :  { %6138 = vmatmul.msk.f32.gmra.mxu2 %vm294_vm0, %v3189_v1 }
0x1588   :  { %v3170_v29 = vmul.f32 0.5, %v3169_v15 }
0x158a   :  { %v3171_v27 = vsub.f32 1.5, %v3170_v29 }
0x158c   :  { %v3172_v20 = vmul.f32 %v6741_v33, %v3171_v27 }
0x158e   :  { %v3176_v10 = vsel %vm3175_vm5, %v6741_v33, %v3172_v20 }
0x158f   :  { %v3180_v32 = vmul.f32 %v3176_v10, %v8596_v24 }
0x1591   :  { %v3185_v37 = vmul.f32 %v3181_v58, %v3180_v32 }
0x1593   :  { %v3190_v9 = vadd.f32 %v3186_v61, %v3185_v37 }
0x1595   :  { %6139 = vmatmul.msk.f32.gmra.mxu2 %vm294_vm0, %v3190_v9 }
0x15fa   :  { %v8643_v14 = vpop.f32.mrf.mxu2 }
0x1602   :  { %v8645_v0 = vpop.f32.mrf.mxu2 }
0x1603   :  { %3262 = vrot.lane.b32.xlu1 %v8645_v0, %s6940_s28 }
0x160a   :  { %v8649_v7 = vpop.f32.mrf.mxu2 }
0x160b   :  { %3250 = vrot.lane.b32.xlu1 %v8645_v0, %s6941_s29  ;;  %3264 = vrot.lane.b32.xlu0 %v8649_v7, %s6940_s28 }
0x1613   :  { %3240 = vrot.lane.b32.xlu1 %v8649_v7, %s6942_s30  ;;  %3260 = vrot.lane.b32.xlu0 %v8643_v14, %s6940_s28 }
0x1618   :  { %v8659_v24 = vpop.f32.mrf.mxu2 }
0x1619   :  { %3266 = vrot.lane.b32.xlu2 %v8659_v24, %s6940_s28 }
0x161b   :  { %3252 = vrot.lane.b32.xlu0 %v8649_v7, %s6941_s29 }
0x1621   :  { %3254 = vrot.lane.b32.xlu2 %v8659_v24, %s6941_s29 }
0x1623   :  { %3242 = vrot.lane.b32.xlu0 %v8659_v24, %s6942_s30 }
0x1629   :  { %3248 = vrot.lane.b32.xlu2 %v8643_v14, %s6941_s29 }
0x162b   :  { %3238 = vrot.lane.b32.xlu0 %v8645_v0, %s6942_s30 }
0x1673   :  { %v8673_v58 = vpop.permute.xlu2 %3266 }
0x1674   :  { %3318 = vrot.lane.b32.xlu2 %v8673_v58, %s6943_s8 }
0x1675   :  { %v8677_v61 = vpop.permute.xlu1 %3262 }
0x1676   :  { %3314 = vrot.lane.b32.xlu0 %v8677_v61, %s6943_s8 }
0x167b   :  { %v8687_v12 = vpop.permute.xlu2 %3254 }
0x167c   :  { %3236 = vrot.lane.b32.xlu2 %v8643_v14, %s6942_s30 }
0x167d   :  { %v8683_v25 = vpop.permute.xlu0 %3264  ;;  %v8695_v36 = vpop.permute.xlu1 %3250 }
0x167e   :  { %3316 = vrot.lane.b32.xlu1 %v8683_v25, %s6943_s8  ;;  %v6442_v47 = vpack.i.bf16 %v8683_v25, %v8673_v58 }
0x1683   :  { %v8697_v5 = vpop.permute.xlu2 %3248 }
0x1684   :  { %3310 = vrot.lane.b32.xlu2 %v8687_v12, %s6943_s8  ;;  %v6437_v28 = vpack.i.bf16 %v8697_v5, %v8695_v36 }
0x1685   :  { %v8691_v13 = vpop.permute.xlu0 %3260  ;;  %v8707_v49 = vpop.permute.xlu1 %3240 }
0x1686   :  { %3312 = vrot.lane.b32.xlu1 %v8691_v13, %s6943_s8  ;;  %v6432_v41 = vpack.i.bf16 %v8691_v13, %v8677_v61 }
0x168c   :  { %3304 = vrot.lane.b32.xlu2 %v8697_v5, %s6943_s8 }
0x168d   :  { %v8701_v62 = vpop.permute.xlu0 %3252 }
0x168e   :  { %3308 = vrot.lane.b32.xlu0 %v8701_v62, %s6943_s8  ;;  %3306 = vrot.lane.b32.xlu1 %v8695_v36, %s6943_s8  ;;  %v6447_v3 = vpack.i.bf16 %v8701_v62, %v8687_v12 }
0x1695   :  { %v8709_v55 = vpop.permute.xlu0 %3242 }
0x1696   :  { %3302 = vrot.lane.b32.xlu0 %v8709_v55, %s6943_s8  ;;  %3300 = vrot.lane.b32.xlu1 %v8707_v49, %s6943_s8  ;;  %v6452_v52 = vpack.i.bf16 %v8707_v49, %v8709_v55 }
0x169d   :  { %v8715_v2 = vpop.permute.xlu0 %3238 }
0x169e   :  { %3298 = vrot.lane.b32.xlu2 %v8715_v2, %s6943_s8  ;;  %3294 = vrot.lane.b32.xlu1 %v8659_v24, %s6943_s8 }
0x16a6   :  { %3292 = vrot.lane.b32.xlu2 %v8649_v7, %s6943_s8  ;;  %3288 = vrot.lane.b32.xlu1 %v8643_v14, %s6943_s8 }
0x16ae   :  { %6443 = vrot.lane.b32.xlu2 %v6442_v47, %s6944_s9  ;;  %6448 = vrot.lane.b32.xlu1 %v6447_v3, %s6944_s9 }
0x16b6   :  { %6453 = vrot.lane.b32.xlu1 %v6452_v52, %s6944_s9 }
0x16ce   :  { %v3319_v45 = vpop.permute.xlu2 %3318 }
0x16cf   :  { %6140 = vmatpush.xpose.msk.msrb.mxu1 %vm529_vm14, %v3319_v45 }
0x16d6   :  { %v8735_v43 = vpop.permute.xlu2 %3236 }
0x16d7   :  { %3296 = vrot.lane.b32.xlu0 %v8735_v43, %s6943_s8 }
0x16de   :  { %v3311_v19 = vpop.permute.xlu2 %3310 }
0x16df   :  { %3290 = vrot.lane.b32.xlu0 %v8645_v0, %s6943_s8 }
0x16e6   :  { %v3305_v18 = vpop.permute.xlu2 %3304 }
0x16e7   :  { %6433 = vrot.lane.b32.xlu0 %v6432_v41, %s6944_s9 }
0x16e8   :  { %v3315_v63 = vpop.permute.xlu0 %3314 }
0x16ef   :  { %6438 = vrot.lane.b32.xlu0 %v6437_v28, %s6944_s9 }
0x16f0   :  { %v3317_v34 = vpop.permute.xlu1 %3316 }
0x16f1   :  { %6141 = vmatpush.xpose.msk.msrb.mxu1 %vm529_vm14, %v3317_v34 }
0x16f5   :  { %6142 = vmatpush.xpose.msk.msrb.mxu1 %vm529_vm14, %v3315_v63 }
0x16f8   :  { %v3299_v33 = vpop.permute.xlu2 %3298  ;;  %v3313_v21 = vpop.permute.xlu1 %3312 }
0x16f9   :  { %6143 = vmatpush.xpose.msk.msrb.mxu1 %vm529_vm14, %v3313_v21 }
0x16fd   :  { %6144 = vmatpush.xpose.msk.msrb.mxu1 %vm529_vm14, %v3311_v19  ;;  %v3272_v19 = vmul.f32 0.35355338, %v8643_v14 }
0x1700   :  { %v3293_v44 = vpop.permute.xlu2 %3292  ;;  %v3309_v1 = vpop.permute.xlu0 %3308 }
0x1701   :  { %6145 = vmatpush.xpose.msk.msrb.mxu1 %vm529_vm14, %v3309_v1  ;;  %v3307_v15 = vpop.permute.xlu1 %3306 }
0x1705   :  { %6146 = vmatpush.xpose.msk.msrb.mxu1 %vm529_vm14, %v3307_v15 }
0x1708   :  { %v6444_v29 = vpop.permute.xlu2 %6443  ;;  %v3303_v10 = vpop.permute.xlu0 %3302 }
0x1709   :  { %v6445_v27 = vunpack.i.l.bf16 %v6444_v29  ;;  %6147 = vmatpush.xpose.msk.msrb.mxu1 %vm529_vm14, %v3305_v18  ;;  %v6446_v20 = vunpack.i.h.bf16 %v6444_v29  ;;  %v3301_v32 = vpop.permute.xlu1 %3300 }
0x170b   :  { %3865 = vmatpush.msrb.mxu3 %v6445_v27  ;;  %v3274_v27 = vmul.f32 0.35355338, %v8649_v7 }
0x170d   :  { %6148 = vmatpush.xpose.msk.msrb.mxu1 %vm529_vm14, %v3303_v10  ;;  %3866 = vmatpush.msrb.mxu3 %v6446_v20  ;;  %v3275_v20 = vmul.f32 0.35355338, %v8659_v24  ;;  %v3276_v10 = vmul.f32 0.35355338, %v8735_v43 }
0x1711   :  { %6149 = vmatpush.xpose.msk.msrb.mxu1 %vm529_vm14, %v3301_v32  ;;  %v3295_v37 = vpop.permute.xlu1 %3294  ;;  %v3277_v32 = vmul.f32 0.35355338, %v8715_v2 }
0x1715   :  { %6150 = vmatpush.xpose.msk.msrb.mxu1 %vm529_vm14, %v3299_v33 }
0x1719   :  { %v3289_v47 = vpop.permute.xlu1 %3288 }
0x1721   :  { %v6449_v52 = vpop.permute.xlu1 %6448 }
0x1722   :  { %v6450_v18 = vunpack.i.l.bf16 %v6449_v52  ;;  %v6451_v34 = vunpack.i.h.bf16 %v6449_v52  ;;  %v3282_v52 = vmul.f32 0.35355338, %v8701_v62  ;;  %v3287_v62 = vmul.f32 0.35355338, %v8673_v58 }
0x1729   :  { %v6454_v21 = vpop.permute.xlu1 %6453 }
0x172a   :  { %v6455_v15 = vunpack.i.l.bf16 %v6454_v21  ;;  %v6456_v29 = vunpack.i.h.bf16 %v6454_v21 }
0x1749   :  { %v3297_v9 = vpop.permute.xlu0 %3296 }
0x174a   :  { %6151 = vmatpush.xpose.msk.msrb.mxu1 %vm529_vm14, %v3297_v9  ;;  %v3279_v9 = vmul.f32 0.35355338, %v8709_v55  ;;  %v3284_v55 = vmul.f32 0.35355338, %v8691_v13 }
0x174e   :  { %6152 = vmatpush.xpose.msk.msrb.mxu1 %vm529_vm14, %v3295_v37  ;;  %v3278_v37 = vmul.f32 0.35355338, %v8707_v49  ;;  %v3283_v49 = vmul.f32 0.35355338, %v8687_v12 }
0x1751   :  { %v3291_v3 = vpop.permute.xlu0 %3290 }
0x1752   :  { %6153 = vmatpush.xpose.msk.msrb.mxu1 %vm529_vm14, %v3293_v44  ;;  %v3273_v44 = vmul.f32 0.35355338, %v8645_v0 }
0x1756   :  { %6154 = vmatpush.xpose.msk.msrb.mxu1 %vm529_vm14, %v3291_v3  ;;  %v3281_v3 = vmul.f32 0.35355338, %v8695_v36  ;;  %v3286_v36 = vmul.f32 0.35355338, %v8683_v25 }
0x1759   :  { %v6434_v45 = vpop.permute.xlu0 %6433 }
0x175a   :  { %v6435_v41 = vunpack.i.l.bf16 %v6434_v45  ;;  %6155 = vmatpush.xpose.msk.msrb.mxu1 %vm529_vm14, %v3289_v47  ;;  %v6436_v28 = vunpack.i.h.bf16 %v6434_v45  ;;  %v3280_v47 = vmul.f32 0.35355338, %v8697_v5  ;;  %v3285_v5 = vmul.f32 0.35355338, %v8677_v61 }
0x175c   :  { %3867 = vmatpush.msrb.mxu3 %v6435_v41 }
0x175d   :  { %6156 = vmatmul.msk.f32.vlgmr.msrb.gmra.mxu1 %vm529_vm14, %v3272_v19 }
0x175e   :  { %3868 = vmatpush.msrb.mxu3 %v6436_v28 }
0x1760   :  { %3869 = vmatpush.msrb.mxu3 %v6450_v18 }
0x1761   :  { %v6439_v63 = vpop.permute.xlu0 %6438 }
0x1762   :  { %v6440_v33 = vunpack.i.l.bf16 %v6439_v63  ;;  %3870 = vmatpush.msrb.mxu3 %v6451_v34  ;;  %v6441_v1 = vunpack.i.h.bf16 %v6439_v63 }
0x1764   :  { %3871 = vmatpush.msrb.mxu3 %v6440_v33 }
0x1765   :  { %6157 = vmatmul.msk.f32.gmra.mxu1 %vm529_vm14, %v3273_v44 }
0x1766   :  { %3872 = vmatpush.msrb.mxu3 %v6441_v1 }
0x1768   :  { %3873 = vmatpush.msrb.mxu3 %v6455_v15 }
0x176a   :  { %3874 = vmatpush.msrb.mxu3 %v6456_v29 }
0x176d   :  { %6158 = vmatmul.msk.f32.gmra.mxu1 %vm529_vm14, %v3274_v27  ;;  %v6462_v27 = vpack.i.bf16 %v8649_v7, %v8659_v24 }
0x1775   :  { %6159 = vmatmul.msk.f32.gmra.mxu1 %vm529_vm14, %v3275_v20 }
0x177d   :  { %6160 = vmatmul.msk.f32.gmra.mxu1 %vm529_vm14, %v3276_v10 }
0x1785   :  { %6161 = vmatmul.msk.f32.gmra.mxu1 %vm529_vm14, %v3277_v32 }
0x178d   :  { %6162 = vmatmul.msk.f32.gmra.mxu1 %vm529_vm14, %v3278_v37 }
0x1795   :  { %6163 = vmatmul.msk.f32.gmra.mxu1 %vm529_vm14, %v3279_v9 }
0x179d   :  { %6164 = vmatmul.msk.f32.gmra.mxu1 %vm529_vm14, %v3280_v47 }
0x17a5   :  { %6165 = vmatmul.msk.f32.gmra.mxu1 %vm529_vm14, %v3281_v3 }
0x17ad   :  { %6166 = vmatmul.msk.f32.gmra.mxu1 %vm529_vm14, %v3282_v52 }
0x17b5   :  { %6167 = vmatmul.msk.f32.gmra.mxu1 %vm529_vm14, %v3283_v49 }
0x17bd   :  { %6168 = vmatmul.msk.f32.gmra.mxu1 %vm529_vm14, %v3284_v55 }
0x17c5   :  { %6169 = vmatmul.msk.f32.gmra.mxu1 %vm529_vm14, %v3285_v5 }
0x17cd   :  { %6170 = vmatmul.msk.f32.gmra.mxu1 %vm529_vm14, %v3286_v36 }
0x17d5   :  { %6171 = vmatmul.msk.f32.gmra.mxu1 %vm529_vm14, %v3287_v62 }
0x17da   :  { %v3417_v45 = vpop.f32.mrf.mxu1 }
0x17db   :  { %v3418_v12 = vadd.f32 %v3417_v45, %v7363_v11  ;;  %v6457_v45 = vpack.i.bf16 %v8735_v43, %v8715_v2 }
0x17dd   :  { %3465 = vmax.xlane.f32.xlu2 %v3418_v12 }
0x17e2   :  { %v3420_v41 = vpop.f32.mrf.mxu1 }
0x17e3   :  { %v3421_v13 = vadd.f32 %v3420_v41, %v7371_v17 }
0x17e5   :  { %3467 = vmax.xlane.f32.xlu0 %v3421_v13 }
0x17ea   :  { %v3423_v19 = vpop.f32.mrf.mxu1 }
0x17eb   :  { %v3424_v61 = vadd.f32 %v3423_v19, %v7379_v22 }
0x17ed   :  { %3469 = vmax.xlane.f32.xlu1 %v3424_v61 }
0x17f2   :  { %v3426_v28 = vpop.f32.mrf.mxu1 }
0x17f3   :  { %v8798_v25 = vadd.f32 %v3426_v28, %v7414_v42 }
0x17f5   :  { %3471 = vmax.xlane.f32.xlu2 %v8798_v25 }
0x17fa   :  { %v3429_v58 = vpop.f32.mrf.mxu1 }
0x17fb   :  { %v8802_v18 = vadd.f32 %v3429_v58, %v7423_v23 }
0x17fd   :  { %3473 = vmax.xlane.f32.xlu0 %v8802_v18 }
0x1802   :  { %v3432_v34 = vpop.f32.mrf.mxu1 }
0x1803   :  { %v8806_v63 = vadd.f32 %v3432_v34, %v7396_v56 }
0x1805   :  { %3475 = vmax.xlane.f32.xlu1 %v8806_v63 }
0x180a   :  { %v3435_v33 = vpop.f32.mrf.mxu1 }
0x180b   :  { %v8810_v21 = vadd.f32 %v3435_v33, %v7404_v48 }
0x180d   :  { %3477 = vmax.xlane.f32.xlu1 %v8810_v21 }
0x1812   :  { %v3438_v44 = vpop.f32.mrf.mxu1 }
0x1813   :  { %v3439_v1 = vadd.f32 %v3438_v44, %v7432_v53 }
0x1815   :  { %3479 = vmax.xlane.f32.xlu0 %v3439_v1 }
0x181a   :  { %v3441_v15 = vpop.f32.mrf.mxu1 }
0x181b   :  { %v8815_v29 = vadd.f32 %v3441_v15, %v7442_v50 }
0x181d   :  { %3481 = vmax.xlane.f32.xlu0 %v8815_v29 }
0x1822   :  { %v3444_v20 = vpop.f32.mrf.mxu1 }
0x1823   :  { %v8822_v3 = vadd.f32 %v3444_v20, %v7480_v4 }
0x182a   :  { %v3447_v37 = vpop.f32.mrf.mxu1 }
0x1831   :  { %6463 = vrot.lane.b32.xlu0 %v6462_v27, %s6944_s9 }
0x1832   :  { %v3450_v5 = vpop.f32.mrf.mxu1 }
0x1833   :  { %v8829_v7 = vadd.f32 %v3450_v5, %v7500_v54 }
0x183a   :  { %v3453_v36 = vpop.f32.mrf.mxu1 }
0x183b   :  { %v8836_v62 = vadd.f32 %v3453_v36, %v7519_v38 }
0x1850   :  { %v3466_v10 = vpop.xlane.xlu2 %3465 }
0x1851   :  { %v3497_v32 = vsub.f32 %v3418_v12, %v3466_v10  ;;  %v6467_v12 = vpack.i.bf16 %v8643_v14, %v8645_v0 }
0x1853   :  { %v3513_v9 = vmul.f32 1.442695, %v3497_v32 }
0x1855   :  { %6742 = vpow2.f32 %v3513_v9  ;;  %v8858_v9 = vadd.f32 %v3447_v37, %v7450_v46 }
0x1858   :  { %v3468_v47 = vpop.xlane.xlu0 %3467 }
0x1859   :  { %v3498_v52 = vsub.f32 %v3421_v13, %v3468_v47  ;;  %v3456_v13 = vpop.f32.mrf.mxu1 }
0x185a   :  { %v8869_v37 = vadd.f32 %v3456_v13, %v7532_v59 }
0x185b   :  { %v8824_v49 = vpop.eup %6742  ;;  %v3515_v55 = vmul.f32 1.442695, %v3498_v52  ;;  %3483 = vmax.xlane.f32.xlu0 %v8822_v3 }
0x185c   :  { %3545 = vadd.xlane.f32.xlu2 %v8824_v49 }
0x185d   :  { %6744 = vpow2.f32 %v3515_v55 }
0x1860   :  { %v3470_v58 = vpop.xlane.xlu1 %3469 }
0x1861   :  { %v3459_v33 = vpop.f32.mrf.mxu1  ;;  %v3499_v44 = vsub.f32 %v3424_v61, %v3470_v58 }
0x1863   :  { %v8831_v24 = vpop.eup %6744  ;;  %3487 = vmax.xlane.f32.xlu0 %v8829_v7  ;;  %v3517_v15 = vmul.f32 1.442695, %v3499_v44 }
0x1864   :  { %3547 = vadd.xlane.f32.xlu1 %v8831_v24 }
0x1868   :  { %v3472_v2 = vpop.xlane.xlu2 %3471 }
0x1869   :  { %v3462_v43 = vpop.f32.mrf.mxu1  ;;  %v3500_v14 = vsub.f32 %v8798_v25, %v3472_v2 }
0x186a   :  { %v8850_v0 = vadd.f32 %v3462_v43, %v7551_v39 }
0x186b   :  { %3489 = vmax.xlane.f32.xlu0 %v8836_v62 }
0x1870   :  { %v3474_v41 = vpop.xlane.xlu0 %3473 }
0x1871   :  { %v3501_v61 = vsub.f32 %v8802_v18, %v3474_v41 }
0x1873   :  { %v3521_v32 = vmul.f32 1.442695, %v3501_v61 }
0x1874   :  { %6458 = vrot.lane.b32.xlu2 %v6457_v45, %s6944_s9 }
0x1878   :  { %v3476_v10 = vpop.xlane.xlu1 %3475 }
0x1879   :  { %v3502_v52 = vsub.f32 %v8806_v63, %v3476_v10 }
0x187b   :  { %v3523_v5 = vmul.f32 1.442695, %v3502_v52 }
0x187d   :  { %6468 = vrot.lane.b32.xlu1 %v6467_v12, %s6944_s9 }
0x1880   :  { %v3478_v18 = vpop.xlane.xlu1 %3477 }
0x1881   :  { %v3503_v12 = vsub.f32 %v8810_v21, %v3478_v18 }
0x1883   :  { %v3525_v63 = vmul.f32 1.442695, %v3503_v12 }
0x1888   :  { %v3480_v19 = vpop.xlane.xlu0 %3479 }
0x1889   :  { %v3504_v28 = vsub.f32 %v3439_v1, %v3480_v19  ;;  %v3519_v1 = vmul.f32 1.442695, %v3500_v14  ;;  %v10044_v19 = vld [vmem:[#allocation2_spill] sm:$0xff] }
0x188b   :  { %v3527_v34 = vmul.f32 1.442695, %v3504_v28  ;;  %v8884_v28 = vadd.f32 %v3459_v33, %v10044_v19 }
0x188d   :  { %6746 = vpow2.f32 %v3527_v34 }
0x188e   :  { %6748 = vpow2.f32 %v3517_v15 }
0x188f   :  { %6750 = vpow2.f32 %v3519_v1 }
0x1890   :  { %v3482_v47 = vpop.xlane.xlu0 %3481  ;;  %6752 = vpow2.f32 %v3521_v32 }
0x1891   :  { %v3505_v55 = vsub.f32 %v8815_v29, %v3482_v47  ;;  %6754 = vpow2.f32 %v3523_v5 }
0x1893   :  { %v8845_v27 = vpop.eup %6746  ;;  %v3529_v45 = vmul.f32 1.442695, %v3505_v55 }
0x1894   :  { %3559 = vadd.xlane.f32.xlu0 %v8845_v27  ;;  %v8852_v20 = vpop.eup %6748 }
0x1895   :  { %v8861_v25 = vpop.eup %6750  ;;  %6756 = vpow2.f32 %v3529_v45 }
0x1896   :  { %v8866_v36 = vpop.eup %6752  ;;  %6758 = vpow2.f32 %v3525_v63 }
0x1897   :  { %v8874_v41 = vpop.eup %6754 }
0x189b   :  { %v8877_v29 = vpop.eup %6756 }
0x189c   :  { %3495 = vmax.xlane.f32.xlu0 %v8850_v0  ;;  %v8880_v13 = vpop.eup %6758 }
0x189d   :  { %3549 = vadd.xlane.f32.xlu2 %v8852_v20 }
0x18a3   :  { %v6464_v21 = vpop.permute.xlu0 %6463 }
0x18a4   :  { %v6466_v55 = vunpack.i.h.bf16 %v6464_v21 }
0x18a5   :  { %3485 = vmax.xlane.f32.xlu2 %v8858_v9 }
0x18a7   :  { %3551 = vadd.xlane.f32.xlu1 %v8861_v25 }
0x18ad   :  { %3553 = vadd.xlane.f32.xlu2 %v8866_v36 }
0x18af   :  { %3491 = vmax.xlane.f32.xlu1 %v8869_v37 }
0x18b5   :  { %3555 = vadd.xlane.f32.xlu2 %v8874_v41 }
0x18b7   :  { %3561 = vadd.xlane.f32.xlu1 %v8877_v29 }
0x18bd   :  { %3557 = vadd.xlane.f32.xlu2 %v8880_v13 }
0x18c5   :  { %3493 = vmax.xlane.f32.xlu2 %v8884_v28 }
0x18ce   :  { %v3484_v58 = vpop.xlane.xlu0 %3483 }
0x18cf   :  { %v3506_v34 = vsub.f32 %v8822_v3, %v3484_v58  ;;  %v3546_v44 = vpop.xlane.xlu2 %3545  ;;  %v6465_v3 = vunpack.i.l.bf16 %v6464_v21 }
0x18d0   :  { %vm3582_vm7 = vweird.f32 %v3546_v44 }
0x18d1   :  { %v3531_v15 = vmul.f32 1.442695, %v3506_v34 }
0x18d3   :  { %6760 = vpow2.f32 %v3531_v15 }
0x18d4   :  { %6762 = vrcp.f32 %v3546_v44 }
0x18d6   :  { %v3488_v2 = vpop.xlane.xlu0 %3487 }
0x18d7   :  { %v3508_v43 = vsub.f32 %v8829_v7, %v3488_v2  ;;  %v6459_v14 = vpop.permute.xlu2 %6458  ;;  %v3548_v33 = vpop.xlane.xlu1 %3547 }
0x18d8   :  { %v6460_v1 = vunpack.i.l.bf16 %v6459_v14  ;;  %v6461_v47 = vunpack.i.h.bf16 %v6459_v14  ;;  %vm3597_vm13 = vweird.f32 %v3548_v33 }
0x18d9   :  { %v8889_v61 = vpop.eup %6760  ;;  %v3535_v10 = vmul.f32 1.442695, %v3508_v43  ;;  %v3588_v43 = vand.u32 2147483648, %v3546_v44 }
0x18da   :  { %v6763_v32 = vpop.eup %6762  ;;  %3563 = vadd.xlane.f32.xlu2 %v8889_v61  ;;  %3875 = vmatpush.msrb.mxu3 %v6460_v1 }
0x18db   :  { %6764 = vpow2.f32 %v3535_v10  ;;  %v3578_v52 = vmul.f32 %v6763_v32, %v3546_v44  ;;  %vm3583_vm6 = vweird.f32 %v6763_v32  ;;  %v3589_v10 = vor.u32 1.1754944e-38, %v3588_v43 }
0x18dc   :  { %6766 = vrcp.f32 %v3548_v33  ;;  %3876 = vmatpush.msrb.mxu3 %v6461_v47  ;;  %vm3584_vm8 = vmor %vm3582_vm7, %vm3583_vm6 }
0x18dd   :  { %v3579_v45 = vsub.f32 1.0, %v3578_v52 }
0x18de   :  { %v3490_v5 = vpop.xlane.xlu0 %3489  ;;  %3877 = vmatpush.msrb.mxu3 %v6465_v3 }
0x18df   :  { %v3509_v7 = vsub.f32 %v8836_v62, %v3490_v5  ;;  %v3580_v58 = vmul.f32 %v6763_v32, %v3579_v45  ;;  %v3586_v62 = vand.u32 2147483647, %v3546_v44 }
0x18e0   :  { %3878 = vmatpush.msrb.mxu3 %v6466_v55 }
0x18e1   :  { %v8893_v18 = vpop.eup %6764  ;;  %v3537_v12 = vmul.f32 1.442695, %v3509_v7  ;;  %v3581_v2 = vadd.f32 %v6763_v32, %v3580_v58  ;;  %vm3587_vm9 = vcmp.eq.f32.partialorder %v3586_v62, 8.507059e+37  ;;  %v3603_v7 = vand.u32 2147483648, %v3548_v33 }
0x18e2   :  { %v6767_v63 = vpop.eup %6766  ;;  %3567 = vadd.xlane.f32.xlu0 %v8893_v18 }
0x18e3   :  { %6768 = vpow2.f32 %v3537_v12  ;;  %v3593_v34 = vmul.f32 %v6767_v63, %v3548_v33  ;;  %v3585_v14 = vsel %vm3584_vm8, %v6763_v32, %v3581_v2  ;;  %vm3598_vm12 = vweird.f32 %v6767_v63 }
0x18e4   :  { %v3590_v52 = vsel %vm3587_vm9, %v3589_v10, %v3585_v14  ;;  %v3601_v12 = vand.u32 2147483647, %v3548_v33  ;;  %vm3599_vm15 = vmor %vm3597_vm13, %vm3598_vm12  ;;  %v3604_v32 = vor.u32 1.1754944e-38, %v3603_v7 }
0x18e5   :  { %v3594_v21 = vsub.f32 1.0, %v3593_v34  ;;  %v3591_v45 = vmul.f32 %v8824_v49, %v3590_v52 }
0x18e6   :  { %vm3602_vm1 = vcmp.eq.f32.partialorder %v3601_v12, 8.507059e+37 }
0x18e7   :  { %v3595_v1 = vmul.f32 %v6767_v63, %v3594_v21 }
0x18e9   :  { %v8896_v15 = vpop.eup %6768  ;;  %v3596_v55 = vadd.f32 %v6767_v63, %v3595_v1 }
0x18ea   :  { %3569 = vadd.xlane.f32.xlu2 %v8896_v15 }
0x18eb   :  { %v3600_v44 = vsel %vm3599_vm15, %v6767_v63, %v3596_v55 }
0x18ec   :  { %v3605_v58 = vsel %vm3602_vm1, %v3604_v32, %v3600_v44 }
0x18ed   :  { %v3606_v34 = vmul.f32 %v8831_v24, %v3605_v58 }
0x18ef   :  { %v6469_v47 = vpop.permute.xlu1 %6468 }
0x18f0   :  { %v6470_v3 = vunpack.i.l.bf16 %v6469_v47  ;;  %v6471_v5 = vunpack.i.h.bf16 %v6469_v47 }
0x18f2   :  { %3879 = vmatpush.msrb.mxu3 %v6470_v3 }
0x18f4   :  { %3880 = vmatpush.msrb.mxu3 %v6471_v5 }
0x18f5   :  { %3881 = vmatmul.f32.vlgmr.msrb.gmra.mxu3 %v3591_v45 }
0x18fd   :  { %3884 = vmatmul.f32.gmra.mxu3 %v3606_v34 }
0x1907   :  { %v8901_v2 = vpop.xlane.xlu0 %3559 }
0x190f   :  { %v3496_v21 = vpop.xlane.xlu0 %3495 }
0x1910   :  { %v3512_v43 = vsub.f32 %v8850_v0, %v3496_v21  ;;  %v3550_v62 = vpop.xlane.xlu2 %3549 }
0x1911   :  { %6770 = vrcp.f32 %v3550_v62  ;;  %v3618_v24 = vand.u32 2147483648, %v3550_v62  ;;  %v3616_v0 = vand.u32 2147483647, %v3550_v62  ;;  %vm3612_vm3 = vweird.f32 %v3550_v62 }
0x1912   :  { %v3543_v49 = vmul.f32 1.442695, %v3512_v43 }
0x1913   :  { %v3619_v7 = vor.u32 1.1754944e-38, %v3618_v24  ;;  %vm3617_vm5 = vcmp.eq.f32.partialorder %v3616_v0, 8.507059e+37 }
0x1914   :  { %6772 = vpow2.f32 %v3543_v49 }
0x1917   :  { %v6771_v33 = vpop.eup %6770 }
0x1918   :  { %v3608_v14 = vmul.f32 %v6771_v33, %v3550_v62  ;;  %v3486_v1 = vpop.xlane.xlu2 %3485  ;;  %vm3613_vm2 = vweird.f32 %v6771_v33 }
0x1919   :  { %v3507_v63 = vsub.f32 %v8858_v9, %v3486_v1  ;;  %vm3614_vm4 = vmor %vm3612_vm3, %vm3613_vm2 }
0x191a   :  { %v8905_v10 = vpop.eup %6772  ;;  %v3609_v47 = vsub.f32 1.0, %v3608_v14  ;;  %v3552_v3 = vpop.xlane.xlu1 %3551 }
0x191b   :  { %v3533_v52 = vmul.f32 1.442695, %v3507_v63  ;;  %6774 = vrcp.f32 %v3552_v3  ;;  %3575 = vadd.xlane.f32.xlu2 %v8905_v10  ;;  %v3631_v63 = vand.u32 2147483647, %v3552_v3  ;;  %vm3627_vm7 = vweird.f32 %v3552_v3 }
0x191c   :  { %v3610_v55 = vmul.f32 %v6771_v33, %v3609_v47 }
0x191d   :  { %6776 = vpow2.f32 %v3533_v52  ;;  %vm3632_vm9 = vcmp.eq.f32.partialorder %v3631_v63, 8.507059e+37 }
0x191e   :  { %v3611_v5 = vadd.f32 %v6771_v33, %v3610_v55 }
0x1920   :  { %v3554_v45 = vpop.xlane.xlu2 %3553  ;;  %v3615_v12 = vsel %vm3614_vm4, %v6771_v33, %v3611_v5  ;;  %v3633_v33 = vand.u32 2147483648, %v3552_v3 }
0x1921   :  { %v6775_v9 = vpop.eup %6774  ;;  %6778 = vrcp.f32 %v3554_v45  ;;  %v3620_v44 = vsel %vm3617_vm5, %v3619_v7, %v3615_v12  ;;  %v3648_v5 = vand.u32 2147483648, %v3554_v45  ;;  %vm3642_vm13 = vweird.f32 %v3554_v45 }
0x1922   :  { %v3623_v32 = vmul.f32 %v6775_v9, %v3552_v3  ;;  %v3492_v58 = vpop.xlane.xlu1 %3491  ;;  %v3621_v34 = vmul.f32 %v8852_v20, %v3620_v44  ;;  %vm3628_vm6 = vweird.f32 %v6775_v9 }
0x1923   :  { %v8909_v21 = vpop.eup %6776  ;;  %v3510_v43 = vsub.f32 %v8869_v37, %v3492_v58  ;;  %vm3629_vm8 = vmor %vm3627_vm7, %vm3628_vm6  ;;  %v3634_v37 = vor.u32 1.1754944e-38, %v3633_v33 }
0x1924   :  { %v3624_v49 = vsub.f32 1.0, %v3623_v32  ;;  %3565 = vadd.xlane.f32.xlu1 %v8909_v21  ;;  %3887 = vmatmul.f32.gmra.mxu3 %v3621_v34  ;;  %v3646_v32 = vand.u32 2147483647, %v3554_v45 }
0x1925   :  { %v3539_v62 = vmul.f32 1.442695, %v3510_v43 }
0x1926   :  { %v3625_v14 = vmul.f32 %v6775_v9, %v3624_v49  ;;  %vm3647_vm1 = vcmp.eq.f32.partialorder %v3646_v32, 8.507059e+37 }
0x1927   :  { %v6779_v1 = vpop.eup %6778  ;;  %6780 = vpow2.f32 %v3539_v62 }
0x1928   :  { %v3638_v47 = vmul.f32 %v6779_v1, %v3554_v45  ;;  %v3556_v24 = vpop.xlane.xlu2 %3555  ;;  %v3626_v52 = vadd.f32 %v6775_v9, %v3625_v14  ;;  %vm3643_vm12 = vweird.f32 %v6779_v1 }
0x1929   :  { %6782 = vrcp.f32 %v3556_v24  ;;  %vm3644_vm15 = vmor %vm3642_vm13, %vm3643_vm12  ;;  %v3663_v63 = vand.u32 2147483648, %v3556_v24  ;;  %vm3657_vm3 = vweird.f32 %v3556_v24  ;;  %vm3687_vm13 = vweird.f32 %v8901_v2 }
0x192a   :  { %v3639_v20 = vsub.f32 1.0, %v3638_v47  ;;  %v3630_v55 = vsel %vm3629_vm8, %v6775_v9, %v3626_v52  ;;  %6784 = vrcp.f32 %v8901_v2  ;;  %v3649_v9 = vor.u32 1.1754944e-38, %v3648_v5  ;;  %v8918_v33 = vpop.xlane.xlu1 %3561 }
0x192b   :  { %v3635_v7 = vsel %vm3632_vm9, %v3634_v37, %v3630_v55  ;;  %v3661_v52 = vand.u32 2147483647, %v3556_v24  ;;  %v3664_v37 = vor.u32 1.1754944e-38, %v3663_v63 }
0x192c   :  { %v3640_v0 = vmul.f32 %v6779_v1, %v3639_v20  ;;  %v3636_v44 = vmul.f32 %v8861_v25, %v3635_v7 }
0x192d   :  { %v8913_v12 = vpop.eup %6780  ;;  %vm3662_vm5 = vcmp.eq.f32.partialorder %v3661_v52, 8.507059e+37 }
0x192e   :  { %3571 = vadd.xlane.f32.xlu1 %v8913_v12  ;;  %v3641_v3 = vadd.f32 %v6779_v1, %v3640_v0  ;;  %3890 = vmatmul.f32.gmra.mxu3 %v3636_v44 }
0x192f   :  { %v6783_v58 = vpop.eup %6782 }
0x1930   :  { %v3653_v34 = vmul.f32 %v6783_v58, %v3556_v24  ;;  %v3558_v43 = vpop.xlane.xlu2 %3557  ;;  %v3645_v49 = vsel %vm3644_vm15, %v6779_v1, %v3641_v3  ;;  %v6785_v25 = vpop.eup %6784  ;;  %vm3658_vm2 = vweird.f32 %v6783_v58 }
0x1931   :  { %6786 = vrcp.f32 %v3558_v43  ;;  %v3650_v14 = vsel %vm3647_vm1, %v3649_v9, %v3645_v49  ;;  %v3683_v55 = vmul.f32 %v6785_v25, %v8901_v2  ;;  %vm3659_vm4 = vmor %vm3657_vm3, %vm3658_vm2  ;;  %v3678_v3 = vand.u32 2147483648, %v3558_v43 }
0x1932   :  { %v3654_v62 = vsub.f32 1.0, %v3653_v34  ;;  %v3651_v47 = vmul.f32 %v8866_v36, %v3650_v14  ;;  %6788 = vrcp.f32 %v8918_v33  ;;  %v3676_v34 = vand.u32 2147483647, %v3558_v43 }
0x1933   :  { %6478 = vrot.lane.b32.xlu2 %v6477_v60, %s6946_s10  ;;  %v3684_v36 = vsub.f32 1.0, %v3683_v55  ;;  %vm3672_vm7 = vweird.f32 %v3558_v43  ;;  %vm3688_vm12 = vweird.f32 %v6785_v25  ;;  %vm3702_vm3 = vweird.f32 %v8918_v33 }
0x1934   :  { %v3655_v45 = vmul.f32 %v6783_v58, %v3654_v62  ;;  %vm3677_vm9 = vcmp.eq.f32.partialorder %v3676_v34, 8.507059e+37  ;;  %vm3689_vm15 = vmor %vm3687_vm13, %vm3688_vm12 }
0x1935   :  { %v3685_v62 = vmul.f32 %v6785_v25, %v3684_v36 }
0x1936   :  { %v3656_v1 = vadd.f32 %v6783_v58, %v3655_v45  ;;  %3893 = vmatmul.f32.gmra.mxu3 %v3651_v47 }
0x1937   :  { %v6787_v20 = vpop.eup %6786  ;;  %v3686_v52 = vadd.f32 %v6785_v25, %v3685_v62 }
0x1938   :  { %v3668_v0 = vmul.f32 %v6787_v20, %v3558_v43  ;;  %v3494_v57 = vpop.xlane.xlu2 %3493  ;;  %v3660_v16 = vsel %vm3659_vm4, %v6783_v58, %v3656_v1  ;;  %v6789_v24 = vpop.eup %6788  ;;  %vm3673_vm6 = vweird.f32 %v6787_v20  ;;  %v3693_v1 = vand.u32 2147483648, %v8901_v2 }
0x1939   :  { %v3511_v60 = vsub.f32 %v8884_v28, %v3494_v57  ;;  %v3665_v7 = vsel %vm3662_vm5, %v3664_v37, %v3660_v16  ;;  %v3698_v58 = vmul.f32 %v6789_v24, %v8918_v33  ;;  %vm3674_vm8 = vmor %vm3672_vm7, %vm3673_vm6  ;;  %v3679_v28 = vor.u32 1.1754944e-38, %v3678_v3 }
0x193a   :  { %v3669_v5 = vsub.f32 1.0, %v3668_v0  ;;  %v3666_v9 = vmul.f32 %v8874_v41, %v3665_v7  ;;  %v3691_v43 = vand.u32 2147483647, %v8901_v2  ;;  %v3694_v37 = vor.u32 1.1754944e-38, %v3693_v1 }
0x193b   :  { %v3541_v44 = vmul.f32 1.442695, %v3511_v60  ;;  %v3699_v47 = vsub.f32 1.0, %v3698_v58  ;;  %vm3703_vm2 = vweird.f32 %v6789_v24  ;;  %v3708_v16 = vand.u32 2147483648, %v8918_v33 }
0x193c   :  { %v3670_v32 = vmul.f32 %v6787_v20, %v3669_v5  ;;  %vm3692_vm1 = vcmp.eq.f32.partialorder %v3691_v43, 8.507059e+37  ;;  %v3706_v60 = vand.u32 2147483647, %v8918_v33  ;;  %vm3704_vm4 = vmor %vm3702_vm3, %vm3703_vm2 }
0x193d   :  { %6790 = vpow2.f32 %v3541_v44  ;;  %v3700_v55 = vmul.f32 %v6789_v24, %v3699_v47  ;;  %v3709_v26 = vor.u32 1.1754944e-38, %v3708_v16 }
0x193e   :  { %v3671_v49 = vadd.f32 %v6787_v20, %v3670_v32  ;;  %3896 = vmatmul.f32.gmra.mxu3 %v3666_v9  ;;  %vm3707_vm5 = vcmp.eq.f32.partialorder %v3706_v60, 8.507059e+37 }
0x193f   :  { %v3701_v57 = vadd.f32 %v6789_v24, %v3700_v55 }
0x1940   :  { %v3675_v14 = vsel %vm3674_vm8, %v6787_v20, %v3671_v49  ;;  %v3690_v20 = vsel %vm3689_vm15, %v6785_v25, %v3686_v52 }
0x1941   :  { %v3680_v45 = vsel %vm3677_vm9, %v3679_v28, %v3675_v14  ;;  %v3695_v0 = vsel %vm3692_vm1, %v3694_v37, %v3690_v20  ;;  %v3705_v25 = vsel %vm3704_vm4, %v6789_v24, %v3701_v57 }
0x1942   :  { %v3681_v41 = vmul.f32 %v8880_v13, %v3680_v45  ;;  %v3696_v2 = vmul.f32 %v8845_v27, %v3695_v0  ;;  %v3710_v40 = vsel %vm3707_vm5, %v3709_v26, %v3705_v25 }
0x1943   :  { %v8930_v63 = vpop.eup %6790  ;;  %v3711_v7 = vmul.f32 %v8877_v29, %v3710_v40 }
0x1944   :  { %3573 = vadd.xlane.f32.xlu0 %v8930_v63 }
0x1946   :  { %3899 = vmatmul.f32.gmra.mxu3 %v3681_v41 }
0x1947   :  { %6473 = vrot.lane.b32.xlu1 %v6472_v31, %s6946_s10 }
0x194d   :  { %v3564_v13 = vpop.xlane.xlu2 %3563 }
0x194e   :  { %6792 = vrcp.f32 %v3564_v13  ;;  %3902 = vmatmul.f32.gmra.mxu3 %v3696_v2  ;;  %v3723_v44 = vand.u32 2147483648, %v3564_v13  ;;  %v3721_v3 = vand.u32 2147483647, %v3564_v13  ;;  %vm3717_vm7 = vweird.f32 %v3564_v13 }
0x1950   :  { %v3724_v33 = vor.u32 1.1754944e-38, %v3723_v44  ;;  %vm3722_vm9 = vcmp.eq.f32.partialorder %v3721_v3, 8.507059e+37 }
0x1954   :  { %v6793_v31 = vpop.eup %6792 }
0x1955   :  { %v3713_v5 = vmul.f32 %v6793_v31, %v3564_v13  ;;  %vm3718_vm6 = vweird.f32 %v6793_v31  ;;  %v3568_v49 = vpop.xlane.xlu0 %3567 }
0x1956   :  { %3905 = vmatmul.f32.gmra.mxu3 %v3711_v7  ;;  %vm3719_vm8 = vmor %vm3717_vm7, %vm3718_vm6  ;;  %6794 = vrcp.f32 %v3568_v49  ;;  %v3753_v40 = vand.u32 2147483648, %v3568_v49  ;;  %vm3747_vm3 = vweird.f32 %v3568_v49  ;;  %v3751_v7 = vand.u32 2147483647, %v3568_v49 }
0x1957   :  { %v3714_v36 = vsub.f32 1.0, %v3713_v5 }
0x1958   :  { %vm3752_vm5 = vcmp.eq.f32.partialorder %v3751_v7, 8.507059e+37 }
0x1959   :  { %v3715_v32 = vmul.f32 %v6793_v31, %v3714_v36 }
0x195b   :  { %v3716_v27 = vadd.f32 %v6793_v31, %v3715_v32 }
0x195c   :  { %v6795_v62 = vpop.eup %6794 }
0x195d   :  { %v3720_v9 = vsel %vm3719_vm8, %v6793_v31, %v3716_v27  ;;  %v3570_v29 = vpop.xlane.xlu2 %3569  ;;  %v3743_v14 = vmul.f32 %v6795_v62, %v3568_v49  ;;  %vm3748_vm1 = vweird.f32 %v6795_v62  ;;  %v3754_v27 = vor.u32 1.1754944e-38, %v3753_v40 }
0x195e   :  { %v3725_v24 = vsel %vm3722_vm9, %v3724_v33, %v3720_v9  ;;  %vm3749_vm4 = vmor %vm3747_vm3, %vm3748_vm1  ;;  %vm3762_vm7 = vweird.f32 %v3570_v29  ;;  %v3766_v49 = vand.u32 2147483647, %v3570_v29 }
0x195f   :  { %v3726_v34 = vmul.f32 %v8889_v61, %v3725_v24  ;;  %v3744_v47 = vsub.f32 1.0, %v3743_v14 }
0x1960   :  { %vm3767_vm9 = vcmp.eq.f32.partialorder %v3766_v49, 8.507059e+37 }
0x1961   :  { %3908 = vmatmul.f32.gmra.mxu3 %v3726_v34  ;;  %v3745_v55 = vmul.f32 %v6795_v62, %v3744_v47 }
0x1963   :  { %v3746_v25 = vadd.f32 %v6795_v62, %v3745_v55 }
0x1965   :  { %v3750_v3 = vsel %vm3749_vm4, %v6795_v62, %v3746_v25 }
0x1966   :  { %v3755_v33 = vsel %vm3752_vm5, %v3754_v27, %v3750_v3 }
0x1978   :  { %v8947_v28 = vpop.f32.mrf.mxu3 }
0x1980   :  { %v8951_v61 = vpop.f32.mrf.mxu3 }
0x198e   :  { %v8958_v9 = vpop.xlane.xlu2 %3575 }
0x1997   :  { %v3566_v58 = vpop.xlane.xlu1 %3565 }
0x1998   :  { %6796 = vrcp.f32 %v3566_v58  ;;  %v3738_v20 = vand.u32 2147483648, %v3566_v58  ;;  %v3736_v57 = vand.u32 2147483647, %v3566_v58  ;;  %vm3732_vm13 = vweird.f32 %v3566_v58 }
0x1999   :  { %6798 = vrcp.f32 %v3570_v29 }
0x199a   :  { %v3739_v13 = vor.u32 1.1754944e-38, %v3738_v20  ;;  %vm3737_vm2 = vcmp.eq.f32.partialorder %v3736_v57, 8.507059e+37 }
0x199e   :  { %v6797_v45 = vpop.eup %6796 }
0x199f   :  { %v3728_v52 = vmul.f32 %v6797_v45, %v3566_v58  ;;  %v6799_v1 = vpop.eup %6798  ;;  %vm3733_vm12 = vweird.f32 %v6797_v45  ;;  %v3768_v58 = vand.u32 2147483648, %v3570_v29 }
0x19a0   :  { %v3758_v37 = vmul.f32 %v6799_v1, %v3570_v29  ;;  %vm3734_vm15 = vmor %vm3732_vm13, %vm3733_vm12  ;;  %vm3763_vm6 = vweird.f32 %v6799_v1 }
0x19a1   :  { %v3729_v41 = vsub.f32 1.0, %v3728_v52  ;;  %v8949_v43 = vpop.xlane.xlu1 %3571  ;;  %vm3764_vm8 = vmor %vm3762_vm7, %vm3763_vm6  ;;  %v3769_v47 = vor.u32 1.1754944e-38, %v3768_v58  ;;  %vm3807_vm7 = vweird.f32 %v8958_v9 }
0x19a2   :  { %6800 = vrcp.f32 %v8949_v43  ;;  %v3759_v2 = vsub.f32 1.0, %v3758_v37  ;;  %v3783_v37 = vand.u32 2147483648, %v8949_v43  ;;  %vm3777_vm13 = vweird.f32 %v8949_v43 }
0x19a3   :  { %v3730_v0 = vmul.f32 %v6797_v45, %v3729_v41  ;;  %6802 = vrcp.f32 %v8958_v9  ;;  %v3781_v29 = vand.u32 2147483647, %v8949_v43 }
0x19a4   :  { %v3760_v44 = vmul.f32 %v6799_v1, %v3759_v2 }
0x19a5   :  { %v3731_v16 = vadd.f32 %v6797_v45, %v3730_v0  ;;  %vm3782_vm1 = vcmp.eq.f32.partialorder %v3781_v29, 8.507059e+37 }
0x19a6   :  { %v3761_v34 = vadd.f32 %v6799_v1, %v3760_v44 }
0x19a7   :  { %v3735_v60 = vsel %vm3734_vm15, %v6797_v45, %v3731_v16  ;;  %v8955_v36 = vpop.f32.mrf.mxu3  ;;  %v3784_v16 = vor.u32 1.1754944e-38, %v3783_v37 }
0x19a8   :  { %v6801_v26 = vpop.eup %6800  ;;  %v3740_v31 = vsel %vm3737_vm2, %v3739_v13, %v3735_v60  ;;  %v3765_v62 = vsel %vm3764_vm8, %v6799_v1, %v3761_v34  ;;  %v3811_v34 = vand.u32 2147483647, %v8958_v9 }
0x19a9   :  { %v3741_v5 = vmul.f32 %v8909_v21, %v3740_v31  ;;  %v3773_v32 = vmul.f32 %v6801_v26, %v8949_v43  ;;  %v3756_v21 = vmul.f32 %v8893_v18, %v3755_v33  ;;  %v3770_v52 = vsel %vm3767_vm9, %v3769_v47, %v3765_v62  ;;  %v6803_v20 = vpop.eup %6802 }
0x19aa   :  { %vm3778_vm12 = vweird.f32 %v6801_v26  ;;  %v3771_v18 = vmul.f32 %v8896_v15, %v3770_v52  ;;  %v3803_v1 = vmul.f32 %v6803_v20, %v8958_v9  ;;  %vm3808_vm6 = vweird.f32 %v6803_v20 }
0x19ab   :  { %3911 = vmatmul.f32.gmra.mxu3 %v3741_v5  ;;  %v3774_v24 = vsub.f32 1.0, %v3773_v32  ;;  %vm3779_vm15 = vmor %vm3777_vm13, %vm3778_vm12  ;;  %v3813_v33 = vand.u32 2147483648, %v8958_v9  ;;  %vm3812_vm9 = vcmp.eq.f32.partialorder %v3811_v34, 8.507059e+37 }
0x19ac   :  { %v3804_v60 = vsub.f32 1.0, %v3803_v1  ;;  %vm3809_vm8 = vmor %vm3807_vm7, %vm3808_vm6  ;;  %v6479_v1 = vpop.permute.xlu2 %6478 }
0x19ad   :  { %v3775_v45 = vmul.f32 %v6801_v26, %v3774_v24  ;;  %v3814_v49 = vor.u32 1.1754944e-38, %v3813_v33 }
0x19ae   :  { %v3805_v43 = vmul.f32 %v6803_v20, %v3804_v60 }
0x19af   :  { %v3776_v55 = vadd.f32 %v6801_v26, %v3775_v45 }
0x19b0   :  { %v3806_v27 = vadd.f32 %v6803_v20, %v3805_v43 }
0x19b1   :  { %v8962_v14 = vpop.f32.mrf.mxu3  ;;  %v3780_v57 = vsel %vm3779_vm15, %v6801_v26, %v3776_v55 }
0x19b2   :  { %v3785_v2 = vsel %vm3782_vm1, %v3784_v16, %v3780_v57  ;;  %v6480_v57 = vunpack.i.l.bf16 %v6479_v1  ;;  %v6481_v16 = vunpack.i.h.bf16 %v6479_v1 }
0x19b3   :  { %3914 = vmatmul.f32.gmra.mxu3 %v3756_v21  ;;  %v3786_v31 = vmul.f32 %v8913_v12, %v3785_v2  ;;  %v3810_v21 = vsel %vm3809_vm8, %v6803_v20, %v3806_v27 }
0x19b4   :  { %v3815_v45 = vsel %vm3812_vm9, %v3814_v49, %v3810_v21 }
0x19b5   :  { %v3816_v62 = vmul.f32 %v8905_v10, %v3815_v45 }
0x19b7   :  { %v3574_v41 = vpop.xlane.xlu0 %3573 }
0x19b8   :  { %6804 = vrcp.f32 %v3574_v41  ;;  %v3798_v15 = vand.u32 2147483648, %v3574_v41  ;;  %v3796_v44 = vand.u32 2147483647, %v3574_v41  ;;  %vm3792_vm3 = vweird.f32 %v3574_v41 }
0x19b9   :  { %v3894_v0 = vpop.f32.mrf.mxu3 }
0x19ba   :  { %3934 = vrot.lane.b32.xlu0 %v3894_v0, %s6947_s11  ;;  %v3799_v32 = vor.u32 1.1754944e-38, %v3798_v15  ;;  %vm3797_vm5 = vcmp.eq.f32.partialorder %v3796_v44, 8.507059e+37 }
0x19bb   :  { %3917 = vmatmul.f32.gmra.mxu3 %v3771_v18  ;;  %v6474_v18 = vpop.permute.xlu1 %6473 }
0x19bc   :  { %v6476_v29 = vunpack.i.h.bf16 %v6474_v18  ;;  %v6475_v0 = vunpack.i.l.bf16 %v6474_v18 }
0x19be   :  { %v6805_v13 = vpop.eup %6804  ;;  %4030 = vmatpush.msrb.mxu2 %v6475_v0 }
0x19bf   :  { %v3788_v25 = vmul.f32 %v6805_v13, %v3574_v41  ;;  %vm3793_vm2 = vweird.f32 %v6805_v13 }
0x19c0   :  { %vm3794_vm4 = vmor %vm3792_vm3, %vm3793_vm2  ;;  %4031 = vmatpush.msrb.mxu2 %v6476_v29 }
0x19c1   :  { %v3789_v40 = vsub.f32 1.0, %v3788_v25  ;;  %v3897_v5 = vpop.f32.mrf.mxu3 }
0x19c2   :  { %3936 = vrot.lane.b32.xlu2 %v3897_v5, %s6947_s11  ;;  %4032 = vmatpush.msrb.mxu2 %v6480_v57 }
0x19c3   :  { %v3790_v7 = vmul.f32 %v6805_v13, %v3789_v40  ;;  %3920 = vmatmul.f32.gmra.mxu3 %v3786_v31 }
0x19c4   :  { %4033 = vmatpush.msrb.mxu2 %v6481_v16 }
0x19c5   :  { %v3791_v26 = vadd.f32 %v6805_v13, %v3790_v7 }
0x19c7   :  { %v3795_v3 = vsel %vm3794_vm4, %v6805_v13, %v3791_v26 }
0x19c8   :  { %v3800_v12 = vsel %vm3797_vm5, %v3799_v32, %v3795_v3 }
0x19c9   :  { %v3801_v24 = vmul.f32 %v8930_v63, %v3800_v12  ;;  %v3900_v58 = vpop.f32.mrf.mxu3 }
0x19ca   :  { %3938 = vrot.lane.b32.xlu2 %v3900_v58, %s6947_s11 }
0x19cb   :  { %3923 = vmatmul.f32.gmra.mxu3 %v3801_v24 }
0x19d1   :  { %v3903_v47 = vpop.f32.mrf.mxu3 }
0x19d2   :  { %3940 = vrot.lane.b32.xlu2 %v3903_v47, %s6947_s11 }
0x19d3   :  { %3926 = vmatmul.f32.gmra.mxu3 %v3816_v62 }
0x19d9   :  { %v3906_v52 = vpop.f32.mrf.mxu3 }
0x19da   :  { %3950 = vrot.lane.b32.xlu0 %v3906_v52, %s6948_s12 }
0x19e4   :  { %v3909_v63 = vpop.f32.mrf.mxu3 }
0x19e5   :  { %3952 = vrot.lane.b32.xlu0 %v3909_v63, %s6948_s12 }
0x1a1c   :  { %v3937_v25 = vpop.permute.xlu2 %3936 }
0x1a1d   :  { %v3979_v43 = vsel %vm529_vm14, %v8951_v61, %v3937_v25 }
0x1a24   :  { %v3939_v32 = vpop.permute.xlu2 %3938 }
0x1a25   :  { %v3980_v3 = vsel %vm529_vm14, %v8955_v36, %v3939_v32  ;;  %v9010_v36 = vld [vmem:[%s10033_s4 + $0x10] sm:$0x7f] }
0x1a26   :  { %v4051_v45 = vperm.slane %v9010_v36, 2 }
0x1a2c   :  { %v3935_v13 = vpop.permute.xlu0 %3934  ;;  %v3941_v61 = vpop.permute.xlu2 %3940 }
0x1a2d   :  { %v3978_v60 = vsel %vm529_vm14, %v8947_v28, %v3935_v13  ;;  %v3981_v34 = vsel %vm529_vm14, %v8962_v14, %v3941_v61  ;;  %v6128_v61 = vld [vmem:[%s10032_s2 + $0x88] sm:$0xff] }
0x1a2e   :  { %v3912_v9 = vpop.f32.mrf.mxu3 }
0x1a2f   :  { %3954 = vrot.lane.b32.xlu0 %v3912_v9, %s6948_s12 }
0x1a36   :  { %v3915_v41 = vpop.f32.mrf.mxu3 }
0x1a37   :  { %3956 = vrot.lane.b32.xlu0 %v3915_v41, %s6948_s12 }
0x1a3e   :  { %v3918_v55 = vpop.f32.mrf.mxu3 }
0x1a3f   :  { %3966 = vrot.lane.b32.xlu1 %v3918_v55, %s6949_s13 }
0x1a46   :  { %v3921_v10 = vpop.f32.mrf.mxu3 }
0x1a47   :  { %3968 = vrot.lane.b32.xlu1 %v3921_v10, %s6949_s13 }
0x1a4c   :  { %v3951_v2 = vpop.permute.xlu0 %3950 }
0x1a4d   :  { %v3982_v40 = vsel %vm1192_vm10, %v3978_v60, %v3951_v2 }
0x1a4e   :  { %v3924_v20 = vpop.f32.mrf.mxu3 }
0x1a4f   :  { %3970 = vrot.lane.b32.xlu1 %v3924_v20, %s6949_s13 }
0x1a56   :  { %v3927_v37 = vpop.f32.mrf.mxu3 }
0x1a57   :  { %3972 = vrot.lane.b32.xlu1 %v3927_v37, %s6949_s13  ;;  %v3953_v5 = vpop.permute.xlu0 %3952 }
0x1a58   :  { %v3983_v7 = vsel %vm1192_vm10, %v3979_v43, %v3953_v5 }
0x1aa1   :  { %v3955_v28 = vpop.permute.xlu0 %3954 }
0x1aa2   :  { %v3984_v27 = vsel %vm1192_vm10, %v3980_v3, %v3955_v28 }
0x1aa9   :  { %v3957_v24 = vpop.permute.xlu0 %3956 }
0x1aaa   :  { %v3985_v58 = vsel %vm1192_vm10, %v3981_v34, %v3957_v24 }
0x1ab1   :  { %v3967_v31 = vpop.permute.xlu1 %3966 }
0x1ab2   :  { %v3986_v15 = vsel %vm1197_vm11, %v3982_v40, %v3967_v31 }
0x1ab3   :  { %6172 = vmatmul.msk.f32.vlgmr.msrb.gmra.mxu2 %vm294_vm0, %v3986_v15 }
0x1ab9   :  { %v3969_v44 = vpop.permute.xlu1 %3968 }
0x1aba   :  { %v3987_v26 = vsel %vm1197_vm11, %v3983_v7, %v3969_v44 }
0x1abb   :  { %6173 = vmatmul.msk.f32.gmra.mxu2 %vm294_vm0, %v3987_v26 }
0x1ac1   :  { %v3971_v33 = vpop.permute.xlu1 %3970 }
0x1ac2   :  { %v3988_v12 = vsel %vm1197_vm11, %v3984_v27, %v3971_v33  ;;  %v6134_v27 = vld [vmem:[%s10032_s2 + $0xb8] sm:$0xff]  ;;  %v6132_v33 = vld [vmem:[%s10032_s2 + $0xa8] sm:$0xff] }
0x1ac3   :  { %6174 = vmatmul.msk.f32.gmra.mxu2 %vm294_vm0, %v3988_v12  ;;  %4179 = vmatpush.msra.mxu0 %v6134_v27  ;;  %v6130_v12 = vld [vmem:[%s10032_s2 + $0x98] sm:$0xff] }
0x1ac5   :  { %4180 = vmatpush.msra.mxu0 %v6132_v33 }
0x1ac7   :  { %4181 = vmatpush.msra.mxu0 %v6130_v12 }
0x1ac9   :  { %v3973_v21 = vpop.permute.xlu1 %3972  ;;  %4182 = vmatpush.msra.mxu0 %v6128_v61 }
0x1aca   :  { %v3989_v49 = vsel %vm1197_vm11, %v3985_v58, %v3973_v21 }
0x1acb   :  { %6175 = vmatmul.msk.f32.gmra.mxu2 %vm294_vm0, %v3989_v49 }
0x1b36   :  { %v4035_v62 = vpop.f32.mrf.mxu2 }
0x1b37   :  { %v4047_v47 = vadd.f32 %v4035_v62, %v8561_v30 }
0x1b39   :  { %v9014_v52 = vadd.f32 %v4051_v45, %v4047_v47 }
0x1b3b   :  { %v4056_v14 = vsel %vm294_vm0, %v9014_v52, 0.0 }
0x1b3c   :  { %4057 = vadd.xlane.f32.xlu2 %v4056_v14 }
0x1b3e   :  { %v4038_v63 = vpop.f32.mrf.mxu2 }
0x1b3f   :  { %v4048_v9 = vadd.f32 %v4038_v63, %v8565_v51 }
0x1b41   :  { %v9019_v41 = vadd.f32 %v4051_v45, %v4048_v9 }
0x1b43   :  { %v4059_v55 = vsel %vm294_vm0, %v9019_v41, 0.0 }
0x1b44   :  { %4060 = vadd.xlane.f32.xlu0 %v4059_v55 }
0x1b46   :  { %v4041_v10 = vpop.f32.mrf.mxu2 }
0x1b47   :  { %v4049_v20 = vadd.f32 %v4041_v10, %v8569_v35 }
0x1b49   :  { %v9024_v37 = vadd.f32 %v4051_v45, %v4049_v20 }
0x1b4b   :  { %v4062_v30 = vsel %vm294_vm0, %v9024_v37, 0.0 }
0x1b4c   :  { %4063 = vadd.xlane.f32.xlu1 %v4062_v30 }
0x1b4e   :  { %v4044_v18 = vpop.f32.mrf.mxu2 }
0x1b4f   :  { %v4050_v29 = vadd.f32 %v4044_v18, %v8573_v8 }
0x1b51   :  { %v9029_v0 = vadd.f32 %v4051_v45, %v4050_v29 }
0x1b53   :  { %v4065_v51 = vsel %vm294_vm0, %v9029_v0, 0.0 }
0x1b54   :  { %4066 = vadd.xlane.f32.xlu2 %v4065_v51  ;;  %v4144_v51 = vperm.slane %v9010_v36, 3 }
0x1baf   :  { %v4058_v1 = vpop.xlane.xlu2 %4057 }
0x1bb0   :  { %v4068_v57 = vmul.f32 %v4058_v1, %v7138_v6 }
0x1bb2   :  { %v4072_v35 = vsub.f32 %v9014_v52, %v4068_v57 }
0x1bb4   :  { %v4076_v16 = vmul.f32 %v4072_v35, %v4072_v35 }
0x1bb6   :  { %v4080_v13 = vsel %vm294_vm0, %v4076_v16, 0.0  ;;  %v4149_v16 = vperm.slane %v9010_v36, 4 }
0x1bb7   :  { %4081 = vadd.xlane.f32.xlu0 %v4080_v13  ;;  %v4061_v2 = vpop.xlane.xlu0 %4060 }
0x1bb8   :  { %v4069_v60 = vmul.f32 %v4061_v2, %v7138_v6 }
0x1bba   :  { %v9038_v8 = vsub.f32 %v9019_v41, %v4069_v60 }
0x1bbc   :  { %v4077_v25 = vmul.f32 %v9038_v8, %v9038_v8 }
0x1bbe   :  { %v4083_v40 = vsel %vm294_vm0, %v4077_v25, 0.0 }
0x1bbf   :  { %4084 = vadd.xlane.f32.xlu1 %v4083_v40  ;;  %v4064_v31 = vpop.xlane.xlu1 %4063 }
0x1bc0   :  { %v4070_v15 = vmul.f32 %v4064_v31, %v7138_v6 }
0x1bc2   :  { %v9045_v5 = vsub.f32 %v9024_v37, %v4070_v15 }
0x1bc4   :  { %v4078_v43 = vmul.f32 %v9045_v5, %v9045_v5 }
0x1bc6   :  { %v4086_v7 = vsel %vm294_vm0, %v4078_v43, 0.0 }
0x1bc7   :  { %v4067_v44 = vpop.xlane.xlu2 %4066  ;;  %4087 = vadd.xlane.f32.xlu2 %v4086_v7 }
0x1bc8   :  { %v4071_v26 = vmul.f32 %v4067_v44, %v7138_v6 }
0x1bca   :  { %v9052_v32 = vsub.f32 %v9029_v0, %v4071_v26 }
0x1bcc   :  { %v4079_v28 = vmul.f32 %v9052_v32, %v9052_v32 }
0x1bce   :  { %v4089_v3 = vsel %vm294_vm0, %v4079_v28, 0.0 }
0x1bcf   :  { %4090 = vadd.xlane.f32.xlu0 %v4089_v3 }
0x1c2a   :  { %v4082_v24 = vpop.xlane.xlu0 %4081 }
0x1c2b   :  { %v4092_v34 = vmul.f32 %v4082_v24, %v7138_v6 }
0x1c2d   :  { %v4096_v58 = vadd.f32 1e-05, %v4092_v34 }
0x1c2f   :  { %6806 = vrsqrt.f32 %v4096_v58  ;;  %vm4106_vm13 = vweird.f32 %v4096_v58 }
0x1c32   :  { %v4085_v21 = vpop.xlane.xlu1 %4084 }
0x1c33   :  { %v4093_v49 = vmul.f32 %v4085_v21, %v7138_v6 }
0x1c35   :  { %v6807_v45 = vpop.eup %6806  ;;  %v4097_v62 = vadd.f32 1e-05, %v4093_v49 }
0x1c36   :  { %v4101_v47 = vmul.f32 %v6807_v45, %v4096_v58  ;;  %vm4107_vm12 = vweird.f32 %v6807_v45 }
0x1c37   :  { %6808 = vrsqrt.f32 %v4097_v62  ;;  %vm4108_vm15 = vmor %vm4106_vm13, %vm4107_vm12  ;;  %vm4116_vm2 = vweird.f32 %v4097_v62 }
0x1c38   :  { %v4102_v14 = vmul.f32 %v6807_v45, %v4101_v47 }
0x1c3a   :  { %v4103_v63 = vmul.f32 0.5, %v4102_v14  ;;  %v4088_v9 = vpop.xlane.xlu2 %4087 }
0x1c3b   :  { %v4094_v55 = vmul.f32 %v4088_v9, %v7138_v6 }
0x1c3c   :  { %v4104_v10 = vsub.f32 1.5, %v4103_v63 }
0x1c3d   :  { %v6809_v20 = vpop.eup %6808  ;;  %v4098_v30 = vadd.f32 1e-05, %v4094_v55 }
0x1c3e   :  { %v4105_v18 = vmul.f32 %v6807_v45, %v4104_v10  ;;  %v4111_v29 = vmul.f32 %v6809_v20, %v4097_v62  ;;  %vm4117_vm1 = vweird.f32 %v6809_v20 }
0x1c3f   :  { %6810 = vrsqrt.f32 %v4098_v30  ;;  %vm4118_vm3 = vmor %vm4116_vm2, %vm4117_vm1  ;;  %vm4126_vm5 = vweird.f32 %v4098_v30 }
0x1c40   :  { %v4109_v1 = vsel %vm4108_vm15, %v6807_v45, %v4105_v18  ;;  %v4112_v57 = vmul.f32 %v6809_v20, %v4111_v29  ;;  %v6194_v18 = vld [vmem:[%s10034_s3 + $0x170] sm:$0xff] }
0x1c41   :  { %v4140_v13 = vmul.f32 %v4109_v1, %v4072_v35  ;;  %v6192_v1 = vld [vmem:[%s10034_s3 + $0x160] sm:$0xff] }
0x1c42   :  { %v4113_v2 = vmul.f32 0.5, %v4112_v57  ;;  %v4091_v60 = vpop.xlane.xlu0 %4090 }
0x1c43   :  { %v4145_v25 = vmul.f32 %v4144_v51, %v4140_v13  ;;  %v4095_v40 = vmul.f32 %v4091_v60, %v7138_v6 }
0x1c44   :  { %v4114_v31 = vsub.f32 1.5, %v4113_v2  ;;  %v6190_v2 = vld [vmem:[%s10034_s3 + $0x150] sm:$0xff] }
0x1c45   :  { %v6811_v15 = vpop.eup %6810  ;;  %v4150_v43 = vadd.f32 %v4149_v16, %v4145_v25  ;;  %v4099_v7 = vadd.f32 1e-05, %v4095_v40  ;;  %v6189_v25 = vld [vmem:[%s10034_s3 + $0x148] sm:$0xff] }
0x1c46   :  { %v4115_v44 = vmul.f32 %v6809_v20, %v4114_v31  ;;  %v4121_v26 = vmul.f32 %v6811_v15, %v4098_v30  ;;  %vm4127_vm4 = vweird.f32 %v6811_v15  ;;  %v4154_v30 = vperm.slane %v9010_v36, 6 }
0x1c47   :  { %6812 = vrsqrt.f32 %v4099_v7  ;;  %6176 = vmatmul.msk.f32.vlgmr.msra.gmra.mxu0 %vm294_vm0, %v4150_v43  ;;  %vm4128_vm6 = vmor %vm4126_vm5, %vm4127_vm4  ;;  %vm4136_vm8 = vweird.f32 %v4099_v7  ;;  %v6188_v43 = vld [vmem:[%s10034_s3 + $0x140] sm:$0xff] }
0x1c48   :  { %v4119_v28 = vsel %vm4118_vm3, %v6809_v20, %v4115_v44  ;;  %v4122_v3 = vmul.f32 %v6811_v15, %v4121_v26  ;;  %v6186_v26 = vld [vmem:[%s10034_s3 + $0x130] sm:$0xff] }
0x1c49   :  { %v4141_v35 = vmul.f32 %v4119_v28, %v9038_v8 }
0x1c4a   :  { %v4123_v27 = vmul.f32 0.5, %v4122_v3  ;;  %v6185_v3 = vld [vmem:[%s10034_s3 + $0x128] sm:$0xff] }
0x1c4b   :  { %v4146_v33 = vmul.f32 %v4144_v51, %v4141_v35 }
0x1c4c   :  { %v4124_v12 = vsub.f32 1.5, %v4123_v27 }
0x1c4d   :  { %v6813_v61 = vpop.eup %6812  ;;  %v4151_v24 = vadd.f32 %v4149_v16, %v4146_v33 }
0x1c4e   :  { %v4125_v34 = vmul.f32 %v6811_v15, %v4124_v12  ;;  %v4131_v58 = vmul.f32 %v6813_v61, %v4099_v7  ;;  %vm4137_vm7 = vweird.f32 %v6813_v61  ;;  %v6187_v7 = vld [vmem:[%s10034_s3 + $0x138] sm:$0xff] }
0x1c4f   :  { %6177 = vmatmul.msk.f32.gmra.mxu0 %vm294_vm0, %v4151_v24  ;;  %vm4138_vm9 = vmor %vm4136_vm8, %vm4137_vm7 }
0x1c50   :  { %v4129_v21 = vsel %vm4128_vm6, %v6811_v15, %v4125_v34  ;;  %v4132_v49 = vmul.f32 %v6813_v61, %v4131_v58 }
0x1c51   :  { %v4142_v45 = vmul.f32 %v4129_v21, %v9045_v5  ;;  %v6195_v5 = vld [vmem:[%s10034_s3 + $0x178] sm:$0xff] }
0x1c52   :  { %v4133_v62 = vmul.f32 0.5, %v4132_v49  ;;  %4374 = vmatpush.msra.mxu2 %v6195_v5  ;;  %v6183_v21 = vld [vmem:[%s10034_s3 + $0x118] sm:$0xff] }
0x1c53   :  { %v4147_v47 = vmul.f32 %v4144_v51, %v4142_v45 }
0x1c54   :  { %v4134_v14 = vsub.f32 1.5, %v4133_v62  ;;  %4375 = vmatpush.msra.mxu2 %v6194_v18 }
0x1c55   :  { %v4152_v8 = vadd.f32 %v4149_v16, %v4147_v47  ;;  %v6182_v47 = vld [vmem:[%s10034_s3 + $0x110] sm:$0xff] }
0x1c56   :  { %v4135_v63 = vmul.f32 %v6813_v61, %v4134_v14 }
0x1c57   :  { %6178 = vmatmul.msk.f32.gmra.mxu0 %vm294_vm0, %v4152_v8 }
0x1c58   :  { %v4139_v9 = vsel %vm4138_vm9, %v6813_v61, %v4135_v63  ;;  %v6184_v61 = vld [vmem:[%s10034_s3 + $0x120] sm:$0xff] }
0x1c59   :  { %v4143_v55 = vmul.f32 %v4139_v9, %v9052_v32  ;;  %v6193_v32 = vld [vmem:[%s10034_s3 + $0x168] sm:$0xff] }
0x1c5a   :  { %4376 = vmatpush.msra.mxu2 %v6193_v32  ;;  %v6181_v9 = vld [vmem:[%s10034_s3 + $0x108] sm:$0xff] }
0x1c5b   :  { %v4148_v10 = vmul.f32 %v4144_v51, %v4143_v55  ;;  %v6180_v55 = vld [vmem:[%s10034_s3 + $0x100] sm:$0xff] }
0x1c5c   :  { %4377 = vmatpush.msra.mxu2 %v6192_v1 }
0x1c5d   :  { %v4153_v20 = vadd.f32 %v4149_v16, %v4148_v10  ;;  %v6191_v16 = vld [vmem:[%s10034_s3 + $0x158] sm:$0xff] }
0x1c5e   :  { %4378 = vmatpush.msra.mxu2 %v6191_v16 }
0x1c5f   :  { %6179 = vmatmul.msk.f32.gmra.mxu0 %vm294_vm0, %v4153_v20 }
0x1c60   :  { %4379 = vmatpush.msra.mxu2 %v6190_v2 }
0x1c62   :  { %4380 = vmatpush.msra.mxu2 %v6189_v25 }
0x1c64   :  { %4381 = vmatpush.msra.mxu2 %v6188_v43 }
0x1c66   :  { %4382 = vmatpush.msra.mxu2 %v6187_v7 }
0x1c68   :  { %4383 = vmatpush.msra.mxu2 %v6186_v26 }
0x1c6a   :  { %4384 = vmatpush.msra.mxu2 %v6185_v3 }
0x1c6c   :  { %4385 = vmatpush.msra.mxu2 %v6184_v61 }
0x1c6e   :  { %4386 = vmatpush.msra.mxu2 %v6183_v21 }
0x1c70   :  { %4387 = vmatpush.msra.mxu2 %v6182_v47 }
0x1c72   :  { %4388 = vmatpush.msra.mxu2 %v6181_v9 }
0x1c74   :  { %4389 = vmatpush.msra.mxu2 %v6180_v55 }
0x1cc4   :  { %v4184_v29 = vpop.f32.mrf.mxu0 }
0x1cc5   :  { %v9092_v51 = vadd.f32 %v4184_v29, %v4154_v30 }
0x1cc7   :  { %v9098_v57 = vmul.f32 0.70710677, %v9092_v51 }
0x1cc9   :  { %v9104_v13 = vand.u32 2147483647, %v9098_v57 }
0x1ccb   :  { %v4204_v60 = vmul.f32 0.3275911, %v9104_v13  ;;  %v4308_v16 = vsub.f32 0.0, %v9104_v13 }
0x1ccc   :  { %v4187_v40 = vpop.f32.mrf.mxu0 }
0x1ccd   :  { %v4208_v31 = vadd.f32 1.0, %v4204_v60  ;;  %v9113_v15 = vadd.f32 %v4187_v40, %v4154_v30  ;;  %v4312_v7 = vmul.f32 %v4308_v16, %v9104_v13 }
0x1ccf   :  { %6814 = vrcp.f32 %v4208_v31  ;;  %v9122_v44 = vmul.f32 0.70710677, %v9113_v15  ;;  %v4223_v45 = vand.u32 2147483648, %v4208_v31  ;;  %v4221_v8 = vand.u32 2147483647, %v4208_v31 }
0x1cd0   :  { %vm4217_vm13 = vweird.f32 %v4208_v31  ;;  %v4316_v47 = vmul.f32 1.442695, %v4312_v7 }
0x1cd1   :  { %v9128_v28 = vand.u32 2147483647, %v9122_v44  ;;  %v4224_v5 = vor.u32 1.1754944e-38, %v4223_v45  ;;  %vm4222_vm1 = vcmp.eq.f32.partialorder %v4221_v8, 8.507059e+37 }
0x1cd3   :  { %v4205_v35 = vmul.f32 0.3275911, %v9128_v28  ;;  %v4309_v55 = vsub.f32 0.0, %v9128_v28 }
0x1cd4   :  { %v4190_v27 = vpop.f32.mrf.mxu0 }
0x1cd5   :  { %v6815_v33 = vpop.eup %6814  ;;  %v9134_v12 = vadd.f32 %v4190_v27, %v4154_v30  ;;  %v4209_v34 = vadd.f32 1.0, %v4205_v35 }
0x1cd6   :  { %v4213_v24 = vmul.f32 %v6815_v33, %v4208_v31  ;;  %vm4218_vm12 = vweird.f32 %v6815_v33 }
0x1cd7   :  { %v9140_v58 = vmul.f32 0.70710677, %v9134_v12  ;;  %6816 = vrcp.f32 %v4209_v34  ;;  %vm4219_vm15 = vmor %vm4217_vm13, %vm4218_vm12  ;;  %v4238_v26 = vand.u32 2147483648, %v4209_v34  ;;  %v4236_v35 = vand.u32 2147483647, %v4209_v34 }
0x1cd8   :  { %v4214_v49 = vsub.f32 1.0, %v4213_v24  ;;  %vm4232_vm3 = vweird.f32 %v4209_v34 }
0x1cd9   :  { %v9146_v62 = vand.u32 2147483647, %v9140_v58  ;;  %vm4237_vm5 = vcmp.eq.f32.partialorder %v4236_v35, 8.507059e+37 }
0x1cda   :  { %v4215_v14 = vmul.f32 %v6815_v33, %v4214_v49  ;;  %v4239_v49 = vor.u32 1.1754944e-38, %v4238_v26 }
0x1cdb   :  { %v4206_v63 = vmul.f32 0.3275911, %v9146_v62  ;;  %v4310_v35 = vsub.f32 0.0, %v9146_v62 }
0x1cdc   :  { %v4216_v10 = vadd.f32 %v6815_v33, %v4215_v14  ;;  %v4193_v20 = vpop.f32.mrf.mxu0 }
0x1cdd   :  { %v4210_v18 = vadd.f32 1.0, %v4206_v63  ;;  %v9158_v32 = vadd.f32 %v4193_v20, %v4154_v30  ;;  %v6817_v29 = vpop.eup %6816 }
0x1cde   :  { %v4220_v1 = vsel %vm4219_vm15, %v6815_v33, %v4216_v10  ;;  %v4228_v60 = vmul.f32 %v6817_v29, %v4209_v34  ;;  %vm4233_vm2 = vweird.f32 %v6817_v29  ;;  %vm4332_vm15 = vcmp.ge.f32.partialorder %v9098_v57, 0.0 }
0x1cdf   :  { %v4225_v2 = vsel %vm4222_vm1, %v4224_v5, %v4220_v1  ;;  %6818 = vrcp.f32 %v4210_v18  ;;  %v9162_v31 = vmul.f32 0.70710677, %v9158_v32  ;;  %vm4234_vm4 = vmor %vm4232_vm3, %vm4233_vm2  ;;  %v4253_v10 = vand.u32 2147483648, %v4210_v18 }
0x1ce0   :  { %v4272_v25 = vmul.f32 1.0614054, %v4225_v2  ;;  %v4229_v40 = vsub.f32 1.0, %v4228_v60  ;;  %v4251_v20 = vand.u32 2147483647, %v4210_v18  ;;  %vm4247_vm7 = vweird.f32 %v4210_v18 }
0x1ce1   :  { %v9166_v3 = vand.u32 2147483647, %v9162_v31  ;;  %vm4333_vm3 = vcmp.ge.f32.partialorder %v9122_v44, 0.0  ;;  %v4346_v44 = vmul.f32 0.5, %v9134_v12 }
0x1ce2   :  { %v4276_v43 = vadd.f32 -1.4531521, %v4272_v25  ;;  %v4230_v30 = vmul.f32 %v6817_v29, %v4229_v40  ;;  %v4254_v40 = vor.u32 1.1754944e-38, %v4253_v10  ;;  %vm4252_vm9 = vcmp.eq.f32.partialorder %v4251_v20, 8.507059e+37 }
0x1ce3   :  { %v4207_v61 = vmul.f32 0.3275911, %v9166_v3 }
0x1ce4   :  { %v4280_v27 = vmul.f32 %v4276_v43, %v4225_v2  ;;  %v4231_v24 = vadd.f32 %v6817_v29, %v4230_v30 }
0x1ce5   :  { %v6819_v33 = vpop.eup %6818  ;;  %v4211_v14 = vadd.f32 1.0, %v4207_v61 }
0x1ce6   :  { %v4284_v21 = vadd.f32 1.4214138, %v4280_v27  ;;  %v4243_v45 = vmul.f32 %v6819_v33, %v4210_v18  ;;  %v4235_v13 = vsel %vm4234_vm4, %v6817_v29, %v4231_v24  ;;  %vm4248_vm6 = vweird.f32 %v6819_v33 }
0x1ce7   :  { %v4240_v9 = vsel %vm4237_vm5, %v4239_v49, %v4235_v13  ;;  %6820 = vrcp.f32 %v4211_v14  ;;  %v4313_v29 = vmul.f32 %v4309_v55, %v9128_v28  ;;  %vm4249_vm8 = vmor %vm4247_vm7, %vm4248_vm6  ;;  %v4268_v55 = vand.u32 2147483648, %v4211_v14 }
0x1ce8   :  { %v4288_v8 = vmul.f32 %v4284_v21, %v4225_v2  ;;  %v4244_v63 = vsub.f32 1.0, %v4243_v45  ;;  %v4273_v1 = vmul.f32 1.0614054, %v4240_v9  ;;  %6822 = vpow2.f32 %v4316_v47 }
0x1ce9   :  { %v4318_v18 = vmul.f32 1.442695, %v4313_v29  ;;  %vm4262_vm13 = vweird.f32 %v4211_v14  ;;  %v4269_v29 = vor.u32 1.1754944e-38, %v4268_v55  ;;  %vm4334_vm4 = vcmp.ge.f32.partialorder %v9140_v58, 0.0 }
0x1cea   :  { %v4292_v34 = vadd.f32 -0.28449672, %v4288_v8  ;;  %v4245_v5 = vmul.f32 %v6819_v33, %v4244_v63  ;;  %v4277_v60 = vadd.f32 -1.4531521, %v4273_v1  ;;  %v4314_v63 = vmul.f32 %v4310_v35, %v9146_v62 }
0x1ceb   :  { %6824 = vpow2.f32 %v4318_v18  ;;  %vm4335_vm5 = vcmp.ge.f32.partialorder %v9162_v31, 0.0 }
0x1cec   :  { %v4296_v16 = vmul.f32 %v4292_v34, %v4225_v2  ;;  %v4246_v25 = vadd.f32 %v6819_v33, %v4245_v5  ;;  %v4281_v7 = vmul.f32 %v4277_v60, %v4240_v9 }
0x1ced   :  { %v6821_v30 = vpop.eup %6820 }
0x1cee   :  { %v4300_v43 = vadd.f32 0.2548296, %v4296_v16  ;;  %v4250_v26 = vsel %vm4249_vm8, %v6819_v33, %v4246_v25  ;;  %v4258_v24 = vmul.f32 %v6821_v30, %v4211_v14  ;;  %v4285_v21 = vadd.f32 1.4214138, %v4281_v7  ;;  %v6823_v45 = vpop.eup %6822 }
0x1cef   :  { %v4255_v27 = vsel %vm4252_vm9, %v4254_v40, %v4250_v26  ;;  %vm4263_vm12 = vweird.f32 %v6821_v30  ;;  %v4266_v33 = vand.u32 2147483647, %v4211_v14  ;;  %v4320_v25 = vmul.f32 1.442695, %v4314_v63 }
0x1cf0   :  { %v4304_v61 = vmul.f32 %v4300_v43, %v4225_v2  ;;  %v4274_v49 = vmul.f32 1.0614054, %v4255_v27  ;;  %v4259_v13 = vsub.f32 1.0, %v4258_v24  ;;  %v4289_v8 = vmul.f32 %v4285_v21, %v4240_v9  ;;  %vm4264_vm1 = vmor %vm4262_vm13, %vm4263_vm12 }
0x1cf1   :  { %vm4267_vm2 = vcmp.eq.f32.partialorder %v4266_v33, 8.507059e+37  ;;  %v4344_v26 = vmul.f32 0.5, %v9092_v51  ;;  %v4311_v14 = vsub.f32 0.0, %v9166_v3  ;;  %6826 = vpow2.f32 %v4320_v25 }
0x1cf2   :  { %v4324_v47 = vmul.f32 %v6823_v45, %v4304_v61  ;;  %v4278_v28 = vadd.f32 -1.4531521, %v4274_v49  ;;  %v4260_v20 = vmul.f32 %v6821_v30, %v4259_v13  ;;  %v4293_v34 = vadd.f32 -0.28449672, %v4289_v8  ;;  %v6825_v45 = vpop.eup %6824 }
0x1cf3   :  { %v4315_v8 = vmul.f32 %v4311_v14, %v9166_v3 }
0x1cf4   :  { %v4328_v10 = vsub.f32 1.0, %v4324_v47  ;;  %v4282_v5 = vmul.f32 %v4278_v28, %v4255_v27  ;;  %v4297_v1 = vmul.f32 %v4293_v34, %v4240_v9  ;;  %v4261_v60 = vadd.f32 %v6821_v30, %v4260_v20 }
0x1cf6   :  { %v4336_v2 = vsub.f32 0.0, %v4328_v10  ;;  %v4286_v16 = vadd.f32 1.4214138, %v4282_v5  ;;  %v4301_v40 = vadd.f32 0.2548296, %v4297_v1  ;;  %v4265_v7 = vsel %vm4264_vm1, %v6821_v30, %v4261_v60 }
0x1cf7   :  { %v4270_v61 = vsel %vm4267_vm2, %v4269_v29, %v4265_v7 }
0x1cf8   :  { %v4340_v62 = vsel %vm4332_vm15, %v4328_v10, %v4336_v2  ;;  %v4290_v43 = vmul.f32 %v4286_v16, %v4255_v27  ;;  %v4305_v24 = vmul.f32 %v4301_v40, %v4240_v9  ;;  %v4275_v49 = vmul.f32 1.0614054, %v4270_v61  ;;  %v6827_v10 = vpop.eup %6826 }
0x1cf9   :  { %v4348_v35 = vadd.f32 1.0, %v4340_v62  ;;  %v4322_v9 = vmul.f32 1.442695, %v4315_v8  ;;  %v4345_v2 = vmul.f32 0.5, %v9113_v15 }
0x1cfa   :  { %v4294_v21 = vadd.f32 -0.28449672, %v4290_v43  ;;  %v4325_v18 = vmul.f32 %v6825_v45, %v4305_v24  ;;  %v4279_v13 = vadd.f32 -1.4531521, %v4275_v49  ;;  %v4373_v45 = vperm.slane %v9010_v36, 5 }
0x1cfb   :  { %v4352_v57 = vmul.f32 %v4348_v35, %v4344_v26  ;;  %6828 = vpow2.f32 %v4322_v9 }
0x1cfc   :  { %v4298_v47 = vmul.f32 %v4294_v21, %v4255_v27  ;;  %v4329_v28 = vsub.f32 1.0, %v4325_v18  ;;  %v4283_v63 = vmul.f32 %v4279_v13, %v4270_v61  ;;  %v4347_v21 = vmul.f32 0.5, %v9158_v32 }
0x1cfd   :  { %4390 = vmatmul.f32.vlgmr.msra.gmra.mxu2 %v4352_v57 }
0x1cfe   :  { %v4302_v30 = vadd.f32 0.2548296, %v4298_v47  ;;  %v4337_v51 = vsub.f32 0.0, %v4329_v28  ;;  %v4287_v33 = vadd.f32 1.4214138, %v4283_v63 }
0x1d00   :  { %v4306_v55 = vmul.f32 %v4302_v30, %v4255_v27  ;;  %v4341_v20 = vsel %vm4333_vm3, %v4329_v28, %v4337_v51  ;;  %v4291_v5 = vmul.f32 %v4287_v33, %v4270_v61 }
0x1d01   :  { %v4349_v1 = vadd.f32 1.0, %v4341_v20  ;;  %v6829_v7 = vpop.eup %6828 }
0x1d02   :  { %v4326_v34 = vmul.f32 %v6827_v10, %v4306_v55  ;;  %v4295_v60 = vadd.f32 -0.28449672, %v4291_v5 }
0x1d03   :  { %v4353_v3 = vmul.f32 %v4349_v1, %v4345_v2 }
0x1d04   :  { %v4330_v16 = vsub.f32 1.0, %v4326_v34  ;;  %v4299_v29 = vmul.f32 %v4295_v60, %v4270_v61 }
0x1d05   :  { %4393 = vmatmul.f32.gmra.mxu2 %v4353_v3 }
0x1d06   :  { %v4338_v25 = vsub.f32 0.0, %v4330_v16  ;;  %v4303_v62 = vadd.f32 0.2548296, %v4299_v29 }
0x1d08   :  { %v4342_v27 = vsel %vm4334_vm4, %v4330_v16, %v4338_v25  ;;  %v4307_v43 = vmul.f32 %v4303_v62, %v4270_v61 }
0x1d09   :  { %v4350_v40 = vadd.f32 1.0, %v4342_v27 }
0x1d0a   :  { %v4327_v35 = vmul.f32 %v6829_v7, %v4307_v43  ;;  %v9232_v43 = vld [vmem:[%s10032_s2 + $0xf0] sm:$0xff]  ;;  %v9238_v7 = vld [vmem:[%s10032_s2 + $0xe0] sm:$0xff] }
0x1d0b   :  { %v4354_v26 = vmul.f32 %v4350_v40, %v4346_v44  ;;  %4540 = vmatpush.msrb.mxu0 %v9232_v43 }
0x1d0c   :  { %v4331_v15 = vsub.f32 1.0, %v4327_v35  ;;  %v9250_v35 = vld [vmem:[%s10032_s2 + $0xc0] sm:$0xff] }
0x1d0d   :  { %4396 = vmatmul.f32.gmra.mxu2 %v4354_v26  ;;  %4541 = vmatpush.msrb.mxu0 %v9238_v7  ;;  %v9244_v26 = vld [vmem:[%s10032_s2 + $0xd0] sm:$0xff] }
0x1d0e   :  { %v4339_v14 = vsub.f32 0.0, %v4331_v15 }
0x1d0f   :  { %4542 = vmatpush.msrb.mxu0 %v9244_v26 }
0x1d10   :  { %v4343_v24 = vsel %vm4335_vm5, %v4331_v15, %v4339_v14 }
0x1d11   :  { %v4351_v49 = vadd.f32 1.0, %v4343_v24  ;;  %4543 = vmatpush.msrb.mxu0 %v9250_v35 }
0x1d13   :  { %v4355_v58 = vmul.f32 %v4351_v49, %v4347_v21  ;;  %v6522_v21 = vpack.i.bf16 %v9238_v7, %v9232_v43 }
0x1d15   :  { %4399 = vmatmul.f32.gmra.mxu2 %v4355_v58 }
0x1d80   :  { %v4391_v57 = vpop.f32.mrf.mxu2 }
0x1d81   :  { %v4392_v12 = vadd.f32 %v4391_v57, %v4373_v45 }
0x1d83   :  { %v9186_v61 = vadd.f32 %v4392_v12, %v9014_v52 }
0x1d85   :  { %v4418_v18 = vsel %vm294_vm0, %v9186_v61, 0.0 }
0x1d86   :  { %4419 = vadd.xlane.f32.xlu1 %v4418_v18 }
0x1d88   :  { %v4394_v47 = vpop.f32.mrf.mxu2 }
0x1d89   :  { %v4395_v13 = vadd.f32 %v4394_v47, %v4373_v45 }
0x1d8b   :  { %v9191_v31 = vadd.f32 %v4395_v13, %v9019_v41  ;;  %v6527_v13 = vpack.i.bf16 %v9250_v35, %v9244_v26 }
0x1d8d   :  { %v4421_v32 = vsel %vm294_vm0, %v9191_v31, 0.0 }
0x1d8e   :  { %4422 = vadd.xlane.f32.xlu2 %v4421_v32  ;;  %v6204_v32 = vld [vmem:[%s10033_s4 + $0x18] sm:$0x7f] }
0x1d90   :  { %v4397_v8 = vpop.f32.mrf.mxu2 }
0x1d91   :  { %v4398_v36 = vadd.f32 %v4397_v8, %v4373_v45 }
0x1d93   :  { %v9196_v28 = vadd.f32 %v4398_v36, %v9024_v37 }
0x1d95   :  { %v4424_v52 = vsel %vm294_vm0, %v9196_v28, 0.0 }
0x1d96   :  { %4425 = vadd.xlane.f32.xlu0 %v4424_v52 }
0x1d98   :  { %v4400_v30 = vpop.f32.mrf.mxu2 }
0x1d99   :  { %v4401_v63 = vadd.f32 %v4400_v30, %v4373_v45 }
0x1d9b   :  { %v9201_v51 = vadd.f32 %v4401_v63, %v9029_v0 }
0x1d9d   :  { %v4427_v41 = vsel %vm294_vm0, %v9201_v51, 0.0 }
0x1d9e   :  { %4428 = vadd.xlane.f32.xlu1 %v4427_v41  ;;  %v4506_v41 = vperm.slane %v6204_v32, 0 }
0x1df9   :  { %v4420_v55 = vpop.xlane.xlu1 %4419 }
0x1dfa   :  { %v4430_v33 = vmul.f32 %v4420_v55, %v7138_v6 }
0x1dfc   :  { %v4434_v10 = vsub.f32 %v9186_v61, %v4430_v33 }
0x1dfe   :  { %v4438_v37 = vmul.f32 %v4434_v10, %v4434_v10 }
0x1e00   :  { %v4442_v9 = vsel %vm294_vm0, %v4438_v37, 0.0 }
0x1e01   :  { %4443 = vadd.xlane.f32.xlu2 %v4442_v9  ;;  %v4423_v20 = vpop.xlane.xlu2 %4422  ;;  %v4511_v9 = vperm.slane %v6204_v32, 1 }
0x1e02   :  { %v4431_v34 = vmul.f32 %v4423_v20, %v7138_v6 }
0x1e04   :  { %v9210_v5 = vsub.f32 %v9191_v31, %v4431_v34 }
0x1e06   :  { %v4439_v0 = vmul.f32 %v9210_v5, %v9210_v5 }
0x1e08   :  { %v4445_v2 = vsel %vm294_vm0, %v4439_v0, 0.0 }
0x1e09   :  { %v4426_v1 = vpop.xlane.xlu0 %4425  ;;  %4446 = vadd.xlane.f32.xlu0 %v4445_v2 }
0x1e0a   :  { %v4432_v16 = vmul.f32 %v4426_v1, %v7138_v6 }
0x1e0c   :  { %v9217_v60 = vsub.f32 %v9196_v28, %v4432_v16 }
0x1e0e   :  { %v4440_v3 = vmul.f32 %v9217_v60, %v9217_v60 }
0x1e10   :  { %v4448_v25 = vsel %vm294_vm0, %v4440_v3, 0.0 }
0x1e11   :  { %4449 = vadd.xlane.f32.xlu1 %v4448_v25  ;;  %v4429_v29 = vpop.xlane.xlu1 %4428 }
0x1e12   :  { %v4433_v27 = vmul.f32 %v4429_v29, %v7138_v6 }
0x1e14   :  { %v9224_v62 = vsub.f32 %v9201_v51, %v4433_v27 }
0x1e16   :  { %v4441_v44 = vmul.f32 %v9224_v62, %v9224_v62 }
0x1e18   :  { %v4451_v40 = vsel %vm294_vm0, %v4441_v44, 0.0 }
0x1e19   :  { %4452 = vadd.xlane.f32.xlu2 %v4451_v40 }
0x1e74   :  { %v4444_v15 = vpop.xlane.xlu2 %4443 }
0x1e75   :  { %v4454_v14 = vmul.f32 %v4444_v15, %v7138_v6 }
0x1e77   :  { %v4458_v24 = vadd.f32 1e-05, %v4454_v14 }
0x1e79   :  { %6830 = vrsqrt.f32 %v4458_v24  ;;  %vm4468_vm7 = vweird.f32 %v4458_v24 }
0x1e7c   :  { %v4447_v49 = vpop.xlane.xlu0 %4446 }
0x1e7d   :  { %v4455_v45 = vmul.f32 %v4447_v49, %v7138_v6 }
0x1e7f   :  { %v6831_v58 = vpop.eup %6830  ;;  %v4459_v12 = vadd.f32 1e-05, %v4455_v45 }
0x1e80   :  { %v4463_v57 = vmul.f32 %v6831_v58, %v4458_v24  ;;  %vm4469_vm6 = vweird.f32 %v6831_v58 }
0x1e81   :  { %6832 = vrsqrt.f32 %v4459_v12  ;;  %vm4470_vm8 = vmor %vm4468_vm7, %vm4469_vm6  ;;  %vm4478_vm12 = vweird.f32 %v4459_v12 }
0x1e82   :  { %v4464_v18 = vmul.f32 %v6831_v58, %v4463_v57 }
0x1e84   :  { %v4465_v47 = vmul.f32 0.5, %v4464_v18  ;;  %v4450_v36 = vpop.xlane.xlu1 %4449 }
0x1e85   :  { %v4456_v52 = vmul.f32 %v4450_v36, %v7138_v6 }
0x1e86   :  { %v4466_v8 = vsub.f32 1.5, %v4465_v47 }
0x1e87   :  { %v6833_v63 = vpop.eup %6832  ;;  %v4460_v55 = vadd.f32 1e-05, %v4456_v52 }
0x1e88   :  { %v4467_v30 = vmul.f32 %v6831_v58, %v4466_v8  ;;  %v4473_v37 = vmul.f32 %v6833_v63, %v4459_v12  ;;  %vm4479_vm9 = vweird.f32 %v6833_v63 }
0x1e89   :  { %6834 = vrsqrt.f32 %v4460_v55  ;;  %vm4480_vm13 = vmor %vm4478_vm12, %vm4479_vm9  ;;  %vm4488_vm1 = vweird.f32 %v4460_v55 }
0x1e8a   :  { %v4471_v33 = vsel %vm4470_vm8, %v6831_v58, %v4467_v30  ;;  %v4474_v34 = vmul.f32 %v6833_v63, %v4473_v37 }
0x1e8b   :  { %v4502_v20 = vmul.f32 %v4471_v33, %v4434_v10 }
0x1e8c   :  { %v4475_v2 = vmul.f32 0.5, %v4474_v34  ;;  %v4453_v1 = vpop.xlane.xlu2 %4452 }
0x1e8d   :  { %v4507_v0 = vmul.f32 %v4506_v41, %v4502_v20  ;;  %v4457_v3 = vmul.f32 %v4453_v1, %v7138_v6 }
0x1e8e   :  { %v4476_v25 = vsub.f32 1.5, %v4475_v2 }
0x1e8f   :  { %v4512_v16 = vadd.f32 %v4511_v9, %v4507_v0  ;;  %v6835_v29 = vpop.eup %6834  ;;  %v4461_v27 = vadd.f32 1e-05, %v4457_v3 }
0x1e90   :  { %v4477_v44 = vmul.f32 %v6833_v63, %v4476_v25  ;;  %v4483_v40 = vmul.f32 %v6835_v29, %v4460_v55  ;;  %vm4489_vm15 = vweird.f32 %v6835_v29 }
0x1e91   :  { %6205 = vmatmul.msk.f32.vlgmr.msrb.gmra.mxu0 %vm294_vm0, %v4512_v16  ;;  %6836 = vrsqrt.f32 %v4461_v27  ;;  %vm4490_vm2 = vmor %vm4488_vm1, %vm4489_vm15  ;;  %vm4498_vm4 = vweird.f32 %v4461_v27 }
0x1e92   :  { %v4481_v10 = vsel %vm4480_vm13, %v6833_v63, %v4477_v44  ;;  %v4484_v15 = vmul.f32 %v6835_v29, %v4483_v40 }
0x1e93   :  { %v4503_v14 = vmul.f32 %v4481_v10, %v9210_v5 }
0x1e94   :  { %v4485_v24 = vmul.f32 0.5, %v4484_v15 }
0x1e95   :  { %v4508_v49 = vmul.f32 %v4506_v41, %v4503_v14 }
0x1e96   :  { %v4486_v58 = vsub.f32 1.5, %v4485_v24 }
0x1e97   :  { %v6837_v45 = vpop.eup %6836  ;;  %v4513_v57 = vadd.f32 %v4511_v9, %v4508_v49 }
0x1e98   :  { %v4487_v18 = vmul.f32 %v6835_v29, %v4486_v58  ;;  %v4493_v47 = vmul.f32 %v6837_v45, %v4461_v27  ;;  %vm4499_vm3 = vweird.f32 %v6837_v45 }
0x1e99   :  { %6206 = vmatmul.msk.f32.gmra.mxu0 %vm294_vm0, %v4513_v57  ;;  %vm4500_vm5 = vmor %vm4498_vm4, %vm4499_vm3 }
0x1e9a   :  { %v4491_v12 = vsel %vm4490_vm2, %v6835_v29, %v4487_v18  ;;  %v4494_v32 = vmul.f32 %v6837_v45, %v4493_v47 }
0x1e9b   :  { %v4504_v8 = vmul.f32 %v4491_v12, %v9217_v60 }
0x1e9c   :  { %v4495_v36 = vmul.f32 0.5, %v4494_v32 }
0x1e9d   :  { %v4509_v52 = vmul.f32 %v4506_v41, %v4504_v8 }
0x1e9e   :  { %v4496_v30 = vsub.f32 1.5, %v4495_v36 }
0x1e9f   :  { %v4514_v5 = vadd.f32 %v4511_v9, %v4509_v52 }
0x1ea0   :  { %v4497_v63 = vmul.f32 %v6837_v45, %v4496_v30 }
0x1ea1   :  { %6207 = vmatmul.msk.f32.gmra.mxu0 %vm294_vm0, %v4514_v5 }
0x1ea2   :  { %v4501_v33 = vsel %vm4500_vm5, %v6837_v45, %v4497_v63 }
0x1ea3   :  { %v4505_v55 = vmul.f32 %v4501_v33, %v9224_v62 }
0x1ea5   :  { %v4510_v37 = vmul.f32 %v4506_v41, %v4505_v55 }
0x1ea7   :  { %v4515_v20 = vadd.f32 %v4511_v9, %v4510_v37 }
0x1ea9   :  { %6208 = vmatmul.msk.f32.gmra.mxu0 %vm294_vm0, %v4515_v20 }
0x1f0e   :  { %v9271_v34 = vpop.f32.mrf.mxu0 }
0x1f16   :  { %v9273_v60 = vpop.f32.mrf.mxu0 }
0x1f17   :  { %4587 = vrot.lane.b32.xlu2 %v9273_v60, %s6940_s28 }
0x1f1e   :  { %v9277_v0 = vpop.f32.mrf.mxu0 }
0x1f1f   :  { %4577 = vrot.lane.b32.xlu2 %v9277_v0, %s6941_s29  ;;  %4589 = vrot.lane.b32.xlu1 %v9277_v0, %s6940_s28 }
0x1f26   :  { %v9283_v62 = vpop.f32.mrf.mxu0 }
0x1f27   :  { %4567 = vrot.lane.b32.xlu2 %v9283_v62, %s6942_s30  ;;  %4579 = vrot.lane.b32.xlu1 %v9283_v62, %s6941_s29 }
0x1f28   :  { %4591 = vrot.lane.b32.xlu0 %v9283_v62, %s6940_s28 }
0x1f2f   :  { %4563 = vrot.lane.b32.xlu2 %v9273_v60, %s6942_s30  ;;  %4573 = vrot.lane.b32.xlu1 %v9271_v34, %s6941_s29 }
0x1f30   :  { %4585 = vrot.lane.b32.xlu0 %v9271_v34, %s6940_s28 }
0x1f38   :  { %4575 = vrot.lane.b32.xlu0 %v9273_v60, %s6941_s29 }
0x1f40   :  { %4565 = vrot.lane.b32.xlu0 %v9277_v0, %s6942_s30 }
0x1f71   :  { %v9301_v41 = vpop.permute.xlu2 %4587 }
0x1f72   :  { %4639 = vrot.lane.b32.xlu2 %v9301_v41, %s6943_s8 }
0x1f79   :  { %v9305_v9 = vpop.permute.xlu2 %4577 }
0x1f7a   :  { %4633 = vrot.lane.b32.xlu2 %v9305_v9, %s6943_s8 }
0x1f81   :  { %v9309_v2 = vpop.permute.xlu2 %4567 }
0x1f82   :  { %4627 = vrot.lane.b32.xlu2 %v9309_v2, %s6943_s8 }
0x1f89   :  { %v9345_v10 = vpop.permute.xlu2 %4563 }
0x1f91   :  { %v9313_v1 = vpop.permute.xlu1 %4589 }
0x1f92   :  { %4641 = vrot.lane.b32.xlu0 %v9313_v1, %s6943_s8 }
0x1f99   :  { %v9329_v29 = vpop.permute.xlu1 %4579 }
0x1f9a   :  { %v9317_v16 = vpop.permute.xlu0 %4591  ;;  %v6497_v15 = vpack.i.bf16 %v9305_v9, %v9329_v29 }
0x1f9b   :  { %4643 = vrot.lane.b32.xlu1 %v9317_v16, %s6943_s8  ;;  %v6492_v24 = vpack.i.bf16 %v9313_v1, %v9317_v16 }
0x1fa1   :  { %v9337_v44 = vpop.permute.xlu1 %4573 }
0x1fa2   :  { %v9321_v3 = vpop.permute.xlu0 %4585 }
0x1fa3   :  { %v6482_v25 = vpack.i.bf16 %v9321_v3, %v9301_v41  ;;  %4561 = vrot.lane.b32.xlu1 %v9271_v34, %s6942_s30  ;;  %4637 = vrot.lane.b32.xlu0 %v9321_v3, %s6943_s8 }
0x1faa   :  { %v9331_v27 = vpop.permute.xlu0 %4575 }
0x1fab   :  { %4635 = vrot.lane.b32.xlu1 %v9329_v29, %s6943_s8  ;;  %4631 = vrot.lane.b32.xlu0 %v9331_v27, %s6943_s8  ;;  %v6487_v14 = vpack.i.bf16 %v9337_v44, %v9331_v27 }
0x1fb2   :  { %v9339_v40 = vpop.permute.xlu0 %4565 }
0x1fb3   :  { %4629 = vrot.lane.b32.xlu1 %v9337_v44, %s6943_s8  ;;  %4625 = vrot.lane.b32.xlu0 %v9339_v40, %s6943_s8 }
0x1fbb   :  { %4623 = vrot.lane.b32.xlu1 %v9345_v10, %s6943_s8  ;;  %4619 = vrot.lane.b32.xlu0 %v9283_v62, %s6943_s8 }
0x1fc3   :  { %4617 = vrot.lane.b32.xlu1 %v9277_v0, %s6943_s8  ;;  %4613 = vrot.lane.b32.xlu0 %v9271_v34, %s6943_s8 }
0x1fcb   :  { %6488 = vrot.lane.b32.xlu1 %v6487_v14, %s6944_s9  ;;  %6498 = vrot.lane.b32.xlu0 %v6497_v15, %s6944_s9 }
0x1fcc   :  { %v4640_v45 = vpop.permute.xlu2 %4639 }
0x1fd3   :  { %6493 = vrot.lane.b32.xlu1 %v6492_v24, %s6944_s9 }
0x1fd4   :  { %v4634_v12 = vpop.permute.xlu2 %4633 }
0x1fdc   :  { %v4628_v36 = vpop.permute.xlu2 %4627 }
0x2004   :  { %v4642_v58 = vpop.permute.xlu0 %4641 }
0x200d   :  { %v4644_v49 = vpop.permute.xlu1 %4643 }
0x200e   :  { %6209 = vmatpush.xpose.msk.msrb.mxu2 %vm529_vm14, %v4644_v49 }
0x2012   :  { %6210 = vmatpush.xpose.msk.msrb.mxu2 %vm529_vm14, %v4642_v58  ;;  %v4597_v58 = vmul.f32 0.35355338, %v9271_v34 }
0x2015   :  { %v9366_v57 = vpop.permute.xlu1 %4561  ;;  %v4638_v18 = vpop.permute.xlu0 %4637 }
0x2016   :  { %4621 = vrot.lane.b32.xlu2 %v9366_v57, %s6943_s8  ;;  %6211 = vmatpush.xpose.msk.msrb.mxu2 %vm529_vm14, %v4640_v45 }
0x201a   :  { %6212 = vmatpush.xpose.msk.msrb.mxu2 %vm529_vm14, %v4638_v18 }
0x201d   :  { %v4636_v47 = vpop.permute.xlu1 %4635  ;;  %v4632_v32 = vpop.permute.xlu0 %4631 }
0x201e   :  { %4615 = vrot.lane.b32.xlu2 %v9273_v60, %s6943_s8  ;;  %6213 = vmatpush.xpose.msk.msrb.mxu2 %vm529_vm14, %v4636_v47 }
0x2022   :  { %6214 = vmatpush.xpose.msk.msrb.mxu2 %vm529_vm14, %v4634_v12 }
0x2025   :  { %v4630_v8 = vpop.permute.xlu1 %4629  ;;  %v4626_v30 = vpop.permute.xlu0 %4625 }
0x2026   :  { %6483 = vrot.lane.b32.xlu2 %v6482_v25, %s6944_s9  ;;  %6215 = vmatpush.xpose.msk.msrb.mxu2 %vm529_vm14, %v4632_v32 }
0x202a   :  { %6216 = vmatpush.xpose.msk.msrb.mxu2 %vm529_vm14, %v4630_v8  ;;  %v4598_v8 = vmul.f32 0.35355338, %v9273_v60 }
0x202d   :  { %v4624_v52 = vpop.permute.xlu1 %4623  ;;  %v4620_v20 = vpop.permute.xlu0 %4619 }
0x202e   :  { %6217 = vmatpush.xpose.msk.msrb.mxu2 %vm529_vm14, %v4628_v36 }
0x2032   :  { %6218 = vmatpush.xpose.msk.msrb.mxu2 %vm529_vm14, %v4626_v30  ;;  %v4600_v30 = vmul.f32 0.35355338, %v9283_v62 }
0x2035   :  { %v4618_v5 = vpop.permute.xlu1 %4617  ;;  %v4614_v15 = vpop.permute.xlu0 %4613 }
0x2036   :  { %6219 = vmatpush.xpose.msk.msrb.mxu2 %vm529_vm14, %v4624_v52  ;;  %v4599_v52 = vmul.f32 0.35355338, %v9277_v0 }
0x203d   :  { %v6489_v63 = vpop.permute.xlu1 %6488  ;;  %v6499_v45 = vpop.permute.xlu0 %6498 }
0x203e   :  { %v6500_v47 = vunpack.i.l.bf16 %v6499_v45  ;;  %v6501_v12 = vunpack.i.h.bf16 %v6499_v45  ;;  %v6490_v32 = vunpack.i.l.bf16 %v6489_v63  ;;  %v6491_v36 = vunpack.i.h.bf16 %v6489_v63 }
0x203f   :  { %v4603_v63 = vmul.f32 0.35355338, %v9339_v40 }
0x2045   :  { %v6494_v33 = vpop.permute.xlu1 %6493 }
0x2046   :  { %v6495_v55 = vunpack.i.l.bf16 %v6494_v33  ;;  %v6496_v37 = vunpack.i.h.bf16 %v6494_v33  ;;  %v4602_v33 = vmul.f32 0.35355338, %v9345_v10 }
0x2048   :  { %5190 = vmatpush.msra.mxu0 %v6495_v55  ;;  %v4604_v55 = vmul.f32 0.35355338, %v9309_v2 }
0x204a   :  { %5191 = vmatpush.msra.mxu0 %v6496_v37  ;;  %v4605_v37 = vmul.f32 0.35355338, %v9337_v44  ;;  %v4610_v44 = vmul.f32 0.35355338, %v9301_v41 }
0x2070   :  { %v4622_v25 = vpop.permute.xlu2 %4621 }
0x2071   :  { %6220 = vmatpush.xpose.msk.msrb.mxu2 %vm529_vm14, %v4622_v25  ;;  %v4607_v25 = vmul.f32 0.35355338, %v9305_v9  ;;  %v4612_v9 = vmul.f32 0.35355338, %v9317_v16 }
0x2075   :  { %6221 = vmatpush.xpose.msk.msrb.mxu2 %vm529_vm14, %v4620_v20  ;;  %v4606_v20 = vmul.f32 0.35355338, %v9331_v27  ;;  %v4611_v27 = vmul.f32 0.35355338, %v9313_v1 }
0x2078   :  { %v4616_v14 = vpop.permute.xlu2 %4615 }
0x2079   :  { %6222 = vmatpush.xpose.msk.msrb.mxu2 %vm529_vm14, %v4618_v5  ;;  %v4601_v5 = vmul.f32 0.35355338, %v9366_v57 }
0x207d   :  { %6223 = vmatpush.xpose.msk.msrb.mxu2 %vm529_vm14, %v4616_v14  ;;  %v4609_v14 = vmul.f32 0.35355338, %v9321_v3 }
0x2080   :  { %v6484_v24 = vpop.permute.xlu2 %6483 }
0x2081   :  { %v6485_v49 = vunpack.i.l.bf16 %v6484_v24  ;;  %6224 = vmatpush.xpose.msk.msrb.mxu2 %vm529_vm14, %v4614_v15  ;;  %v6486_v18 = vunpack.i.h.bf16 %v6484_v24  ;;  %v4608_v15 = vmul.f32 0.35355338, %v9329_v29 }
0x2083   :  { %5192 = vmatpush.msra.mxu0 %v6485_v49 }
0x2084   :  { %6225 = vmatmul.msk.f32.vlgmr.msrb.gmra.mxu2 %vm529_vm14, %v4597_v58 }
0x2085   :  { %5193 = vmatpush.msra.mxu0 %v6486_v18  ;;  %v6507_v18 = vpack.i.bf16 %v9366_v57, %v9345_v10 }
0x2087   :  { %5194 = vmatpush.msra.mxu0 %v6500_v47 }
0x2089   :  { %5195 = vmatpush.msra.mxu0 %v6501_v12  ;;  %v6502_v12 = vpack.i.bf16 %v9339_v40, %v9309_v2 }
0x208b   :  { %5196 = vmatpush.msra.mxu0 %v6490_v32 }
0x208c   :  { %6226 = vmatmul.msk.f32.gmra.mxu2 %vm529_vm14, %v4598_v8 }
0x208d   :  { %5197 = vmatpush.msra.mxu0 %v6491_v36 }
0x2094   :  { %6227 = vmatmul.msk.f32.gmra.mxu2 %vm529_vm14, %v4599_v52 }
0x209c   :  { %6228 = vmatmul.msk.f32.gmra.mxu2 %vm529_vm14, %v4600_v30 }
0x20a4   :  { %6229 = vmatmul.msk.f32.gmra.mxu2 %vm529_vm14, %v4601_v5 }
0x20ac   :  { %6230 = vmatmul.msk.f32.gmra.mxu2 %vm529_vm14, %v4602_v33 }
0x20b4   :  { %6231 = vmatmul.msk.f32.gmra.mxu2 %vm529_vm14, %v4603_v63 }
0x20bc   :  { %6232 = vmatmul.msk.f32.gmra.mxu2 %vm529_vm14, %v4604_v55 }
0x20c4   :  { %6233 = vmatmul.msk.f32.gmra.mxu2 %vm529_vm14, %v4605_v37  ;;  %v6517_v37 = vpack.i.bf16 %v9271_v34, %v9273_v60 }
0x20cc   :  { %6234 = vmatmul.msk.f32.gmra.mxu2 %vm529_vm14, %v4606_v20 }
0x20d4   :  { %6235 = vmatmul.msk.f32.gmra.mxu2 %vm529_vm14, %v4607_v25 }
0x20dc   :  { %6236 = vmatmul.msk.f32.gmra.mxu2 %vm529_vm14, %v4608_v15 }
0x20e4   :  { %6237 = vmatmul.msk.f32.gmra.mxu2 %vm529_vm14, %v4609_v14 }
0x20ec   :  { %6238 = vmatmul.msk.f32.gmra.mxu2 %vm529_vm14, %v4610_v44 }
0x20f4   :  { %6239 = vmatmul.msk.f32.gmra.mxu2 %vm529_vm14, %v4611_v27 }
0x20fc   :  { %6240 = vmatmul.msk.f32.gmra.mxu2 %vm529_vm14, %v4612_v9 }
0x2107   :  { %v4742_v24 = vpop.f32.mrf.mxu2 }
0x2108   :  { %v4743_v29 = vadd.f32 %v4742_v24, %v7363_v11 }
0x210a   :  { %4790 = vmax.xlane.f32.xlu1 %v4743_v29 }
0x210f   :  { %v4745_v49 = vpop.f32.mrf.mxu2 }
0x2110   :  { %v4746_v3 = vadd.f32 %v4745_v49, %v7371_v17 }
0x2112   :  { %4792 = vmax.xlane.f32.xlu2 %v4746_v3 }
0x2117   :  { %v4748_v58 = vpop.f32.mrf.mxu2 }
0x2118   :  { %v4749_v41 = vadd.f32 %v4748_v58, %v7379_v22 }
0x211a   :  { %4794 = vmax.xlane.f32.xlu0 %v4749_v41 }
0x211f   :  { %v4751_v45 = vpop.f32.mrf.mxu2 }
0x2120   :  { %v9423_v1 = vadd.f32 %v4751_v45, %v7414_v42 }
0x2122   :  { %4796 = vmax.xlane.f32.xlu1 %v9423_v1 }
0x2127   :  { %v4754_v16 = vpop.f32.mrf.mxu2 }
0x212a   :  { %6508 = vrot.lane.b32.xlu2 %v6507_v18, %s6944_s9 }
0x212f   :  { %v4757_v11 = vpop.f32.mrf.mxu2 }
0x2130   :  { %v4758_v17 = vadd.f32 %v4757_v11, %v7396_v56  ;;  %v9443_v56 = vadd.f32 %v4754_v16, %v7423_v23 }
0x2132   :  { %4800 = vmax.xlane.f32.xlu0 %v4758_v17 }
0x2137   :  { %v4760_v47 = vpop.f32.mrf.mxu2 }
0x2138   :  { %v4761_v22 = vadd.f32 %v4760_v47, %v7404_v48  ;;  %v6512_v48 = vpack.i.bf16 %v9277_v0, %v9283_v62 }
0x213a   :  { %4802 = vmax.xlane.f32.xlu0 %v4761_v22 }
0x213b   :  { %6503 = vrot.lane.b32.xlu1 %v6502_v12, %s6944_s9 }
0x213f   :  { %v4763_v42 = vpop.f32.mrf.mxu2 }
0x2140   :  { %v9435_v32 = vadd.f32 %v4763_v42, %v7432_v53 }
0x2142   :  { %4804 = vmax.xlane.f32.xlu0 %v9435_v32 }
0x2147   :  { %v4766_v10 = vpop.f32.mrf.mxu2 }
0x2148   :  { %v9439_v57 = vadd.f32 %v4766_v10, %v7442_v50 }
0x214a   :  { %4806 = vmax.xlane.f32.xlu0 %v9439_v57 }
0x214f   :  { %v4769_v53 = vpop.f32.mrf.mxu2 }
0x2150   :  { %v9450_v2 = vadd.f32 %v4769_v53, %v7480_v4 }
0x2153   :  { %4798 = vmax.xlane.f32.xlu2 %v9443_v56 }
0x2157   :  { %v4772_v63 = vpop.f32.mrf.mxu2 }
0x2158   :  { %v9463_v55 = vadd.f32 %v4772_v63, %v7450_v46 }
0x215e   :  { %6513 = vrot.lane.b32.xlu0 %v6512_v48, %s6944_s9 }
0x215f   :  { %v4775_v20 = vpop.f32.mrf.mxu2 }
0x2160   :  { %v9470_v14 = vadd.f32 %v4775_v20, %v7500_v54 }
0x2165   :  { %4808 = vmax.xlane.f32.xlu1 %v9450_v2 }
0x2167   :  { %v4778_v27 = vpop.f32.mrf.mxu2 }
0x2168   :  { %v9474_v34 = vadd.f32 %v4778_v27, %v7519_v38 }
0x216f   :  { %v4781_v18 = vpop.f32.mrf.mxu2 }
0x217d   :  { %v4791_v50 = vpop.xlane.xlu1 %4790 }
0x217e   :  { %v4822_v40 = vsub.f32 %v4743_v29, %v4791_v50 }
0x2180   :  { %v4838_v8 = vmul.f32 1.442695, %v4822_v40 }
0x2182   :  { %6838 = vpow2.f32 %v4838_v8 }
0x2185   :  { %v4793_v36 = vpop.xlane.xlu2 %4792 }
0x2186   :  { %v4823_v23 = vsub.f32 %v4746_v3, %v4793_v36 }
0x2188   :  { %v9453_v52 = vpop.eup %6838  ;;  %v4840_v30 = vmul.f32 1.442695, %v4823_v23 }
0x2189   :  { %4870 = vadd.xlane.f32.xlu2 %v9453_v52 }
0x218a   :  { %6840 = vpow2.f32 %v4840_v30 }
0x218d   :  { %v4795_v0 = vpop.xlane.xlu0 %4794  ;;  %v6509_v60 = vpop.permute.xlu2 %6508 }
0x218e   :  { %v4824_v62 = vsub.f32 %v4749_v41, %v4795_v0  ;;  %v6510_v3 = vunpack.i.l.bf16 %v6509_v60  ;;  %v6511_v58 = vunpack.i.h.bf16 %v6509_v60 }
0x2190   :  { %v9456_v5 = vpop.eup %6840  ;;  %v4842_v4 = vmul.f32 1.442695, %v4824_v62 }
0x2191   :  { %4872 = vadd.xlane.f32.xlu1 %v9456_v5 }
0x2192   :  { %6842 = vpow2.f32 %v4842_v4 }
0x2195   :  { %v4797_v25 = vpop.xlane.xlu1 %4796 }
0x2196   :  { %v4825_v11 = vsub.f32 %v9423_v1, %v4797_v25 }
0x2198   :  { %v9459_v33 = vpop.eup %6842  ;;  %v4844_v47 = vmul.f32 1.442695, %v4825_v11 }
0x2199   :  { %4874 = vadd.xlane.f32.xlu1 %v9459_v33 }
0x21a1   :  { %6518 = vrot.lane.b32.xlu2 %v6517_v37, %s6944_s9  ;;  %4810 = vmax.xlane.f32.xlu1 %v9463_v55 }
0x21a5   :  { %v4801_v15 = vpop.xlane.xlu0 %4800 }
0x21a6   :  { %v4827_v44 = vsub.f32 %v4758_v17, %v4801_v15 }
0x21a8   :  { %v4848_v24 = vmul.f32 1.442695, %v4827_v44 }
0x21a9   :  { %4812 = vmax.xlane.f32.xlu1 %v9470_v14 }
0x21aa   :  { %6844 = vpow2.f32 %v4848_v24 }
0x21ad   :  { %v4803_v9 = vpop.xlane.xlu0 %4802  ;;  %v6504_v46 = vpop.permute.xlu1 %6503 }
0x21ae   :  { %v6505_v29 = vunpack.i.l.bf16 %v6504_v46  ;;  %v6506_v49 = vunpack.i.h.bf16 %v6504_v46  ;;  %v4828_v54 = vsub.f32 %v4761_v22, %v4803_v9  ;;  %v4784_v22 = vpop.f32.mrf.mxu2 }
0x21b0   :  { %5198 = vmatpush.msra.mxu0 %v6505_v29  ;;  %v4850_v41 = vmul.f32 1.442695, %v4828_v54  ;;  %v9477_v16 = vpop.eup %6844 }
0x21b1   :  { %4814 = vmax.xlane.f32.xlu1 %v9474_v34 }
0x21b2   :  { %5199 = vmatpush.msra.mxu0 %v6506_v49  ;;  %6846 = vpow2.f32 %v4850_v41 }
0x21b4   :  { %5200 = vmatpush.msra.mxu0 %v6510_v3 }
0x21b5   :  { %v4805_v45 = vpop.xlane.xlu0 %4804 }
0x21b6   :  { %5201 = vmatpush.msra.mxu0 %v6511_v58  ;;  %v4829_v38 = vsub.f32 %v9435_v32, %v4805_v45  ;;  %v4787_v40 = vpop.f32.mrf.mxu2 }
0x21b7   :  { %v9494_v8 = vadd.f32 %v4787_v40, %v7551_v39  ;;  %v9505_v39 = vadd.f32 %v4784_v22, %v10044_v19 }
0x21b8   :  { %v4852_v17 = vmul.f32 1.442695, %v4829_v38  ;;  %v9482_v12 = vpop.eup %6846 }
0x21b9   :  { %4880 = vadd.xlane.f32.xlu1 %v9477_v16 }
0x21ba   :  { %6848 = vpow2.f32 %v4852_v17 }
0x21bb   :  { %6850 = vpow2.f32 %v4844_v47 }
0x21bd   :  { %v4807_v53 = vpop.xlane.xlu0 %4806 }
0x21be   :  { %v4830_v1 = vsub.f32 %v9439_v57, %v4807_v53 }
0x21c0   :  { %v9486_v48 = vpop.eup %6848  ;;  %v4854_v36 = vmul.f32 1.442695, %v4830_v1 }
0x21c1   :  { %4882 = vadd.xlane.f32.xlu1 %v9482_v12  ;;  %v9488_v50 = vpop.eup %6850 }
0x21c6   :  { %v4799_v42 = vpop.xlane.xlu2 %4798 }
0x21c7   :  { %v4826_v10 = vsub.f32 %v9443_v56, %v4799_v42  ;;  %v9497_v56 = vadd.f32 %v4781_v18, %v7532_v59 }
0x21c9   :  { %v4846_v32 = vmul.f32 1.442695, %v4826_v10  ;;  %4884 = vadd.xlane.f32.xlu1 %v9486_v48 }
0x21ca   :  { %4876 = vadd.xlane.f32.xlu2 %v9488_v50 }
0x21cb   :  { %6852 = vpow2.f32 %v4846_v32 }
0x21cc   :  { %6854 = vpow2.f32 %v4854_v36 }
0x21d0   :  { %v6514_v23 = vpop.permute.xlu0 %6513 }
0x21d1   :  { %v9499_v30 = vpop.eup %6852  ;;  %v6515_v0 = vunpack.i.l.bf16 %v6514_v23  ;;  %4820 = vmax.xlane.f32.xlu1 %v9494_v8  ;;  %v6516_v57 = vunpack.i.h.bf16 %v6514_v23 }
0x21d2   :  { %4878 = vadd.xlane.f32.xlu0 %v9499_v30  ;;  %4816 = vmax.xlane.f32.xlu2 %v9497_v56  ;;  %v9507_v59 = vpop.eup %6854 }
0x21d3   :  { %5202 = vmatpush.msra.mxu0 %v6515_v0 }
0x21d5   :  { %5203 = vmatpush.msra.mxu0 %v6516_v57 }
0x21d8   :  { %v4809_v62 = vpop.xlane.xlu1 %4808 }
0x21d9   :  { %v4831_v4 = vsub.f32 %v9450_v2, %v4809_v62 }
0x21da   :  { %4818 = vmax.xlane.f32.xlu0 %v9505_v39  ;;  %4886 = vadd.xlane.f32.xlu2 %v9507_v59 }
0x21db   :  { %v4856_v63 = vmul.f32 1.442695, %v4831_v4 }
0x21dd   :  { %6856 = vpow2.f32 %v4856_v63 }
0x21e3   :  { %v9512_v37 = vpop.eup %6856 }
0x21e4   :  { %4888 = vadd.xlane.f32.xlu0 %v9512_v37 }
0x21fc   :  { %v4871_v20 = vpop.xlane.xlu2 %4870 }
0x21fd   :  { %6858 = vrcp.f32 %v4871_v20  ;;  %v4913_v2 = vand.u32 2147483648, %v4871_v20  ;;  %v4911_v29 = vand.u32 2147483647, %v4871_v20  ;;  %vm4907_vm7 = vweird.f32 %v4871_v20 }
0x21ff   :  { %v4914_v3 = vor.u32 1.1754944e-38, %v4913_v2  ;;  %vm4912_vm9 = vcmp.eq.f32.partialorder %v4911_v29, 8.507059e+37 }
0x2203   :  { %v6859_v25 = vpop.eup %6858 }
0x2204   :  { %v4903_v19 = vmul.f32 %v6859_v25, %v4871_v20  ;;  %v6519_v15 = vpop.permute.xlu2 %6518  ;;  %v4873_v44 = vpop.xlane.xlu1 %4872  ;;  %vm4908_vm6 = vweird.f32 %v6859_v25 }
0x2205   :  { %v6520_v27 = vunpack.i.l.bf16 %v6519_v15  ;;  %6860 = vrcp.f32 %v4873_v44  ;;  %v6521_v46 = vunpack.i.h.bf16 %v6519_v15  ;;  %vm4909_vm8 = vmor %vm4907_vm7, %vm4908_vm6  ;;  %v4928_v11 = vand.u32 2147483648, %v4873_v44 }
0x2206   :  { %v4904_v9 = vsub.f32 1.0, %v4903_v19  ;;  %v4926_v47 = vand.u32 2147483647, %v4873_v44  ;;  %vm4922_vm13 = vweird.f32 %v4873_v44 }
0x2207   :  { %5204 = vmatpush.msra.mxu0 %v6520_v27  ;;  %v4929_v10 = vor.u32 1.1754944e-38, %v4928_v11 }
0x2208   :  { %v4905_v24 = vmul.f32 %v6859_v25, %v4904_v9  ;;  %vm4927_vm1 = vcmp.eq.f32.partialorder %v4926_v47, 8.507059e+37 }
0x2209   :  { %5205 = vmatpush.msra.mxu0 %v6521_v46 }
0x220a   :  { %v4906_v60 = vadd.f32 %v6859_v25, %v4905_v24 }
0x220b   :  { %v6861_v49 = vpop.eup %6860 }
0x220c   :  { %v4910_v54 = vsel %vm4909_vm8, %v6859_v25, %v4906_v60  ;;  %v4918_v58 = vmul.f32 %v6861_v49, %v4873_v44  ;;  %v4875_v41 = vpop.xlane.xlu1 %4874  ;;  %vm4923_vm12 = vweird.f32 %v6861_v49 }
0x220d   :  { %v4915_v45 = vsel %vm4912_vm9, %v4914_v3, %v4910_v54  ;;  %6862 = vrcp.f32 %v4875_v41  ;;  %vm4924_vm15 = vmor %vm4922_vm13, %vm4923_vm12  ;;  %v4943_v0 = vand.u32 2147483648, %v4875_v41  ;;  %v4941_v4 = vand.u32 2147483647, %v4875_v41 }
0x220e   :  { %v4919_v18 = vsub.f32 1.0, %v4918_v58  ;;  %v4916_v38 = vmul.f32 %v9453_v52, %v4915_v45  ;;  %vm4937_vm3 = vweird.f32 %v4875_v41 }
0x220f   :  { %v4944_v20 = vor.u32 1.1754944e-38, %v4943_v0  ;;  %vm4942_vm5 = vcmp.eq.f32.partialorder %v4941_v4, 8.507059e+37 }
0x2210   :  { %v4920_v17 = vmul.f32 %v6861_v49, %v4919_v18  ;;  %5206 = vmatmul.f32.vlgmr.msra.gmra.mxu0 %v4916_v38 }
0x2212   :  { %v4921_v22 = vadd.f32 %v6861_v49, %v4920_v17 }
0x2213   :  { %v6863_v42 = vpop.eup %6862 }
0x2214   :  { %v4933_v53 = vmul.f32 %v6863_v42, %v4875_v41  ;;  %v4811_v32 = vpop.xlane.xlu1 %4810  ;;  %v4925_v1 = vsel %vm4924_vm15, %v6861_v49, %v4921_v22  ;;  %vm4938_vm2 = vweird.f32 %v6863_v42 }
0x2215   :  { %v4832_v40 = vsub.f32 %v9463_v55, %v4811_v32  ;;  %v4930_v36 = vsel %vm4927_vm1, %v4929_v10, %v4925_v1  ;;  %vm4939_vm4 = vmor %vm4937_vm3, %vm4938_vm2 }
0x2216   :  { %v4934_v23 = vsub.f32 1.0, %v4933_v53  ;;  %v4931_v52 = vmul.f32 %v9456_v5, %v4930_v36 }
0x2217   :  { %v4858_v57 = vmul.f32 1.442695, %v4832_v40 }
0x2218   :  { %v4935_v62 = vmul.f32 %v6863_v42, %v4934_v23  ;;  %5209 = vmatmul.f32.gmra.mxu0 %v4931_v52 }
0x2219   :  { %6864 = vpow2.f32 %v4858_v57 }
0x221a   :  { %v4936_v63 = vadd.f32 %v6863_v42, %v4935_v62 }
0x221c   :  { %v4813_v25 = vpop.xlane.xlu1 %4812  ;;  %v4940_v19 = vsel %vm4939_vm4, %v6863_v42, %v4936_v63 }
0x221d   :  { %v4833_v55 = vsub.f32 %v9470_v14, %v4813_v25  ;;  %v4945_v15 = vsel %vm4942_vm5, %v4944_v20, %v4940_v19 }
0x221e   :  { %v4946_v44 = vmul.f32 %v9459_v33, %v4945_v15 }
0x221f   :  { %v9520_v5 = vpop.eup %6864  ;;  %v4860_v27 = vmul.f32 1.442695, %v4833_v55 }
0x2220   :  { %4890 = vadd.xlane.f32.xlu2 %v9520_v5  ;;  %5212 = vmatmul.f32.gmra.mxu0 %v4946_v44 }
0x2221   :  { %6866 = vpow2.f32 %v4860_v27 }
0x2224   :  { %v4815_v9 = vpop.xlane.xlu1 %4814 }
0x2225   :  { %v4834_v2 = vsub.f32 %v9474_v34, %v4815_v9 }
0x2227   :  { %v9524_v46 = vpop.eup %6866  ;;  %v4862_v24 = vmul.f32 1.442695, %v4834_v2 }
0x2228   :  { %4892 = vadd.xlane.f32.xlu1 %v9524_v46 }
0x2229   :  { %6868 = vpow2.f32 %v4862_v24 }
0x222c   :  { %v9527_v14 = vpop.xlane.xlu1 %4880 }
0x222d   :  { %vm4982_vm3 = vweird.f32 %v9527_v14 }
0x222f   :  { %v9529_v29 = vpop.eup %6868 }
0x2230   :  { %4894 = vadd.xlane.f32.xlu0 %v9529_v29 }
0x2234   :  { %v9532_v33 = vpop.xlane.xlu1 %4882 }
0x223c   :  { %v9534_v60 = vpop.xlane.xlu1 %4884 }
0x223d   :  { %v4877_v49 = vpop.xlane.xlu2 %4876 }
0x223e   :  { %6870 = vrcp.f32 %v4877_v49  ;;  %v4958_v47 = vand.u32 2147483648, %v4877_v49  ;;  %vm4952_vm7 = vweird.f32 %v4877_v49 }
0x223f   :  { %6872 = vrcp.f32 %v9527_v14 }
0x2240   :  { %v4959_v1 = vor.u32 1.1754944e-38, %v4958_v47 }
0x2244   :  { %v6871_v34 = vpop.eup %6870  ;;  %v4821_v3 = vpop.xlane.xlu1 %4820 }
0x2245   :  { %v4948_v54 = vmul.f32 %v6871_v34, %v4877_v49  ;;  %v4837_v58 = vsub.f32 %v9494_v8, %v4821_v3  ;;  %v4879_v41 = vpop.xlane.xlu0 %4878  ;;  %v4817_v45 = vpop.xlane.xlu2 %4816  ;;  %vm4953_vm6 = vweird.f32 %v6871_v34  ;;  %v4956_v8 = vand.u32 2147483647, %v4877_v49 }
0x2246   :  { %6874 = vrcp.f32 %v4879_v41  ;;  %v9538_v18 = vpop.eup %6872  ;;  %v4835_v17 = vsub.f32 %v9497_v56, %v4817_v45  ;;  %vm4954_vm8 = vmor %vm4952_vm7, %vm4953_vm6  ;;  %v4973_v63 = vand.u32 2147483648, %v4879_v41  ;;  %v4971_v15 = vand.u32 2147483647, %v4879_v41 }
0x2247   :  { %v4949_v38 = vsub.f32 1.0, %v4948_v54  ;;  %v4868_v11 = vmul.f32 1.442695, %v4837_v58  ;;  %6876 = vrcp.f32 %v9532_v33  ;;  %v4978_v10 = vmul.f32 %v9538_v18, %v9527_v14 }
0x2248   :  { %v4864_v42 = vmul.f32 1.442695, %v4835_v17  ;;  %vm4957_vm9 = vcmp.eq.f32.partialorder %v4956_v8, 8.507059e+37  ;;  %vm4967_vm13 = vweird.f32 %v4879_v41  ;;  %v4974_v9 = vor.u32 1.1754944e-38, %v4973_v63 }
0x2249   :  { %v4950_v22 = vmul.f32 %v6871_v34, %v4949_v38  ;;  %6878 = vpow2.f32 %v4868_v11  ;;  %v4979_v52 = vsub.f32 1.0, %v4978_v10  ;;  %vm4972_vm1 = vcmp.eq.f32.partialorder %v4971_v15, 8.507059e+37 }
0x224a   :  { %6880 = vpow2.f32 %v4864_v42  ;;  %vm4983_vm2 = vweird.f32 %v9538_v18  ;;  %v4988_v54 = vand.u32 2147483648, %v9527_v14  ;;  %v5003_v8 = vand.u32 2147483648, %v9532_v33 }
0x224b   :  { %v4951_v53 = vadd.f32 %v6871_v34, %v4950_v22  ;;  %6882 = vrcp.f32 %v9534_v60  ;;  %vm4984_vm4 = vmor %vm4982_vm3, %vm4983_vm2  ;;  %vm4997_vm7 = vweird.f32 %v9532_v33 }
0x224c   :  { %v6875_v32 = vpop.eup %6874  ;;  %v4989_v47 = vor.u32 1.1754944e-38, %v4988_v54 }
0x224d   :  { %v4963_v40 = vmul.f32 %v6875_v32, %v4879_v41  ;;  %v4819_v36 = vpop.xlane.xlu0 %4818  ;;  %v4955_v56 = vsel %vm4954_vm8, %v6871_v34, %v4951_v53  ;;  %v9544_v23 = vpop.eup %6876  ;;  %vm4968_vm12 = vweird.f32 %v6875_v32  ;;  %v4986_v41 = vand.u32 2147483647, %v9527_v14 }
0x224e   :  { %v4836_v0 = vsub.f32 %v9505_v39, %v4819_v36  ;;  %v4960_v4 = vsel %vm4957_vm9, %v4959_v1, %v4955_v56  ;;  %v4980_v39 = vmul.f32 %v9538_v18, %v4979_v52  ;;  %v4993_v44 = vmul.f32 %v9544_v23, %v9532_v33  ;;  %vm4969_vm15 = vmor %vm4967_vm13, %vm4968_vm12  ;;  %v9558_v24 = vpop.xlane.xlu2 %4886 }
0x224f   :  { %v9547_v57 = vpop.eup %6878  ;;  %v4964_v62 = vsub.f32 1.0, %v4963_v40  ;;  %v4961_v25 = vmul.f32 %v9488_v50, %v4960_v4  ;;  %vm4987_vm5 = vcmp.eq.f32.partialorder %v4986_v41, 8.507059e+37  ;;  %vm4998_vm6 = vweird.f32 %v9544_v23 }
0x2250   :  { %v4866_v20 = vmul.f32 1.442695, %v4836_v0  ;;  %4900 = vadd.xlane.f32.xlu0 %v9547_v57  ;;  %v9551_v19 = vpop.eup %6880  ;;  %v4994_v2 = vsub.f32 1.0, %v4993_v44  ;;  %v4981_v34 = vadd.f32 %v9538_v18, %v4980_v39  ;;  %vm4999_vm8 = vmor %vm4997_vm7, %vm4998_vm6  ;;  %v5004_v36 = vor.u32 1.1754944e-38, %v5003_v8 }
0x2251   :  { %v4965_v55 = vmul.f32 %v6875_v32, %v4964_v62  ;;  %4896 = vadd.xlane.f32.xlu2 %v9551_v19  ;;  %5215 = vmatmul.f32.gmra.mxu0 %v4961_v25  ;;  %v6883_v3 = vpop.eup %6882  ;;  %v5018_v0 = vand.u32 2147483648, %v9534_v60  ;;  %vm5012_vm13 = vweird.f32 %v9534_v60  ;;  %vm5027_vm3 = vweird.f32 %v9558_v24 }
0x2252   :  { %6884 = vpow2.f32 %v4866_v20  ;;  %v4995_v38 = vmul.f32 %v9544_v23, %v4994_v2  ;;  %v5008_v11 = vmul.f32 %v6883_v3, %v9534_v60  ;;  %v4985_v17 = vsel %vm4984_vm4, %v9538_v18, %v4981_v34 }
0x2253   :  { %v4966_v27 = vadd.f32 %v6875_v32, %v4965_v55  ;;  %6886 = vrcp.f32 %v9558_v24  ;;  %vm5013_vm12 = vweird.f32 %v6883_v3  ;;  %v5019_v26 = vor.u32 1.1754944e-38, %v5018_v0 }
0x2254   :  { %v5009_v22 = vsub.f32 1.0, %v5008_v11  ;;  %v4996_v10 = vadd.f32 %v9544_v23, %v4995_v38  ;;  %v5031_v55 = vand.u32 2147483647, %v9558_v24 }
0x2255   :  { %v4970_v50 = vsel %vm4969_vm15, %v6875_v32, %v4966_v27  ;;  %v5001_v32 = vand.u32 2147483647, %v9532_v33  ;;  %vm5014_vm15 = vmor %vm5012_vm13, %vm5013_vm12 }
0x2256   :  { %v4975_v49 = vsel %vm4972_vm1, %v4974_v9, %v4970_v50  ;;  %v5010_v18 = vmul.f32 %v6883_v3, %v5009_v22  ;;  %v5000_v40 = vsel %vm4999_vm8, %v9544_v23, %v4996_v10  ;;  %v5016_v23 = vand.u32 2147483647, %v9534_v60 }
0x2257   :  { %v4976_v58 = vmul.f32 %v9499_v30, %v4975_v49  ;;  %v4990_v30 = vsel %vm4987_vm5, %v4989_v47, %v4985_v17  ;;  %v4889_v42 = vpop.xlane.xlu0 %4888  ;;  %vm5002_vm9 = vcmp.eq.f32.partialorder %v5001_v32, 8.507059e+37  ;;  %vm5032_vm5 = vcmp.eq.f32.partialorder %v5031_v55, 8.507059e+37 }
0x2258   :  { %v9564_v45 = vpop.eup %6884  ;;  %v4991_v53 = vmul.f32 %v9477_v16, %v4990_v30  ;;  %6888 = vrcp.f32 %v4889_v42  ;;  %v5005_v56 = vsel %vm5002_vm9, %v5004_v36, %v5000_v40  ;;  %v5011_v16 = vadd.f32 %v6883_v3, %v5010_v18 }
0x2259   :  { %4898 = vadd.xlane.f32.xlu1 %v9564_v45  ;;  %5218 = vmatmul.f32.gmra.mxu0 %v4976_v58  ;;  %v6887_v14 = vpop.eup %6886  ;;  %v5006_v62 = vmul.f32 %v9482_v12, %v5005_v56  ;;  %vm5017_vm1 = vcmp.eq.f32.partialorder %v5016_v23, 8.507059e+37  ;;  %v5033_v12 = vand.u32 2147483648, %v9558_v24  ;;  %v5048_v44 = vand.u32 2147483648, %v4889_v42 }
0x225a   :  { %v5023_v1 = vmul.f32 %v6887_v14, %v9558_v24  ;;  %v5015_v20 = vsel %vm5014_vm15, %v6883_v3, %v5011_v16  ;;  %vm5028_vm2 = vweird.f32 %v6887_v14  ;;  %vm5042_vm7 = vweird.f32 %v4889_v42 }
0x225b   :  { %v5020_v35 = vsel %vm5017_vm1, %v5019_v26, %v5015_v20  ;;  %vm5029_vm4 = vmor %vm5027_vm3, %vm5028_vm2  ;;  %v5034_v43 = vor.u32 1.1754944e-38, %v5033_v12  ;;  %v5046_v9 = vand.u32 2147483647, %v4889_v42 }
0x225c   :  { %v5024_v52 = vsub.f32 1.0, %v5023_v1  ;;  %v5021_v60 = vmul.f32 %v9486_v48, %v5020_v35  ;;  %v5049_v48 = vor.u32 1.1754944e-38, %v5048_v44 }
0x225d   :  { %vm5047_vm9 = vcmp.eq.f32.partialorder %v5046_v9, 8.507059e+37 }
0x225e   :  { %v6889_v33 = vpop.eup %6888  ;;  %v5025_v4 = vmul.f32 %v6887_v14, %v5024_v52 }
0x225f   :  { %v5038_v63 = vmul.f32 %v6889_v33, %v4889_v42  ;;  %vm5043_vm6 = vweird.f32 %v6889_v33 }
0x2260   :  { %v5026_v25 = vadd.f32 %v6887_v14, %v5025_v4  ;;  %vm5044_vm8 = vmor %vm5042_vm7, %vm5043_vm6 }
0x2261   :  { %5221 = vmatmul.f32.gmra.mxu0 %v4991_v53 }
0x2262   :  { %v5030_v39 = vsel %vm5029_vm4, %v6887_v14, %v5026_v25 }
0x2263   :  { %v5035_v7 = vsel %vm5032_vm5, %v5034_v43, %v5030_v39 }
0x2264   :  { %6528 = vrot.lane.b32.xlu0 %v6527_v13, %s6946_s10  ;;  %v5039_v13 = vsub.f32 1.0, %v5038_v63  ;;  %v5036_v27 = vmul.f32 %v9507_v59, %v5035_v7 }
0x2266   :  { %v5040_v15 = vmul.f32 %v6889_v33, %v5039_v13 }
0x2269   :  { %5224 = vmatmul.f32.gmra.mxu0 %v5006_v62  ;;  %6523 = vrot.lane.b32.xlu2 %v6522_v21, %s6946_s10  ;;  %v5041_v21 = vadd.f32 %v6889_v33, %v5040_v15 }
0x226b   :  { %v5045_v50 = vsel %vm5044_vm8, %v6889_v33, %v5041_v21 }
0x226c   :  { %v5050_v2 = vsel %vm5047_vm9, %v5049_v48, %v5045_v50 }
0x226d   :  { %v5051_v24 = vmul.f32 %v9512_v37, %v5050_v2 }
0x2271   :  { %5227 = vmatmul.f32.gmra.mxu0 %v5021_v60 }
0x2279   :  { %5230 = vmatmul.f32.gmra.mxu0 %v5036_v27 }
0x2281   :  { %5233 = vmatmul.f32.gmra.mxu0 %v5051_v24 }
0x228d   :  { %v9601_v63 = vpop.f32.mrf.mxu0 }
0x2293   :  { %v4891_v49 = vpop.xlane.xlu2 %4890 }
0x2294   :  { %6890 = vrcp.f32 %v4891_v49  ;;  %v5063_v41 = vand.u32 2147483648, %v4891_v49  ;;  %v5061_v59 = vand.u32 2147483647, %v4891_v49  ;;  %vm5057_vm13 = vweird.f32 %v4891_v49 }
0x2295   :  { %v9604_v13 = vpop.f32.mrf.mxu0 }
0x2296   :  { %v5064_v47 = vor.u32 1.1754944e-38, %v5063_v41  ;;  %vm5062_vm1 = vcmp.eq.f32.partialorder %v5061_v59, 8.507059e+37 }
0x229a   :  { %v6891_v34 = vpop.eup %6890 }
0x229b   :  { %v5053_v3 = vmul.f32 %v6891_v34, %v4891_v49  ;;  %v4893_v54 = vpop.xlane.xlu1 %4892  ;;  %vm5058_vm12 = vweird.f32 %v6891_v34 }
0x229c   :  { %6892 = vrcp.f32 %v4893_v54  ;;  %vm5059_vm15 = vmor %vm5057_vm13, %vm5058_vm12  ;;  %v5078_v8 = vand.u32 2147483648, %v4893_v54  ;;  %v5076_v32 = vand.u32 2147483647, %v4893_v54  ;;  %vm5072_vm3 = vweird.f32 %v4893_v54 }
0x229d   :  { %v5054_v58 = vsub.f32 1.0, %v5053_v3  ;;  %v9606_v12 = vpop.f32.mrf.mxu0 }
0x229e   :  { %v5079_v40 = vor.u32 1.1754944e-38, %v5078_v8  ;;  %vm5077_vm5 = vcmp.eq.f32.partialorder %v5076_v32, 8.507059e+37 }
0x229f   :  { %v5055_v38 = vmul.f32 %v6891_v34, %v5054_v58 }
0x22a1   :  { %v5056_v11 = vadd.f32 %v6891_v34, %v5055_v38 }
0x22a2   :  { %v6893_v17 = vpop.eup %6892 }
0x22a3   :  { %v5068_v30 = vmul.f32 %v6893_v17, %v4893_v54  ;;  %v4895_v22 = vpop.xlane.xlu0 %4894  ;;  %v5060_v37 = vsel %vm5059_vm15, %v6891_v34, %v5056_v11  ;;  %vm5073_vm2 = vweird.f32 %v6893_v17 }
0x22a4   :  { %6894 = vrcp.f32 %v4895_v22  ;;  %v5065_v42 = vsel %vm5062_vm1, %v5064_v47, %v5060_v37  ;;  %vm5074_vm4 = vmor %vm5072_vm3, %vm5073_vm2  ;;  %v5093_v0 = vand.u32 2147483648, %v4895_v22  ;;  %vm5087_vm7 = vweird.f32 %v4895_v22 }
0x22a5   :  { %v5069_v10 = vsub.f32 1.0, %v5068_v30  ;;  %v5066_v14 = vmul.f32 %v9520_v5, %v5065_v42  ;;  %v5091_v5 = vand.u32 2147483647, %v4895_v22 }
0x22a6   :  { %v5094_v4 = vor.u32 1.1754944e-38, %v5093_v0 }
0x22a7   :  { %v5070_v53 = vmul.f32 %v6893_v17, %v5069_v10  ;;  %5236 = vmatmul.f32.gmra.mxu0 %v5066_v14  ;;  %vm5092_vm9 = vcmp.eq.f32.partialorder %v5091_v5, 8.507059e+37 }
0x22a9   :  { %v5071_v18 = vadd.f32 %v6893_v17, %v5070_v53 }
0x22aa   :  { %v6895_v1 = vpop.eup %6894 }
0x22ab   :  { %v5083_v36 = vmul.f32 %v6895_v1, %v4895_v22  ;;  %v5075_v56 = vsel %vm5074_vm4, %v6893_v17, %v5071_v18  ;;  %vm5088_vm6 = vweird.f32 %v6895_v1 }
0x22ac   :  { %v5080_v52 = vsel %vm5077_vm5, %v5079_v40, %v5075_v56  ;;  %vm5089_vm8 = vmor %vm5087_vm7, %vm5088_vm6 }
0x22ad   :  { %v5084_v16 = vsub.f32 1.0, %v5083_v36  ;;  %v5081_v33 = vmul.f32 %v9524_v46, %v5080_v52 }
0x22af   :  { %v5085_v62 = vmul.f32 %v6895_v1, %v5084_v16  ;;  %5239 = vmatmul.f32.gmra.mxu0 %v5081_v33 }
0x22b1   :  { %v5086_v23 = vadd.f32 %v6895_v1, %v5085_v62 }
0x22b3   :  { %v5090_v20 = vsel %vm5089_vm8, %v6895_v1, %v5086_v23 }
0x22b4   :  { %v5095_v26 = vsel %vm5092_vm9, %v5094_v4, %v5090_v20 }
0x22b5   :  { %v5096_v35 = vmul.f32 %v9529_v29, %v5095_v26 }
0x22b7   :  { %5242 = vmatmul.f32.gmra.mxu0 %v5096_v35 }
0x22c3   :  { %v4901_v46 = vpop.xlane.xlu0 %4900 }
0x22c4   :  { %v4897_v25 = vpop.xlane.xlu2 %4896  ;;  %v5138_v42 = vand.u32 2147483648, %v4901_v46  ;;  %vm5132_vm7 = vweird.f32 %v4901_v46  ;;  %v5136_v14 = vand.u32 2147483647, %v4901_v46 }
0x22c5   :  { %6896 = vrcp.f32 %v4897_v25  ;;  %v5108_v21 = vand.u32 2147483648, %v4897_v25  ;;  %v5106_v27 = vand.u32 2147483647, %v4897_v25  ;;  %vm5102_vm13 = vweird.f32 %v4897_v25 }
0x22c6   :  { %6898 = vrcp.f32 %v4901_v46  ;;  %v5139_v53 = vor.u32 1.1754944e-38, %v5138_v42  ;;  %vm5137_vm9 = vcmp.eq.f32.partialorder %v5136_v14, 8.507059e+37 }
0x22c7   :  { %v5109_v48 = vor.u32 1.1754944e-38, %v5108_v21  ;;  %vm5107_vm1 = vcmp.eq.f32.partialorder %v5106_v27, 8.507059e+37 }
0x22cb   :  { %v6897_v60 = vpop.eup %6896 }
0x22cc   :  { %v4899_v55 = vpop.xlane.xlu1 %4898  ;;  %v5098_v15 = vmul.f32 %v6897_v60, %v4897_v25  ;;  %v6899_v39 = vpop.eup %6898  ;;  %vm5103_vm12 = vweird.f32 %v6897_v60 }
0x22cd   :  { %6900 = vrcp.f32 %v4899_v55  ;;  %v5128_v44 = vmul.f32 %v6899_v39, %v4901_v46  ;;  %vm5104_vm15 = vmor %vm5102_vm13, %vm5103_vm12  ;;  %v5123_v54 = vand.u32 2147483648, %v4899_v55  ;;  %v5121_v59 = vand.u32 2147483647, %v4899_v55  ;;  %v6524_v56 = vpop.permute.xlu2 %6523 }
0x22ce   :  { %v5099_v43 = vsub.f32 1.0, %v5098_v15  ;;  %v9608_v7 = vpop.f32.mrf.mxu0  ;;  %vm5117_vm3 = vweird.f32 %v4899_v55  ;;  %vm5133_vm6 = vweird.f32 %v6899_v39  ;;  %v6526_v52 = vunpack.i.h.bf16 %v6524_v56 }
0x22cf   :  { %v5129_v24 = vsub.f32 1.0, %v5128_v44  ;;  %v5124_v47 = vor.u32 1.1754944e-38, %v5123_v54  ;;  %vm5122_vm5 = vcmp.eq.f32.partialorder %v5121_v59, 8.507059e+37  ;;  %vm5134_vm8 = vmor %vm5132_vm7, %vm5133_vm6  ;;  %v6525_v16 = vunpack.i.l.bf16 %v6524_v56 }
0x22d0   :  { %v5100_v29 = vmul.f32 %v6897_v60, %v5099_v43 }
0x22d1   :  { %v5130_v11 = vmul.f32 %v6899_v39, %v5129_v24  ;;  %5355 = vmatpush.msra.mxu1 %v6525_v16 }
0x22d2   :  { %v5101_v50 = vadd.f32 %v6897_v60, %v5100_v29 }
0x22d3   :  { %v6901_v9 = vpop.eup %6900  ;;  %v5131_v37 = vadd.f32 %v6899_v39, %v5130_v11  ;;  %5356 = vmatpush.msra.mxu1 %v6526_v52 }
0x22d4   :  { %v5113_v2 = vmul.f32 %v6901_v9, %v4899_v55  ;;  %v5105_v49 = vsel %vm5104_vm15, %v6897_v60, %v5101_v50  ;;  %vm5118_vm2 = vweird.f32 %v6901_v9 }
0x22d5   :  { %v5110_v3 = vsel %vm5107_vm1, %v5109_v48, %v5105_v49  ;;  %vm5119_vm4 = vmor %vm5117_vm3, %vm5118_vm2  ;;  %v5135_v8 = vsel %vm5134_vm8, %v6899_v39, %v5131_v37 }
0x22d6   :  { %v5114_v34 = vsub.f32 1.0, %v5113_v2  ;;  %v5219_v58 = vpop.f32.mrf.mxu0  ;;  %v5111_v41 = vmul.f32 %v9551_v19, %v5110_v3  ;;  %v5140_v32 = vsel %vm5137_vm9, %v5139_v53, %v5135_v8  ;;  %v6529_v62 = vpop.permute.xlu0 %6528 }
0x22d7   :  { %5259 = vrot.lane.b32.xlu1 %v5219_v58, %s6947_s11  ;;  %v5141_v1 = vmul.f32 %v9547_v57, %v5140_v32  ;;  %v6531_v5 = vunpack.i.h.bf16 %v6529_v62  ;;  %v6530_v23 = vunpack.i.l.bf16 %v6529_v62 }
0x22d8   :  { %v5115_v38 = vmul.f32 %v6901_v9, %v5114_v34  ;;  %5245 = vmatmul.f32.gmra.mxu0 %v5111_v41 }
0x22d9   :  { %5357 = vmatpush.msra.mxu1 %v6530_v23 }
0x22da   :  { %v5116_v17 = vadd.f32 %v6901_v9, %v5115_v38 }
0x22db   :  { %5358 = vmatpush.msra.mxu1 %v6531_v5 }
0x22dc   :  { %v5120_v30 = vsel %vm5119_vm4, %v6901_v9, %v5116_v17 }
0x22dd   :  { %v5125_v22 = vsel %vm5122_vm5, %v5124_v47, %v5120_v30 }
0x22de   :  { %v5126_v10 = vmul.f32 %v9564_v45, %v5125_v22  ;;  %v5222_v19 = vpop.f32.mrf.mxu0 }
0x22df   :  { %5261 = vrot.lane.b32.xlu1 %v5222_v19, %s6947_s11 }
0x22e0   :  { %5248 = vmatmul.f32.gmra.mxu0 %v5126_v10 }
0x22e6   :  { %v5225_v18 = vpop.f32.mrf.mxu0 }
0x22e7   :  { %5263 = vrot.lane.b32.xlu1 %v5225_v18, %s6947_s11 }
0x22e8   :  { %5251 = vmatmul.f32.gmra.mxu0 %v5141_v1 }
0x22ee   :  { %v5228_v40 = vpop.f32.mrf.mxu0 }
0x22ef   :  { %5265 = vrot.lane.b32.xlu1 %v5228_v40, %s6947_s11  ;;  %v6203_v40 = vld [vmem:[%s10032_s2 + $0xf8] sm:$0xff] }
0x22f0   :  { %5504 = vmatpush.msra.mxu3 %v6203_v40 }
0x22f6   :  { %v5231_v45 = vpop.f32.mrf.mxu0 }
0x22f7   :  { %5275 = vrot.lane.b32.xlu0 %v5231_v45, %s6948_s12 }
0x22fe   :  { %v5234_v36 = vpop.f32.mrf.mxu0 }
0x22ff   :  { %5277 = vrot.lane.b32.xlu0 %v5234_v36, %s6948_s12 }
0x2324   :  { %v5237_v33 = vpop.f32.mrf.mxu0 }
0x2325   :  { %5279 = vrot.lane.b32.xlu0 %v5237_v33, %s6948_s12 }
0x232c   :  { %v5240_v57 = vpop.f32.mrf.mxu0 }
0x232d   :  { %5281 = vrot.lane.b32.xlu0 %v5240_v57, %s6948_s12 }
0x2334   :  { %v5243_v0 = vpop.f32.mrf.mxu0 }
0x2335   :  { %5291 = vrot.lane.b32.xlu2 %v5243_v0, %s6949_s13 }
0x2349   :  { %v5260_v35 = vpop.permute.xlu1 %5259 }
0x234a   :  { %v5303_v25 = vsel %vm529_vm14, %v9601_v63, %v5260_v35 }
0x2351   :  { %v5262_v39 = vpop.permute.xlu1 %5261 }
0x2352   :  { %v5304_v21 = vsel %vm529_vm14, %v9604_v13, %v5262_v39 }
0x2355   :  { %v5246_v4 = vpop.f32.mrf.mxu0 }
0x2356   :  { %5293 = vrot.lane.b32.xlu2 %v5246_v4, %s6949_s13 }
0x2359   :  { %v5264_v9 = vpop.permute.xlu1 %5263 }
0x235a   :  { %v5305_v50 = vsel %vm529_vm14, %v9606_v12, %v5264_v9  ;;  %v9648_v12 = vld [vmem:[%s10033_s4 + $0x18] sm:$0x7f] }
0x235b   :  { %v5376_v41 = vperm.slane %v9648_v12, 2  ;;  %v5469_v9 = vperm.slane %v9648_v12, 3 }
0x235d   :  { %v5249_v20 = vpop.f32.mrf.mxu0 }
0x235e   :  { %5295 = vrot.lane.b32.xlu2 %v5249_v20, %s6949_s13 }
0x2361   :  { %v5266_v13 = vpop.permute.xlu1 %5265 }
0x2362   :  { %v5306_v34 = vsel %vm529_vm14, %v9608_v7, %v5266_v13 }
0x2365   :  { %v5252_v26 = vpop.f32.mrf.mxu0 }
0x2366   :  { %5297 = vrot.lane.b32.xlu2 %v5252_v26, %s6949_s13 }
0x2369   :  { %v5276_v46 = vpop.permute.xlu0 %5275 }
0x236a   :  { %v5307_v60 = vsel %vm1192_vm10, %v5303_v25, %v5276_v46  ;;  %v6199_v46 = vld [vmem:[%s10032_s2 + $0xd8] sm:$0xff]  ;;  %v6197_v25 = vld [vmem:[%s10032_s2 + $0xc8] sm:$0xff] }
0x2371   :  { %v5278_v43 = vpop.permute.xlu0 %5277 }
0x2372   :  { %v5308_v44 = vsel %vm1192_vm10, %v5304_v21, %v5278_v43 }
0x238f   :  { %v5292_v55 = vpop.permute.xlu2 %5291 }
0x2390   :  { %v5311_v15 = vsel %vm1197_vm11, %v5307_v60, %v5292_v55 }
0x2391   :  { %6241 = vmatmul.msk.f32.vlgmr.msra.gmra.mxu1 %vm294_vm0, %v5311_v15 }
0x2397   :  { %v5280_v63 = vpop.permute.xlu0 %5279 }
0x2398   :  { %v5309_v48 = vsel %vm1192_vm10, %v5305_v50, %v5280_v63  ;;  %v5474_v50 = vperm.slane %v9648_v12, 4 }
0x239f   :  { %v5282_v49 = vpop.permute.xlu0 %5281 }
0x23a0   :  { %v5310_v3 = vsel %vm1192_vm10, %v5306_v34, %v5282_v49 }
0x23b0   :  { %v5294_v29 = vpop.permute.xlu2 %5293 }
0x23b1   :  { %v5312_v27 = vsel %vm1197_vm11, %v5308_v44, %v5294_v29 }
0x23b2   :  { %6242 = vmatmul.msk.f32.gmra.mxu1 %vm294_vm0, %v5312_v27 }
0x23b8   :  { %v5296_v2 = vpop.permute.xlu2 %5295 }
0x23b9   :  { %v5313_v24 = vsel %vm1197_vm11, %v5309_v48, %v5296_v2 }
0x23ba   :  { %6243 = vmatmul.msk.f32.gmra.mxu1 %vm294_vm0, %v5313_v24 }
0x23c0   :  { %v5298_v54 = vpop.permute.xlu2 %5297 }
0x23c1   :  { %v5314_v58 = vsel %vm1197_vm11, %v5310_v3, %v5298_v54 }
0x23c2   :  { %6244 = vmatmul.msk.f32.gmra.mxu1 %vm294_vm0, %v5314_v58 }
0x240e   :  { %v5360_v38 = vpop.f32.mrf.mxu1 }
0x240f   :  { %v5372_v59 = vadd.f32 %v5360_v38, %v9186_v61 }
0x2411   :  { %v9652_v11 = vadd.f32 %v5376_v41, %v5372_v59 }
0x2413   :  { %v5381_v7 = vsel %vm294_vm0, %v9652_v11, 0.0 }
0x2414   :  { %5382 = vadd.xlane.f32.xlu1 %v5381_v7 }
0x242f   :  { %v5363_v17 = vpop.f32.mrf.mxu1 }
0x2430   :  { %v5373_v47 = vadd.f32 %v5363_v17, %v9191_v31 }
0x2432   :  { %v9657_v30 = vadd.f32 %v5376_v41, %v5373_v47 }
0x2434   :  { %v5384_v22 = vsel %vm294_vm0, %v9657_v30, 0.0 }
0x2435   :  { %5385 = vadd.xlane.f32.xlu0 %v5384_v22 }
0x2437   :  { %v5366_v37 = vpop.f32.mrf.mxu1 }
0x2438   :  { %v5374_v42 = vadd.f32 %v5366_v37, %v9196_v28 }
0x243a   :  { %v9662_v10 = vadd.f32 %v5376_v41, %v5374_v42 }
0x243c   :  { %v5387_v61 = vsel %vm294_vm0, %v9662_v10, 0.0 }
0x243d   :  { %5388 = vadd.xlane.f32.xlu2 %v5387_v61 }
0x243f   :  { %v5369_v19 = vpop.f32.mrf.mxu1 }
0x2440   :  { %v5375_v14 = vadd.f32 %v5369_v19, %v9201_v51  ;;  %v6201_v51 = vld [vmem:[%s10032_s2 + $0xe8] sm:$0xff] }
0x2441   :  { %5505 = vmatpush.msra.mxu3 %v6201_v51 }
0x2442   :  { %v9667_v8 = vadd.f32 %v5376_v41, %v5375_v14 }
0x2443   :  { %5506 = vmatpush.msra.mxu3 %v6199_v46  ;;  %v9724_v46 = vperm.slane %v9648_v12, 6 }
0x2444   :  { %v5390_v31 = vsel %vm294_vm0, %v9667_v8, 0.0 }
0x2445   :  { %5391 = vadd.xlane.f32.xlu1 %v5390_v31  ;;  %5507 = vmatpush.msra.mxu3 %v6197_v25  ;;  %v6263_v25 = vld [vmem:[%s10034_s3 + $0x1f0] sm:$0xff] }
0x2487   :  { %v5383_v53 = vpop.xlane.xlu1 %5382 }
0x2488   :  { %v5393_v32 = vmul.f32 %v5383_v53, %v7138_v6 }
0x248a   :  { %v5397_v28 = vsub.f32 %v9652_v11, %v5393_v32 }
0x248c   :  { %v5401_v18 = vmul.f32 %v5397_v28, %v5397_v28 }
0x248e   :  { %v5405_v1 = vsel %vm294_vm0, %v5401_v18, 0.0 }
0x248f   :  { %5406 = vadd.xlane.f32.xlu2 %v5405_v1 }
0x24a8   :  { %v5386_v45 = vpop.xlane.xlu0 %5385 }
0x24a9   :  { %v5394_v36 = vmul.f32 %v5386_v45, %v7138_v6 }
0x24ab   :  { %v9682_v56 = vsub.f32 %v9657_v30, %v5394_v36 }
0x24ad   :  { %v5402_v52 = vmul.f32 %v9682_v56, %v9682_v56 }
0x24af   :  { %v5408_v16 = vsel %vm294_vm0, %v5402_v52, 0.0 }
0x24b0   :  { %5409 = vadd.xlane.f32.xlu0 %v5408_v16  ;;  %v5389_v33 = vpop.xlane.xlu2 %5388 }
0x24b1   :  { %v5395_v57 = vmul.f32 %v5389_v33, %v7138_v6 }
0x24b3   :  { %v9689_v0 = vsub.f32 %v9662_v10, %v5395_v57 }
0x24b5   :  { %v5403_v62 = vmul.f32 %v9689_v0, %v9689_v0 }
0x24b7   :  { %v5411_v5 = vsel %vm294_vm0, %v5403_v62, 0.0 }
0x24b8   :  { %v5392_v23 = vpop.xlane.xlu1 %5391  ;;  %5412 = vadd.xlane.f32.xlu1 %v5411_v5 }
0x24b9   :  { %v5396_v4 = vmul.f32 %v5392_v23, %v7138_v6 }
0x24bb   :  { %v9696_v20 = vsub.f32 %v9667_v8, %v5396_v4 }
0x24bd   :  { %v5404_v26 = vmul.f32 %v9696_v20, %v9696_v20 }
0x24bf   :  { %v5414_v35 = vsel %vm294_vm0, %v5404_v26, 0.0 }
0x24c0   :  { %5415 = vadd.xlane.f32.xlu2 %v5414_v35 }
0x2502   :  { %v5407_v60 = vpop.xlane.xlu2 %5406 }
0x2503   :  { %v5417_v55 = vmul.f32 %v5407_v60, %v7138_v6 }
0x2505   :  { %v5421_v15 = vadd.f32 1e-05, %v5417_v55 }
0x2507   :  { %6902 = vrsqrt.f32 %v5421_v15  ;;  %vm5431_vm10 = vweird.f32 %v5421_v15 }
0x250d   :  { %v6903_v39 = vpop.eup %6902 }
0x250e   :  { %v5426_v43 = vmul.f32 %v6903_v39, %v5421_v15  ;;  %vm5432_vm14 = vweird.f32 %v6903_v39  ;;  %v6261_v15 = vld [vmem:[%s10034_s3 + $0x1e0] sm:$0xff] }
0x250f   :  { %vm5433_vm11 = vmor %vm5431_vm10, %vm5432_vm14 }
0x2510   :  { %v5427_v21 = vmul.f32 %v6903_v39, %v5426_v43  ;;  %v6260_v43 = vld [vmem:[%s10034_s3 + $0x1d8] sm:$0xff] }
0x2512   :  { %v5428_v44 = vmul.f32 0.5, %v5427_v21 }
0x2514   :  { %v5429_v29 = vsub.f32 1.5, %v5428_v44  ;;  %v6259_v44 = vld [vmem:[%s10034_s3 + $0x1d0] sm:$0xff] }
0x2516   :  { %v5430_v27 = vmul.f32 %v6903_v39, %v5429_v29 }
0x2518   :  { %v5434_v63 = vsel %vm5433_vm11, %v6903_v39, %v5430_v27  ;;  %v6258_v27 = vld [vmem:[%s10034_s3 + $0x1c8] sm:$0xff] }
0x2519   :  { %v5465_v48 = vmul.f32 %v5434_v63, %v5397_v28  ;;  %v6257_v63 = vld [vmem:[%s10034_s3 + $0x1c0] sm:$0xff] }
0x251b   :  { %v5470_v2 = vmul.f32 %v5469_v9, %v5465_v48  ;;  %v6255_v48 = vld [vmem:[%s10034_s3 + $0x1b0] sm:$0xff] }
0x251d   :  { %v5475_v24 = vadd.f32 %v5474_v50, %v5470_v2  ;;  %v6254_v2 = vld [vmem:[%s10034_s3 + $0x1a8] sm:$0xff] }
0x251f   :  { %6245 = vmatmul.msk.f32.vlgmr.msra.gmra.mxu3 %vm294_vm0, %v5475_v24 }
0x2523   :  { %v5410_v13 = vpop.xlane.xlu0 %5409 }
0x2524   :  { %v5418_v49 = vmul.f32 %v5410_v13, %v7138_v6 }
0x2526   :  { %v5422_v34 = vadd.f32 1e-05, %v5418_v49  ;;  %v6253_v49 = vld [vmem:[%s10034_s3 + $0x1a0] sm:$0xff] }
0x2528   :  { %6904 = vrsqrt.f32 %v5422_v34  ;;  %vm5441_vm13 = vweird.f32 %v5422_v34 }
0x252b   :  { %v5413_v3 = vpop.xlane.xlu1 %5412 }
0x252c   :  { %v5419_v54 = vmul.f32 %v5413_v3, %v7138_v6  ;;  %v6252_v3 = vld [vmem:[%s10034_s3 + $0x198] sm:$0xff] }
0x252e   :  { %v6905_v58 = vpop.eup %6904  ;;  %v5423_v41 = vadd.f32 1e-05, %v5419_v54 }
0x252f   :  { %v5436_v38 = vmul.f32 %v6905_v58, %v5422_v34  ;;  %vm5442_vm12 = vweird.f32 %v6905_v58 }
0x2530   :  { %6906 = vrsqrt.f32 %v5423_v41  ;;  %vm5443_vm15 = vmor %vm5441_vm13, %vm5442_vm12  ;;  %vm5451_vm2 = vweird.f32 %v5423_v41 }
0x2531   :  { %v5437_v59 = vmul.f32 %v6905_v58, %v5436_v38  ;;  %v6251_v38 = vld [vmem:[%s10034_s3 + $0x190] sm:$0xff] }
0x2533   :  { %v5438_v7 = vmul.f32 0.5, %v5437_v59  ;;  %v5416_v17 = vpop.xlane.xlu2 %5415 }
0x2534   :  { %v5420_v47 = vmul.f32 %v5416_v17, %v7138_v6 }
0x2535   :  { %v5439_v22 = vsub.f32 1.5, %v5438_v7  ;;  %v6250_v7 = vld [vmem:[%s10034_s3 + $0x188] sm:$0xff] }
0x2536   :  { %v6907_v37 = vpop.eup %6906  ;;  %v5424_v42 = vadd.f32 1e-05, %v5420_v47 }
0x2537   :  { %v5440_v61 = vmul.f32 %v6905_v58, %v5439_v22  ;;  %v5446_v19 = vmul.f32 %v6907_v37, %v5423_v41  ;;  %vm5452_vm1 = vweird.f32 %v6907_v37  ;;  %v6249_v22 = vld [vmem:[%s10034_s3 + $0x180] sm:$0xff] }
0x2538   :  { %6908 = vrsqrt.f32 %v5424_v42  ;;  %vm5453_vm3 = vmor %vm5451_vm2, %vm5452_vm1  ;;  %vm5461_vm5 = vweird.f32 %v5424_v42 }
0x2539   :  { %v5444_v14 = vsel %vm5443_vm15, %v6905_v58, %v5440_v61  ;;  %v5447_v31 = vmul.f32 %v6907_v37, %v5446_v19 }
0x253a   :  { %v5466_v53 = vmul.f32 %v5444_v14, %v9682_v56 }
0x253b   :  { %v5448_v32 = vmul.f32 0.5, %v5447_v31 }
0x253c   :  { %v5471_v28 = vmul.f32 %v5469_v9, %v5466_v53 }
0x253d   :  { %v5449_v18 = vsub.f32 1.5, %v5448_v32 }
0x253e   :  { %v6909_v1 = vpop.eup %6908  ;;  %v5476_v40 = vadd.f32 %v5474_v50, %v5471_v28 }
0x253f   :  { %v5450_v51 = vmul.f32 %v6907_v37, %v5449_v18  ;;  %v5456_v45 = vmul.f32 %v6909_v1, %v5424_v42  ;;  %vm5462_vm4 = vweird.f32 %v6909_v1 }
0x2540   :  { %6246 = vmatmul.msk.f32.gmra.mxu3 %vm294_vm0, %v5476_v40  ;;  %vm5463_vm6 = vmor %vm5461_vm5, %vm5462_vm4 }
0x2541   :  { %v5454_v36 = vsel %vm5453_vm3, %v6907_v37, %v5450_v51  ;;  %v5457_v52 = vmul.f32 %v6909_v1, %v5456_v45 }
0x2542   :  { %v5467_v16 = vmul.f32 %v5454_v36, %v9689_v0  ;;  %v6264_v0 = vld [vmem:[%s10034_s3 + $0x1f8] sm:$0xff] }
0x2543   :  { %v5458_v33 = vmul.f32 0.5, %v5457_v52  ;;  %5699 = vmatpush.msrb.mxu1 %v6264_v0 }
0x2544   :  { %v5472_v57 = vmul.f32 %v5469_v9, %v5467_v16 }
0x2545   :  { %v5459_v62 = vsub.f32 1.5, %v5458_v33  ;;  %5700 = vmatpush.msrb.mxu1 %v6263_v25 }
0x2546   :  { %v5477_v56 = vadd.f32 %v5474_v50, %v5472_v57 }
0x2547   :  { %v5460_v5 = vmul.f32 %v6909_v1, %v5459_v62 }
0x2548   :  { %6247 = vmatmul.msk.f32.gmra.mxu3 %vm294_vm0, %v5477_v56 }
0x2549   :  { %v5464_v23 = vsel %vm5463_vm6, %v6909_v1, %v5460_v5 }
0x254a   :  { %v5468_v4 = vmul.f32 %v5464_v23, %v9696_v20  ;;  %v6262_v20 = vld [vmem:[%s10034_s3 + $0x1e8] sm:$0xff] }
0x254b   :  { %5701 = vmatpush.msrb.mxu1 %v6262_v20 }
0x254c   :  { %v5473_v26 = vmul.f32 %v5469_v9, %v5468_v4 }
0x254d   :  { %5702 = vmatpush.msrb.mxu1 %v6261_v15 }
0x254e   :  { %v5478_v35 = vadd.f32 %v5474_v50, %v5473_v26  ;;  %v6256_v50 = vld [vmem:[%s10034_s3 + $0x1b8] sm:$0xff] }
0x254f   :  { %5703 = vmatpush.msrb.mxu1 %v6260_v43 }
0x2550   :  { %6248 = vmatmul.msk.f32.gmra.mxu3 %vm294_vm0, %v5478_v35 }
0x2551   :  { %5704 = vmatpush.msrb.mxu1 %v6259_v44 }
0x2553   :  { %5705 = vmatpush.msrb.mxu1 %v6258_v27 }
0x2555   :  { %5706 = vmatpush.msrb.mxu1 %v6257_v63 }
0x2557   :  { %5707 = vmatpush.msrb.mxu1 %v6256_v50 }
0x2559   :  { %5708 = vmatpush.msrb.mxu1 %v6255_v48 }
0x255b   :  { %5709 = vmatpush.msrb.mxu1 %v6254_v2 }
0x255d   :  { %5710 = vmatpush.msrb.mxu1 %v6253_v49 }
0x255f   :  { %5711 = vmatpush.msrb.mxu1 %v6252_v3 }
0x2561   :  { %5712 = vmatpush.msrb.mxu1 %v6251_v38 }
0x2563   :  { %5713 = vmatpush.msrb.mxu1 %v6250_v7 }
0x2565   :  { %5714 = vmatpush.msrb.mxu1 %v6249_v22 }
0x25a2   :  { %v5509_v60 = vpop.f32.mrf.mxu3 }
0x25a3   :  { %v9733_v55 = vadd.f32 %v5509_v60, %v9724_v46 }
0x25a5   :  { %v9739_v39 = vmul.f32 0.70710677, %v9733_v55 }
0x25a7   :  { %v5525_v21 = vand.u32 2147483647, %v9739_v39  ;;  %vm5657_vm10 = vcmp.ge.f32.partialorder %v9739_v39, 0.0 }
0x25a9   :  { %v5529_v29 = vmul.f32 0.3275911, %v5525_v21  ;;  %v5633_v42 = vsub.f32 0.0, %v5525_v21 }
0x25ab   :  { %v5533_v9 = vadd.f32 1.0, %v5529_v29  ;;  %v5637_v14 = vmul.f32 %v5633_v42, %v5525_v21  ;;  %v5669_v29 = vmul.f32 0.5, %v9733_v55 }
0x25ad   :  { %6910 = vrcp.f32 %v5533_v9  ;;  %v5548_v54 = vand.u32 2147483648, %v5533_v9  ;;  %v5546_v41 = vand.u32 2147483647, %v5533_v9  ;;  %vm5542_vm8 = vweird.f32 %v5533_v9 }
0x25ae   :  { %v5641_v28 = vmul.f32 1.442695, %v5637_v14 }
0x25af   :  { %v5549_v17 = vor.u32 1.1754944e-38, %v5548_v54  ;;  %vm5547_vm14 = vcmp.eq.f32.partialorder %v5546_v41, 8.507059e+37 }
0x25b0   :  { %6912 = vpow2.f32 %v5641_v28 }
0x25b3   :  { %v6911_v24 = vpop.eup %6910 }
0x25b4   :  { %v5538_v13 = vmul.f32 %v6911_v24, %v5533_v9  ;;  %vm5543_vm7 = vweird.f32 %v6911_v24 }
0x25b5   :  { %vm5544_vm9 = vmor %vm5542_vm8, %vm5543_vm7 }
0x25b6   :  { %v5539_v34 = vsub.f32 1.0, %v5538_v13  ;;  %v6913_v5 = vpop.eup %6912 }
0x25b8   :  { %v5540_v58 = vmul.f32 %v6911_v24, %v5539_v34 }
0x25ba   :  { %v5541_v59 = vadd.f32 %v6911_v24, %v5540_v58 }
0x25bc   :  { %v5545_v47 = vsel %vm5544_vm9, %v6911_v24, %v5541_v59 }
0x25bd   :  { %v5550_v37 = vsel %vm5547_vm14, %v5549_v17, %v5545_v47 }
0x25be   :  { %v5597_v61 = vmul.f32 1.0614054, %v5550_v37 }
0x25c0   :  { %v5601_v19 = vadd.f32 -1.4531521, %v5597_v61 }
0x25c2   :  { %v5605_v31 = vmul.f32 %v5601_v19, %v5550_v37 }
0x25c3   :  { %v5512_v32 = vpop.f32.mrf.mxu3 }
0x25c4   :  { %v5609_v53 = vadd.f32 1.4214138, %v5605_v31  ;;  %v9779_v18 = vadd.f32 %v5512_v32, %v9724_v46 }
0x25c6   :  { %v5613_v1 = vmul.f32 %v5609_v53, %v5550_v37  ;;  %v9782_v40 = vmul.f32 0.70710677, %v9779_v18 }
0x25c8   :  { %v5617_v51 = vadd.f32 -0.28449672, %v5613_v1  ;;  %v5526_v45 = vand.u32 2147483647, %v9782_v40  ;;  %vm5658_vm9 = vcmp.ge.f32.partialorder %v9782_v40, 0.0 }
0x25ca   :  { %v5621_v36 = vmul.f32 %v5617_v51, %v5550_v37  ;;  %v5530_v52 = vmul.f32 0.3275911, %v5526_v45  ;;  %v5634_v58 = vsub.f32 0.0, %v5526_v45 }
0x25cb   :  { %v5515_v33 = vpop.f32.mrf.mxu3 }
0x25cc   :  { %v5625_v16 = vadd.f32 0.2548296, %v5621_v36  ;;  %v5534_v57 = vadd.f32 1.0, %v5530_v52  ;;  %v9786_v62 = vadd.f32 %v5515_v33, %v9724_v46 }
0x25ce   :  { %v5629_v56 = vmul.f32 %v5625_v16, %v5550_v37  ;;  %6914 = vrcp.f32 %v5534_v57  ;;  %v9789_v4 = vmul.f32 0.70710677, %v9786_v62  ;;  %v5563_v39 = vand.u32 2147483648, %v5534_v57 }
0x25cf   :  { %vm5557_vm12 = vweird.f32 %v5534_v57  ;;  %v5638_v37 = vmul.f32 %v5634_v58, %v5526_v45 }
0x25d0   :  { %v5649_v23 = vmul.f32 %v6913_v5, %v5629_v56  ;;  %v9792_v35 = vand.u32 2147483647, %v9789_v4  ;;  %v5564_v34 = vor.u32 1.1754944e-38, %v5563_v39  ;;  %vm5659_vm14 = vcmp.ge.f32.partialorder %v9789_v4, 0.0 }
0x25d1   :  { %v5643_v28 = vmul.f32 1.442695, %v5638_v37  ;;  %v5698_v4 = vperm.slane %v9648_v12, 5 }
0x25d2   :  { %v5653_v26 = vsub.f32 1.0, %v5649_v23  ;;  %v5531_v25 = vmul.f32 0.3275911, %v9792_v35  ;;  %v5635_v1 = vsub.f32 0.0, %v9792_v35 }
0x25d3   :  { %v5518_v20 = vpop.f32.mrf.mxu3 }
0x25d4   :  { %v5661_v0 = vsub.f32 0.0, %v5653_v26  ;;  %v6915_v60 = vpop.eup %6914  ;;  %v9797_v15 = vadd.f32 %v5518_v20, %v9724_v46  ;;  %v5535_v44 = vadd.f32 1.0, %v5531_v25  ;;  %v5561_v46 = vand.u32 2147483647, %v5534_v57 }
0x25d5   :  { %v5553_v21 = vmul.f32 %v6915_v60, %v5534_v57  ;;  %vm5558_vm11 = vweird.f32 %v6915_v60  ;;  %v5639_v23 = vmul.f32 %v5635_v1, %v9792_v35 }
0x25d6   :  { %v5665_v43 = vsel %vm5657_vm10, %v5653_v26, %v5661_v0  ;;  %v9801_v9 = vmul.f32 0.70710677, %v9797_v15  ;;  %6916 = vrcp.f32 %v5535_v44  ;;  %vm5559_vm13 = vmor %vm5557_vm12, %vm5558_vm11  ;;  %vm5562_vm15 = vcmp.eq.f32.partialorder %v5561_v46, 8.507059e+37 }
0x25d7   :  { %v5673_v27 = vadd.f32 1.0, %v5665_v43  ;;  %v5554_v63 = vsub.f32 1.0, %v5553_v21  ;;  %v5578_v7 = vand.u32 2147483648, %v5535_v44  ;;  %v5576_v47 = vand.u32 2147483647, %v5535_v44 }
0x25d8   :  { %v9804_v48 = vand.u32 2147483647, %v9801_v9  ;;  %vm5572_vm2 = vweird.f32 %v5535_v44  ;;  %vm5660_vm10 = vcmp.ge.f32.partialorder %v9801_v9, 0.0 }
0x25d9   :  { %v5677_v50 = vmul.f32 %v5673_v27, %v5669_v29  ;;  %v5555_v2 = vmul.f32 %v6915_v60, %v5554_v63  ;;  %v5579_v14 = vor.u32 1.1754944e-38, %v5578_v7  ;;  %vm5577_vm4 = vcmp.eq.f32.partialorder %v5576_v47, 8.507059e+37 }
0x25da   :  { %v5532_v24 = vmul.f32 0.3275911, %v9804_v48  ;;  %v5636_v43 = vsub.f32 0.0, %v9804_v48  ;;  %v5645_v27 = vmul.f32 1.442695, %v5639_v23  ;;  %v5670_v47 = vmul.f32 0.5, %v9779_v18 }
0x25db   :  { %5715 = vmatmul.f32.vlgmr.msrb.gmra.mxu1 %v5677_v50  ;;  %v5556_v13 = vadd.f32 %v6915_v60, %v5555_v2 }
0x25dc   :  { %v5536_v55 = vadd.f32 1.0, %v5532_v24  ;;  %v6917_v49 = vpop.eup %6916  ;;  %v5640_v35 = vmul.f32 %v5636_v43, %v9804_v48 }
0x25dd   :  { %v5560_v3 = vsel %vm5559_vm13, %v6915_v60, %v5556_v13  ;;  %v5568_v54 = vmul.f32 %v6917_v49, %v5535_v44  ;;  %vm5573_vm1 = vweird.f32 %v6917_v49 }
0x25de   :  { %6918 = vrcp.f32 %v5536_v55  ;;  %v5565_v41 = vsel %vm5562_vm15, %v5564_v34, %v5560_v3  ;;  %vm5574_vm3 = vmor %vm5572_vm2, %vm5573_vm1  ;;  %v5593_v52 = vand.u32 2147483648, %v5536_v55  ;;  %v5591_v45 = vand.u32 2147483647, %v5536_v55 }
0x25df   :  { %v5569_v38 = vsub.f32 1.0, %v5568_v54  ;;  %v5598_v59 = vmul.f32 1.0614054, %v5565_v41  ;;  %6920 = vpow2.f32 %v5643_v28  ;;  %vm5587_vm6 = vweird.f32 %v5536_v55 }
0x25e0   :  { %v5594_v0 = vor.u32 1.1754944e-38, %v5593_v52  ;;  %vm5592_vm8 = vcmp.eq.f32.partialorder %v5591_v45, 8.507059e+37  ;;  %6922 = vpow2.f32 %v5645_v27  ;;  %v5647_v54 = vmul.f32 1.442695, %v5640_v35  ;;  %v194_v35 = vld [vmem:[%s10029_s5 + $0x188] sm:$0xff] }
0x25e1   :  { %v5570_v17 = vmul.f32 %v6917_v49, %v5569_v38  ;;  %v5602_v22 = vadd.f32 -1.4531521, %v5598_v59  ;;  %v5671_v28 = vmul.f32 0.5, %v9786_v62 }
0x25e2   :  { %6924 = vpow2.f32 %v5647_v54  ;;  %v192_v54 = vld [vmem:[%s10029_s5 + $0x178] sm:$0xff] }
0x25e3   :  { %v5606_v61 = vmul.f32 %v5602_v22, %v5565_v41  ;;  %v5571_v19 = vadd.f32 %v6917_v49, %v5570_v17 }
0x25e4   :  { %v6919_v42 = vpop.eup %6918 }
0x25e5   :  { %v5583_v31 = vmul.f32 %v6919_v42, %v5536_v55  ;;  %v5610_v53 = vadd.f32 1.4214138, %v5606_v61  ;;  %v5575_v32 = vsel %vm5574_vm3, %v6917_v49, %v5571_v19  ;;  %vm5588_vm5 = vweird.f32 %v6919_v42  ;;  %v6921_v39 = vpop.eup %6920 }
0x25e6   :  { %v5580_v36 = vsel %vm5577_vm4, %v5579_v14, %v5575_v32  ;;  %vm5589_vm7 = vmor %vm5587_vm6, %vm5588_vm5  ;;  %v6923_v17 = vpop.eup %6922 }
0x25e7   :  { %v5584_v51 = vsub.f32 1.0, %v5583_v31  ;;  %v5614_v16 = vmul.f32 %v5610_v53, %v5565_v41  ;;  %v5599_v33 = vmul.f32 1.0614054, %v5580_v36 }
0x25e8   :  { %v6925_v40 = vpop.eup %6924 }
0x25e9   :  { %v5585_v57 = vmul.f32 %v6919_v42, %v5584_v51  ;;  %v5618_v56 = vadd.f32 -0.28449672, %v5614_v16  ;;  %v5603_v5 = vadd.f32 -1.4531521, %v5599_v33  ;;  %v5672_v33 = vmul.f32 0.5, %v9797_v15 }
0x25eb   :  { %v5586_v26 = vadd.f32 %v6919_v42, %v5585_v57  ;;  %v5622_v25 = vmul.f32 %v5618_v56, %v5565_v41  ;;  %v5607_v20 = vmul.f32 %v5603_v5, %v5580_v36 }
0x25ed   :  { %v5590_v60 = vsel %vm5589_vm7, %v6919_v42, %v5586_v26  ;;  %v5626_v21 = vadd.f32 0.2548296, %v5622_v25  ;;  %v5611_v44 = vadd.f32 1.4214138, %v5607_v20 }
0x25ee   :  { %v5595_v29 = vsel %vm5592_vm8, %v5594_v0, %v5590_v60 }
0x25ef   :  { %v5600_v63 = vmul.f32 1.0614054, %v5595_v29  ;;  %v5630_v50 = vmul.f32 %v5626_v21, %v5565_v41  ;;  %v5615_v2 = vmul.f32 %v5611_v44, %v5580_v36 }
0x25f1   :  { %v5604_v46 = vadd.f32 -1.4531521, %v5600_v63  ;;  %v5650_v24 = vmul.f32 %v6921_v39, %v5630_v50  ;;  %v5619_v13 = vadd.f32 -0.28449672, %v5615_v2  ;;  %v212_v50 = vld [vmem:[%s10029_s5 + $0x218] sm:$0xff]  ;;  %v211_v2 = vld [vmem:[%s10029_s5 + $0x210] sm:$0xff] }
0x25f2   :  { %6285 = vmatpush.xpose.msk.msrb.mxu0 %vm294_vm0, %v212_v50  ;;  %v195_v39 = vld [vmem:[%s10029_s5 + $0x190] sm:$0xff] }
0x25f3   :  { %v5608_v55 = vmul.f32 %v5604_v46, %v5595_v29  ;;  %v5654_v49 = vsub.f32 1.0, %v5650_v24  ;;  %v5623_v34 = vmul.f32 %v5619_v13, %v5580_v36  ;;  %v210_v46 = vld [vmem:[%s10029_s5 + $0x208] sm:$0xff] }
0x25f5   :  { %v5612_v3 = vadd.f32 1.4214138, %v5608_v55  ;;  %v5662_v58 = vsub.f32 0.0, %v5654_v49  ;;  %v5627_v38 = vadd.f32 0.2548296, %v5623_v34  ;;  %v209_v55 = vld [vmem:[%s10029_s5 + $0x200] sm:$0xff] }
0x25f6   :  { %6286 = vmatpush.xpose.msk.msrb.mxu0 %vm294_vm0, %v211_v2 }
0x25f7   :  { %v5616_v59 = vmul.f32 %v5612_v3, %v5595_v29  ;;  %v5666_v7 = vsel %vm5658_vm9, %v5654_v49, %v5662_v58  ;;  %v5631_v41 = vmul.f32 %v5627_v38, %v5580_v36  ;;  %v193_v49 = vld [vmem:[%s10029_s5 + $0x180] sm:$0xff]  ;;  %v208_v58 = vld [vmem:[%s10029_s5 + $0x1f8] sm:$0xff] }
0x25f8   :  { %v5674_v22 = vadd.f32 1.0, %v5666_v7 }
0x25f9   :  { %v5620_v48 = vadd.f32 -0.28449672, %v5616_v59  ;;  %v5651_v37 = vmul.f32 %v6923_v17, %v5631_v41  ;;  %v191_v41 = vld [vmem:[%s10029_s5 + $0x170] sm:$0xff] }
0x25fa   :  { %v5678_v42 = vmul.f32 %v5674_v22, %v5670_v47  ;;  %6287 = vmatpush.xpose.msk.msrb.mxu0 %vm294_vm0, %v210_v46  ;;  %v207_v17 = vld [vmem:[%s10029_s5 + $0x1f0] sm:$0xff] }
0x25fb   :  { %v5624_v61 = vmul.f32 %v5620_v48, %v5595_v29  ;;  %v5655_v19 = vsub.f32 1.0, %v5651_v37  ;;  %v190_v48 = vld [vmem:[%s10029_s5 + $0x168] sm:$0xff] }
0x25fc   :  { %5718 = vmatmul.f32.gmra.mxu1 %v5678_v42  ;;  %v206_v37 = vld [vmem:[%s10029_s5 + $0x1e8] sm:$0xff] }
0x25fd   :  { %v5628_v14 = vadd.f32 0.2548296, %v5624_v61  ;;  %v5663_v31 = vsub.f32 0.0, %v5655_v19 }
0x25fe   :  { %6288 = vmatpush.xpose.msk.msrb.mxu0 %vm294_vm0, %v209_v55 }
0x25ff   :  { %v5632_v53 = vmul.f32 %v5628_v14, %v5595_v29  ;;  %v5667_v32 = vsel %vm5659_vm14, %v5655_v19, %v5663_v31  ;;  %v189_v14 = vld [vmem:[%s10029_s5 + $0x160] sm:$0xff] }
0x2600   :  { %v5675_v1 = vadd.f32 1.0, %v5667_v32  ;;  %v205_v31 = vld [vmem:[%s10029_s5 + $0x1e0] sm:$0xff]  ;;  %v188_v32 = vld [vmem:[%s10029_s5 + $0x158] sm:$0xff] }
0x2601   :  { %v5652_v51 = vmul.f32 %v6925_v40, %v5632_v53 }
0x2602   :  { %v5679_v18 = vmul.f32 %v5675_v1, %v5671_v28  ;;  %6289 = vmatpush.xpose.msk.msrb.mxu0 %vm294_vm0, %v208_v58  ;;  %v204_v28 = vld [vmem:[%s10029_s5 + $0x1d8] sm:$0xff] }
0x2603   :  { %v5656_v36 = vsub.f32 1.0, %v5652_v51  ;;  %v187_v51 = vld [vmem:[%s10029_s5 + $0x150] sm:$0xff] }
0x2604   :  { %5721 = vmatmul.f32.gmra.mxu1 %v5679_v18  ;;  %v203_v18 = vld [vmem:[%s10029_s5 + $0x1d0] sm:$0xff] }
0x2605   :  { %v5664_v52 = vsub.f32 0.0, %v5656_v36 }
0x2606   :  { %6290 = vmatpush.xpose.msk.msrb.mxu0 %vm294_vm0, %v207_v17 }
0x2607   :  { %v5668_v16 = vsel %vm5660_vm10, %v5656_v36, %v5664_v52  ;;  %v186_v36 = vld [vmem:[%s10029_s5 + $0x148] sm:$0xff] }
0x2608   :  { %v5676_v57 = vadd.f32 1.0, %v5668_v16  ;;  %v202_v52 = vld [vmem:[%s10029_s5 + $0x1c8] sm:$0xff]  ;;  %v185_v16 = vld [vmem:[%s10029_s5 + $0x140] sm:$0xff] }
0x260a   :  { %v5680_v45 = vmul.f32 %v5676_v57, %v5672_v33  ;;  %6291 = vmatpush.xpose.msk.msrb.mxu0 %vm294_vm0, %v206_v37  ;;  %v201_v33 = vld [vmem:[%s10029_s5 + $0x1c0] sm:$0xff]  ;;  %v184_v57 = vld [vmem:[%s10029_s5 + $0x138] sm:$0xff] }
0x260c   :  { %5724 = vmatmul.f32.gmra.mxu1 %v5680_v45  ;;  %v200_v45 = vld [vmem:[%s10029_s5 + $0x1b8] sm:$0xff] }
0x260e   :  { %6292 = vmatpush.xpose.msk.msrb.mxu0 %vm294_vm0, %v205_v31 }
0x2612   :  { %6293 = vmatpush.xpose.msk.msrb.mxu0 %vm294_vm0, %v204_v28 }
0x2616   :  { %6294 = vmatpush.xpose.msk.msrb.mxu0 %vm294_vm0, %v203_v18 }
0x261a   :  { %6295 = vmatpush.xpose.msk.msrb.mxu0 %vm294_vm0, %v202_v52 }
0x261e   :  { %6296 = vmatpush.xpose.msk.msrb.mxu0 %vm294_vm0, %v201_v33 }
0x2622   :  { %6297 = vmatpush.xpose.msk.msrb.mxu0 %vm294_vm0, %v200_v45 }
0x2658   :  { %v5716_v56 = vpop.f32.mrf.mxu1 }
0x2659   :  { %v5717_v5 = vadd.f32 %v5716_v56, %v5698_v4  ;;  %v199_v56 = vld [vmem:[%s10029_s5 + $0x1b0] sm:$0xff] }
0x265a   :  { %6298 = vmatpush.xpose.msk.msrb.mxu0 %vm294_vm0, %v199_v56 }
0x265b   :  { %v5728_v62 = vadd.f32 %v5717_v5, %v9652_v11  ;;  %v182_v5 = vld [vmem:[%s10029_s5 + $0x128] sm:$0xff] }
0x265d   :  { %v5732_v23 = vsel %vm294_vm0, %v5728_v62, 0.0 }
0x265e   :  { %5733 = vadd.xlane.f32.xlu0 %v5732_v23  ;;  %v181_v23 = vld [vmem:[%s10029_s5 + $0x120] sm:$0xff] }
0x2679   :  { %v5719_v26 = vpop.f32.mrf.mxu1 }
0x267a   :  { %v5720_v0 = vadd.f32 %v5719_v26, %v5698_v4  ;;  %v197_v26 = vld [vmem:[%s10029_s5 + $0x1a0] sm:$0xff] }
0x267c   :  { %v5729_v25 = vadd.f32 %v5720_v0, %v9657_v30 }
0x267e   :  { %v5735_v9 = vsel %vm294_vm0, %v5729_v25, 0.0 }
0x267f   :  { %5736 = vadd.xlane.f32.xlu1 %v5735_v9 }
0x2681   :  { %v5722_v15 = vpop.f32.mrf.mxu1 }
0x2682   :  { %v5723_v20 = vadd.f32 %v5722_v15, %v5698_v4 }
0x2684   :  { %v5730_v60 = vadd.f32 %v5723_v20, %v9662_v10 }
0x2686   :  { %v5738_v12 = vsel %vm294_vm0, %v5730_v60, 0.0 }
0x2687   :  { %5739 = vadd.xlane.f32.xlu2 %v5738_v12 }
0x2689   :  { %v5725_v43 = vpop.f32.mrf.mxu1 }
0x268a   :  { %v5726_v21 = vadd.f32 %v5725_v43, %v5698_v4  ;;  %v183_v4 = vld [vmem:[%s10029_s5 + $0x130] sm:$0xff] }
0x268c   :  { %v5731_v11 = vadd.f32 %v5726_v21, %v9667_v8  ;;  %v196_v8 = vld [vmem:[%s10029_s5 + $0x198] sm:$0xff] }
0x268d   :  { %6265 = vmatpush.xpose.msk.msrb.mxu3 %vm294_vm0, %v196_v8 }
0x268e   :  { %v5741_v44 = vsel %vm294_vm0, %v5731_v11, 0.0 }
0x268f   :  { %5742 = vadd.xlane.f32.xlu0 %v5741_v44 }
0x2691   :  { %6266 = vmatpush.xpose.msk.msrb.mxu3 %vm294_vm0, %v195_v39 }
0x2695   :  { %6267 = vmatpush.xpose.msk.msrb.mxu3 %vm294_vm0, %v194_v35 }
0x2699   :  { %6268 = vmatpush.xpose.msk.msrb.mxu3 %vm294_vm0, %v193_v49 }
0x269d   :  { %6269 = vmatpush.xpose.msk.msrb.mxu3 %vm294_vm0, %v192_v54 }
0x26a1   :  { %6270 = vmatpush.xpose.msk.msrb.mxu3 %vm294_vm0, %v191_v41 }
0x26a5   :  { %6271 = vmatpush.xpose.msk.msrb.mxu3 %vm294_vm0, %v190_v48 }
0x26a9   :  { %6272 = vmatpush.xpose.msk.msrb.mxu3 %vm294_vm0, %v189_v14 }
0x26ad   :  { %6273 = vmatpush.xpose.msk.msrb.mxu3 %vm294_vm0, %v188_v32 }
0x26b1   :  { %6274 = vmatpush.xpose.msk.msrb.mxu3 %vm294_vm0, %v187_v51 }
0x26b5   :  { %6275 = vmatpush.xpose.msk.msrb.mxu3 %vm294_vm0, %v186_v36 }
0x26b9   :  { %6276 = vmatpush.xpose.msk.msrb.mxu3 %vm294_vm0, %v185_v16 }
0x26bd   :  { %6277 = vmatpush.xpose.msk.msrb.mxu3 %vm294_vm0, %v184_v57 }
0x26c1   :  { %6278 = vmatpush.xpose.msk.msrb.mxu3 %vm294_vm0, %v183_v4 }
0x26c5   :  { %6279 = vmatpush.xpose.msk.msrb.mxu3 %vm294_vm0, %v182_v5 }
0x26c9   :  { %6280 = vmatpush.xpose.msk.msrb.mxu3 %vm294_vm0, %v181_v23 }
0x26d1   :  { %v5734_v29 = vpop.xlane.xlu0 %5733 }
0x26d2   :  { %v5744_v30 = vmul.f32 %v5734_v29, %v7138_v6 }
0x26d4   :  { %v9827_v27 = vsub.f32 %v5728_v62, %v5744_v30  ;;  %v198_v62 = vld [vmem:[%s10029_s5 + $0x1a8] sm:$0xff] }
0x26d5   :  { %6299 = vmatpush.xpose.msk.msrb.mxu0 %vm294_vm0, %v198_v62 }
0x26d6   :  { %v5752_v63 = vmul.f32 %v9827_v27, %v9827_v27 }
0x26d8   :  { %v5756_v10 = vsel %vm294_vm0, %v5752_v63, 0.0 }
0x26d9   :  { %5757 = vadd.xlane.f32.xlu1 %v5756_v10  ;;  %6300 = vmatpush.xpose.msk.msrb.mxu0 %vm294_vm0, %v197_v26 }
0x26f2   :  { %v5737_v24 = vpop.xlane.xlu1 %5736 }
0x26f3   :  { %v5745_v13 = vmul.f32 %v5737_v24, %v7138_v6 }
0x26f5   :  { %v9863_v34 = vsub.f32 %v5729_v25, %v5745_v13 }
0x26f7   :  { %v5753_v3 = vmul.f32 %v9863_v34, %v9863_v34 }
0x26f9   :  { %v5759_v38 = vsel %vm294_vm0, %v5753_v3, 0.0 }
0x26fa   :  { %5760 = vadd.xlane.f32.xlu2 %v5759_v38  ;;  %v5740_v59 = vpop.xlane.xlu2 %5739 }
0x26fb   :  { %v5746_v7 = vmul.f32 %v5740_v59, %v7138_v6 }
0x26fd   :  { %v9885_v47 = vsub.f32 %v5730_v60, %v5746_v7 }
0x26ff   :  { %v5754_v22 = vmul.f32 %v9885_v47, %v9885_v47 }
0x2701   :  { %v5762_v42 = vsel %vm294_vm0, %v5754_v22, 0.0 }
0x2702   :  { %v5743_v61 = vpop.xlane.xlu0 %5742  ;;  %5763 = vadd.xlane.f32.xlu0 %v5762_v42 }
0x2703   :  { %v5747_v19 = vmul.f32 %v5743_v61, %v7138_v6 }
0x2705   :  { %v9907_v53 = vsub.f32 %v5731_v11, %v5747_v19  ;;  %v9982_v11 = vld [vmem:[%s10035_s6] sm:$0x1f] }
0x2706   :  { %v5820_v44 = vperm.slane %v9982_v11, 3  ;;  %v5825_v30 = vperm.slane %v9982_v11, 4  ;;  %v5830_v5 = vperm.slane %v9982_v11, 0 }
0x2707   :  { %v5755_v40 = vmul.f32 %v9907_v53, %v9907_v53 }
0x2709   :  { %v5765_v1 = vsel %vm294_vm0, %v5755_v40, 0.0 }
0x270a   :  { %5766 = vadd.xlane.f32.xlu1 %v5765_v1 }
0x274c   :  { %v5758_v0 = vpop.xlane.xlu1 %5757 }
0x274d   :  { %v5768_v25 = vmul.f32 %v5758_v0, %v7138_v6 }
0x274f   :  { %v5772_v9 = vadd.f32 1e-05, %v5768_v25 }
0x2751   :  { %6926 = vrsqrt.f32 %v5772_v9  ;;  %vm5782_vm12 = vweird.f32 %v5772_v9 }
0x2757   :  { %v6927_v15 = vpop.eup %6926 }
0x2758   :  { %v5777_v20 = vmul.f32 %v6927_v15, %v5772_v9  ;;  %vm5783_vm11 = vweird.f32 %v6927_v15 }
0x2759   :  { %vm5784_vm13 = vmor %vm5782_vm12, %vm5783_vm11 }
0x275a   :  { %v5778_v60 = vmul.f32 %v6927_v15, %v5777_v20 }
0x275c   :  { %v5779_v12 = vmul.f32 0.5, %v5778_v60 }
0x275e   :  { %v5780_v43 = vsub.f32 1.5, %v5779_v12 }
0x2760   :  { %v5781_v21 = vmul.f32 %v6927_v15, %v5780_v43 }
0x2762   :  { %v5785_v29 = vsel %vm5784_vm13, %v6927_v15, %v5781_v21 }
0x2763   :  { %v5816_v63 = vmul.f32 %v5785_v29, %v9827_v27 }
0x2765   :  { %v5821_v10 = vmul.f32 %v5820_v44, %v5816_v63 }
0x2767   :  { %v5826_v50 = vadd.f32 %v5825_v30, %v5821_v10 }
0x2769   :  { %6281 = vmatmul.msk.f32.vlgmr.msrb.gmra.mxu3 %vm294_vm0, %v5826_v50  ;;  %6301 = vmatmul.msk.f32.vlgmr.msrb.gmra.mxu0 %vm294_vm0, %v5826_v50 }
0x276d   :  { %v5761_v8 = vpop.xlane.xlu2 %5760 }
0x276e   :  { %v5769_v2 = vmul.f32 %v5761_v8, %v7138_v6 }
0x2770   :  { %v5773_v39 = vadd.f32 1e-05, %v5769_v2 }
0x2772   :  { %6928 = vrsqrt.f32 %v5773_v39  ;;  %vm5792_vm1 = vweird.f32 %v5773_v39 }
0x2775   :  { %v5764_v46 = vpop.xlane.xlu0 %5763 }
0x2776   :  { %v5770_v35 = vmul.f32 %v5764_v46, %v7138_v6 }
0x2778   :  { %v6929_v24 = vpop.eup %6928  ;;  %v5774_v13 = vadd.f32 1e-05, %v5770_v35 }
0x2779   :  { %v5787_v55 = vmul.f32 %v6929_v24, %v5773_v39  ;;  %vm5793_vm15 = vweird.f32 %v6929_v24 }
0x277a   :  { %6930 = vrsqrt.f32 %v5774_v13  ;;  %vm5794_vm2 = vmor %vm5792_vm1, %vm5793_vm15  ;;  %vm5802_vm4 = vweird.f32 %v5774_v13 }
0x277b   :  { %v5788_v49 = vmul.f32 %v6929_v24, %v5787_v55 }
0x277d   :  { %v5789_v27 = vmul.f32 0.5, %v5788_v49  ;;  %v5767_v3 = vpop.xlane.xlu1 %5766 }
0x277e   :  { %v5771_v54 = vmul.f32 %v5767_v3, %v7138_v6 }
0x277f   :  { %v5790_v58 = vsub.f32 1.5, %v5789_v27 }
0x2780   :  { %v6931_v38 = vpop.eup %6930  ;;  %v5775_v59 = vadd.f32 1e-05, %v5771_v54 }
0x2781   :  { %v5791_v7 = vmul.f32 %v6929_v24, %v5790_v58  ;;  %v5797_v41 = vmul.f32 %v6931_v38, %v5774_v13  ;;  %vm5803_vm3 = vweird.f32 %v6931_v38 }
0x2782   :  { %6932 = vrsqrt.f32 %v5775_v59  ;;  %vm5804_vm5 = vmor %vm5802_vm4, %vm5803_vm3  ;;  %vm5812_vm7 = vweird.f32 %v5775_v59 }
0x2783   :  { %v5795_v17 = vsel %vm5794_vm2, %v6929_v24, %v5791_v7  ;;  %v5798_v22 = vmul.f32 %v6931_v38, %v5797_v41 }
0x2784   :  { %v5817_v48 = vmul.f32 %v5795_v17, %v9863_v34 }
0x2785   :  { %v5799_v37 = vmul.f32 0.5, %v5798_v22 }
0x2786   :  { %v5822_v42 = vmul.f32 %v5820_v44, %v5817_v48 }
0x2787   :  { %v5800_v61 = vsub.f32 1.5, %v5799_v37 }
0x2788   :  { %v6933_v19 = vpop.eup %6932  ;;  %v5827_v14 = vadd.f32 %v5825_v30, %v5822_v42 }
0x2789   :  { %v5801_v6 = vmul.f32 %v6931_v38, %v5800_v61  ;;  %v5807_v31 = vmul.f32 %v6933_v19, %v5775_v59  ;;  %vm5813_vm6 = vweird.f32 %v6933_v19 }
0x278a   :  { %6282 = vmatmul.msk.f32.gmra.mxu3 %vm294_vm0, %v5827_v14  ;;  %6302 = vmatmul.msk.f32.gmra.mxu0 %vm294_vm0, %v5827_v14  ;;  %vm5814_vm8 = vmor %vm5812_vm7, %vm5813_vm6 }
0x278b   :  { %v5805_v40 = vsel %vm5804_vm5, %v6931_v38, %v5801_v6  ;;  %v5808_v32 = vmul.f32 %v6933_v19, %v5807_v31 }
0x278c   :  { %v5818_v28 = vmul.f32 %v5805_v40, %v9885_v47  ;;  %v214_v47 = vld [vmem:[%s10035_s6 + $0x8] sm:$0x1f] }
0x278d   :  { %v5809_v1 = vmul.f32 0.5, %v5808_v32  ;;  %v5831_v45 = vperm.slane %v214_v47, 0 }
0x278e   :  { %v5823_v34 = vmul.f32 %v5820_v44, %v5818_v28 }
0x278f   :  { %v5810_v51 = vsub.f32 1.5, %v5809_v1 }
0x2790   :  { %v5828_v18 = vadd.f32 %v5825_v30, %v5823_v34 }
0x2791   :  { %v5811_v36 = vmul.f32 %v6933_v19, %v5810_v51 }
0x2792   :  { %6283 = vmatmul.msk.f32.gmra.mxu3 %vm294_vm0, %v5828_v18  ;;  %6303 = vmatmul.msk.f32.gmra.mxu0 %vm294_vm0, %v5828_v18 }
0x2793   :  { %v5815_v52 = vsel %vm5814_vm8, %v6933_v19, %v5811_v36 }
0x2794   :  { %v5819_v16 = vmul.f32 %v5815_v52, %v9907_v53 }
0x2796   :  { %v5824_v33 = vmul.f32 %v5820_v44, %v5819_v16 }
0x2798   :  { %v5829_v57 = vadd.f32 %v5825_v30, %v5824_v33 }
0x279a   :  { %6284 = vmatmul.msk.f32.gmra.mxu3 %vm294_vm0, %v5829_v57  ;;  %6304 = vmatmul.msk.f32.gmra.mxu0 %vm294_vm0, %v5829_v57 }
0x27e6   :  { %v5986_v4 = vpop.f32.mrf.mxu0 }
0x27e7   :  { %v5987_v56 = vadd.f32 %v5986_v4, %v5831_v45 }
0x27e9   :  { %5999 = vst [vmem:[%s10036_s7 + $0x8] sm:$0xff] %v5987_v56 }
0x27ec   :  { %v5957_v53 = vpop.f32.mrf.mxu3 }
0x27ed   :  { %v5958_v62 = vadd.f32 %v5957_v53, %v5830_v5 }
0x27ef   :  { %5998 = vst [vmem:[%s10036_s7] sm:$0xff] %v5958_v62 }
0x2807   :  { %v5989_v23 = vpop.f32.mrf.mxu0 }
0x2808   :  { %v5990_v26 = vadd.f32 %v5989_v23, %v5831_v45 }
0x280a   :  { %6001 = vst [vmem:[%s10036_s7 + $0x18] sm:$0xff] %v5990_v26 }
0x280d   :  { %v5960_v0 = vpop.f32.mrf.mxu3 }
0x280e   :  { %v5961_v25 = vadd.f32 %v5960_v0, %v5830_v5 }
0x280f   :  { %v5992_v9 = vpop.f32.mrf.mxu0 }
0x2810   :  { %6000 = vst [vmem:[%s10036_s7 + $0x10] sm:$0xff] %v5961_v25  ;;  %v5993_v15 = vadd.f32 %v5992_v9, %v5831_v45 }
0x2812   :  { %6003 = vst [vmem:[%s10036_s7 + $0x28] sm:$0xff] %v5993_v15 }
0x2815   :  { %v5963_v20 = vpop.f32.mrf.mxu3 }
0x2816   :  { %v5964_v60 = vadd.f32 %v5963_v20, %v5830_v5 }
0x2817   :  { %v5995_v12 = vpop.f32.mrf.mxu0 }
0x2818   :  { %6002 = vst [vmem:[%s10036_s7 + $0x20] sm:$0xff] %v5964_v60  ;;  %v5996_v43 = vadd.f32 %v5995_v12, %v5831_v45 }
0x281a   :  { %6005 = vst [vmem:[%s10036_s7 + $0x38] sm:$0xff] %v5996_v43 }
0x281d   :  { %v5966_v21 = vpop.f32.mrf.mxu3 }
0x281e   :  { %v5967_v11 = vadd.f32 %v5966_v21, %v5830_v5 }
0x2820   :  { %6004 = vst [vmem:[%s10036_s7 + $0x30] sm:$0xff] %v5967_v11 }

</bundles_post_ra>
